<compile_context>
chip_gen: v7x
topology: tpu7x:2x2x1
jax: 0.10.0
libtpu: 0.0.40
codegen_flags: <defaults>
</compile_context>

<pallas_src>
import functools
import math

import jax
import jax.numpy as jnp
from jax.experimental import pallas as pl
from jax.experimental.pallas import tpu as pltpu  # noqa: F401  (TPU backend)


# ----------------------------------------------------------------------------
# In-kernel helpers (traced inside the fused Pallas kernel)
# ----------------------------------------------------------------------------
def _layer_norm(x, g, b, eps=1e-5):
    mu = jnp.mean(x, axis=-1, keepdims=True)
    var = jnp.mean(jnp.square(x - mu), axis=-1, keepdims=True)
    return (x - mu) * jax.lax.rsqrt(var + eps) * g + b


def _mha(x_q, x_kv, wqkv, bqkv, wo, bo, *, B, Lq, Lk, H, dh, causal):
    """Packed multi-head attention, all values resident in vregs.

    wqkv : (D, 3*H*dh)  packed [q | k | v] projection (q block pre-scaled by 1/sqrt(dh))
    bqkv : (1, 3*H*dh)
    wo   : (H*dh, D)    single packed output projection
    bo   : (1, D)
    x_q  : (B*Lq, D) ;  x_kv : (B*Lk, D)
    """
    HD = H * dh
    if x_q is x_kv:  # self-attention: ONE packed QKV matmul
        qkv = jnp.dot(x_q, wqkv, preferred_element_type=jnp.float32) + bqkv
        q, k, v = qkv[:, :HD], qkv[:, HD:2 * HD], qkv[:, 2 * HD:]
    else:            # cross-attention: q and packed kv matmuls
        q = jnp.dot(x_q, wqkv[:, :HD], preferred_element_type=jnp.float32) + bqkv[:, :HD]
        kv = jnp.dot(x_kv, wqkv[:, HD:], preferred_element_type=jnp.float32) + bqkv[:, HD:]
        k, v = kv[:, :HD], kv[:, HD:]

    if causal:
        row = jax.lax.broadcasted_iota(jnp.int32, (Lq, Lk), 0)
        col = jax.lax.broadcasted_iota(jnp.int32, (Lq, Lk), 1)
        keep = col <= row  # == tril mask

    blocks = []
    for b in range(B):                       # static unroll (B small)
        qb = q[b * Lq:(b + 1) * Lq, :]
        kb = k[b * Lk:(b + 1) * Lk, :]
        vb = v[b * Lk:(b + 1) * Lk, :]
        heads = []
        for h in range(H):                   # static unroll (H = 4)
            sl = slice(h * dh, (h + 1) * dh)
            s = jax.lax.dot_general(qb[:, sl], kb[:, sl], (((1,), (1,)), ((), ())),
                                    preferred_element_type=jnp.float32)   # (Lq, Lk)
            if causal:
                s = jnp.where(keep, s, -1e30)
            m = jnp.max(s, axis=-1, keepdims=True)
            p = jnp.exp(s - m)
            p = p * pl.reciprocal(jnp.sum(p, axis=-1, keepdims=True), approx=True)
            heads.append(jnp.dot(p, vb[:, sl], preferred_element_type=jnp.float32))
        blocks.append(jnp.concatenate(heads, axis=-1))                    # (Lq, HD)
    o = jnp.concatenate(blocks, axis=0)                                   # (B*Lq, HD)
    return jnp.dot(o, wo, preferred_element_type=jnp.float32) + bo        # (B*Lq, D)


# ----------------------------------------------------------------------------
# One fused kernel for the whole network
# ----------------------------------------------------------------------------
def _fused_transformer_kernel(
        src_ref, tgt_ref,
        we1_ref, be1_ref, we2_ref, be2_ref,
        wd1_ref, bd1_ref, wd2_ref, bd2_ref,
        enc_pe_ref, dec_pe_ref, start_ref, end_ref, amask_ref,
        e_wqkv_ref, e_bqkv_ref, e_wo_ref, e_bo_ref, e_g1_ref, e_b1_ref,
        e_wf1_ref, e_bf1_ref, e_wf2_ref, e_bf2_ref, e_g2_ref, e_b2_ref,
        d_wqkv1_ref, d_bqkv1_ref, d_wo1_ref, d_bo1_ref, d_g1_ref, d_be1_ref,
        d_wqkv2_ref, d_bqkv2_ref, d_wo2_ref, d_bo2_ref, d_g2_ref, d_be2_ref,
        d_wf1_ref, d_bf1_ref, d_wf2_ref, d_bf2_ref, d_g3_ref, d_be3_ref,
        wl1_ref, bl1_ref, wl2_ref, bl2_ref,
        out_ref,
        *, B, Lin, Lout, n_heads, dh, n_enc, n_dec):
    f32 = jnp.float32
    D = n_heads * dh
    Lt = Lout + 1
    Lt_pad = ((Lt + 7) // 8) * 8          # pad decoder rows to a sublane multiple
    pad = Lt_pad - Lt

    # ------------------ encoder embedding + positional encoding ------------------
    xs = src_ref[...].reshape(B * Lin, -1)                                  # (B*Lin, d_in)
    h = jnp.maximum(jnp.dot(xs, we1_ref[...], preferred_element_type=f32)
                    + be1_ref[...], 0.0)
    src = jnp.dot(h, we2_ref[...], preferred_element_type=f32) + be2_ref[...]
    src = src + jnp.concatenate([enc_pe_ref[...]] * B, axis=0)              # (B*Lin, D)

    # --------------- decoder embedding + start token + pos. encoding -------------
    xt = tgt_ref[...].reshape(B * Lout, -1)                                 # (B*Lout, d_out)
    h = jnp.maximum(jnp.dot(xt, wd1_ref[...], preferred_element_type=f32)
                    + bd1_ref[...], 0.0)
    temb = jnp.dot(h, wd2_ref[...], preferred_element_type=f32) + bd2_ref[...]
    pe = dec_pe_ref[...]                                                    # (Lt, D)
    start = start_ref[...]                                                  # (1, D)
    parts = []
    for b in range(B):
        blk = jnp.concatenate([start, temb[b * Lout:(b + 1) * Lout, :]], axis=0) + pe
        if pad:
            blk = jnp.concatenate([blk, jnp.zeros((pad, D), f32)], axis=0)
        parts.append(blk)
    trg = jnp.concatenate(parts, axis=0)                                    # (B*Lt_pad, D)

    # ------------------------------- encoder stack --------------------------------
    for i in range(n_enc):                                                  # static unroll
        a = _mha(src, src, e_wqkv_ref[i], e_bqkv_ref[i], e_wo_ref[i], e_bo_ref[i],
                 B=B, Lq=Lin, Lk=Lin, H=n_heads, dh=dh, causal=False)
        x1 = _layer_norm(src + a, e_g1_ref[i], e_b1_ref[i])
        hid = jnp.maximum(jnp.dot(x1, e_wf1_ref[i], preferred_element_type=f32)
                          + e_bf1_ref[i], 0.0)
        f = jnp.dot(hid, e_wf2_ref[i], preferred_element_type=f32) + e_bf2_ref[i]
        src = _layer_norm(x1 + f, e_g2_ref[i], e_b2_ref[i])

    # ------------------------------- decoder stack --------------------------------
    for i in range(n_dec):                                                  # static unroll
        # causal (masked) self-attention — mask generated in-kernel
        a = _mha(trg, trg, d_wqkv1_ref[i], d_bqkv1_ref[i], d_wo1_ref[i], d_bo1_ref[i],
                 B=B, Lq=Lt_pad, Lk=Lt_pad, H=n_heads, dh=dh, causal=True)
        t1 = _layer_norm(trg + a, d_g1_ref[i], d_be1_ref[i])
        # cross-attention (reference mask is all-ones -> dropped)
        c = _mha(t1, src, d_wqkv2_ref[i], d_bqkv2_ref[i], d_wo2_ref[i], d_bo2_ref[i],
                 B=B, Lq=Lt_pad, Lk=Lin, H=n_heads, dh=dh, causal=False)
        t2 = _layer_norm(t1 + c, d_g2_ref[i], d_be2_ref[i])
        hid = jnp.maximum(jnp.dot(t2, d_wf1_ref[i], preferred_element_type=f32)
                          + d_bf1_ref[i], 0.0)
        f = jnp.dot(hid, d_wf2_ref[i], preferred_element_type=f32) + d_bf2_ref[i]
        trg = _layer_norm(t2 + f, d_g3_ref[i], d_be3_ref[i])

    # ------------- end-token mask + final feed-forward + lane-dense store ---------
    amask_parts = []
    for b in range(B):
        blk = amask_ref[b]                                                  # (Lt, D)
        if pad:
            blk = jnp.concatenate([blk, jnp.zeros((pad, D), f32)], axis=0)
        amask_parts.append(blk)
    trg = trg - end_ref[...] * jnp.concatenate(amask_parts, axis=0)         # no-op if mask==0
    hid = jnp.maximum(jnp.dot(trg, wl1_ref[...], preferred_element_type=f32)
                      + bl1_ref[...], 0.0)
    outv = jnp.dot(hid, wl2_ref[...], preferred_element_type=f32) + bl2_ref[...]
    for b in range(B):
        out_ref[b] = outv[b * Lt_pad:b * Lt_pad + Lt, :]                    # drop pad rows


# ----------------------------------------------------------------------------
# Forward pass wrapper (single pallas_call)
# ----------------------------------------------------------------------------
def transformer_translator_forward(params, cfg, source, target, target_mask=None):
    B, Lin, _ = source.shape
    Lout = target.shape[1]
    Lt = Lout + 1
    d_att, n_heads, d_out = cfg["d_att"], cfg["n_heads"], cfg["d_out"]
    n_enc = params["enc"]["wqkv"].shape[0]
    n_dec = params["dec"]["wqkv1"].shape[0]

    if target_mask is not None:
        add_mask, mult_mask = target_mask
        add_mask = jnp.broadcast_to(add_mask, (B, Lt, d_att)).astype(jnp.float32)
    else:
        add_mask = jnp.zeros((B, Lt, d_att), jnp.float32)
        mult_mask = None

    e, d = params["enc"], params["dec"]
    wl1, bl1, wl2p, bl2p = params["last_decoder"]
    n_pad = wl2p.shape[1]

    inputs = [
        source, target,
        *params["enc_embedding"], *params["dec_embedding"],
        params["enc_pe"], params["dec_pe"], params["start_token"], params["end_token"],
        add_mask,
        e["wqkv"], e["bqkv"], e["wo"], e["bo"], e["g1"], e["b1"],
        e["wf1"], e["bf1"], e["wf2"], e["bf2"], e["g2"], e["b2"],
        d["wqkv1"], d["bqkv1"], d["wo1"], d["bo1"], d["g1"], d["b1"],
        d["wqkv2"], d["bqkv2"], d["wo2"], d["bo2"], d["g2"], d["b2"],
        d["wf1"], d["bf1"], d["wf2"], d["bf2"], d["g3"], d["b3"],
        wl1, bl1, wl2p, bl2p,
    ]

    kernel = functools.partial(
        _fused_transformer_kernel,
        B=B, Lin=Lin, Lout=Lout, n_heads=n_heads, dh=d_att // n_heads,
        n_enc=n_enc, n_dec=n_dec)

    # Grid-less call: every (tiny) operand lives whole in VMEM; one dispatch total.
    out = pl.pallas_call(
        kernel,
        out_shape=jax.ShapeDtypeStruct((B, Lt, n_pad), jnp.float32),
    )(*inputs)

    out = out[:, :, :d_out]                       # slice lane padding back to d_out
    if mult_mask is not None:
        out = out * mult_mask
    return out                                    # [B, Lout+1, d_out]


# ----------------------------------------------------------------------------
# Deterministic parameter init (packed / stacked layouts)
# ----------------------------------------------------------------------------
def sinusoidal_pe(max_len, dim):
    pos = jnp.arange(max_len, dtype=jnp.float32)[:, None]
    div = jnp.exp(jnp.arange(0, dim, 2, dtype=jnp.float32) * (-math.log(10000.0) / dim))
    pe = jnp.zeros((max_len, dim), jnp.float32)
    pe = pe.at[:, 0::2].set(jnp.sin(pos * div))
    pe = pe.at[:, 1::2].set(jnp.cos(pos * div))
    return pe


def _init_linear(key, d_in, d_out):
    w = jax.random.normal(key, (d_in, d_out), jnp.float32) / math.sqrt(d_in)
    b = jnp.zeros((1, d_out), jnp.float32)
    return w, b


def _init_ln(dim):
    return jnp.ones((1, dim), jnp.float32), jnp.zeros((1, dim), jnp.float32)


def _init_attn(key, d_att, n_heads):
    dh = d_att // n_heads
    k1, k2 = jax.random.split(key)
    wqkv = jax.random.normal(k1, (d_att, 3 * d_att), jnp.float32) / math.sqrt(d_att)
    bqkv = jnp.zeros((1, 3 * d_att), jnp.float32)
    scale = 1.0 / math.sqrt(dh)
    wqkv = wqkv.at[:, :d_att].multiply(scale)   # fold 1/sqrt(dh) into the q projection
    bqkv = bqkv.at[:, :d_att].multiply(scale)
    wo = jax.random.normal(k2, (d_att, d_att), jnp.float32) / math.sqrt(d_att)
    bo = jnp.zeros((1, d_att), jnp.float32)
    return wqkv, bqkv, wo, bo


def init_params(key, cfg):
    d_in, d_out, d_att = cfg["d_in"], cfg["d_out"], cfg["d_att"]
    n_heads = cfg["n_heads"]
    w_emb = cfg["widths_embedding"][0]
    w_ff = cfg["width_FF"][0]
    n_enc, n_dec = cfg["n_encoders"], cfg["n_decoders"]
    ks = jax.random.split(key, 7 + n_enc + n_dec)

    params = {}
    k0a, k0b = jax.random.split(ks[0])
    we1, be1 = _init_linear(k0a, d_in, w_emb)
    we2, be2 = _init_linear(k0b, w_emb, d_att)
    params["enc_embedding"] = (we1, be1, we2, be2)

    k1a, k1b = jax.random.split(ks[1])
    wd1, bd1 = _init_linear(k1a, d_out, w_emb)
    wd2, bd2 = _init_linear(k1b, w_emb, d_att)
    params["dec_embedding"] = (wd1, bd1, wd2, bd2)

    params["start_token"] = jax.random.normal(ks[2], (1, d_att), jnp.float32)
    params["end_token"] = jax.random.normal(ks[3], (1, d_att), jnp.float32)

    # last_decoder: d_att -> 16 -> d_out ; last layer zero-padded to 128 lanes so the
    # network's single HBM store is lane-dense (wrapper slices back to d_out).
    k4a, k4b = jax.random.split(ks[4])
    wl1, bl1 = _init_linear(k4a, d_att, 16)
    wl2, bl2 = _init_linear(k4b, 16, d_out)
    n_pad = (-d_out) % 128
    params["last_decoder"] = (wl1, bl1,
                              jnp.pad(wl2, ((0, 0), (0, n_pad))),
                              jnp.pad(bl2, ((0, 0), (0, n_pad))))

    params["enc_pe"] = sinusoidal_pe(cfg["len_in"], d_att)
    params["dec_pe"] = sinusoidal_pe(cfg["len_out"] + 1, d_att)
    # NOTE: the tril mask_decoder buffer is generated in-kernel via iota comparison.

    def enc_layer(k):
        ka, kb, kc = jax.random.split(k, 3)
        wqkv, bqkv, wo, bo = _init_attn(ka, d_att, n_heads)
        wf1, bf1 = _init_linear(kb, d_att, w_ff)
        wf2, bf2 = _init_linear(kc, w_ff, d_att)
        g1, b1 = _init_ln(d_att)
        g2, b2 = _init_ln(d_att)
        return dict(wqkv=wqkv, bqkv=bqkv, wo=wo, bo=bo, g1=g1, b1=b1,
                    wf1=wf1, bf1=bf1, wf2=wf2, bf2=bf2, g2=g2, b2=b2)

    def dec_layer(k):
        ka, kb, kc, kd = jax.random.split(k, 4)
        wq1, bq1, wo1, bo1 = _init_attn(ka, d_att, n_heads)
        wq2, bq2, wo2, bo2 = _init_attn(kb, d_att, n_heads)
        wf1, bf1 = _init_linear(kc, d_att, w_ff)
        wf2, bf2 = _init_linear(kd, w_ff, d_att)
        g1, b1 = _init_ln(d_att)
        g2, b2 = _init_ln(d_att)
        g3, b3 = _init_ln(d_att)
        return dict(wqkv1=wq1, bqkv1=bq1, wo1=wo1, bo1=bo1, g1=g1, b1=b1,
                    wqkv2=wq2, bqkv2=bq2, wo2=wo2, bo2=bo2, g2=g2, b2=b2,
                    wf1=wf1, bf1=bf1, wf2=wf2, bf2=bf2, g3=g3, b3=b3)

    enc_layers = [enc_layer(ks[5 + i]) for i in range(n_enc)]
    dec_layers = [dec_layer(ks[5 + n_enc + i]) for i in range(n_dec)]
    # Stack per-layer weights along a leading "layer" axis (static indexing in-kernel).
    params["enc"] = {k: jnp.stack([lyr[k] for lyr in enc_layers]) for k in enc_layers[0]}
    params["dec"] = {k: jnp.stack([lyr[k] for lyr in dec_layers]) for k in dec_layers[0]}
    return params


# ----------------------------------------------------------------------------
if __name__ == "__main__":
    cfg = dict(d_in=4, d_out=3, d_att=32, n_heads=4, n_encoders=2, n_decoders=2,
               width_FF=[32], widths_embedding=[32], len_in=8, len_out=8)
    key = jax.random.PRNGKey(0)
    kp, ksrc, ktgt = jax.random.split(key, 3)

    params = init_params(kp, cfg)
    source = jax.random.normal(ksrc, (2, cfg["len_in"], cfg["d_in"]), jnp.float32)
    target = jax.random.normal(ktgt, (2, cfg["len_out"], cfg["d_out"]), jnp.float32)

    fwd = jax.jit(lambda p, s, t: transformer_translator_forward(p, cfg, s, t))
    out = jax.block_until_ready(fwd(params, source, target))

    assert out.shape == (2, cfg["len_out"] + 1, cfg["d_out"]), out.shape
    assert bool(jnp.all(jnp.isfinite(out)))
    print("KERNEL_OK")
</pallas_src>

<mosaic_0001>
module attributes {stable_mosaic.version = 11 : i64} {
  func.func @_fused_transformer_kernel(%arg0: memref<2x8x4xf32, #tpu.memory_space<vmem>>, %arg1: memref<2x8x3xf32, #tpu.memory_space<vmem>>, %arg2: memref<4x32xf32, #tpu.memory_space<vmem>>, %arg3: memref<1x32xf32, #tpu.memory_space<vmem>>, %arg4: memref<32x32xf32, #tpu.memory_space<vmem>>, %arg5: memref<1x32xf32, #tpu.memory_space<vmem>>, %arg6: memref<3x32xf32, #tpu.memory_space<vmem>>, %arg7: memref<1x32xf32, #tpu.memory_space<vmem>>, %arg8: memref<32x32xf32, #tpu.memory_space<vmem>>, %arg9: memref<1x32xf32, #tpu.memory_space<vmem>>, %arg10: memref<8x32xf32, #tpu.memory_space<vmem>>, %arg11: memref<9x32xf32, #tpu.memory_space<vmem>>, %arg12: memref<1x32xf32, #tpu.memory_space<vmem>>, %arg13: memref<1x32xf32, #tpu.memory_space<vmem>>, %arg14: memref<2x9x32xf32, #tpu.memory_space<vmem>>, %arg15: memref<2x32x96xf32, #tpu.memory_space<vmem>>, %arg16: memref<2x1x96xf32, #tpu.memory_space<vmem>>, %arg17: memref<2x32x32xf32, #tpu.memory_space<vmem>>, %arg18: memref<2x1x32xf32, #tpu.memory_space<vmem>>, %arg19: memref<2x1x32xf32, #tpu.memory_space<vmem>>, %arg20: memref<2x1x32xf32, #tpu.memory_space<vmem>>, %arg21: memref<2x32x32xf32, #tpu.memory_space<vmem>>, %arg22: memref<2x1x32xf32, #tpu.memory_space<vmem>>, %arg23: memref<2x32x32xf32, #tpu.memory_space<vmem>>, %arg24: memref<2x1x32xf32, #tpu.memory_space<vmem>>, %arg25: memref<2x1x32xf32, #tpu.memory_space<vmem>>, %arg26: memref<2x1x32xf32, #tpu.memory_space<vmem>>, %arg27: memref<2x32x96xf32, #tpu.memory_space<vmem>>, %arg28: memref<2x1x96xf32, #tpu.memory_space<vmem>>, %arg29: memref<2x32x32xf32, #tpu.memory_space<vmem>>, %arg30: memref<2x1x32xf32, #tpu.memory_space<vmem>>, %arg31: memref<2x1x32xf32, #tpu.memory_space<vmem>>, %arg32: memref<2x1x32xf32, #tpu.memory_space<vmem>>, %arg33: memref<2x32x96xf32, #tpu.memory_space<vmem>>, %arg34: memref<2x1x96xf32, #tpu.memory_space<vmem>>, %arg35: memref<2x32x32xf32, #tpu.memory_space<vmem>>, %arg36: memref<2x1x32xf32, #tpu.memory_space<vmem>>, %arg37: memref<2x1x32xf32, #tpu.memory_space<vmem>>, %arg38: memref<2x1x32xf32, #tpu.memory_space<vmem>>, %arg39: memref<2x32x32xf32, #tpu.memory_space<vmem>>, %arg40: memref<2x1x32xf32, #tpu.memory_space<vmem>>, %arg41: memref<2x32x32xf32, #tpu.memory_space<vmem>>, %arg42: memref<2x1x32xf32, #tpu.memory_space<vmem>>, %arg43: memref<2x1x32xf32, #tpu.memory_space<vmem>>, %arg44: memref<2x1x32xf32, #tpu.memory_space<vmem>>, %arg45: memref<32x16xf32, #tpu.memory_space<vmem>>, %arg46: memref<1x16xf32, #tpu.memory_space<vmem>>, %arg47: memref<16x128xf32, #tpu.memory_space<vmem>>, %arg48: memref<1x128xf32, #tpu.memory_space<vmem>>, %arg49: memref<2x9x128xf32, #tpu.memory_space<vmem>>) attributes {dimension_semantics = [], scalar_prefetch = 0 : i64, scratch_operands = 0 : i64, tpu.core_type = #tpu.core_type<tc>} {
    %c0 = arith.constant 0 : index
    %c0_0 = arith.constant 0 : index
    %c0_1 = arith.constant 0 : index
    %0 = vector.load %arg0[%c0, %c0_0, %c0_1] : memref<2x8x4xf32, #tpu.memory_space<vmem>>, vector<2x8x4xf32>
    %1 = vector.shape_cast %0 : vector<2x8x4xf32> to vector<16x4xf32>
    %c0_2 = arith.constant 0 : index
    %c0_3 = arith.constant 0 : index
    %2 = vector.load %arg2[%c0_2, %c0_3] : memref<4x32xf32, #tpu.memory_space<vmem>>, vector<4x32xf32>
    %cst = arith.constant dense<0.000000e+00> : vector<16x32xf32>
    %3 = tpu.matmul %1, %2, %cst {dimension_numbers = #tpu.dot_dimension_numbers<[1], [0], [0], [1], [0, 0, 1, 1], [], []>} : vector<16x4xf32>, vector<4x32xf32>, vector<16x32xf32> -> vector<16x32xf32>
    %c0_4 = arith.constant 0 : index
    %c0_5 = arith.constant 0 : index
    %4 = vector.load %arg3[%c0_4, %c0_5] : memref<1x32xf32, #tpu.memory_space<vmem>>, vector<1x32xf32>
    %5 = vector.broadcast %4 : vector<1x32xf32> to vector<16x32xf32>
    %6 = arith.addf %3, %5 : vector<16x32xf32>
    %cst_6 = arith.constant 0.000000e+00 : f32
    %7 = vector.broadcast %cst_6 : f32 to vector<16x32xf32>
    %8 = arith.maximumf %6, %7 : vector<16x32xf32>
    %c0_7 = arith.constant 0 : index
    %c0_8 = arith.constant 0 : index
    %9 = vector.load %arg4[%c0_7, %c0_8] : memref<32x32xf32, #tpu.memory_space<vmem>>, vector<32x32xf32>
    %cst_9 = arith.constant dense<0.000000e+00> : vector<16x32xf32>
    %10 = tpu.matmul %8, %9, %cst_9 {dimension_numbers = #tpu.dot_dimension_numbers<[1], [0], [0], [1], [0, 0, 1, 1], [], []>} : vector<16x32xf32>, vector<32x32xf32>, vector<16x32xf32> -> vector<16x32xf32>
    %c0_10 = arith.constant 0 : index
    %c0_11 = arith.constant 0 : index
    %11 = vector.load %arg5[%c0_10, %c0_11] : memref<1x32xf32, #tpu.memory_space<vmem>>, vector<1x32xf32>
    %12 = vector.broadcast %11 : vector<1x32xf32> to vector<16x32xf32>
    %13 = arith.addf %10, %12 : vector<16x32xf32>
    %c0_12 = arith.constant 0 : index
    %c0_13 = arith.constant 0 : index
    %14 = vector.load %arg10[%c0_12, %c0_13] : memref<8x32xf32, #tpu.memory_space<vmem>>, vector<8x32xf32>
    %15 = tpu.concatenate %14, %14 in 0 : vector<8x32xf32>, vector<8x32xf32> -> vector<16x32xf32>
    %16 = arith.addf %13, %15 : vector<16x32xf32>
    %c0_14 = arith.constant 0 : index
    %c0_15 = arith.constant 0 : index
    %c0_16 = arith.constant 0 : index
    %17 = vector.load %arg1[%c0_14, %c0_15, %c0_16] : memref<2x8x3xf32, #tpu.memory_space<vmem>>, vector<2x8x3xf32>
    %18 = vector.shape_cast %17 : vector<2x8x3xf32> to vector<16x3xf32>
    %c0_17 = arith.constant 0 : index
    %c0_18 = arith.constant 0 : index
    %19 = vector.load %arg6[%c0_17, %c0_18] : memref<3x32xf32, #tpu.memory_space<vmem>>, vector<3x32xf32>
    %cst_19 = arith.constant dense<0.000000e+00> : vector<16x32xf32>
    %20 = tpu.matmul %18, %19, %cst_19 {dimension_numbers = #tpu.dot_dimension_numbers<[1], [0], [0], [1], [0, 0, 1, 1], [], []>} : vector<16x3xf32>, vector<3x32xf32>, vector<16x32xf32> -> vector<16x32xf32>
    %c0_20 = arith.constant 0 : index
    %c0_21 = arith.constant 0 : index
    %21 = vector.load %arg7[%c0_20, %c0_21] : memref<1x32xf32, #tpu.memory_space<vmem>>, vector<1x32xf32>
    %22 = vector.broadcast %21 : vector<1x32xf32> to vector<16x32xf32>
    %23 = arith.addf %20, %22 : vector<16x32xf32>
    %cst_22 = arith.constant 0.000000e+00 : f32
    %24 = vector.broadcast %cst_22 : f32 to vector<16x32xf32>
    %25 = arith.maximumf %23, %24 : vector<16x32xf32>
    %c0_23 = arith.constant 0 : index
    %c0_24 = arith.constant 0 : index
    %26 = vector.load %arg8[%c0_23, %c0_24] : memref<32x32xf32, #tpu.memory_space<vmem>>, vector<32x32xf32>
    %cst_25 = arith.constant dense<0.000000e+00> : vector<16x32xf32>
    %27 = tpu.matmul %25, %26, %cst_25 {dimension_numbers = #tpu.dot_dimension_numbers<[1], [0], [0], [1], [0, 0, 1, 1], [], []>} : vector<16x32xf32>, vector<32x32xf32>, vector<16x32xf32> -> vector<16x32xf32>
    %c0_26 = arith.constant 0 : index
    %c0_27 = arith.constant 0 : index
    %28 = vector.load %arg9[%c0_26, %c0_27] : memref<1x32xf32, #tpu.memory_space<vmem>>, vector<1x32xf32>
    %29 = vector.broadcast %28 : vector<1x32xf32> to vector<16x32xf32>
    %30 = arith.addf %27, %29 : vector<16x32xf32>
    %c0_28 = arith.constant 0 : index
    %c0_29 = arith.constant 0 : index
    %31 = vector.load %arg11[%c0_28, %c0_29] : memref<9x32xf32, #tpu.memory_space<vmem>>, vector<9x32xf32>
    %c0_30 = arith.constant 0 : index
    %c0_31 = arith.constant 0 : index
    %32 = vector.load %arg12[%c0_30, %c0_31] : memref<1x32xf32, #tpu.memory_space<vmem>>, vector<1x32xf32>
    %33 = vector.extract_strided_slice %30 {offsets = [0, 0], sizes = [8, 32], strides = [1, 1]} : vector<16x32xf32> to vector<8x32xf32>
    %34 = tpu.concatenate %32, %33 in 0 : vector<1x32xf32>, vector<8x32xf32> -> vector<9x32xf32>
    %35 = arith.addf %34, %31 : vector<9x32xf32>
    %cst_32 = arith.constant 0.000000e+00 : f32
    %36 = vector.broadcast %cst_32 : f32 to vector<7x32xf32>
    %37 = tpu.concatenate %35, %36 in 0 : vector<9x32xf32>, vector<7x32xf32> -> vector<16x32xf32>
    %38 = vector.extract_strided_slice %30 {offsets = [8, 0], sizes = [8, 32], strides = [1, 1]} : vector<16x32xf32> to vector<8x32xf32>
    %39 = tpu.concatenate %32, %38 in 0 : vector<1x32xf32>, vector<8x32xf32> -> vector<9x32xf32>
    %40 = arith.addf %39, %31 : vector<9x32xf32>
    %cst_33 = arith.constant 0.000000e+00 : f32
    %41 = vector.broadcast %cst_33 : f32 to vector<7x32xf32>
    %42 = tpu.concatenate %40, %41 in 0 : vector<9x32xf32>, vector<7x32xf32> -> vector<16x32xf32>
    %43 = tpu.concatenate %37, %42 in 0 : vector<16x32xf32>, vector<16x32xf32> -> vector<32x32xf32>
    %c0_34 = arith.constant 0 : index
    %c0_35 = arith.constant 0 : index
    %c0_36 = arith.constant 0 : index
    %44 = vector.load %arg15[%c0_34, %c0_35, %c0_36] : memref<2x32x96xf32, #tpu.memory_space<vmem>>, vector<1x32x96xf32>
    %45 = vector.shape_cast %44 : vector<1x32x96xf32> to vector<32x96xf32>
    %c0_37 = arith.constant 0 : index
    %c0_38 = arith.constant 0 : index
    %c0_39 = arith.constant 0 : index
    %46 = vector.load %arg16[%c0_37, %c0_38, %c0_39] : memref<2x1x96xf32, #tpu.memory_space<vmem>>, vector<1x1x96xf32>
    %47 = vector.shape_cast %46 : vector<1x1x96xf32> to vector<1x96xf32>
    %c0_40 = arith.constant 0 : index
    %c0_41 = arith.constant 0 : index
    %c0_42 = arith.constant 0 : index
    %48 = vector.load %arg17[%c0_40, %c0_41, %c0_42] : memref<2x32x32xf32, #tpu.memory_space<vmem>>, vector<1x32x32xf32>
    %49 = vector.shape_cast %48 : vector<1x32x32xf32> to vector<32x32xf32>
    %c0_43 = arith.constant 0 : index
    %c0_44 = arith.constant 0 : index
    %c0_45 = arith.constant 0 : index
    %50 = vector.load %arg18[%c0_43, %c0_44, %c0_45] : memref<2x1x32xf32, #tpu.memory_space<vmem>>, vector<1x1x32xf32>
    %51 = vector.shape_cast %50 : vector<1x1x32xf32> to vector<1x32xf32>
    %cst_46 = arith.constant dense<0.000000e+00> : vector<16x96xf32>
    %52 = tpu.matmul %16, %45, %cst_46 {dimension_numbers = #tpu.dot_dimension_numbers<[1], [0], [0], [1], [0, 0, 1, 1], [], []>} : vector<16x32xf32>, vector<32x96xf32>, vector<16x96xf32> -> vector<16x96xf32>
    %53 = vector.broadcast %47 : vector<1x96xf32> to vector<16x96xf32>
    %54 = arith.addf %52, %53 : vector<16x96xf32>
    %55 = vector.extract_strided_slice %54 {offsets = [0, 0], sizes = [16, 32], strides = [1, 1]} : vector<16x96xf32> to vector<16x32xf32>
    %56 = vector.extract_strided_slice %54 {offsets = [0, 32], sizes = [16, 32], strides = [1, 1]} : vector<16x96xf32> to vector<16x32xf32>
    %57 = vector.extract_strided_slice %54 {offsets = [0, 64], sizes = [16, 32], strides = [1, 1]} : vector<16x96xf32> to vector<16x32xf32>
    %58 = vector.extract_strided_slice %55 {offsets = [0, 0], sizes = [8, 32], strides = [1, 1]} : vector<16x32xf32> to vector<8x32xf32>
    %59 = vector.extract_strided_slice %56 {offsets = [0, 0], sizes = [8, 32], strides = [1, 1]} : vector<16x32xf32> to vector<8x32xf32>
    %60 = vector.extract_strided_slice %57 {offsets = [0, 0], sizes = [8, 32], strides = [1, 1]} : vector<16x32xf32> to vector<8x32xf32>
    %61 = vector.extract_strided_slice %58 {offsets = [0, 0], sizes = [8, 8], strides = [1, 1]} : vector<8x32xf32> to vector<8x8xf32>
    %62 = vector.extract_strided_slice %59 {offsets = [0, 0], sizes = [8, 8], strides = [1, 1]} : vector<8x32xf32> to vector<8x8xf32>
    %cst_47 = arith.constant dense<0.000000e+00> : vector<8x8xf32>
    %63 = tpu.matmul %61, %62, %cst_47 {dimension_numbers = #tpu.dot_dimension_numbers<[1], [1], [0], [0], [0, 0, 1, 0], [], []>} : vector<8x8xf32>, vector<8x8xf32>, vector<8x8xf32> -> vector<8x8xf32>
    %cst_48 = arith.constant dense<0xFF800000> : vector<8xf32>
    %64 = vector.multi_reduction <maximumf>, %63, %cst_48 [1] : vector<8x8xf32> to vector<8xf32>
    %65 = vector.shape_cast %64 : vector<8xf32> to vector<8x1xf32>
    %66 = vector.broadcast %65 : vector<8x1xf32> to vector<8x8xf32>
    %67 = arith.subf %63, %66 : vector<8x8xf32>
    %68 = math.exp %67 : vector<8x8xf32>
    %cst_49 = arith.constant dense<0.000000e+00> : vector<8xf32>
    %69 = vector.multi_reduction <add>, %68, %cst_49 [1] : vector<8x8xf32> to vector<8xf32>
    %70 = vector.shape_cast %69 : vector<8xf32> to vector<8x1xf32>
    %71 = tpu.reciprocal %70 {approx = true} : vector<8x1xf32> -> vector<8x1xf32>
    %72 = vector.broadcast %71 : vector<8x1xf32> to vector<8x8xf32>
    %73 = arith.mulf %68, %72 : vector<8x8xf32>
    %74 = vector.extract_strided_slice %60 {offsets = [0, 0], sizes = [8, 8], strides = [1, 1]} : vector<8x32xf32> to vector<8x8xf32>
    %cst_50 = arith.constant dense<0.000000e+00> : vector<8x8xf32>
    %75 = tpu.matmul %73, %74, %cst_50 {dimension_numbers = #tpu.dot_dimension_numbers<[1], [0], [0], [1], [0, 0, 1, 1], [], []>} : vector<8x8xf32>, vector<8x8xf32>, vector<8x8xf32> -> vector<8x8xf32>
    %76 = vector.extract_strided_slice %58 {offsets = [0, 8], sizes = [8, 8], strides = [1, 1]} : vector<8x32xf32> to vector<8x8xf32>
    %77 = vector.extract_strided_slice %59 {offsets = [0, 8], sizes = [8, 8], strides = [1, 1]} : vector<8x32xf32> to vector<8x8xf32>
    %cst_51 = arith.constant dense<0.000000e+00> : vector<8x8xf32>
    %78 = tpu.matmul %76, %77, %cst_51 {dimension_numbers = #tpu.dot_dimension_numbers<[1], [1], [0], [0], [0, 0, 1, 0], [], []>} : vector<8x8xf32>, vector<8x8xf32>, vector<8x8xf32> -> vector<8x8xf32>
    %cst_52 = arith.constant dense<0xFF800000> : vector<8xf32>
    %79 = vector.multi_reduction <maximumf>, %78, %cst_52 [1] : vector<8x8xf32> to vector<8xf32>
    %80 = vector.shape_cast %79 : vector<8xf32> to vector<8x1xf32>
    %81 = vector.broadcast %80 : vector<8x1xf32> to vector<8x8xf32>
    %82 = arith.subf %78, %81 : vector<8x8xf32>
    %83 = math.exp %82 : vector<8x8xf32>
    %cst_53 = arith.constant dense<0.000000e+00> : vector<8xf32>
    %84 = vector.multi_reduction <add>, %83, %cst_53 [1] : vector<8x8xf32> to vector<8xf32>
    %85 = vector.shape_cast %84 : vector<8xf32> to vector<8x1xf32>
    %86 = tpu.reciprocal %85 {approx = true} : vector<8x1xf32> -> vector<8x1xf32>
    %87 = vector.broadcast %86 : vector<8x1xf32> to vector<8x8xf32>
    %88 = arith.mulf %83, %87 : vector<8x8xf32>
    %89 = vector.extract_strided_slice %60 {offsets = [0, 8], sizes = [8, 8], strides = [1, 1]} : vector<8x32xf32> to vector<8x8xf32>
    %cst_54 = arith.constant dense<0.000000e+00> : vector<8x8xf32>
    %90 = tpu.matmul %88, %89, %cst_54 {dimension_numbers = #tpu.dot_dimension_numbers<[1], [0], [0], [1], [0, 0, 1, 1], [], []>} : vector<8x8xf32>, vector<8x8xf32>, vector<8x8xf32> -> vector<8x8xf32>
    %91 = vector.extract_strided_slice %58 {offsets = [0, 16], sizes = [8, 8], strides = [1, 1]} : vector<8x32xf32> to vector<8x8xf32>
    %92 = vector.extract_strided_slice %59 {offsets = [0, 16], sizes = [8, 8], strides = [1, 1]} : vector<8x32xf32> to vector<8x8xf32>
    %cst_55 = arith.constant dense<0.000000e+00> : vector<8x8xf32>
    %93 = tpu.matmul %91, %92, %cst_55 {dimension_numbers = #tpu.dot_dimension_numbers<[1], [1], [0], [0], [0, 0, 1, 0], [], []>} : vector<8x8xf32>, vector<8x8xf32>, vector<8x8xf32> -> vector<8x8xf32>
    %cst_56 = arith.constant dense<0xFF800000> : vector<8xf32>
    %94 = vector.multi_reduction <maximumf>, %93, %cst_56 [1] : vector<8x8xf32> to vector<8xf32>
    %95 = vector.shape_cast %94 : vector<8xf32> to vector<8x1xf32>
    %96 = vector.broadcast %95 : vector<8x1xf32> to vector<8x8xf32>
    %97 = arith.subf %93, %96 : vector<8x8xf32>
    %98 = math.exp %97 : vector<8x8xf32>
    %cst_57 = arith.constant dense<0.000000e+00> : vector<8xf32>
    %99 = vector.multi_reduction <add>, %98, %cst_57 [1] : vector<8x8xf32> to vector<8xf32>
    %100 = vector.shape_cast %99 : vector<8xf32> to vector<8x1xf32>
    %101 = tpu.reciprocal %100 {approx = true} : vector<8x1xf32> -> vector<8x1xf32>
    %102 = vector.broadcast %101 : vector<8x1xf32> to vector<8x8xf32>
    %103 = arith.mulf %98, %102 : vector<8x8xf32>
    %104 = vector.extract_strided_slice %60 {offsets = [0, 16], sizes = [8, 8], strides = [1, 1]} : vector<8x32xf32> to vector<8x8xf32>
    %cst_58 = arith.constant dense<0.000000e+00> : vector<8x8xf32>
    %105 = tpu.matmul %103, %104, %cst_58 {dimension_numbers = #tpu.dot_dimension_numbers<[1], [0], [0], [1], [0, 0, 1, 1], [], []>} : vector<8x8xf32>, vector<8x8xf32>, vector<8x8xf32> -> vector<8x8xf32>
    %106 = vector.extract_strided_slice %58 {offsets = [0, 24], sizes = [8, 8], strides = [1, 1]} : vector<8x32xf32> to vector<8x8xf32>
    %107 = vector.extract_strided_slice %59 {offsets = [0, 24], sizes = [8, 8], strides = [1, 1]} : vector<8x32xf32> to vector<8x8xf32>
    %cst_59 = arith.constant dense<0.000000e+00> : vector<8x8xf32>
    %108 = tpu.matmul %106, %107, %cst_59 {dimension_numbers = #tpu.dot_dimension_numbers<[1], [1], [0], [0], [0, 0, 1, 0], [], []>} : vector<8x8xf32>, vector<8x8xf32>, vector<8x8xf32> -> vector<8x8xf32>
    %cst_60 = arith.constant dense<0xFF800000> : vector<8xf32>
    %109 = vector.multi_reduction <maximumf>, %108, %cst_60 [1] : vector<8x8xf32> to vector<8xf32>
    %110 = vector.shape_cast %109 : vector<8xf32> to vector<8x1xf32>
    %111 = vector.broadcast %110 : vector<8x1xf32> to vector<8x8xf32>
    %112 = arith.subf %108, %111 : vector<8x8xf32>
    %113 = math.exp %112 : vector<8x8xf32>
    %cst_61 = arith.constant dense<0.000000e+00> : vector<8xf32>
    %114 = vector.multi_reduction <add>, %113, %cst_61 [1] : vector<8x8xf32> to vector<8xf32>
    %115 = vector.shape_cast %114 : vector<8xf32> to vector<8x1xf32>
    %116 = tpu.reciprocal %115 {approx = true} : vector<8x1xf32> -> vector<8x1xf32>
    %117 = vector.broadcast %116 : vector<8x1xf32> to vector<8x8xf32>
    %118 = arith.mulf %113, %117 : vector<8x8xf32>
    %119 = vector.extract_strided_slice %60 {offsets = [0, 24], sizes = [8, 8], strides = [1, 1]} : vector<8x32xf32> to vector<8x8xf32>
    %cst_62 = arith.constant dense<0.000000e+00> : vector<8x8xf32>
    %120 = tpu.matmul %118, %119, %cst_62 {dimension_numbers = #tpu.dot_dimension_numbers<[1], [0], [0], [1], [0, 0, 1, 1], [], []>} : vector<8x8xf32>, vector<8x8xf32>, vector<8x8xf32> -> vector<8x8xf32>
    %121 = tpu.concatenate %75, %90, %105, %120 in 1 : vector<8x8xf32>, vector<8x8xf32>, vector<8x8xf32>, vector<8x8xf32> -> vector<8x32xf32>
    %122 = vector.extract_strided_slice %55 {offsets = [8, 0], sizes = [8, 32], strides = [1, 1]} : vector<16x32xf32> to vector<8x32xf32>
    %123 = vector.extract_strided_slice %56 {offsets = [8, 0], sizes = [8, 32], strides = [1, 1]} : vector<16x32xf32> to vector<8x32xf32>
    %124 = vector.extract_strided_slice %57 {offsets = [8, 0], sizes = [8, 32], strides = [1, 1]} : vector<16x32xf32> to vector<8x32xf32>
    %125 = vector.extract_strided_slice %122 {offsets = [0, 0], sizes = [8, 8], strides = [1, 1]} : vector<8x32xf32> to vector<8x8xf32>
    %126 = vector.extract_strided_slice %123 {offsets = [0, 0], sizes = [8, 8], strides = [1, 1]} : vector<8x32xf32> to vector<8x8xf32>
    %cst_63 = arith.constant dense<0.000000e+00> : vector<8x8xf32>
    %127 = tpu.matmul %125, %126, %cst_63 {dimension_numbers = #tpu.dot_dimension_numbers<[1], [1], [0], [0], [0, 0, 1, 0], [], []>} : vector<8x8xf32>, vector<8x8xf32>, vector<8x8xf32> -> vector<8x8xf32>
    %cst_64 = arith.constant dense<0xFF800000> : vector<8xf32>
    %128 = vector.multi_reduction <maximumf>, %127, %cst_64 [1] : vector<8x8xf32> to vector<8xf32>
    %129 = vector.shape_cast %128 : vector<8xf32> to vector<8x1xf32>
    %130 = vector.broadcast %129 : vector<8x1xf32> to vector<8x8xf32>
    %131 = arith.subf %127, %130 : vector<8x8xf32>
    %132 = math.exp %131 : vector<8x8xf32>
    %cst_65 = arith.constant dense<0.000000e+00> : vector<8xf32>
    %133 = vector.multi_reduction <add>, %132, %cst_65 [1] : vector<8x8xf32> to vector<8xf32>
    %134 = vector.shape_cast %133 : vector<8xf32> to vector<8x1xf32>
    %135 = tpu.reciprocal %134 {approx = true} : vector<8x1xf32> -> vector<8x1xf32>
    %136 = vector.broadcast %135 : vector<8x1xf32> to vector<8x8xf32>
    %137 = arith.mulf %132, %136 : vector<8x8xf32>
    %138 = vector.extract_strided_slice %124 {offsets = [0, 0], sizes = [8, 8], strides = [1, 1]} : vector<8x32xf32> to vector<8x8xf32>
    %cst_66 = arith.constant dense<0.000000e+00> : vector<8x8xf32>
    %139 = tpu.matmul %137, %138, %cst_66 {dimension_numbers = #tpu.dot_dimension_numbers<[1], [0], [0], [1], [0, 0, 1, 1], [], []>} : vector<8x8xf32>, vector<8x8xf32>, vector<8x8xf32> -> vector<8x8xf32>
    %140 = vector.extract_strided_slice %122 {offsets = [0, 8], sizes = [8, 8], strides = [1, 1]} : vector<8x32xf32> to vector<8x8xf32>
    %141 = vector.extract_strided_slice %123 {offsets = [0, 8], sizes = [8, 8], strides = [1, 1]} : vector<8x32xf32> to vector<8x8xf32>
    %cst_67 = arith.constant dense<0.000000e+00> : vector<8x8xf32>
    %142 = tpu.matmul %140, %141, %cst_67 {dimension_numbers = #tpu.dot_dimension_numbers<[1], [1], [0], [0], [0, 0, 1, 0], [], []>} : vector<8x8xf32>, vector<8x8xf32>, vector<8x8xf32> -> vector<8x8xf32>
    %cst_68 = arith.constant dense<0xFF800000> : vector<8xf32>
    %143 = vector.multi_reduction <maximumf>, %142, %cst_68 [1] : vector<8x8xf32> to vector<8xf32>
    %144 = vector.shape_cast %143 : vector<8xf32> to vector<8x1xf32>
    %145 = vector.broadcast %144 : vector<8x1xf32> to vector<8x8xf32>
    %146 = arith.subf %142, %145 : vector<8x8xf32>
    %147 = math.exp %146 : vector<8x8xf32>
    %cst_69 = arith.constant dense<0.000000e+00> : vector<8xf32>
    %148 = vector.multi_reduction <add>, %147, %cst_69 [1] : vector<8x8xf32> to vector<8xf32>
    %149 = vector.shape_cast %148 : vector<8xf32> to vector<8x1xf32>
    %150 = tpu.reciprocal %149 {approx = true} : vector<8x1xf32> -> vector<8x1xf32>
    %151 = vector.broadcast %150 : vector<8x1xf32> to vector<8x8xf32>
    %152 = arith.mulf %147, %151 : vector<8x8xf32>
    %153 = vector.extract_strided_slice %124 {offsets = [0, 8], sizes = [8, 8], strides = [1, 1]} : vector<8x32xf32> to vector<8x8xf32>
    %cst_70 = arith.constant dense<0.000000e+00> : vector<8x8xf32>
    %154 = tpu.matmul %152, %153, %cst_70 {dimension_numbers = #tpu.dot_dimension_numbers<[1], [0], [0], [1], [0, 0, 1, 1], [], []>} : vector<8x8xf32>, vector<8x8xf32>, vector<8x8xf32> -> vector<8x8xf32>
    %155 = vector.extract_strided_slice %122 {offsets = [0, 16], sizes = [8, 8], strides = [1, 1]} : vector<8x32xf32> to vector<8x8xf32>
    %156 = vector.extract_strided_slice %123 {offsets = [0, 16], sizes = [8, 8], strides = [1, 1]} : vector<8x32xf32> to vector<8x8xf32>
    %cst_71 = arith.constant dense<0.000000e+00> : vector<8x8xf32>
    %157 = tpu.matmul %155, %156, %cst_71 {dimension_numbers = #tpu.dot_dimension_numbers<[1], [1], [0], [0], [0, 0, 1, 0], [], []>} : vector<8x8xf32>, vector<8x8xf32>, vector<8x8xf32> -> vector<8x8xf32>
    %cst_72 = arith.constant dense<0xFF800000> : vector<8xf32>
    %158 = vector.multi_reduction <maximumf>, %157, %cst_72 [1] : vector<8x8xf32> to vector<8xf32>
    %159 = vector.shape_cast %158 : vector<8xf32> to vector<8x1xf32>
    %160 = vector.broadcast %159 : vector<8x1xf32> to vector<8x8xf32>
    %161 = arith.subf %157, %160 : vector<8x8xf32>
    %162 = math.exp %161 : vector<8x8xf32>
    %cst_73 = arith.constant dense<0.000000e+00> : vector<8xf32>
    %163 = vector.multi_reduction <add>, %162, %cst_73 [1] : vector<8x8xf32> to vector<8xf32>
    %164 = vector.shape_cast %163 : vector<8xf32> to vector<8x1xf32>
    %165 = tpu.reciprocal %164 {approx = true} : vector<8x1xf32> -> vector<8x1xf32>
    %166 = vector.broadcast %165 : vector<8x1xf32> to vector<8x8xf32>
    %167 = arith.mulf %162, %166 : vector<8x8xf32>
    %168 = vector.extract_strided_slice %124 {offsets = [0, 16], sizes = [8, 8], strides = [1, 1]} : vector<8x32xf32> to vector<8x8xf32>
    %cst_74 = arith.constant dense<0.000000e+00> : vector<8x8xf32>
    %169 = tpu.matmul %167, %168, %cst_74 {dimension_numbers = #tpu.dot_dimension_numbers<[1], [0], [0], [1], [0, 0, 1, 1], [], []>} : vector<8x8xf32>, vector<8x8xf32>, vector<8x8xf32> -> vector<8x8xf32>
    %170 = vector.extract_strided_slice %122 {offsets = [0, 24], sizes = [8, 8], strides = [1, 1]} : vector<8x32xf32> to vector<8x8xf32>
    %171 = vector.extract_strided_slice %123 {offsets = [0, 24], sizes = [8, 8], strides = [1, 1]} : vector<8x32xf32> to vector<8x8xf32>
    %cst_75 = arith.constant dense<0.000000e+00> : vector<8x8xf32>
    %172 = tpu.matmul %170, %171, %cst_75 {dimension_numbers = #tpu.dot_dimension_numbers<[1], [1], [0], [0], [0, 0, 1, 0], [], []>} : vector<8x8xf32>, vector<8x8xf32>, vector<8x8xf32> -> vector<8x8xf32>
    %cst_76 = arith.constant dense<0xFF800000> : vector<8xf32>
    %173 = vector.multi_reduction <maximumf>, %172, %cst_76 [1] : vector<8x8xf32> to vector<8xf32>
    %174 = vector.shape_cast %173 : vector<8xf32> to vector<8x1xf32>
    %175 = vector.broadcast %174 : vector<8x1xf32> to vector<8x8xf32>
    %176 = arith.subf %172, %175 : vector<8x8xf32>
    %177 = math.exp %176 : vector<8x8xf32>
    %cst_77 = arith.constant dense<0.000000e+00> : vector<8xf32>
    %178 = vector.multi_reduction <add>, %177, %cst_77 [1] : vector<8x8xf32> to vector<8xf32>
    %179 = vector.shape_cast %178 : vector<8xf32> to vector<8x1xf32>
    %180 = tpu.reciprocal %179 {approx = true} : vector<8x1xf32> -> vector<8x1xf32>
    %181 = vector.broadcast %180 : vector<8x1xf32> to vector<8x8xf32>
    %182 = arith.mulf %177, %181 : vector<8x8xf32>
    %183 = vector.extract_strided_slice %124 {offsets = [0, 24], sizes = [8, 8], strides = [1, 1]} : vector<8x32xf32> to vector<8x8xf32>
    %cst_78 = arith.constant dense<0.000000e+00> : vector<8x8xf32>
    %184 = tpu.matmul %182, %183, %cst_78 {dimension_numbers = #tpu.dot_dimension_numbers<[1], [0], [0], [1], [0, 0, 1, 1], [], []>} : vector<8x8xf32>, vector<8x8xf32>, vector<8x8xf32> -> vector<8x8xf32>
    %185 = tpu.concatenate %139, %154, %169, %184 in 1 : vector<8x8xf32>, vector<8x8xf32>, vector<8x8xf32>, vector<8x8xf32> -> vector<8x32xf32>
    %186 = tpu.concatenate %121, %185 in 0 : vector<8x32xf32>, vector<8x32xf32> -> vector<16x32xf32>
    %cst_79 = arith.constant dense<0.000000e+00> : vector<16x32xf32>
    %187 = tpu.matmul %186, %49, %cst_79 {dimension_numbers = #tpu.dot_dimension_numbers<[1], [0], [0], [1], [0, 0, 1, 1], [], []>} : vector<16x32xf32>, vector<32x32xf32>, vector<16x32xf32> -> vector<16x32xf32>
    %188 = vector.broadcast %51 : vector<1x32xf32> to vector<16x32xf32>
    %189 = arith.addf %187, %188 : vector<16x32xf32>
    %190 = arith.addf %16, %189 : vector<16x32xf32>
    %c0_80 = arith.constant 0 : index
    %c0_81 = arith.constant 0 : index
    %c0_82 = arith.constant 0 : index
    %191 = vector.load %arg19[%c0_80, %c0_81, %c0_82] : memref<2x1x32xf32, #tpu.memory_space<vmem>>, vector<1x1x32xf32>
    %192 = vector.shape_cast %191 : vector<1x1x32xf32> to vector<1x32xf32>
    %c0_83 = arith.constant 0 : index
    %c0_84 = arith.constant 0 : index
    %c0_85 = arith.constant 0 : index
    %193 = vector.load %arg20[%c0_83, %c0_84, %c0_85] : memref<2x1x32xf32, #tpu.memory_space<vmem>>, vector<1x1x32xf32>
    %194 = vector.shape_cast %193 : vector<1x1x32xf32> to vector<1x32xf32>
    %cst_86 = arith.constant dense<0.000000e+00> : vector<16xf32>
    %195 = vector.multi_reduction <add>, %190, %cst_86 [1] : vector<16x32xf32> to vector<16xf32>
    %196 = vector.shape_cast %195 : vector<16xf32> to vector<16x1xf32>
    %cst_87 = arith.constant 3.200000e+01 : f32
    %197 = vector.broadcast %cst_87 : f32 to vector<16x1xf32>
    %198 = arith.divf %196, %197 : vector<16x1xf32>
    %199 = vector.broadcast %198 : vector<16x1xf32> to vector<16x32xf32>
    %200 = arith.subf %190, %199 : vector<16x32xf32>
    %201 = arith.mulf %200, %200 : vector<16x32xf32>
    %cst_88 = arith.constant dense<0.000000e+00> : vector<16xf32>
    %202 = vector.multi_reduction <add>, %201, %cst_88 [1] : vector<16x32xf32> to vector<16xf32>
    %203 = vector.shape_cast %202 : vector<16xf32> to vector<16x1xf32>
    %cst_89 = arith.constant 3.200000e+01 : f32
    %204 = vector.broadcast %cst_89 : f32 to vector<16x1xf32>
    %205 = arith.divf %203, %204 : vector<16x1xf32>
    %206 = vector.broadcast %198 : vector<16x1xf32> to vector<16x32xf32>
    %207 = arith.subf %190, %206 : vector<16x32xf32>
    %cst_90 = arith.constant 9.99999974E-6 : f32
    %208 = vector.broadcast %cst_90 : f32 to vector<16x1xf32>
    %209 = arith.addf %205, %208 : vector<16x1xf32>
    %210 = math.rsqrt %209 : vector<16x1xf32>
    %211 = vector.broadcast %210 : vector<16x1xf32> to vector<16x32xf32>
    %212 = arith.mulf %207, %211 : vector<16x32xf32>
    %213 = vector.broadcast %192 : vector<1x32xf32> to vector<16x32xf32>
    %214 = arith.mulf %212, %213 : vector<16x32xf32>
    %215 = vector.broadcast %194 : vector<1x32xf32> to vector<16x32xf32>
    %216 = arith.addf %214, %215 : vector<16x32xf32>
    %c0_91 = arith.constant 0 : index
    %c0_92 = arith.constant 0 : index
    %c0_93 = arith.constant 0 : index
    %217 = vector.load %arg21[%c0_91, %c0_92, %c0_93] : memref<2x32x32xf32, #tpu.memory_space<vmem>>, vector<1x32x32xf32>
    %218 = vector.shape_cast %217 : vector<1x32x32xf32> to vector<32x32xf32>
    %cst_94 = arith.constant dense<0.000000e+00> : vector<16x32xf32>
    %219 = tpu.matmul %216, %218, %cst_94 {dimension_numbers = #tpu.dot_dimension_numbers<[1], [0], [0], [1], [0, 0, 1, 1], [], []>} : vector<16x32xf32>, vector<32x32xf32>, vector<16x32xf32> -> vector<16x32xf32>
    %c0_95 = arith.constant 0 : index
    %c0_96 = arith.constant 0 : index
    %c0_97 = arith.constant 0 : index
    %220 = vector.load %arg22[%c0_95, %c0_96, %c0_97] : memref<2x1x32xf32, #tpu.memory_space<vmem>>, vector<1x1x32xf32>
    %221 = vector.shape_cast %220 : vector<1x1x32xf32> to vector<1x32xf32>
    %222 = vector.broadcast %221 : vector<1x32xf32> to vector<16x32xf32>
    %223 = arith.addf %219, %222 : vector<16x32xf32>
    %cst_98 = arith.constant 0.000000e+00 : f32
    %224 = vector.broadcast %cst_98 : f32 to vector<16x32xf32>
    %225 = arith.maximumf %223, %224 : vector<16x32xf32>
    %c0_99 = arith.constant 0 : index
    %c0_100 = arith.constant 0 : index
    %c0_101 = arith.constant 0 : index
    %226 = vector.load %arg23[%c0_99, %c0_100, %c0_101] : memref<2x32x32xf32, #tpu.memory_space<vmem>>, vector<1x32x32xf32>
    %227 = vector.shape_cast %226 : vector<1x32x32xf32> to vector<32x32xf32>
    %cst_102 = arith.constant dense<0.000000e+00> : vector<16x32xf32>
    %228 = tpu.matmul %225, %227, %cst_102 {dimension_numbers = #tpu.dot_dimension_numbers<[1], [0], [0], [1], [0, 0, 1, 1], [], []>} : vector<16x32xf32>, vector<32x32xf32>, vector<16x32xf32> -> vector<16x32xf32>
    %c0_103 = arith.constant 0 : index
    %c0_104 = arith.constant 0 : index
    %c0_105 = arith.constant 0 : index
    %229 = vector.load %arg24[%c0_103, %c0_104, %c0_105] : memref<2x1x32xf32, #tpu.memory_space<vmem>>, vector<1x1x32xf32>
    %230 = vector.shape_cast %229 : vector<1x1x32xf32> to vector<1x32xf32>
    %231 = vector.broadcast %230 : vector<1x32xf32> to vector<16x32xf32>
    %232 = arith.addf %228, %231 : vector<16x32xf32>
    %233 = arith.addf %216, %232 : vector<16x32xf32>
    %c0_106 = arith.constant 0 : index
    %c0_107 = arith.constant 0 : index
    %c0_108 = arith.constant 0 : index
    %234 = vector.load %arg25[%c0_106, %c0_107, %c0_108] : memref<2x1x32xf32, #tpu.memory_space<vmem>>, vector<1x1x32xf32>
    %235 = vector.shape_cast %234 : vector<1x1x32xf32> to vector<1x32xf32>
    %c0_109 = arith.constant 0 : index
    %c0_110 = arith.constant 0 : index
    %c0_111 = arith.constant 0 : index
    %236 = vector.load %arg26[%c0_109, %c0_110, %c0_111] : memref<2x1x32xf32, #tpu.memory_space<vmem>>, vector<1x1x32xf32>
    %237 = vector.shape_cast %236 : vector<1x1x32xf32> to vector<1x32xf32>
    %cst_112 = arith.constant dense<0.000000e+00> : vector<16xf32>
    %238 = vector.multi_reduction <add>, %233, %cst_112 [1] : vector<16x32xf32> to vector<16xf32>
    %239 = vector.shape_cast %238 : vector<16xf32> to vector<16x1xf32>
    %cst_113 = arith.constant 3.200000e+01 : f32
    %240 = vector.broadcast %cst_113 : f32 to vector<16x1xf32>
    %241 = arith.divf %239, %240 : vector<16x1xf32>
    %242 = vector.broadcast %241 : vector<16x1xf32> to vector<16x32xf32>
    %243 = arith.subf %233, %242 : vector<16x32xf32>
    %244 = arith.mulf %243, %243 : vector<16x32xf32>
    %cst_114 = arith.constant dense<0.000000e+00> : vector<16xf32>
    %245 = vector.multi_reduction <add>, %244, %cst_114 [1] : vector<16x32xf32> to vector<16xf32>
    %246 = vector.shape_cast %245 : vector<16xf32> to vector<16x1xf32>
    %cst_115 = arith.constant 3.200000e+01 : f32
    %247 = vector.broadcast %cst_115 : f32 to vector<16x1xf32>
    %248 = arith.divf %246, %247 : vector<16x1xf32>
    %249 = vector.broadcast %241 : vector<16x1xf32> to vector<16x32xf32>
    %250 = arith.subf %233, %249 : vector<16x32xf32>
    %cst_116 = arith.constant 9.99999974E-6 : f32
    %251 = vector.broadcast %cst_116 : f32 to vector<16x1xf32>
    %252 = arith.addf %248, %251 : vector<16x1xf32>
    %253 = math.rsqrt %252 : vector<16x1xf32>
    %254 = vector.broadcast %253 : vector<16x1xf32> to vector<16x32xf32>
    %255 = arith.mulf %250, %254 : vector<16x32xf32>
    %256 = vector.broadcast %235 : vector<1x32xf32> to vector<16x32xf32>
    %257 = arith.mulf %255, %256 : vector<16x32xf32>
    %258 = vector.broadcast %237 : vector<1x32xf32> to vector<16x32xf32>
    %259 = arith.addf %257, %258 : vector<16x32xf32>
    %c1 = arith.constant 1 : index
    %c0_117 = arith.constant 0 : index
    %c0_118 = arith.constant 0 : index
    %260 = vector.load %arg15[%c1, %c0_117, %c0_118] : memref<2x32x96xf32, #tpu.memory_space<vmem>>, vector<1x32x96xf32>
    %261 = vector.shape_cast %260 : vector<1x32x96xf32> to vector<32x96xf32>
    %c1_119 = arith.constant 1 : index
    %c0_120 = arith.constant 0 : index
    %c0_121 = arith.constant 0 : index
    %262 = vector.load %arg16[%c1_119, %c0_120, %c0_121] : memref<2x1x96xf32, #tpu.memory_space<vmem>>, vector<1x1x96xf32>
    %263 = vector.shape_cast %262 : vector<1x1x96xf32> to vector<1x96xf32>
    %c1_122 = arith.constant 1 : index
    %c0_123 = arith.constant 0 : index
    %c0_124 = arith.constant 0 : index
    %264 = vector.load %arg17[%c1_122, %c0_123, %c0_124] : memref<2x32x32xf32, #tpu.memory_space<vmem>>, vector<1x32x32xf32>
    %265 = vector.shape_cast %264 : vector<1x32x32xf32> to vector<32x32xf32>
    %c1_125 = arith.constant 1 : index
    %c0_126 = arith.constant 0 : index
    %c0_127 = arith.constant 0 : index
    %266 = vector.load %arg18[%c1_125, %c0_126, %c0_127] : memref<2x1x32xf32, #tpu.memory_space<vmem>>, vector<1x1x32xf32>
    %267 = vector.shape_cast %266 : vector<1x1x32xf32> to vector<1x32xf32>
    %cst_128 = arith.constant dense<0.000000e+00> : vector<16x96xf32>
    %268 = tpu.matmul %259, %261, %cst_128 {dimension_numbers = #tpu.dot_dimension_numbers<[1], [0], [0], [1], [0, 0, 1, 1], [], []>} : vector<16x32xf32>, vector<32x96xf32>, vector<16x96xf32> -> vector<16x96xf32>
    %269 = vector.broadcast %263 : vector<1x96xf32> to vector<16x96xf32>
    %270 = arith.addf %268, %269 : vector<16x96xf32>
    %271 = vector.extract_strided_slice %270 {offsets = [0, 0], sizes = [16, 32], strides = [1, 1]} : vector<16x96xf32> to vector<16x32xf32>
    %272 = vector.extract_strided_slice %270 {offsets = [0, 32], sizes = [16, 32], strides = [1, 1]} : vector<16x96xf32> to vector<16x32xf32>
    %273 = vector.extract_strided_slice %270 {offsets = [0, 64], sizes = [16, 32], strides = [1, 1]} : vector<16x96xf32> to vector<16x32xf32>
    %274 = vector.extract_strided_slice %271 {offsets = [0, 0], sizes = [8, 32], strides = [1, 1]} : vector<16x32xf32> to vector<8x32xf32>
    %275 = vector.extract_strided_slice %272 {offsets = [0, 0], sizes = [8, 32], strides = [1, 1]} : vector<16x32xf32> to vector<8x32xf32>
    %276 = vector.extract_strided_slice %273 {offsets = [0, 0], sizes = [8, 32], strides = [1, 1]} : vector<16x32xf32> to vector<8x32xf32>
    %277 = vector.extract_strided_slice %274 {offsets = [0, 0], sizes = [8, 8], strides = [1, 1]} : vector<8x32xf32> to vector<8x8xf32>
    %278 = vector.extract_strided_slice %275 {offsets = [0, 0], sizes = [8, 8], strides = [1, 1]} : vector<8x32xf32> to vector<8x8xf32>
    %cst_129 = arith.constant dense<0.000000e+00> : vector<8x8xf32>
    %279 = tpu.matmul %277, %278, %cst_129 {dimension_numbers = #tpu.dot_dimension_numbers<[1], [1], [0], [0], [0, 0, 1, 0], [], []>} : vector<8x8xf32>, vector<8x8xf32>, vector<8x8xf32> -> vector<8x8xf32>
    %cst_130 = arith.constant dense<0xFF800000> : vector<8xf32>
    %280 = vector.multi_reduction <maximumf>, %279, %cst_130 [1] : vector<8x8xf32> to vector<8xf32>
    %281 = vector.shape_cast %280 : vector<8xf32> to vector<8x1xf32>
    %282 = vector.broadcast %281 : vector<8x1xf32> to vector<8x8xf32>
    %283 = arith.subf %279, %282 : vector<8x8xf32>
    %284 = math.exp %283 : vector<8x8xf32>
    %cst_131 = arith.constant dense<0.000000e+00> : vector<8xf32>
    %285 = vector.multi_reduction <add>, %284, %cst_131 [1] : vector<8x8xf32> to vector<8xf32>
    %286 = vector.shape_cast %285 : vector<8xf32> to vector<8x1xf32>
    %287 = tpu.reciprocal %286 {approx = true} : vector<8x1xf32> -> vector<8x1xf32>
    %288 = vector.broadcast %287 : vector<8x1xf32> to vector<8x8xf32>
    %289 = arith.mulf %284, %288 : vector<8x8xf32>
    %290 = vector.extract_strided_slice %276 {offsets = [0, 0], sizes = [8, 8], strides = [1, 1]} : vector<8x32xf32> to vector<8x8xf32>
    %cst_132 = arith.constant dense<0.000000e+00> : vector<8x8xf32>
    %291 = tpu.matmul %289, %290, %cst_132 {dimension_numbers = #tpu.dot_dimension_numbers<[1], [0], [0], [1], [0, 0, 1, 1], [], []>} : vector<8x8xf32>, vector<8x8xf32>, vector<8x8xf32> -> vector<8x8xf32>
    %292 = vector.extract_strided_slice %274 {offsets = [0, 8], sizes = [8, 8], strides = [1, 1]} : vector<8x32xf32> to vector<8x8xf32>
    %293 = vector.extract_strided_slice %275 {offsets = [0, 8], sizes = [8, 8], strides = [1, 1]} : vector<8x32xf32> to vector<8x8xf32>
    %cst_133 = arith.constant dense<0.000000e+00> : vector<8x8xf32>
    %294 = tpu.matmul %292, %293, %cst_133 {dimension_numbers = #tpu.dot_dimension_numbers<[1], [1], [0], [0], [0, 0, 1, 0], [], []>} : vector<8x8xf32>, vector<8x8xf32>, vector<8x8xf32> -> vector<8x8xf32>
    %cst_134 = arith.constant dense<0xFF800000> : vector<8xf32>
    %295 = vector.multi_reduction <maximumf>, %294, %cst_134 [1] : vector<8x8xf32> to vector<8xf32>
    %296 = vector.shape_cast %295 : vector<8xf32> to vector<8x1xf32>
    %297 = vector.broadcast %296 : vector<8x1xf32> to vector<8x8xf32>
    %298 = arith.subf %294, %297 : vector<8x8xf32>
    %299 = math.exp %298 : vector<8x8xf32>
    %cst_135 = arith.constant dense<0.000000e+00> : vector<8xf32>
    %300 = vector.multi_reduction <add>, %299, %cst_135 [1] : vector<8x8xf32> to vector<8xf32>
    %301 = vector.shape_cast %300 : vector<8xf32> to vector<8x1xf32>
    %302 = tpu.reciprocal %301 {approx = true} : vector<8x1xf32> -> vector<8x1xf32>
    %303 = vector.broadcast %302 : vector<8x1xf32> to vector<8x8xf32>
    %304 = arith.mulf %299, %303 : vector<8x8xf32>
    %305 = vector.extract_strided_slice %276 {offsets = [0, 8], sizes = [8, 8], strides = [1, 1]} : vector<8x32xf32> to vector<8x8xf32>
    %cst_136 = arith.constant dense<0.000000e+00> : vector<8x8xf32>
    %306 = tpu.matmul %304, %305, %cst_136 {dimension_numbers = #tpu.dot_dimension_numbers<[1], [0], [0], [1], [0, 0, 1, 1], [], []>} : vector<8x8xf32>, vector<8x8xf32>, vector<8x8xf32> -> vector<8x8xf32>
    %307 = vector.extract_strided_slice %274 {offsets = [0, 16], sizes = [8, 8], strides = [1, 1]} : vector<8x32xf32> to vector<8x8xf32>
    %308 = vector.extract_strided_slice %275 {offsets = [0, 16], sizes = [8, 8], strides = [1, 1]} : vector<8x32xf32> to vector<8x8xf32>
    %cst_137 = arith.constant dense<0.000000e+00> : vector<8x8xf32>
    %309 = tpu.matmul %307, %308, %cst_137 {dimension_numbers = #tpu.dot_dimension_numbers<[1], [1], [0], [0], [0, 0, 1, 0], [], []>} : vector<8x8xf32>, vector<8x8xf32>, vector<8x8xf32> -> vector<8x8xf32>
    %cst_138 = arith.constant dense<0xFF800000> : vector<8xf32>
    %310 = vector.multi_reduction <maximumf>, %309, %cst_138 [1] : vector<8x8xf32> to vector<8xf32>
    %311 = vector.shape_cast %310 : vector<8xf32> to vector<8x1xf32>
    %312 = vector.broadcast %311 : vector<8x1xf32> to vector<8x8xf32>
    %313 = arith.subf %309, %312 : vector<8x8xf32>
    %314 = math.exp %313 : vector<8x8xf32>
    %cst_139 = arith.constant dense<0.000000e+00> : vector<8xf32>
    %315 = vector.multi_reduction <add>, %314, %cst_139 [1] : vector<8x8xf32> to vector<8xf32>
    %316 = vector.shape_cast %315 : vector<8xf32> to vector<8x1xf32>
    %317 = tpu.reciprocal %316 {approx = true} : vector<8x1xf32> -> vector<8x1xf32>
    %318 = vector.broadcast %317 : vector<8x1xf32> to vector<8x8xf32>
    %319 = arith.mulf %314, %318 : vector<8x8xf32>
    %320 = vector.extract_strided_slice %276 {offsets = [0, 16], sizes = [8, 8], strides = [1, 1]} : vector<8x32xf32> to vector<8x8xf32>
    %cst_140 = arith.constant dense<0.000000e+00> : vector<8x8xf32>
    %321 = tpu.matmul %319, %320, %cst_140 {dimension_numbers = #tpu.dot_dimension_numbers<[1], [0], [0], [1], [0, 0, 1, 1], [], []>} : vector<8x8xf32>, vector<8x8xf32>, vector<8x8xf32> -> vector<8x8xf32>
    %322 = vector.extract_strided_slice %274 {offsets = [0, 24], sizes = [8, 8], strides = [1, 1]} : vector<8x32xf32> to vector<8x8xf32>
    %323 = vector.extract_strided_slice %275 {offsets = [0, 24], sizes = [8, 8], strides = [1, 1]} : vector<8x32xf32> to vector<8x8xf32>
    %cst_141 = arith.constant dense<0.000000e+00> : vector<8x8xf32>
    %324 = tpu.matmul %322, %323, %cst_141 {dimension_numbers = #tpu.dot_dimension_numbers<[1], [1], [0], [0], [0, 0, 1, 0], [], []>} : vector<8x8xf32>, vector<8x8xf32>, vector<8x8xf32> -> vector<8x8xf32>
    %cst_142 = arith.constant dense<0xFF800000> : vector<8xf32>
    %325 = vector.multi_reduction <maximumf>, %324, %cst_142 [1] : vector<8x8xf32> to vector<8xf32>
    %326 = vector.shape_cast %325 : vector<8xf32> to vector<8x1xf32>
    %327 = vector.broadcast %326 : vector<8x1xf32> to vector<8x8xf32>
    %328 = arith.subf %324, %327 : vector<8x8xf32>
    %329 = math.exp %328 : vector<8x8xf32>
    %cst_143 = arith.constant dense<0.000000e+00> : vector<8xf32>
    %330 = vector.multi_reduction <add>, %329, %cst_143 [1] : vector<8x8xf32> to vector<8xf32>
    %331 = vector.shape_cast %330 : vector<8xf32> to vector<8x1xf32>
    %332 = tpu.reciprocal %331 {approx = true} : vector<8x1xf32> -> vector<8x1xf32>
    %333 = vector.broadcast %332 : vector<8x1xf32> to vector<8x8xf32>
    %334 = arith.mulf %329, %333 : vector<8x8xf32>
    %335 = vector.extract_strided_slice %276 {offsets = [0, 24], sizes = [8, 8], strides = [1, 1]} : vector<8x32xf32> to vector<8x8xf32>
    %cst_144 = arith.constant dense<0.000000e+00> : vector<8x8xf32>
    %336 = tpu.matmul %334, %335, %cst_144 {dimension_numbers = #tpu.dot_dimension_numbers<[1], [0], [0], [1], [0, 0, 1, 1], [], []>} : vector<8x8xf32>, vector<8x8xf32>, vector<8x8xf32> -> vector<8x8xf32>
    %337 = tpu.concatenate %291, %306, %321, %336 in 1 : vector<8x8xf32>, vector<8x8xf32>, vector<8x8xf32>, vector<8x8xf32> -> vector<8x32xf32>
    %338 = vector.extract_strided_slice %271 {offsets = [8, 0], sizes = [8, 32], strides = [1, 1]} : vector<16x32xf32> to vector<8x32xf32>
    %339 = vector.extract_strided_slice %272 {offsets = [8, 0], sizes = [8, 32], strides = [1, 1]} : vector<16x32xf32> to vector<8x32xf32>
    %340 = vector.extract_strided_slice %273 {offsets = [8, 0], sizes = [8, 32], strides = [1, 1]} : vector<16x32xf32> to vector<8x32xf32>
    %341 = vector.extract_strided_slice %338 {offsets = [0, 0], sizes = [8, 8], strides = [1, 1]} : vector<8x32xf32> to vector<8x8xf32>
    %342 = vector.extract_strided_slice %339 {offsets = [0, 0], sizes = [8, 8], strides = [1, 1]} : vector<8x32xf32> to vector<8x8xf32>
    %cst_145 = arith.constant dense<0.000000e+00> : vector<8x8xf32>
    %343 = tpu.matmul %341, %342, %cst_145 {dimension_numbers = #tpu.dot_dimension_numbers<[1], [1], [0], [0], [0, 0, 1, 0], [], []>} : vector<8x8xf32>, vector<8x8xf32>, vector<8x8xf32> -> vector<8x8xf32>
    %cst_146 = arith.constant dense<0xFF800000> : vector<8xf32>
    %344 = vector.multi_reduction <maximumf>, %343, %cst_146 [1] : vector<8x8xf32> to vector<8xf32>
    %345 = vector.shape_cast %344 : vector<8xf32> to vector<8x1xf32>
    %346 = vector.broadcast %345 : vector<8x1xf32> to vector<8x8xf32>
    %347 = arith.subf %343, %346 : vector<8x8xf32>
    %348 = math.exp %347 : vector<8x8xf32>
    %cst_147 = arith.constant dense<0.000000e+00> : vector<8xf32>
    %349 = vector.multi_reduction <add>, %348, %cst_147 [1] : vector<8x8xf32> to vector<8xf32>
    %350 = vector.shape_cast %349 : vector<8xf32> to vector<8x1xf32>
    %351 = tpu.reciprocal %350 {approx = true} : vector<8x1xf32> -> vector<8x1xf32>
    %352 = vector.broadcast %351 : vector<8x1xf32> to vector<8x8xf32>
    %353 = arith.mulf %348, %352 : vector<8x8xf32>
    %354 = vector.extract_strided_slice %340 {offsets = [0, 0], sizes = [8, 8], strides = [1, 1]} : vector<8x32xf32> to vector<8x8xf32>
    %cst_148 = arith.constant dense<0.000000e+00> : vector<8x8xf32>
    %355 = tpu.matmul %353, %354, %cst_148 {dimension_numbers = #tpu.dot_dimension_numbers<[1], [0], [0], [1], [0, 0, 1, 1], [], []>} : vector<8x8xf32>, vector<8x8xf32>, vector<8x8xf32> -> vector<8x8xf32>
    %356 = vector.extract_strided_slice %338 {offsets = [0, 8], sizes = [8, 8], strides = [1, 1]} : vector<8x32xf32> to vector<8x8xf32>
    %357 = vector.extract_strided_slice %339 {offsets = [0, 8], sizes = [8, 8], strides = [1, 1]} : vector<8x32xf32> to vector<8x8xf32>
    %cst_149 = arith.constant dense<0.000000e+00> : vector<8x8xf32>
    %358 = tpu.matmul %356, %357, %cst_149 {dimension_numbers = #tpu.dot_dimension_numbers<[1], [1], [0], [0], [0, 0, 1, 0], [], []>} : vector<8x8xf32>, vector<8x8xf32>, vector<8x8xf32> -> vector<8x8xf32>
    %cst_150 = arith.constant dense<0xFF800000> : vector<8xf32>
    %359 = vector.multi_reduction <maximumf>, %358, %cst_150 [1] : vector<8x8xf32> to vector<8xf32>
    %360 = vector.shape_cast %359 : vector<8xf32> to vector<8x1xf32>
    %361 = vector.broadcast %360 : vector<8x1xf32> to vector<8x8xf32>
    %362 = arith.subf %358, %361 : vector<8x8xf32>
    %363 = math.exp %362 : vector<8x8xf32>
    %cst_151 = arith.constant dense<0.000000e+00> : vector<8xf32>
    %364 = vector.multi_reduction <add>, %363, %cst_151 [1] : vector<8x8xf32> to vector<8xf32>
    %365 = vector.shape_cast %364 : vector<8xf32> to vector<8x1xf32>
    %366 = tpu.reciprocal %365 {approx = true} : vector<8x1xf32> -> vector<8x1xf32>
    %367 = vector.broadcast %366 : vector<8x1xf32> to vector<8x8xf32>
    %368 = arith.mulf %363, %367 : vector<8x8xf32>
    %369 = vector.extract_strided_slice %340 {offsets = [0, 8], sizes = [8, 8], strides = [1, 1]} : vector<8x32xf32> to vector<8x8xf32>
    %cst_152 = arith.constant dense<0.000000e+00> : vector<8x8xf32>
    %370 = tpu.matmul %368, %369, %cst_152 {dimension_numbers = #tpu.dot_dimension_numbers<[1], [0], [0], [1], [0, 0, 1, 1], [], []>} : vector<8x8xf32>, vector<8x8xf32>, vector<8x8xf32> -> vector<8x8xf32>
    %371 = vector.extract_strided_slice %338 {offsets = [0, 16], sizes = [8, 8], strides = [1, 1]} : vector<8x32xf32> to vector<8x8xf32>
    %372 = vector.extract_strided_slice %339 {offsets = [0, 16], sizes = [8, 8], strides = [1, 1]} : vector<8x32xf32> to vector<8x8xf32>
    %cst_153 = arith.constant dense<0.000000e+00> : vector<8x8xf32>
    %373 = tpu.matmul %371, %372, %cst_153 {dimension_numbers = #tpu.dot_dimension_numbers<[1], [1], [0], [0], [0, 0, 1, 0], [], []>} : vector<8x8xf32>, vector<8x8xf32>, vector<8x8xf32> -> vector<8x8xf32>
    %cst_154 = arith.constant dense<0xFF800000> : vector<8xf32>
    %374 = vector.multi_reduction <maximumf>, %373, %cst_154 [1] : vector<8x8xf32> to vector<8xf32>
    %375 = vector.shape_cast %374 : vector<8xf32> to vector<8x1xf32>
    %376 = vector.broadcast %375 : vector<8x1xf32> to vector<8x8xf32>
    %377 = arith.subf %373, %376 : vector<8x8xf32>
    %378 = math.exp %377 : vector<8x8xf32>
    %cst_155 = arith.constant dense<0.000000e+00> : vector<8xf32>
    %379 = vector.multi_reduction <add>, %378, %cst_155 [1] : vector<8x8xf32> to vector<8xf32>
    %380 = vector.shape_cast %379 : vector<8xf32> to vector<8x1xf32>
    %381 = tpu.reciprocal %380 {approx = true} : vector<8x1xf32> -> vector<8x1xf32>
    %382 = vector.broadcast %381 : vector<8x1xf32> to vector<8x8xf32>
    %383 = arith.mulf %378, %382 : vector<8x8xf32>
    %384 = vector.extract_strided_slice %340 {offsets = [0, 16], sizes = [8, 8], strides = [1, 1]} : vector<8x32xf32> to vector<8x8xf32>
    %cst_156 = arith.constant dense<0.000000e+00> : vector<8x8xf32>
    %385 = tpu.matmul %383, %384, %cst_156 {dimension_numbers = #tpu.dot_dimension_numbers<[1], [0], [0], [1], [0, 0, 1, 1], [], []>} : vector<8x8xf32>, vector<8x8xf32>, vector<8x8xf32> -> vector<8x8xf32>
    %386 = vector.extract_strided_slice %338 {offsets = [0, 24], sizes = [8, 8], strides = [1, 1]} : vector<8x32xf32> to vector<8x8xf32>
    %387 = vector.extract_strided_slice %339 {offsets = [0, 24], sizes = [8, 8], strides = [1, 1]} : vector<8x32xf32> to vector<8x8xf32>
    %cst_157 = arith.constant dense<0.000000e+00> : vector<8x8xf32>
    %388 = tpu.matmul %386, %387, %cst_157 {dimension_numbers = #tpu.dot_dimension_numbers<[1], [1], [0], [0], [0, 0, 1, 0], [], []>} : vector<8x8xf32>, vector<8x8xf32>, vector<8x8xf32> -> vector<8x8xf32>
    %cst_158 = arith.constant dense<0xFF800000> : vector<8xf32>
    %389 = vector.multi_reduction <maximumf>, %388, %cst_158 [1] : vector<8x8xf32> to vector<8xf32>
    %390 = vector.shape_cast %389 : vector<8xf32> to vector<8x1xf32>
    %391 = vector.broadcast %390 : vector<8x1xf32> to vector<8x8xf32>
    %392 = arith.subf %388, %391 : vector<8x8xf32>
    %393 = math.exp %392 : vector<8x8xf32>
    %cst_159 = arith.constant dense<0.000000e+00> : vector<8xf32>
    %394 = vector.multi_reduction <add>, %393, %cst_159 [1] : vector<8x8xf32> to vector<8xf32>
    %395 = vector.shape_cast %394 : vector<8xf32> to vector<8x1xf32>
    %396 = tpu.reciprocal %395 {approx = true} : vector<8x1xf32> -> vector<8x1xf32>
    %397 = vector.broadcast %396 : vector<8x1xf32> to vector<8x8xf32>
    %398 = arith.mulf %393, %397 : vector<8x8xf32>
    %399 = vector.extract_strided_slice %340 {offsets = [0, 24], sizes = [8, 8], strides = [1, 1]} : vector<8x32xf32> to vector<8x8xf32>
    %cst_160 = arith.constant dense<0.000000e+00> : vector<8x8xf32>
    %400 = tpu.matmul %398, %399, %cst_160 {dimension_numbers = #tpu.dot_dimension_numbers<[1], [0], [0], [1], [0, 0, 1, 1], [], []>} : vector<8x8xf32>, vector<8x8xf32>, vector<8x8xf32> -> vector<8x8xf32>
    %401 = tpu.concatenate %355, %370, %385, %400 in 1 : vector<8x8xf32>, vector<8x8xf32>, vector<8x8xf32>, vector<8x8xf32> -> vector<8x32xf32>
    %402 = tpu.concatenate %337, %401 in 0 : vector<8x32xf32>, vector<8x32xf32> -> vector<16x32xf32>
    %cst_161 = arith.constant dense<0.000000e+00> : vector<16x32xf32>
    %403 = tpu.matmul %402, %265, %cst_161 {dimension_numbers = #tpu.dot_dimension_numbers<[1], [0], [0], [1], [0, 0, 1, 1], [], []>} : vector<16x32xf32>, vector<32x32xf32>, vector<16x32xf32> -> vector<16x32xf32>
    %404 = vector.broadcast %267 : vector<1x32xf32> to vector<16x32xf32>
    %405 = arith.addf %403, %404 : vector<16x32xf32>
    %406 = arith.addf %259, %405 : vector<16x32xf32>
    %c1_162 = arith.constant 1 : index
    %c0_163 = arith.constant 0 : index
    %c0_164 = arith.constant 0 : index
    %407 = vector.load %arg19[%c1_162, %c0_163, %c0_164] : memref<2x1x32xf32, #tpu.memory_space<vmem>>, vector<1x1x32xf32>
    %408 = vector.shape_cast %407 : vector<1x1x32xf32> to vector<1x32xf32>
    %c1_165 = arith.constant 1 : index
    %c0_166 = arith.constant 0 : index
    %c0_167 = arith.constant 0 : index
    %409 = vector.load %arg20[%c1_165, %c0_166, %c0_167] : memref<2x1x32xf32, #tpu.memory_space<vmem>>, vector<1x1x32xf32>
    %410 = vector.shape_cast %409 : vector<1x1x32xf32> to vector<1x32xf32>
    %cst_168 = arith.constant dense<0.000000e+00> : vector<16xf32>
    %411 = vector.multi_reduction <add>, %406, %cst_168 [1] : vector<16x32xf32> to vector<16xf32>
    %412 = vector.shape_cast %411 : vector<16xf32> to vector<16x1xf32>
    %cst_169 = arith.constant 3.200000e+01 : f32
    %413 = vector.broadcast %cst_169 : f32 to vector<16x1xf32>
    %414 = arith.divf %412, %413 : vector<16x1xf32>
    %415 = vector.broadcast %414 : vector<16x1xf32> to vector<16x32xf32>
    %416 = arith.subf %406, %415 : vector<16x32xf32>
    %417 = arith.mulf %416, %416 : vector<16x32xf32>
    %cst_170 = arith.constant dense<0.000000e+00> : vector<16xf32>
    %418 = vector.multi_reduction <add>, %417, %cst_170 [1] : vector<16x32xf32> to vector<16xf32>
    %419 = vector.shape_cast %418 : vector<16xf32> to vector<16x1xf32>
    %cst_171 = arith.constant 3.200000e+01 : f32
    %420 = vector.broadcast %cst_171 : f32 to vector<16x1xf32>
    %421 = arith.divf %419, %420 : vector<16x1xf32>
    %422 = vector.broadcast %414 : vector<16x1xf32> to vector<16x32xf32>
    %423 = arith.subf %406, %422 : vector<16x32xf32>
    %cst_172 = arith.constant 9.99999974E-6 : f32
    %424 = vector.broadcast %cst_172 : f32 to vector<16x1xf32>
    %425 = arith.addf %421, %424 : vector<16x1xf32>
    %426 = math.rsqrt %425 : vector<16x1xf32>
    %427 = vector.broadcast %426 : vector<16x1xf32> to vector<16x32xf32>
    %428 = arith.mulf %423, %427 : vector<16x32xf32>
    %429 = vector.broadcast %408 : vector<1x32xf32> to vector<16x32xf32>
    %430 = arith.mulf %428, %429 : vector<16x32xf32>
    %431 = vector.broadcast %410 : vector<1x32xf32> to vector<16x32xf32>
    %432 = arith.addf %430, %431 : vector<16x32xf32>
    %c1_173 = arith.constant 1 : index
    %c0_174 = arith.constant 0 : index
    %c0_175 = arith.constant 0 : index
    %433 = vector.load %arg21[%c1_173, %c0_174, %c0_175] : memref<2x32x32xf32, #tpu.memory_space<vmem>>, vector<1x32x32xf32>
    %434 = vector.shape_cast %433 : vector<1x32x32xf32> to vector<32x32xf32>
    %cst_176 = arith.constant dense<0.000000e+00> : vector<16x32xf32>
    %435 = tpu.matmul %432, %434, %cst_176 {dimension_numbers = #tpu.dot_dimension_numbers<[1], [0], [0], [1], [0, 0, 1, 1], [], []>} : vector<16x32xf32>, vector<32x32xf32>, vector<16x32xf32> -> vector<16x32xf32>
    %c1_177 = arith.constant 1 : index
    %c0_178 = arith.constant 0 : index
    %c0_179 = arith.constant 0 : index
    %436 = vector.load %arg22[%c1_177, %c0_178, %c0_179] : memref<2x1x32xf32, #tpu.memory_space<vmem>>, vector<1x1x32xf32>
    %437 = vector.shape_cast %436 : vector<1x1x32xf32> to vector<1x32xf32>
    %438 = vector.broadcast %437 : vector<1x32xf32> to vector<16x32xf32>
    %439 = arith.addf %435, %438 : vector<16x32xf32>
    %cst_180 = arith.constant 0.000000e+00 : f32
    %440 = vector.broadcast %cst_180 : f32 to vector<16x32xf32>
    %441 = arith.maximumf %439, %440 : vector<16x32xf32>
    %c1_181 = arith.constant 1 : index
    %c0_182 = arith.constant 0 : index
    %c0_183 = arith.constant 0 : index
    %442 = vector.load %arg23[%c1_181, %c0_182, %c0_183] : memref<2x32x32xf32, #tpu.memory_space<vmem>>, vector<1x32x32xf32>
    %443 = vector.shape_cast %442 : vector<1x32x32xf32> to vector<32x32xf32>
    %cst_184 = arith.constant dense<0.000000e+00> : vector<16x32xf32>
    %444 = tpu.matmul %441, %443, %cst_184 {dimension_numbers = #tpu.dot_dimension_numbers<[1], [0], [0], [1], [0, 0, 1, 1], [], []>} : vector<16x32xf32>, vector<32x32xf32>, vector<16x32xf32> -> vector<16x32xf32>
    %c1_185 = arith.constant 1 : index
    %c0_186 = arith.constant 0 : index
    %c0_187 = arith.constant 0 : index
    %445 = vector.load %arg24[%c1_185, %c0_186, %c0_187] : memref<2x1x32xf32, #tpu.memory_space<vmem>>, vector<1x1x32xf32>
    %446 = vector.shape_cast %445 : vector<1x1x32xf32> to vector<1x32xf32>
    %447 = vector.broadcast %446 : vector<1x32xf32> to vector<16x32xf32>
    %448 = arith.addf %444, %447 : vector<16x32xf32>
    %449 = arith.addf %432, %448 : vector<16x32xf32>
    %c1_188 = arith.constant 1 : index
    %c0_189 = arith.constant 0 : index
    %c0_190 = arith.constant 0 : index
    %450 = vector.load %arg25[%c1_188, %c0_189, %c0_190] : memref<2x1x32xf32, #tpu.memory_space<vmem>>, vector<1x1x32xf32>
    %451 = vector.shape_cast %450 : vector<1x1x32xf32> to vector<1x32xf32>
    %c1_191 = arith.constant 1 : index
    %c0_192 = arith.constant 0 : index
    %c0_193 = arith.constant 0 : index
    %452 = vector.load %arg26[%c1_191, %c0_192, %c0_193] : memref<2x1x32xf32, #tpu.memory_space<vmem>>, vector<1x1x32xf32>
    %453 = vector.shape_cast %452 : vector<1x1x32xf32> to vector<1x32xf32>
    %cst_194 = arith.constant dense<0.000000e+00> : vector<16xf32>
    %454 = vector.multi_reduction <add>, %449, %cst_194 [1] : vector<16x32xf32> to vector<16xf32>
    %455 = vector.shape_cast %454 : vector<16xf32> to vector<16x1xf32>
    %cst_195 = arith.constant 3.200000e+01 : f32
    %456 = vector.broadcast %cst_195 : f32 to vector<16x1xf32>
    %457 = arith.divf %455, %456 : vector<16x1xf32>
    %458 = vector.broadcast %457 : vector<16x1xf32> to vector<16x32xf32>
    %459 = arith.subf %449, %458 : vector<16x32xf32>
    %460 = arith.mulf %459, %459 : vector<16x32xf32>
    %cst_196 = arith.constant dense<0.000000e+00> : vector<16xf32>
    %461 = vector.multi_reduction <add>, %460, %cst_196 [1] : vector<16x32xf32> to vector<16xf32>
    %462 = vector.shape_cast %461 : vector<16xf32> to vector<16x1xf32>
    %cst_197 = arith.constant 3.200000e+01 : f32
    %463 = vector.broadcast %cst_197 : f32 to vector<16x1xf32>
    %464 = arith.divf %462, %463 : vector<16x1xf32>
    %465 = vector.broadcast %457 : vector<16x1xf32> to vector<16x32xf32>
    %466 = arith.subf %449, %465 : vector<16x32xf32>
    %cst_198 = arith.constant 9.99999974E-6 : f32
    %467 = vector.broadcast %cst_198 : f32 to vector<16x1xf32>
    %468 = arith.addf %464, %467 : vector<16x1xf32>
    %469 = math.rsqrt %468 : vector<16x1xf32>
    %470 = vector.broadcast %469 : vector<16x1xf32> to vector<16x32xf32>
    %471 = arith.mulf %466, %470 : vector<16x32xf32>
    %472 = vector.broadcast %451 : vector<1x32xf32> to vector<16x32xf32>
    %473 = arith.mulf %471, %472 : vector<16x32xf32>
    %474 = vector.broadcast %453 : vector<1x32xf32> to vector<16x32xf32>
    %475 = arith.addf %473, %474 : vector<16x32xf32>
    %c0_199 = arith.constant 0 : index
    %c0_200 = arith.constant 0 : index
    %c0_201 = arith.constant 0 : index
    %476 = vector.load %arg27[%c0_199, %c0_200, %c0_201] : memref<2x32x96xf32, #tpu.memory_space<vmem>>, vector<1x32x96xf32>
    %477 = vector.shape_cast %476 : vector<1x32x96xf32> to vector<32x96xf32>
    %c0_202 = arith.constant 0 : index
    %c0_203 = arith.constant 0 : index
    %c0_204 = arith.constant 0 : index
    %478 = vector.load %arg28[%c0_202, %c0_203, %c0_204] : memref<2x1x96xf32, #tpu.memory_space<vmem>>, vector<1x1x96xf32>
    %479 = vector.shape_cast %478 : vector<1x1x96xf32> to vector<1x96xf32>
    %c0_205 = arith.constant 0 : index
    %c0_206 = arith.constant 0 : index
    %c0_207 = arith.constant 0 : index
    %480 = vector.load %arg29[%c0_205, %c0_206, %c0_207] : memref<2x32x32xf32, #tpu.memory_space<vmem>>, vector<1x32x32xf32>
    %481 = vector.shape_cast %480 : vector<1x32x32xf32> to vector<32x32xf32>
    %c0_208 = arith.constant 0 : index
    %c0_209 = arith.constant 0 : index
    %c0_210 = arith.constant 0 : index
    %482 = vector.load %arg30[%c0_208, %c0_209, %c0_210] : memref<2x1x32xf32, #tpu.memory_space<vmem>>, vector<1x1x32xf32>
    %483 = vector.shape_cast %482 : vector<1x1x32xf32> to vector<1x32xf32>
    %cst_211 = arith.constant dense<0.000000e+00> : vector<32x96xf32>
    %484 = tpu.matmul %43, %477, %cst_211 {dimension_numbers = #tpu.dot_dimension_numbers<[1], [0], [0], [1], [0, 0, 1, 1], [], []>} : vector<32x32xf32>, vector<32x96xf32>, vector<32x96xf32> -> vector<32x96xf32>
    %485 = vector.broadcast %479 : vector<1x96xf32> to vector<32x96xf32>
    %486 = arith.addf %484, %485 : vector<32x96xf32>
    %487 = vector.extract_strided_slice %486 {offsets = [0, 0], sizes = [32, 32], strides = [1, 1]} : vector<32x96xf32> to vector<32x32xf32>
    %488 = vector.extract_strided_slice %486 {offsets = [0, 32], sizes = [32, 32], strides = [1, 1]} : vector<32x96xf32> to vector<32x32xf32>
    %489 = vector.extract_strided_slice %486 {offsets = [0, 64], sizes = [32, 32], strides = [1, 1]} : vector<32x96xf32> to vector<32x32xf32>
    %490 = tpu.iota {dimensions = array<i32: 0>} : vector<16x16xi32>
    %491 = tpu.iota {dimensions = array<i32: 1>} : vector<16x16xi32>
    %492 = arith.cmpi sle, %491, %490 : vector<16x16xi32>
    %493 = vector.extract_strided_slice %487 {offsets = [0, 0], sizes = [16, 32], strides = [1, 1]} : vector<32x32xf32> to vector<16x32xf32>
    %494 = vector.extract_strided_slice %488 {offsets = [0, 0], sizes = [16, 32], strides = [1, 1]} : vector<32x32xf32> to vector<16x32xf32>
    %495 = vector.extract_strided_slice %489 {offsets = [0, 0], sizes = [16, 32], strides = [1, 1]} : vector<32x32xf32> to vector<16x32xf32>
    %496 = vector.extract_strided_slice %493 {offsets = [0, 0], sizes = [16, 8], strides = [1, 1]} : vector<16x32xf32> to vector<16x8xf32>
    %497 = vector.extract_strided_slice %494 {offsets = [0, 0], sizes = [16, 8], strides = [1, 1]} : vector<16x32xf32> to vector<16x8xf32>
    %cst_212 = arith.constant dense<0.000000e+00> : vector<16x16xf32>
    %498 = tpu.matmul %496, %497, %cst_212 {dimension_numbers = #tpu.dot_dimension_numbers<[1], [1], [0], [0], [0, 0, 1, 0], [], []>} : vector<16x8xf32>, vector<16x8xf32>, vector<16x16xf32> -> vector<16x16xf32>
    %cst_213 = arith.constant -1.000000e+30 : f32
    %499 = vector.broadcast %cst_213 : f32 to vector<16x16xf32>
    %500 = arith.select %492, %498, %499 : vector<16x16xi1>, vector<16x16xf32>
    %cst_214 = arith.constant dense<0xFF800000> : vector<16xf32>
    %501 = vector.multi_reduction <maximumf>, %500, %cst_214 [1] : vector<16x16xf32> to vector<16xf32>
    %502 = vector.shape_cast %501 : vector<16xf32> to vector<16x1xf32>
    %503 = vector.broadcast %502 : vector<16x1xf32> to vector<16x16xf32>
    %504 = arith.subf %500, %503 : vector<16x16xf32>
    %505 = math.exp %504 : vector<16x16xf32>
    %cst_215 = arith.constant dense<0.000000e+00> : vector<16xf32>
    %506 = vector.multi_reduction <add>, %505, %cst_215 [1] : vector<16x16xf32> to vector<16xf32>
    %507 = vector.shape_cast %506 : vector<16xf32> to vector<16x1xf32>
    %508 = tpu.reciprocal %507 {approx = true} : vector<16x1xf32> -> vector<16x1xf32>
    %509 = vector.broadcast %508 : vector<16x1xf32> to vector<16x16xf32>
    %510 = arith.mulf %505, %509 : vector<16x16xf32>
    %511 = vector.extract_strided_slice %495 {offsets = [0, 0], sizes = [16, 8], strides = [1, 1]} : vector<16x32xf32> to vector<16x8xf32>
    %cst_216 = arith.constant dense<0.000000e+00> : vector<16x8xf32>
    %512 = tpu.matmul %510, %511, %cst_216 {dimension_numbers = #tpu.dot_dimension_numbers<[1], [0], [0], [1], [0, 0, 1, 1], [], []>} : vector<16x16xf32>, vector<16x8xf32>, vector<16x8xf32> -> vector<16x8xf32>
    %513 = vector.extract_strided_slice %493 {offsets = [0, 8], sizes = [16, 8], strides = [1, 1]} : vector<16x32xf32> to vector<16x8xf32>
    %514 = vector.extract_strided_slice %494 {offsets = [0, 8], sizes = [16, 8], strides = [1, 1]} : vector<16x32xf32> to vector<16x8xf32>
    %cst_217 = arith.constant dense<0.000000e+00> : vector<16x16xf32>
    %515 = tpu.matmul %513, %514, %cst_217 {dimension_numbers = #tpu.dot_dimension_numbers<[1], [1], [0], [0], [0, 0, 1, 0], [], []>} : vector<16x8xf32>, vector<16x8xf32>, vector<16x16xf32> -> vector<16x16xf32>
    %cst_218 = arith.constant -1.000000e+30 : f32
    %516 = vector.broadcast %cst_218 : f32 to vector<16x16xf32>
    %517 = arith.select %492, %515, %516 : vector<16x16xi1>, vector<16x16xf32>
    %cst_219 = arith.constant dense<0xFF800000> : vector<16xf32>
    %518 = vector.multi_reduction <maximumf>, %517, %cst_219 [1] : vector<16x16xf32> to vector<16xf32>
    %519 = vector.shape_cast %518 : vector<16xf32> to vector<16x1xf32>
    %520 = vector.broadcast %519 : vector<16x1xf32> to vector<16x16xf32>
    %521 = arith.subf %517, %520 : vector<16x16xf32>
    %522 = math.exp %521 : vector<16x16xf32>
    %cst_220 = arith.constant dense<0.000000e+00> : vector<16xf32>
    %523 = vector.multi_reduction <add>, %522, %cst_220 [1] : vector<16x16xf32> to vector<16xf32>
    %524 = vector.shape_cast %523 : vector<16xf32> to vector<16x1xf32>
    %525 = tpu.reciprocal %524 {approx = true} : vector<16x1xf32> -> vector<16x1xf32>
    %526 = vector.broadcast %525 : vector<16x1xf32> to vector<16x16xf32>
    %527 = arith.mulf %522, %526 : vector<16x16xf32>
    %528 = vector.extract_strided_slice %495 {offsets = [0, 8], sizes = [16, 8], strides = [1, 1]} : vector<16x32xf32> to vector<16x8xf32>
    %cst_221 = arith.constant dense<0.000000e+00> : vector<16x8xf32>
    %529 = tpu.matmul %527, %528, %cst_221 {dimension_numbers = #tpu.dot_dimension_numbers<[1], [0], [0], [1], [0, 0, 1, 1], [], []>} : vector<16x16xf32>, vector<16x8xf32>, vector<16x8xf32> -> vector<16x8xf32>
    %530 = vector.extract_strided_slice %493 {offsets = [0, 16], sizes = [16, 8], strides = [1, 1]} : vector<16x32xf32> to vector<16x8xf32>
    %531 = vector.extract_strided_slice %494 {offsets = [0, 16], sizes = [16, 8], strides = [1, 1]} : vector<16x32xf32> to vector<16x8xf32>
    %cst_222 = arith.constant dense<0.000000e+00> : vector<16x16xf32>
    %532 = tpu.matmul %530, %531, %cst_222 {dimension_numbers = #tpu.dot_dimension_numbers<[1], [1], [0], [0], [0, 0, 1, 0], [], []>} : vector<16x8xf32>, vector<16x8xf32>, vector<16x16xf32> -> vector<16x16xf32>
    %cst_223 = arith.constant -1.000000e+30 : f32
    %533 = vector.broadcast %cst_223 : f32 to vector<16x16xf32>
    %534 = arith.select %492, %532, %533 : vector<16x16xi1>, vector<16x16xf32>
    %cst_224 = arith.constant dense<0xFF800000> : vector<16xf32>
    %535 = vector.multi_reduction <maximumf>, %534, %cst_224 [1] : vector<16x16xf32> to vector<16xf32>
    %536 = vector.shape_cast %535 : vector<16xf32> to vector<16x1xf32>
    %537 = vector.broadcast %536 : vector<16x1xf32> to vector<16x16xf32>
    %538 = arith.subf %534, %537 : vector<16x16xf32>
    %539 = math.exp %538 : vector<16x16xf32>
    %cst_225 = arith.constant dense<0.000000e+00> : vector<16xf32>
    %540 = vector.multi_reduction <add>, %539, %cst_225 [1] : vector<16x16xf32> to vector<16xf32>
    %541 = vector.shape_cast %540 : vector<16xf32> to vector<16x1xf32>
    %542 = tpu.reciprocal %541 {approx = true} : vector<16x1xf32> -> vector<16x1xf32>
    %543 = vector.broadcast %542 : vector<16x1xf32> to vector<16x16xf32>
    %544 = arith.mulf %539, %543 : vector<16x16xf32>
    %545 = vector.extract_strided_slice %495 {offsets = [0, 16], sizes = [16, 8], strides = [1, 1]} : vector<16x32xf32> to vector<16x8xf32>
    %cst_226 = arith.constant dense<0.000000e+00> : vector<16x8xf32>
    %546 = tpu.matmul %544, %545, %cst_226 {dimension_numbers = #tpu.dot_dimension_numbers<[1], [0], [0], [1], [0, 0, 1, 1], [], []>} : vector<16x16xf32>, vector<16x8xf32>, vector<16x8xf32> -> vector<16x8xf32>
    %547 = vector.extract_strided_slice %493 {offsets = [0, 24], sizes = [16, 8], strides = [1, 1]} : vector<16x32xf32> to vector<16x8xf32>
    %548 = vector.extract_strided_slice %494 {offsets = [0, 24], sizes = [16, 8], strides = [1, 1]} : vector<16x32xf32> to vector<16x8xf32>
    %cst_227 = arith.constant dense<0.000000e+00> : vector<16x16xf32>
    %549 = tpu.matmul %547, %548, %cst_227 {dimension_numbers = #tpu.dot_dimension_numbers<[1], [1], [0], [0], [0, 0, 1, 0], [], []>} : vector<16x8xf32>, vector<16x8xf32>, vector<16x16xf32> -> vector<16x16xf32>
    %cst_228 = arith.constant -1.000000e+30 : f32
    %550 = vector.broadcast %cst_228 : f32 to vector<16x16xf32>
    %551 = arith.select %492, %549, %550 : vector<16x16xi1>, vector<16x16xf32>
    %cst_229 = arith.constant dense<0xFF800000> : vector<16xf32>
    %552 = vector.multi_reduction <maximumf>, %551, %cst_229 [1] : vector<16x16xf32> to vector<16xf32>
    %553 = vector.shape_cast %552 : vector<16xf32> to vector<16x1xf32>
    %554 = vector.broadcast %553 : vector<16x1xf32> to vector<16x16xf32>
    %555 = arith.subf %551, %554 : vector<16x16xf32>
    %556 = math.exp %555 : vector<16x16xf32>
    %cst_230 = arith.constant dense<0.000000e+00> : vector<16xf32>
    %557 = vector.multi_reduction <add>, %556, %cst_230 [1] : vector<16x16xf32> to vector<16xf32>
    %558 = vector.shape_cast %557 : vector<16xf32> to vector<16x1xf32>
    %559 = tpu.reciprocal %558 {approx = true} : vector<16x1xf32> -> vector<16x1xf32>
    %560 = vector.broadcast %559 : vector<16x1xf32> to vector<16x16xf32>
    %561 = arith.mulf %556, %560 : vector<16x16xf32>
    %562 = vector.extract_strided_slice %495 {offsets = [0, 24], sizes = [16, 8], strides = [1, 1]} : vector<16x32xf32> to vector<16x8xf32>
    %cst_231 = arith.constant dense<0.000000e+00> : vector<16x8xf32>
    %563 = tpu.matmul %561, %562, %cst_231 {dimension_numbers = #tpu.dot_dimension_numbers<[1], [0], [0], [1], [0, 0, 1, 1], [], []>} : vector<16x16xf32>, vector<16x8xf32>, vector<16x8xf32> -> vector<16x8xf32>
    %564 = tpu.concatenate %512, %529, %546, %563 in 1 : vector<16x8xf32>, vector<16x8xf32>, vector<16x8xf32>, vector<16x8xf32> -> vector<16x32xf32>
    %565 = vector.extract_strided_slice %487 {offsets = [16, 0], sizes = [16, 32], strides = [1, 1]} : vector<32x32xf32> to vector<16x32xf32>
    %566 = vector.extract_strided_slice %488 {offsets = [16, 0], sizes = [16, 32], strides = [1, 1]} : vector<32x32xf32> to vector<16x32xf32>
    %567 = vector.extract_strided_slice %489 {offsets = [16, 0], sizes = [16, 32], strides = [1, 1]} : vector<32x32xf32> to vector<16x32xf32>
    %568 = vector.extract_strided_slice %565 {offsets = [0, 0], sizes = [16, 8], strides = [1, 1]} : vector<16x32xf32> to vector<16x8xf32>
    %569 = vector.extract_strided_slice %566 {offsets = [0, 0], sizes = [16, 8], strides = [1, 1]} : vector<16x32xf32> to vector<16x8xf32>
    %cst_232 = arith.constant dense<0.000000e+00> : vector<16x16xf32>
    %570 = tpu.matmul %568, %569, %cst_232 {dimension_numbers = #tpu.dot_dimension_numbers<[1], [1], [0], [0], [0, 0, 1, 0], [], []>} : vector<16x8xf32>, vector<16x8xf32>, vector<16x16xf32> -> vector<16x16xf32>
    %cst_233 = arith.constant -1.000000e+30 : f32
    %571 = vector.broadcast %cst_233 : f32 to vector<16x16xf32>
    %572 = arith.select %492, %570, %571 : vector<16x16xi1>, vector<16x16xf32>
    %cst_234 = arith.constant dense<0xFF800000> : vector<16xf32>
    %573 = vector.multi_reduction <maximumf>, %572, %cst_234 [1] : vector<16x16xf32> to vector<16xf32>
    %574 = vector.shape_cast %573 : vector<16xf32> to vector<16x1xf32>
    %575 = vector.broadcast %574 : vector<16x1xf32> to vector<16x16xf32>
    %576 = arith.subf %572, %575 : vector<16x16xf32>
    %577 = math.exp %576 : vector<16x16xf32>
    %cst_235 = arith.constant dense<0.000000e+00> : vector<16xf32>
    %578 = vector.multi_reduction <add>, %577, %cst_235 [1] : vector<16x16xf32> to vector<16xf32>
    %579 = vector.shape_cast %578 : vector<16xf32> to vector<16x1xf32>
    %580 = tpu.reciprocal %579 {approx = true} : vector<16x1xf32> -> vector<16x1xf32>
    %581 = vector.broadcast %580 : vector<16x1xf32> to vector<16x16xf32>
    %582 = arith.mulf %577, %581 : vector<16x16xf32>
    %583 = vector.extract_strided_slice %567 {offsets = [0, 0], sizes = [16, 8], strides = [1, 1]} : vector<16x32xf32> to vector<16x8xf32>
    %cst_236 = arith.constant dense<0.000000e+00> : vector<16x8xf32>
    %584 = tpu.matmul %582, %583, %cst_236 {dimension_numbers = #tpu.dot_dimension_numbers<[1], [0], [0], [1], [0, 0, 1, 1], [], []>} : vector<16x16xf32>, vector<16x8xf32>, vector<16x8xf32> -> vector<16x8xf32>
    %585 = vector.extract_strided_slice %565 {offsets = [0, 8], sizes = [16, 8], strides = [1, 1]} : vector<16x32xf32> to vector<16x8xf32>
    %586 = vector.extract_strided_slice %566 {offsets = [0, 8], sizes = [16, 8], strides = [1, 1]} : vector<16x32xf32> to vector<16x8xf32>
    %cst_237 = arith.constant dense<0.000000e+00> : vector<16x16xf32>
    %587 = tpu.matmul %585, %586, %cst_237 {dimension_numbers = #tpu.dot_dimension_numbers<[1], [1], [0], [0], [0, 0, 1, 0], [], []>} : vector<16x8xf32>, vector<16x8xf32>, vector<16x16xf32> -> vector<16x16xf32>
    %cst_238 = arith.constant -1.000000e+30 : f32
    %588 = vector.broadcast %cst_238 : f32 to vector<16x16xf32>
    %589 = arith.select %492, %587, %588 : vector<16x16xi1>, vector<16x16xf32>
    %cst_239 = arith.constant dense<0xFF800000> : vector<16xf32>
    %590 = vector.multi_reduction <maximumf>, %589, %cst_239 [1] : vector<16x16xf32> to vector<16xf32>
    %591 = vector.shape_cast %590 : vector<16xf32> to vector<16x1xf32>
    %592 = vector.broadcast %591 : vector<16x1xf32> to vector<16x16xf32>
    %593 = arith.subf %589, %592 : vector<16x16xf32>
    %594 = math.exp %593 : vector<16x16xf32>
    %cst_240 = arith.constant dense<0.000000e+00> : vector<16xf32>
    %595 = vector.multi_reduction <add>, %594, %cst_240 [1] : vector<16x16xf32> to vector<16xf32>
    %596 = vector.shape_cast %595 : vector<16xf32> to vector<16x1xf32>
    %597 = tpu.reciprocal %596 {approx = true} : vector<16x1xf32> -> vector<16x1xf32>
    %598 = vector.broadcast %597 : vector<16x1xf32> to vector<16x16xf32>
    %599 = arith.mulf %594, %598 : vector<16x16xf32>
    %600 = vector.extract_strided_slice %567 {offsets = [0, 8], sizes = [16, 8], strides = [1, 1]} : vector<16x32xf32> to vector<16x8xf32>
    %cst_241 = arith.constant dense<0.000000e+00> : vector<16x8xf32>
    %601 = tpu.matmul %599, %600, %cst_241 {dimension_numbers = #tpu.dot_dimension_numbers<[1], [0], [0], [1], [0, 0, 1, 1], [], []>} : vector<16x16xf32>, vector<16x8xf32>, vector<16x8xf32> -> vector<16x8xf32>
    %602 = vector.extract_strided_slice %565 {offsets = [0, 16], sizes = [16, 8], strides = [1, 1]} : vector<16x32xf32> to vector<16x8xf32>
    %603 = vector.extract_strided_slice %566 {offsets = [0, 16], sizes = [16, 8], strides = [1, 1]} : vector<16x32xf32> to vector<16x8xf32>
    %cst_242 = arith.constant dense<0.000000e+00> : vector<16x16xf32>
    %604 = tpu.matmul %602, %603, %cst_242 {dimension_numbers = #tpu.dot_dimension_numbers<[1], [1], [0], [0], [0, 0, 1, 0], [], []>} : vector<16x8xf32>, vector<16x8xf32>, vector<16x16xf32> -> vector<16x16xf32>
    %cst_243 = arith.constant -1.000000e+30 : f32
    %605 = vector.broadcast %cst_243 : f32 to vector<16x16xf32>
    %606 = arith.select %492, %604, %605 : vector<16x16xi1>, vector<16x16xf32>
    %cst_244 = arith.constant dense<0xFF800000> : vector<16xf32>
    %607 = vector.multi_reduction <maximumf>, %606, %cst_244 [1] : vector<16x16xf32> to vector<16xf32>
    %608 = vector.shape_cast %607 : vector<16xf32> to vector<16x1xf32>
    %609 = vector.broadcast %608 : vector<16x1xf32> to vector<16x16xf32>
    %610 = arith.subf %606, %609 : vector<16x16xf32>
    %611 = math.exp %610 : vector<16x16xf32>
    %cst_245 = arith.constant dense<0.000000e+00> : vector<16xf32>
    %612 = vector.multi_reduction <add>, %611, %cst_245 [1] : vector<16x16xf32> to vector<16xf32>
    %613 = vector.shape_cast %612 : vector<16xf32> to vector<16x1xf32>
    %614 = tpu.reciprocal %613 {approx = true} : vector<16x1xf32> -> vector<16x1xf32>
    %615 = vector.broadcast %614 : vector<16x1xf32> to vector<16x16xf32>
    %616 = arith.mulf %611, %615 : vector<16x16xf32>
    %617 = vector.extract_strided_slice %567 {offsets = [0, 16], sizes = [16, 8], strides = [1, 1]} : vector<16x32xf32> to vector<16x8xf32>
    %cst_246 = arith.constant dense<0.000000e+00> : vector<16x8xf32>
    %618 = tpu.matmul %616, %617, %cst_246 {dimension_numbers = #tpu.dot_dimension_numbers<[1], [0], [0], [1], [0, 0, 1, 1], [], []>} : vector<16x16xf32>, vector<16x8xf32>, vector<16x8xf32> -> vector<16x8xf32>
    %619 = vector.extract_strided_slice %565 {offsets = [0, 24], sizes = [16, 8], strides = [1, 1]} : vector<16x32xf32> to vector<16x8xf32>
    %620 = vector.extract_strided_slice %566 {offsets = [0, 24], sizes = [16, 8], strides = [1, 1]} : vector<16x32xf32> to vector<16x8xf32>
    %cst_247 = arith.constant dense<0.000000e+00> : vector<16x16xf32>
    %621 = tpu.matmul %619, %620, %cst_247 {dimension_numbers = #tpu.dot_dimension_numbers<[1], [1], [0], [0], [0, 0, 1, 0], [], []>} : vector<16x8xf32>, vector<16x8xf32>, vector<16x16xf32> -> vector<16x16xf32>
    %cst_248 = arith.constant -1.000000e+30 : f32
    %622 = vector.broadcast %cst_248 : f32 to vector<16x16xf32>
    %623 = arith.select %492, %621, %622 : vector<16x16xi1>, vector<16x16xf32>
    %cst_249 = arith.constant dense<0xFF800000> : vector<16xf32>
    %624 = vector.multi_reduction <maximumf>, %623, %cst_249 [1] : vector<16x16xf32> to vector<16xf32>
    %625 = vector.shape_cast %624 : vector<16xf32> to vector<16x1xf32>
    %626 = vector.broadcast %625 : vector<16x1xf32> to vector<16x16xf32>
    %627 = arith.subf %623, %626 : vector<16x16xf32>
    %628 = math.exp %627 : vector<16x16xf32>
    %cst_250 = arith.constant dense<0.000000e+00> : vector<16xf32>
    %629 = vector.multi_reduction <add>, %628, %cst_250 [1] : vector<16x16xf32> to vector<16xf32>
    %630 = vector.shape_cast %629 : vector<16xf32> to vector<16x1xf32>
    %631 = tpu.reciprocal %630 {approx = true} : vector<16x1xf32> -> vector<16x1xf32>
    %632 = vector.broadcast %631 : vector<16x1xf32> to vector<16x16xf32>
    %633 = arith.mulf %628, %632 : vector<16x16xf32>
    %634 = vector.extract_strided_slice %567 {offsets = [0, 24], sizes = [16, 8], strides = [1, 1]} : vector<16x32xf32> to vector<16x8xf32>
    %cst_251 = arith.constant dense<0.000000e+00> : vector<16x8xf32>
    %635 = tpu.matmul %633, %634, %cst_251 {dimension_numbers = #tpu.dot_dimension_numbers<[1], [0], [0], [1], [0, 0, 1, 1], [], []>} : vector<16x16xf32>, vector<16x8xf32>, vector<16x8xf32> -> vector<16x8xf32>
    %636 = tpu.concatenate %584, %601, %618, %635 in 1 : vector<16x8xf32>, vector<16x8xf32>, vector<16x8xf32>, vector<16x8xf32> -> vector<16x32xf32>
    %637 = tpu.concatenate %564, %636 in 0 : vector<16x32xf32>, vector<16x32xf32> -> vector<32x32xf32>
    %cst_252 = arith.constant dense<0.000000e+00> : vector<32x32xf32>
    %638 = tpu.matmul %637, %481, %cst_252 {dimension_numbers = #tpu.dot_dimension_numbers<[1], [0], [0], [1], [0, 0, 1, 1], [], []>} : vector<32x32xf32>, vector<32x32xf32>, vector<32x32xf32> -> vector<32x32xf32>
    %639 = vector.broadcast %483 : vector<1x32xf32> to vector<32x32xf32>
    %640 = arith.addf %638, %639 : vector<32x32xf32>
    %641 = arith.addf %43, %640 : vector<32x32xf32>
    %c0_253 = arith.constant 0 : index
    %c0_254 = arith.constant 0 : index
    %c0_255 = arith.constant 0 : index
    %642 = vector.load %arg31[%c0_253, %c0_254, %c0_255] : memref<2x1x32xf32, #tpu.memory_space<vmem>>, vector<1x1x32xf32>
    %643 = vector.shape_cast %642 : vector<1x1x32xf32> to vector<1x32xf32>
    %c0_256 = arith.constant 0 : index
    %c0_257 = arith.constant 0 : index
    %c0_258 = arith.constant 0 : index
    %644 = vector.load %arg32[%c0_256, %c0_257, %c0_258] : memref<2x1x32xf32, #tpu.memory_space<vmem>>, vector<1x1x32xf32>
    %645 = vector.shape_cast %644 : vector<1x1x32xf32> to vector<1x32xf32>
    %cst_259 = arith.constant dense<0.000000e+00> : vector<32xf32>
    %646 = vector.multi_reduction <add>, %641, %cst_259 [1] : vector<32x32xf32> to vector<32xf32>
    %647 = vector.shape_cast %646 : vector<32xf32> to vector<32x1xf32>
    %cst_260 = arith.constant 3.200000e+01 : f32
    %648 = vector.broadcast %cst_260 : f32 to vector<32x1xf32>
    %649 = arith.divf %647, %648 : vector<32x1xf32>
    %650 = vector.broadcast %649 : vector<32x1xf32> to vector<32x32xf32>
    %651 = arith.subf %641, %650 : vector<32x32xf32>
    %652 = arith.mulf %651, %651 : vector<32x32xf32>
    %cst_261 = arith.constant dense<0.000000e+00> : vector<32xf32>
    %653 = vector.multi_reduction <add>, %652, %cst_261 [1] : vector<32x32xf32> to vector<32xf32>
    %654 = vector.shape_cast %653 : vector<32xf32> to vector<32x1xf32>
    %cst_262 = arith.constant 3.200000e+01 : f32
    %655 = vector.broadcast %cst_262 : f32 to vector<32x1xf32>
    %656 = arith.divf %654, %655 : vector<32x1xf32>
    %657 = vector.broadcast %649 : vector<32x1xf32> to vector<32x32xf32>
    %658 = arith.subf %641, %657 : vector<32x32xf32>
    %cst_263 = arith.constant 9.99999974E-6 : f32
    %659 = vector.broadcast %cst_263 : f32 to vector<32x1xf32>
    %660 = arith.addf %656, %659 : vector<32x1xf32>
    %661 = math.rsqrt %660 : vector<32x1xf32>
    %662 = vector.broadcast %661 : vector<32x1xf32> to vector<32x32xf32>
    %663 = arith.mulf %658, %662 : vector<32x32xf32>
    %664 = vector.broadcast %643 : vector<1x32xf32> to vector<32x32xf32>
    %665 = arith.mulf %663, %664 : vector<32x32xf32>
    %666 = vector.broadcast %645 : vector<1x32xf32> to vector<32x32xf32>
    %667 = arith.addf %665, %666 : vector<32x32xf32>
    %c0_264 = arith.constant 0 : index
    %c0_265 = arith.constant 0 : index
    %c0_266 = arith.constant 0 : index
    %668 = vector.load %arg33[%c0_264, %c0_265, %c0_266] : memref<2x32x96xf32, #tpu.memory_space<vmem>>, vector<1x32x96xf32>
    %669 = vector.shape_cast %668 : vector<1x32x96xf32> to vector<32x96xf32>
    %c0_267 = arith.constant 0 : index
    %c0_268 = arith.constant 0 : index
    %c0_269 = arith.constant 0 : index
    %670 = vector.load %arg34[%c0_267, %c0_268, %c0_269] : memref<2x1x96xf32, #tpu.memory_space<vmem>>, vector<1x1x96xf32>
    %671 = vector.shape_cast %670 : vector<1x1x96xf32> to vector<1x96xf32>
    %c0_270 = arith.constant 0 : index
    %c0_271 = arith.constant 0 : index
    %c0_272 = arith.constant 0 : index
    %672 = vector.load %arg35[%c0_270, %c0_271, %c0_272] : memref<2x32x32xf32, #tpu.memory_space<vmem>>, vector<1x32x32xf32>
    %673 = vector.shape_cast %672 : vector<1x32x32xf32> to vector<32x32xf32>
    %c0_273 = arith.constant 0 : index
    %c0_274 = arith.constant 0 : index
    %c0_275 = arith.constant 0 : index
    %674 = vector.load %arg36[%c0_273, %c0_274, %c0_275] : memref<2x1x32xf32, #tpu.memory_space<vmem>>, vector<1x1x32xf32>
    %675 = vector.shape_cast %674 : vector<1x1x32xf32> to vector<1x32xf32>
    %676 = vector.extract_strided_slice %669 {offsets = [0, 0], sizes = [32, 32], strides = [1, 1]} : vector<32x96xf32> to vector<32x32xf32>
    %cst_276 = arith.constant dense<0.000000e+00> : vector<32x32xf32>
    %677 = tpu.matmul %667, %676, %cst_276 {dimension_numbers = #tpu.dot_dimension_numbers<[1], [0], [0], [1], [0, 0, 1, 1], [], []>} : vector<32x32xf32>, vector<32x32xf32>, vector<32x32xf32> -> vector<32x32xf32>
    %678 = vector.extract_strided_slice %671 {offsets = [0, 0], sizes = [1, 32], strides = [1, 1]} : vector<1x96xf32> to vector<1x32xf32>
    %679 = vector.broadcast %678 : vector<1x32xf32> to vector<32x32xf32>
    %680 = arith.addf %677, %679 : vector<32x32xf32>
    %681 = vector.extract_strided_slice %669 {offsets = [0, 32], sizes = [32, 64], strides = [1, 1]} : vector<32x96xf32> to vector<32x64xf32>
    %cst_277 = arith.constant dense<0.000000e+00> : vector<16x64xf32>
    %682 = tpu.matmul %475, %681, %cst_277 {dimension_numbers = #tpu.dot_dimension_numbers<[1], [0], [0], [1], [0, 0, 1, 1], [], []>} : vector<16x32xf32>, vector<32x64xf32>, vector<16x64xf32> -> vector<16x64xf32>
    %683 = vector.extract_strided_slice %671 {offsets = [0, 32], sizes = [1, 64], strides = [1, 1]} : vector<1x96xf32> to vector<1x64xf32>
    %684 = vector.broadcast %683 : vector<1x64xf32> to vector<16x64xf32>
    %685 = arith.addf %682, %684 : vector<16x64xf32>
    %686 = vector.extract_strided_slice %685 {offsets = [0, 0], sizes = [16, 32], strides = [1, 1]} : vector<16x64xf32> to vector<16x32xf32>
    %687 = vector.extract_strided_slice %685 {offsets = [0, 32], sizes = [16, 32], strides = [1, 1]} : vector<16x64xf32> to vector<16x32xf32>
    %688 = vector.extract_strided_slice %680 {offsets = [0, 0], sizes = [16, 32], strides = [1, 1]} : vector<32x32xf32> to vector<16x32xf32>
    %689 = vector.extract_strided_slice %686 {offsets = [0, 0], sizes = [8, 32], strides = [1, 1]} : vector<16x32xf32> to vector<8x32xf32>
    %690 = vector.extract_strided_slice %687 {offsets = [0, 0], sizes = [8, 32], strides = [1, 1]} : vector<16x32xf32> to vector<8x32xf32>
    %691 = vector.extract_strided_slice %688 {offsets = [0, 0], sizes = [16, 8], strides = [1, 1]} : vector<16x32xf32> to vector<16x8xf32>
    %692 = vector.extract_strided_slice %689 {offsets = [0, 0], sizes = [8, 8], strides = [1, 1]} : vector<8x32xf32> to vector<8x8xf32>
    %cst_278 = arith.constant dense<0.000000e+00> : vector<16x8xf32>
    %693 = tpu.matmul %691, %692, %cst_278 {dimension_numbers = #tpu.dot_dimension_numbers<[1], [1], [0], [0], [0, 0, 1, 0], [], []>} : vector<16x8xf32>, vector<8x8xf32>, vector<16x8xf32> -> vector<16x8xf32>
    %cst_279 = arith.constant dense<0xFF800000> : vector<16xf32>
    %694 = vector.multi_reduction <maximumf>, %693, %cst_279 [1] : vector<16x8xf32> to vector<16xf32>
    %695 = vector.shape_cast %694 : vector<16xf32> to vector<16x1xf32>
    %696 = vector.broadcast %695 : vector<16x1xf32> to vector<16x8xf32>
    %697 = arith.subf %693, %696 : vector<16x8xf32>
    %698 = math.exp %697 : vector<16x8xf32>
    %cst_280 = arith.constant dense<0.000000e+00> : vector<16xf32>
    %699 = vector.multi_reduction <add>, %698, %cst_280 [1] : vector<16x8xf32> to vector<16xf32>
    %700 = vector.shape_cast %699 : vector<16xf32> to vector<16x1xf32>
    %701 = tpu.reciprocal %700 {approx = true} : vector<16x1xf32> -> vector<16x1xf32>
    %702 = vector.broadcast %701 : vector<16x1xf32> to vector<16x8xf32>
    %703 = arith.mulf %698, %702 : vector<16x8xf32>
    %704 = vector.extract_strided_slice %690 {offsets = [0, 0], sizes = [8, 8], strides = [1, 1]} : vector<8x32xf32> to vector<8x8xf32>
    %cst_281 = arith.constant dense<0.000000e+00> : vector<16x8xf32>
    %705 = tpu.matmul %703, %704, %cst_281 {dimension_numbers = #tpu.dot_dimension_numbers<[1], [0], [0], [1], [0, 0, 1, 1], [], []>} : vector<16x8xf32>, vector<8x8xf32>, vector<16x8xf32> -> vector<16x8xf32>
    %706 = vector.extract_strided_slice %688 {offsets = [0, 8], sizes = [16, 8], strides = [1, 1]} : vector<16x32xf32> to vector<16x8xf32>
    %707 = vector.extract_strided_slice %689 {offsets = [0, 8], sizes = [8, 8], strides = [1, 1]} : vector<8x32xf32> to vector<8x8xf32>
    %cst_282 = arith.constant dense<0.000000e+00> : vector<16x8xf32>
    %708 = tpu.matmul %706, %707, %cst_282 {dimension_numbers = #tpu.dot_dimension_numbers<[1], [1], [0], [0], [0, 0, 1, 0], [], []>} : vector<16x8xf32>, vector<8x8xf32>, vector<16x8xf32> -> vector<16x8xf32>
    %cst_283 = arith.constant dense<0xFF800000> : vector<16xf32>
    %709 = vector.multi_reduction <maximumf>, %708, %cst_283 [1] : vector<16x8xf32> to vector<16xf32>
    %710 = vector.shape_cast %709 : vector<16xf32> to vector<16x1xf32>
    %711 = vector.broadcast %710 : vector<16x1xf32> to vector<16x8xf32>
    %712 = arith.subf %708, %711 : vector<16x8xf32>
    %713 = math.exp %712 : vector<16x8xf32>
    %cst_284 = arith.constant dense<0.000000e+00> : vector<16xf32>
    %714 = vector.multi_reduction <add>, %713, %cst_284 [1] : vector<16x8xf32> to vector<16xf32>
    %715 = vector.shape_cast %714 : vector<16xf32> to vector<16x1xf32>
    %716 = tpu.reciprocal %715 {approx = true} : vector<16x1xf32> -> vector<16x1xf32>
    %717 = vector.broadcast %716 : vector<16x1xf32> to vector<16x8xf32>
    %718 = arith.mulf %713, %717 : vector<16x8xf32>
    %719 = vector.extract_strided_slice %690 {offsets = [0, 8], sizes = [8, 8], strides = [1, 1]} : vector<8x32xf32> to vector<8x8xf32>
    %cst_285 = arith.constant dense<0.000000e+00> : vector<16x8xf32>
    %720 = tpu.matmul %718, %719, %cst_285 {dimension_numbers = #tpu.dot_dimension_numbers<[1], [0], [0], [1], [0, 0, 1, 1], [], []>} : vector<16x8xf32>, vector<8x8xf32>, vector<16x8xf32> -> vector<16x8xf32>
    %721 = vector.extract_strided_slice %688 {offsets = [0, 16], sizes = [16, 8], strides = [1, 1]} : vector<16x32xf32> to vector<16x8xf32>
    %722 = vector.extract_strided_slice %689 {offsets = [0, 16], sizes = [8, 8], strides = [1, 1]} : vector<8x32xf32> to vector<8x8xf32>
    %cst_286 = arith.constant dense<0.000000e+00> : vector<16x8xf32>
    %723 = tpu.matmul %721, %722, %cst_286 {dimension_numbers = #tpu.dot_dimension_numbers<[1], [1], [0], [0], [0, 0, 1, 0], [], []>} : vector<16x8xf32>, vector<8x8xf32>, vector<16x8xf32> -> vector<16x8xf32>
    %cst_287 = arith.constant dense<0xFF800000> : vector<16xf32>
    %724 = vector.multi_reduction <maximumf>, %723, %cst_287 [1] : vector<16x8xf32> to vector<16xf32>
    %725 = vector.shape_cast %724 : vector<16xf32> to vector<16x1xf32>
    %726 = vector.broadcast %725 : vector<16x1xf32> to vector<16x8xf32>
    %727 = arith.subf %723, %726 : vector<16x8xf32>
    %728 = math.exp %727 : vector<16x8xf32>
    %cst_288 = arith.constant dense<0.000000e+00> : vector<16xf32>
    %729 = vector.multi_reduction <add>, %728, %cst_288 [1] : vector<16x8xf32> to vector<16xf32>
    %730 = vector.shape_cast %729 : vector<16xf32> to vector<16x1xf32>
    %731 = tpu.reciprocal %730 {approx = true} : vector<16x1xf32> -> vector<16x1xf32>
    %732 = vector.broadcast %731 : vector<16x1xf32> to vector<16x8xf32>
    %733 = arith.mulf %728, %732 : vector<16x8xf32>
    %734 = vector.extract_strided_slice %690 {offsets = [0, 16], sizes = [8, 8], strides = [1, 1]} : vector<8x32xf32> to vector<8x8xf32>
    %cst_289 = arith.constant dense<0.000000e+00> : vector<16x8xf32>
    %735 = tpu.matmul %733, %734, %cst_289 {dimension_numbers = #tpu.dot_dimension_numbers<[1], [0], [0], [1], [0, 0, 1, 1], [], []>} : vector<16x8xf32>, vector<8x8xf32>, vector<16x8xf32> -> vector<16x8xf32>
    %736 = vector.extract_strided_slice %688 {offsets = [0, 24], sizes = [16, 8], strides = [1, 1]} : vector<16x32xf32> to vector<16x8xf32>
    %737 = vector.extract_strided_slice %689 {offsets = [0, 24], sizes = [8, 8], strides = [1, 1]} : vector<8x32xf32> to vector<8x8xf32>
    %cst_290 = arith.constant dense<0.000000e+00> : vector<16x8xf32>
    %738 = tpu.matmul %736, %737, %cst_290 {dimension_numbers = #tpu.dot_dimension_numbers<[1], [1], [0], [0], [0, 0, 1, 0], [], []>} : vector<16x8xf32>, vector<8x8xf32>, vector<16x8xf32> -> vector<16x8xf32>
    %cst_291 = arith.constant dense<0xFF800000> : vector<16xf32>
    %739 = vector.multi_reduction <maximumf>, %738, %cst_291 [1] : vector<16x8xf32> to vector<16xf32>
    %740 = vector.shape_cast %739 : vector<16xf32> to vector<16x1xf32>
    %741 = vector.broadcast %740 : vector<16x1xf32> to vector<16x8xf32>
    %742 = arith.subf %738, %741 : vector<16x8xf32>
    %743 = math.exp %742 : vector<16x8xf32>
    %cst_292 = arith.constant dense<0.000000e+00> : vector<16xf32>
    %744 = vector.multi_reduction <add>, %743, %cst_292 [1] : vector<16x8xf32> to vector<16xf32>
    %745 = vector.shape_cast %744 : vector<16xf32> to vector<16x1xf32>
    %746 = tpu.reciprocal %745 {approx = true} : vector<16x1xf32> -> vector<16x1xf32>
    %747 = vector.broadcast %746 : vector<16x1xf32> to vector<16x8xf32>
    %748 = arith.mulf %743, %747 : vector<16x8xf32>
    %749 = vector.extract_strided_slice %690 {offsets = [0, 24], sizes = [8, 8], strides = [1, 1]} : vector<8x32xf32> to vector<8x8xf32>
    %cst_293 = arith.constant dense<0.000000e+00> : vector<16x8xf32>
    %750 = tpu.matmul %748, %749, %cst_293 {dimension_numbers = #tpu.dot_dimension_numbers<[1], [0], [0], [1], [0, 0, 1, 1], [], []>} : vector<16x8xf32>, vector<8x8xf32>, vector<16x8xf32> -> vector<16x8xf32>
    %751 = tpu.concatenate %705, %720, %735, %750 in 1 : vector<16x8xf32>, vector<16x8xf32>, vector<16x8xf32>, vector<16x8xf32> -> vector<16x32xf32>
    %752 = vector.extract_strided_slice %680 {offsets = [16, 0], sizes = [16, 32], strides = [1, 1]} : vector<32x32xf32> to vector<16x32xf32>
    %753 = vector.extract_strided_slice %686 {offsets = [8, 0], sizes = [8, 32], strides = [1, 1]} : vector<16x32xf32> to vector<8x32xf32>
    %754 = vector.extract_strided_slice %687 {offsets = [8, 0], sizes = [8, 32], strides = [1, 1]} : vector<16x32xf32> to vector<8x32xf32>
    %755 = vector.extract_strided_slice %752 {offsets = [0, 0], sizes = [16, 8], strides = [1, 1]} : vector<16x32xf32> to vector<16x8xf32>
    %756 = vector.extract_strided_slice %753 {offsets = [0, 0], sizes = [8, 8], strides = [1, 1]} : vector<8x32xf32> to vector<8x8xf32>
    %cst_294 = arith.constant dense<0.000000e+00> : vector<16x8xf32>
    %757 = tpu.matmul %755, %756, %cst_294 {dimension_numbers = #tpu.dot_dimension_numbers<[1], [1], [0], [0], [0, 0, 1, 0], [], []>} : vector<16x8xf32>, vector<8x8xf32>, vector<16x8xf32> -> vector<16x8xf32>
    %cst_295 = arith.constant dense<0xFF800000> : vector<16xf32>
    %758 = vector.multi_reduction <maximumf>, %757, %cst_295 [1] : vector<16x8xf32> to vector<16xf32>
    %759 = vector.shape_cast %758 : vector<16xf32> to vector<16x1xf32>
    %760 = vector.broadcast %759 : vector<16x1xf32> to vector<16x8xf32>
    %761 = arith.subf %757, %760 : vector<16x8xf32>
    %762 = math.exp %761 : vector<16x8xf32>
    %cst_296 = arith.constant dense<0.000000e+00> : vector<16xf32>
    %763 = vector.multi_reduction <add>, %762, %cst_296 [1] : vector<16x8xf32> to vector<16xf32>
    %764 = vector.shape_cast %763 : vector<16xf32> to vector<16x1xf32>
    %765 = tpu.reciprocal %764 {approx = true} : vector<16x1xf32> -> vector<16x1xf32>
    %766 = vector.broadcast %765 : vector<16x1xf32> to vector<16x8xf32>
    %767 = arith.mulf %762, %766 : vector<16x8xf32>
    %768 = vector.extract_strided_slice %754 {offsets = [0, 0], sizes = [8, 8], strides = [1, 1]} : vector<8x32xf32> to vector<8x8xf32>
    %cst_297 = arith.constant dense<0.000000e+00> : vector<16x8xf32>
    %769 = tpu.matmul %767, %768, %cst_297 {dimension_numbers = #tpu.dot_dimension_numbers<[1], [0], [0], [1], [0, 0, 1, 1], [], []>} : vector<16x8xf32>, vector<8x8xf32>, vector<16x8xf32> -> vector<16x8xf32>
    %770 = vector.extract_strided_slice %752 {offsets = [0, 8], sizes = [16, 8], strides = [1, 1]} : vector<16x32xf32> to vector<16x8xf32>
    %771 = vector.extract_strided_slice %753 {offsets = [0, 8], sizes = [8, 8], strides = [1, 1]} : vector<8x32xf32> to vector<8x8xf32>
    %cst_298 = arith.constant dense<0.000000e+00> : vector<16x8xf32>
    %772 = tpu.matmul %770, %771, %cst_298 {dimension_numbers = #tpu.dot_dimension_numbers<[1], [1], [0], [0], [0, 0, 1, 0], [], []>} : vector<16x8xf32>, vector<8x8xf32>, vector<16x8xf32> -> vector<16x8xf32>
    %cst_299 = arith.constant dense<0xFF800000> : vector<16xf32>
    %773 = vector.multi_reduction <maximumf>, %772, %cst_299 [1] : vector<16x8xf32> to vector<16xf32>
    %774 = vector.shape_cast %773 : vector<16xf32> to vector<16x1xf32>
    %775 = vector.broadcast %774 : vector<16x1xf32> to vector<16x8xf32>
    %776 = arith.subf %772, %775 : vector<16x8xf32>
    %777 = math.exp %776 : vector<16x8xf32>
    %cst_300 = arith.constant dense<0.000000e+00> : vector<16xf32>
    %778 = vector.multi_reduction <add>, %777, %cst_300 [1] : vector<16x8xf32> to vector<16xf32>
    %779 = vector.shape_cast %778 : vector<16xf32> to vector<16x1xf32>
    %780 = tpu.reciprocal %779 {approx = true} : vector<16x1xf32> -> vector<16x1xf32>
    %781 = vector.broadcast %780 : vector<16x1xf32> to vector<16x8xf32>
    %782 = arith.mulf %777, %781 : vector<16x8xf32>
    %783 = vector.extract_strided_slice %754 {offsets = [0, 8], sizes = [8, 8], strides = [1, 1]} : vector<8x32xf32> to vector<8x8xf32>
    %cst_301 = arith.constant dense<0.000000e+00> : vector<16x8xf32>
    %784 = tpu.matmul %782, %783, %cst_301 {dimension_numbers = #tpu.dot_dimension_numbers<[1], [0], [0], [1], [0, 0, 1, 1], [], []>} : vector<16x8xf32>, vector<8x8xf32>, vector<16x8xf32> -> vector<16x8xf32>
    %785 = vector.extract_strided_slice %752 {offsets = [0, 16], sizes = [16, 8], strides = [1, 1]} : vector<16x32xf32> to vector<16x8xf32>
    %786 = vector.extract_strided_slice %753 {offsets = [0, 16], sizes = [8, 8], strides = [1, 1]} : vector<8x32xf32> to vector<8x8xf32>
    %cst_302 = arith.constant dense<0.000000e+00> : vector<16x8xf32>
    %787 = tpu.matmul %785, %786, %cst_302 {dimension_numbers = #tpu.dot_dimension_numbers<[1], [1], [0], [0], [0, 0, 1, 0], [], []>} : vector<16x8xf32>, vector<8x8xf32>, vector<16x8xf32> -> vector<16x8xf32>
    %cst_303 = arith.constant dense<0xFF800000> : vector<16xf32>
    %788 = vector.multi_reduction <maximumf>, %787, %cst_303 [1] : vector<16x8xf32> to vector<16xf32>
    %789 = vector.shape_cast %788 : vector<16xf32> to vector<16x1xf32>
    %790 = vector.broadcast %789 : vector<16x1xf32> to vector<16x8xf32>
    %791 = arith.subf %787, %790 : vector<16x8xf32>
    %792 = math.exp %791 : vector<16x8xf32>
    %cst_304 = arith.constant dense<0.000000e+00> : vector<16xf32>
    %793 = vector.multi_reduction <add>, %792, %cst_304 [1] : vector<16x8xf32> to vector<16xf32>
    %794 = vector.shape_cast %793 : vector<16xf32> to vector<16x1xf32>
    %795 = tpu.reciprocal %794 {approx = true} : vector<16x1xf32> -> vector<16x1xf32>
    %796 = vector.broadcast %795 : vector<16x1xf32> to vector<16x8xf32>
    %797 = arith.mulf %792, %796 : vector<16x8xf32>
    %798 = vector.extract_strided_slice %754 {offsets = [0, 16], sizes = [8, 8], strides = [1, 1]} : vector<8x32xf32> to vector<8x8xf32>
    %cst_305 = arith.constant dense<0.000000e+00> : vector<16x8xf32>
    %799 = tpu.matmul %797, %798, %cst_305 {dimension_numbers = #tpu.dot_dimension_numbers<[1], [0], [0], [1], [0, 0, 1, 1], [], []>} : vector<16x8xf32>, vector<8x8xf32>, vector<16x8xf32> -> vector<16x8xf32>
    %800 = vector.extract_strided_slice %752 {offsets = [0, 24], sizes = [16, 8], strides = [1, 1]} : vector<16x32xf32> to vector<16x8xf32>
    %801 = vector.extract_strided_slice %753 {offsets = [0, 24], sizes = [8, 8], strides = [1, 1]} : vector<8x32xf32> to vector<8x8xf32>
    %cst_306 = arith.constant dense<0.000000e+00> : vector<16x8xf32>
    %802 = tpu.matmul %800, %801, %cst_306 {dimension_numbers = #tpu.dot_dimension_numbers<[1], [1], [0], [0], [0, 0, 1, 0], [], []>} : vector<16x8xf32>, vector<8x8xf32>, vector<16x8xf32> -> vector<16x8xf32>
    %cst_307 = arith.constant dense<0xFF800000> : vector<16xf32>
    %803 = vector.multi_reduction <maximumf>, %802, %cst_307 [1] : vector<16x8xf32> to vector<16xf32>
    %804 = vector.shape_cast %803 : vector<16xf32> to vector<16x1xf32>
    %805 = vector.broadcast %804 : vector<16x1xf32> to vector<16x8xf32>
    %806 = arith.subf %802, %805 : vector<16x8xf32>
    %807 = math.exp %806 : vector<16x8xf32>
    %cst_308 = arith.constant dense<0.000000e+00> : vector<16xf32>
    %808 = vector.multi_reduction <add>, %807, %cst_308 [1] : vector<16x8xf32> to vector<16xf32>
    %809 = vector.shape_cast %808 : vector<16xf32> to vector<16x1xf32>
    %810 = tpu.reciprocal %809 {approx = true} : vector<16x1xf32> -> vector<16x1xf32>
    %811 = vector.broadcast %810 : vector<16x1xf32> to vector<16x8xf32>
    %812 = arith.mulf %807, %811 : vector<16x8xf32>
    %813 = vector.extract_strided_slice %754 {offsets = [0, 24], sizes = [8, 8], strides = [1, 1]} : vector<8x32xf32> to vector<8x8xf32>
    %cst_309 = arith.constant dense<0.000000e+00> : vector<16x8xf32>
    %814 = tpu.matmul %812, %813, %cst_309 {dimension_numbers = #tpu.dot_dimension_numbers<[1], [0], [0], [1], [0, 0, 1, 1], [], []>} : vector<16x8xf32>, vector<8x8xf32>, vector<16x8xf32> -> vector<16x8xf32>
    %815 = tpu.concatenate %769, %784, %799, %814 in 1 : vector<16x8xf32>, vector<16x8xf32>, vector<16x8xf32>, vector<16x8xf32> -> vector<16x32xf32>
    %816 = tpu.concatenate %751, %815 in 0 : vector<16x32xf32>, vector<16x32xf32> -> vector<32x32xf32>
    %cst_310 = arith.constant dense<0.000000e+00> : vector<32x32xf32>
    %817 = tpu.matmul %816, %673, %cst_310 {dimension_numbers = #tpu.dot_dimension_numbers<[1], [0], [0], [1], [0, 0, 1, 1], [], []>} : vector<32x32xf32>, vector<32x32xf32>, vector<32x32xf32> -> vector<32x32xf32>
    %818 = vector.broadcast %675 : vector<1x32xf32> to vector<32x32xf32>
    %819 = arith.addf %817, %818 : vector<32x32xf32>
    %820 = arith.addf %667, %819 : vector<32x32xf32>
    %c0_311 = arith.constant 0 : index
    %c0_312 = arith.constant 0 : index
    %c0_313 = arith.constant 0 : index
    %821 = vector.load %arg37[%c0_311, %c0_312, %c0_313] : memref<2x1x32xf32, #tpu.memory_space<vmem>>, vector<1x1x32xf32>
    %822 = vector.shape_cast %821 : vector<1x1x32xf32> to vector<1x32xf32>
    %c0_314 = arith.constant 0 : index
    %c0_315 = arith.constant 0 : index
    %c0_316 = arith.constant 0 : index
    %823 = vector.load %arg38[%c0_314, %c0_315, %c0_316] : memref<2x1x32xf32, #tpu.memory_space<vmem>>, vector<1x1x32xf32>
    %824 = vector.shape_cast %823 : vector<1x1x32xf32> to vector<1x32xf32>
    %cst_317 = arith.constant dense<0.000000e+00> : vector<32xf32>
    %825 = vector.multi_reduction <add>, %820, %cst_317 [1] : vector<32x32xf32> to vector<32xf32>
    %826 = vector.shape_cast %825 : vector<32xf32> to vector<32x1xf32>
    %cst_318 = arith.constant 3.200000e+01 : f32
    %827 = vector.broadcast %cst_318 : f32 to vector<32x1xf32>
    %828 = arith.divf %826, %827 : vector<32x1xf32>
    %829 = vector.broadcast %828 : vector<32x1xf32> to vector<32x32xf32>
    %830 = arith.subf %820, %829 : vector<32x32xf32>
    %831 = arith.mulf %830, %830 : vector<32x32xf32>
    %cst_319 = arith.constant dense<0.000000e+00> : vector<32xf32>
    %832 = vector.multi_reduction <add>, %831, %cst_319 [1] : vector<32x32xf32> to vector<32xf32>
    %833 = vector.shape_cast %832 : vector<32xf32> to vector<32x1xf32>
    %cst_320 = arith.constant 3.200000e+01 : f32
    %834 = vector.broadcast %cst_320 : f32 to vector<32x1xf32>
    %835 = arith.divf %833, %834 : vector<32x1xf32>
    %836 = vector.broadcast %828 : vector<32x1xf32> to vector<32x32xf32>
    %837 = arith.subf %820, %836 : vector<32x32xf32>
    %cst_321 = arith.constant 9.99999974E-6 : f32
    %838 = vector.broadcast %cst_321 : f32 to vector<32x1xf32>
    %839 = arith.addf %835, %838 : vector<32x1xf32>
    %840 = math.rsqrt %839 : vector<32x1xf32>
    %841 = vector.broadcast %840 : vector<32x1xf32> to vector<32x32xf32>
    %842 = arith.mulf %837, %841 : vector<32x32xf32>
    %843 = vector.broadcast %822 : vector<1x32xf32> to vector<32x32xf32>
    %844 = arith.mulf %842, %843 : vector<32x32xf32>
    %845 = vector.broadcast %824 : vector<1x32xf32> to vector<32x32xf32>
    %846 = arith.addf %844, %845 : vector<32x32xf32>
    %c0_322 = arith.constant 0 : index
    %c0_323 = arith.constant 0 : index
    %c0_324 = arith.constant 0 : index
    %847 = vector.load %arg39[%c0_322, %c0_323, %c0_324] : memref<2x32x32xf32, #tpu.memory_space<vmem>>, vector<1x32x32xf32>
    %848 = vector.shape_cast %847 : vector<1x32x32xf32> to vector<32x32xf32>
    %cst_325 = arith.constant dense<0.000000e+00> : vector<32x32xf32>
    %849 = tpu.matmul %846, %848, %cst_325 {dimension_numbers = #tpu.dot_dimension_numbers<[1], [0], [0], [1], [0, 0, 1, 1], [], []>} : vector<32x32xf32>, vector<32x32xf32>, vector<32x32xf32> -> vector<32x32xf32>
    %c0_326 = arith.constant 0 : index
    %c0_327 = arith.constant 0 : index
    %c0_328 = arith.constant 0 : index
    %850 = vector.load %arg40[%c0_326, %c0_327, %c0_328] : memref<2x1x32xf32, #tpu.memory_space<vmem>>, vector<1x1x32xf32>
    %851 = vector.shape_cast %850 : vector<1x1x32xf32> to vector<1x32xf32>
    %852 = vector.broadcast %851 : vector<1x32xf32> to vector<32x32xf32>
    %853 = arith.addf %849, %852 : vector<32x32xf32>
    %cst_329 = arith.constant 0.000000e+00 : f32
    %854 = vector.broadcast %cst_329 : f32 to vector<32x32xf32>
    %855 = arith.maximumf %853, %854 : vector<32x32xf32>
    %c0_330 = arith.constant 0 : index
    %c0_331 = arith.constant 0 : index
    %c0_332 = arith.constant 0 : index
    %856 = vector.load %arg41[%c0_330, %c0_331, %c0_332] : memref<2x32x32xf32, #tpu.memory_space<vmem>>, vector<1x32x32xf32>
    %857 = vector.shape_cast %856 : vector<1x32x32xf32> to vector<32x32xf32>
    %cst_333 = arith.constant dense<0.000000e+00> : vector<32x32xf32>
    %858 = tpu.matmul %855, %857, %cst_333 {dimension_numbers = #tpu.dot_dimension_numbers<[1], [0], [0], [1], [0, 0, 1, 1], [], []>} : vector<32x32xf32>, vector<32x32xf32>, vector<32x32xf32> -> vector<32x32xf32>
    %c0_334 = arith.constant 0 : index
    %c0_335 = arith.constant 0 : index
    %c0_336 = arith.constant 0 : index
    %859 = vector.load %arg42[%c0_334, %c0_335, %c0_336] : memref<2x1x32xf32, #tpu.memory_space<vmem>>, vector<1x1x32xf32>
    %860 = vector.shape_cast %859 : vector<1x1x32xf32> to vector<1x32xf32>
    %861 = vector.broadcast %860 : vector<1x32xf32> to vector<32x32xf32>
    %862 = arith.addf %858, %861 : vector<32x32xf32>
    %863 = arith.addf %846, %862 : vector<32x32xf32>
    %c0_337 = arith.constant 0 : index
    %c0_338 = arith.constant 0 : index
    %c0_339 = arith.constant 0 : index
    %864 = vector.load %arg43[%c0_337, %c0_338, %c0_339] : memref<2x1x32xf32, #tpu.memory_space<vmem>>, vector<1x1x32xf32>
    %865 = vector.shape_cast %864 : vector<1x1x32xf32> to vector<1x32xf32>
    %c0_340 = arith.constant 0 : index
    %c0_341 = arith.constant 0 : index
    %c0_342 = arith.constant 0 : index
    %866 = vector.load %arg44[%c0_340, %c0_341, %c0_342] : memref<2x1x32xf32, #tpu.memory_space<vmem>>, vector<1x1x32xf32>
    %867 = vector.shape_cast %866 : vector<1x1x32xf32> to vector<1x32xf32>
    %cst_343 = arith.constant dense<0.000000e+00> : vector<32xf32>
    %868 = vector.multi_reduction <add>, %863, %cst_343 [1] : vector<32x32xf32> to vector<32xf32>
    %869 = vector.shape_cast %868 : vector<32xf32> to vector<32x1xf32>
    %cst_344 = arith.constant 3.200000e+01 : f32
    %870 = vector.broadcast %cst_344 : f32 to vector<32x1xf32>
    %871 = arith.divf %869, %870 : vector<32x1xf32>
    %872 = vector.broadcast %871 : vector<32x1xf32> to vector<32x32xf32>
    %873 = arith.subf %863, %872 : vector<32x32xf32>
    %874 = arith.mulf %873, %873 : vector<32x32xf32>
    %cst_345 = arith.constant dense<0.000000e+00> : vector<32xf32>
    %875 = vector.multi_reduction <add>, %874, %cst_345 [1] : vector<32x32xf32> to vector<32xf32>
    %876 = vector.shape_cast %875 : vector<32xf32> to vector<32x1xf32>
    %cst_346 = arith.constant 3.200000e+01 : f32
    %877 = vector.broadcast %cst_346 : f32 to vector<32x1xf32>
    %878 = arith.divf %876, %877 : vector<32x1xf32>
    %879 = vector.broadcast %871 : vector<32x1xf32> to vector<32x32xf32>
    %880 = arith.subf %863, %879 : vector<32x32xf32>
    %cst_347 = arith.constant 9.99999974E-6 : f32
    %881 = vector.broadcast %cst_347 : f32 to vector<32x1xf32>
    %882 = arith.addf %878, %881 : vector<32x1xf32>
    %883 = math.rsqrt %882 : vector<32x1xf32>
    %884 = vector.broadcast %883 : vector<32x1xf32> to vector<32x32xf32>
    %885 = arith.mulf %880, %884 : vector<32x32xf32>
    %886 = vector.broadcast %865 : vector<1x32xf32> to vector<32x32xf32>
    %887 = arith.mulf %885, %886 : vector<32x32xf32>
    %888 = vector.broadcast %867 : vector<1x32xf32> to vector<32x32xf32>
    %889 = arith.addf %887, %888 : vector<32x32xf32>
    %c1_348 = arith.constant 1 : index
    %c0_349 = arith.constant 0 : index
    %c0_350 = arith.constant 0 : index
    %890 = vector.load %arg27[%c1_348, %c0_349, %c0_350] : memref<2x32x96xf32, #tpu.memory_space<vmem>>, vector<1x32x96xf32>
    %891 = vector.shape_cast %890 : vector<1x32x96xf32> to vector<32x96xf32>
    %c1_351 = arith.constant 1 : index
    %c0_352 = arith.constant 0 : index
    %c0_353 = arith.constant 0 : index
    %892 = vector.load %arg28[%c1_351, %c0_352, %c0_353] : memref<2x1x96xf32, #tpu.memory_space<vmem>>, vector<1x1x96xf32>
    %893 = vector.shape_cast %892 : vector<1x1x96xf32> to vector<1x96xf32>
    %c1_354 = arith.constant 1 : index
    %c0_355 = arith.constant 0 : index
    %c0_356 = arith.constant 0 : index
    %894 = vector.load %arg29[%c1_354, %c0_355, %c0_356] : memref<2x32x32xf32, #tpu.memory_space<vmem>>, vector<1x32x32xf32>
    %895 = vector.shape_cast %894 : vector<1x32x32xf32> to vector<32x32xf32>
    %c1_357 = arith.constant 1 : index
    %c0_358 = arith.constant 0 : index
    %c0_359 = arith.constant 0 : index
    %896 = vector.load %arg30[%c1_357, %c0_358, %c0_359] : memref<2x1x32xf32, #tpu.memory_space<vmem>>, vector<1x1x32xf32>
    %897 = vector.shape_cast %896 : vector<1x1x32xf32> to vector<1x32xf32>
    %cst_360 = arith.constant dense<0.000000e+00> : vector<32x96xf32>
    %898 = tpu.matmul %889, %891, %cst_360 {dimension_numbers = #tpu.dot_dimension_numbers<[1], [0], [0], [1], [0, 0, 1, 1], [], []>} : vector<32x32xf32>, vector<32x96xf32>, vector<32x96xf32> -> vector<32x96xf32>
    %899 = vector.broadcast %893 : vector<1x96xf32> to vector<32x96xf32>
    %900 = arith.addf %898, %899 : vector<32x96xf32>
    %901 = vector.extract_strided_slice %900 {offsets = [0, 0], sizes = [32, 32], strides = [1, 1]} : vector<32x96xf32> to vector<32x32xf32>
    %902 = vector.extract_strided_slice %900 {offsets = [0, 32], sizes = [32, 32], strides = [1, 1]} : vector<32x96xf32> to vector<32x32xf32>
    %903 = vector.extract_strided_slice %900 {offsets = [0, 64], sizes = [32, 32], strides = [1, 1]} : vector<32x96xf32> to vector<32x32xf32>
    %904 = tpu.iota {dimensions = array<i32: 0>} : vector<16x16xi32>
    %905 = tpu.iota {dimensions = array<i32: 1>} : vector<16x16xi32>
    %906 = arith.cmpi sle, %905, %904 : vector<16x16xi32>
    %907 = vector.extract_strided_slice %901 {offsets = [0, 0], sizes = [16, 32], strides = [1, 1]} : vector<32x32xf32> to vector<16x32xf32>
    %908 = vector.extract_strided_slice %902 {offsets = [0, 0], sizes = [16, 32], strides = [1, 1]} : vector<32x32xf32> to vector<16x32xf32>
    %909 = vector.extract_strided_slice %903 {offsets = [0, 0], sizes = [16, 32], strides = [1, 1]} : vector<32x32xf32> to vector<16x32xf32>
    %910 = vector.extract_strided_slice %907 {offsets = [0, 0], sizes = [16, 8], strides = [1, 1]} : vector<16x32xf32> to vector<16x8xf32>
    %911 = vector.extract_strided_slice %908 {offsets = [0, 0], sizes = [16, 8], strides = [1, 1]} : vector<16x32xf32> to vector<16x8xf32>
    %cst_361 = arith.constant dense<0.000000e+00> : vector<16x16xf32>
    %912 = tpu.matmul %910, %911, %cst_361 {dimension_numbers = #tpu.dot_dimension_numbers<[1], [1], [0], [0], [0, 0, 1, 0], [], []>} : vector<16x8xf32>, vector<16x8xf32>, vector<16x16xf32> -> vector<16x16xf32>
    %cst_362 = arith.constant -1.000000e+30 : f32
    %913 = vector.broadcast %cst_362 : f32 to vector<16x16xf32>
    %914 = arith.select %906, %912, %913 : vector<16x16xi1>, vector<16x16xf32>
    %cst_363 = arith.constant dense<0xFF800000> : vector<16xf32>
    %915 = vector.multi_reduction <maximumf>, %914, %cst_363 [1] : vector<16x16xf32> to vector<16xf32>
    %916 = vector.shape_cast %915 : vector<16xf32> to vector<16x1xf32>
    %917 = vector.broadcast %916 : vector<16x1xf32> to vector<16x16xf32>
    %918 = arith.subf %914, %917 : vector<16x16xf32>
    %919 = math.exp %918 : vector<16x16xf32>
    %cst_364 = arith.constant dense<0.000000e+00> : vector<16xf32>
    %920 = vector.multi_reduction <add>, %919, %cst_364 [1] : vector<16x16xf32> to vector<16xf32>
    %921 = vector.shape_cast %920 : vector<16xf32> to vector<16x1xf32>
    %922 = tpu.reciprocal %921 {approx = true} : vector<16x1xf32> -> vector<16x1xf32>
    %923 = vector.broadcast %922 : vector<16x1xf32> to vector<16x16xf32>
    %924 = arith.mulf %919, %923 : vector<16x16xf32>
    %925 = vector.extract_strided_slice %909 {offsets = [0, 0], sizes = [16, 8], strides = [1, 1]} : vector<16x32xf32> to vector<16x8xf32>
    %cst_365 = arith.constant dense<0.000000e+00> : vector<16x8xf32>
    %926 = tpu.matmul %924, %925, %cst_365 {dimension_numbers = #tpu.dot_dimension_numbers<[1], [0], [0], [1], [0, 0, 1, 1], [], []>} : vector<16x16xf32>, vector<16x8xf32>, vector<16x8xf32> -> vector<16x8xf32>
    %927 = vector.extract_strided_slice %907 {offsets = [0, 8], sizes = [16, 8], strides = [1, 1]} : vector<16x32xf32> to vector<16x8xf32>
    %928 = vector.extract_strided_slice %908 {offsets = [0, 8], sizes = [16, 8], strides = [1, 1]} : vector<16x32xf32> to vector<16x8xf32>
    %cst_366 = arith.constant dense<0.000000e+00> : vector<16x16xf32>
    %929 = tpu.matmul %927, %928, %cst_366 {dimension_numbers = #tpu.dot_dimension_numbers<[1], [1], [0], [0], [0, 0, 1, 0], [], []>} : vector<16x8xf32>, vector<16x8xf32>, vector<16x16xf32> -> vector<16x16xf32>
    %cst_367 = arith.constant -1.000000e+30 : f32
    %930 = vector.broadcast %cst_367 : f32 to vector<16x16xf32>
    %931 = arith.select %906, %929, %930 : vector<16x16xi1>, vector<16x16xf32>
    %cst_368 = arith.constant dense<0xFF800000> : vector<16xf32>
    %932 = vector.multi_reduction <maximumf>, %931, %cst_368 [1] : vector<16x16xf32> to vector<16xf32>
    %933 = vector.shape_cast %932 : vector<16xf32> to vector<16x1xf32>
    %934 = vector.broadcast %933 : vector<16x1xf32> to vector<16x16xf32>
    %935 = arith.subf %931, %934 : vector<16x16xf32>
    %936 = math.exp %935 : vector<16x16xf32>
    %cst_369 = arith.constant dense<0.000000e+00> : vector<16xf32>
    %937 = vector.multi_reduction <add>, %936, %cst_369 [1] : vector<16x16xf32> to vector<16xf32>
    %938 = vector.shape_cast %937 : vector<16xf32> to vector<16x1xf32>
    %939 = tpu.reciprocal %938 {approx = true} : vector<16x1xf32> -> vector<16x1xf32>
    %940 = vector.broadcast %939 : vector<16x1xf32> to vector<16x16xf32>
    %941 = arith.mulf %936, %940 : vector<16x16xf32>
    %942 = vector.extract_strided_slice %909 {offsets = [0, 8], sizes = [16, 8], strides = [1, 1]} : vector<16x32xf32> to vector<16x8xf32>
    %cst_370 = arith.constant dense<0.000000e+00> : vector<16x8xf32>
    %943 = tpu.matmul %941, %942, %cst_370 {dimension_numbers = #tpu.dot_dimension_numbers<[1], [0], [0], [1], [0, 0, 1, 1], [], []>} : vector<16x16xf32>, vector<16x8xf32>, vector<16x8xf32> -> vector<16x8xf32>
    %944 = vector.extract_strided_slice %907 {offsets = [0, 16], sizes = [16, 8], strides = [1, 1]} : vector<16x32xf32> to vector<16x8xf32>
    %945 = vector.extract_strided_slice %908 {offsets = [0, 16], sizes = [16, 8], strides = [1, 1]} : vector<16x32xf32> to vector<16x8xf32>
    %cst_371 = arith.constant dense<0.000000e+00> : vector<16x16xf32>
    %946 = tpu.matmul %944, %945, %cst_371 {dimension_numbers = #tpu.dot_dimension_numbers<[1], [1], [0], [0], [0, 0, 1, 0], [], []>} : vector<16x8xf32>, vector<16x8xf32>, vector<16x16xf32> -> vector<16x16xf32>
    %cst_372 = arith.constant -1.000000e+30 : f32
    %947 = vector.broadcast %cst_372 : f32 to vector<16x16xf32>
    %948 = arith.select %906, %946, %947 : vector<16x16xi1>, vector<16x16xf32>
    %cst_373 = arith.constant dense<0xFF800000> : vector<16xf32>
    %949 = vector.multi_reduction <maximumf>, %948, %cst_373 [1] : vector<16x16xf32> to vector<16xf32>
    %950 = vector.shape_cast %949 : vector<16xf32> to vector<16x1xf32>
    %951 = vector.broadcast %950 : vector<16x1xf32> to vector<16x16xf32>
    %952 = arith.subf %948, %951 : vector<16x16xf32>
    %953 = math.exp %952 : vector<16x16xf32>
    %cst_374 = arith.constant dense<0.000000e+00> : vector<16xf32>
    %954 = vector.multi_reduction <add>, %953, %cst_374 [1] : vector<16x16xf32> to vector<16xf32>
    %955 = vector.shape_cast %954 : vector<16xf32> to vector<16x1xf32>
    %956 = tpu.reciprocal %955 {approx = true} : vector<16x1xf32> -> vector<16x1xf32>
    %957 = vector.broadcast %956 : vector<16x1xf32> to vector<16x16xf32>
    %958 = arith.mulf %953, %957 : vector<16x16xf32>
    %959 = vector.extract_strided_slice %909 {offsets = [0, 16], sizes = [16, 8], strides = [1, 1]} : vector<16x32xf32> to vector<16x8xf32>
    %cst_375 = arith.constant dense<0.000000e+00> : vector<16x8xf32>
    %960 = tpu.matmul %958, %959, %cst_375 {dimension_numbers = #tpu.dot_dimension_numbers<[1], [0], [0], [1], [0, 0, 1, 1], [], []>} : vector<16x16xf32>, vector<16x8xf32>, vector<16x8xf32> -> vector<16x8xf32>
    %961 = vector.extract_strided_slice %907 {offsets = [0, 24], sizes = [16, 8], strides = [1, 1]} : vector<16x32xf32> to vector<16x8xf32>
    %962 = vector.extract_strided_slice %908 {offsets = [0, 24], sizes = [16, 8], strides = [1, 1]} : vector<16x32xf32> to vector<16x8xf32>
    %cst_376 = arith.constant dense<0.000000e+00> : vector<16x16xf32>
    %963 = tpu.matmul %961, %962, %cst_376 {dimension_numbers = #tpu.dot_dimension_numbers<[1], [1], [0], [0], [0, 0, 1, 0], [], []>} : vector<16x8xf32>, vector<16x8xf32>, vector<16x16xf32> -> vector<16x16xf32>
    %cst_377 = arith.constant -1.000000e+30 : f32
    %964 = vector.broadcast %cst_377 : f32 to vector<16x16xf32>
    %965 = arith.select %906, %963, %964 : vector<16x16xi1>, vector<16x16xf32>
    %cst_378 = arith.constant dense<0xFF800000> : vector<16xf32>
    %966 = vector.multi_reduction <maximumf>, %965, %cst_378 [1] : vector<16x16xf32> to vector<16xf32>
    %967 = vector.shape_cast %966 : vector<16xf32> to vector<16x1xf32>
    %968 = vector.broadcast %967 : vector<16x1xf32> to vector<16x16xf32>
    %969 = arith.subf %965, %968 : vector<16x16xf32>
    %970 = math.exp %969 : vector<16x16xf32>
    %cst_379 = arith.constant dense<0.000000e+00> : vector<16xf32>
    %971 = vector.multi_reduction <add>, %970, %cst_379 [1] : vector<16x16xf32> to vector<16xf32>
    %972 = vector.shape_cast %971 : vector<16xf32> to vector<16x1xf32>
    %973 = tpu.reciprocal %972 {approx = true} : vector<16x1xf32> -> vector<16x1xf32>
    %974 = vector.broadcast %973 : vector<16x1xf32> to vector<16x16xf32>
    %975 = arith.mulf %970, %974 : vector<16x16xf32>
    %976 = vector.extract_strided_slice %909 {offsets = [0, 24], sizes = [16, 8], strides = [1, 1]} : vector<16x32xf32> to vector<16x8xf32>
    %cst_380 = arith.constant dense<0.000000e+00> : vector<16x8xf32>
    %977 = tpu.matmul %975, %976, %cst_380 {dimension_numbers = #tpu.dot_dimension_numbers<[1], [0], [0], [1], [0, 0, 1, 1], [], []>} : vector<16x16xf32>, vector<16x8xf32>, vector<16x8xf32> -> vector<16x8xf32>
    %978 = tpu.concatenate %926, %943, %960, %977 in 1 : vector<16x8xf32>, vector<16x8xf32>, vector<16x8xf32>, vector<16x8xf32> -> vector<16x32xf32>
    %979 = vector.extract_strided_slice %901 {offsets = [16, 0], sizes = [16, 32], strides = [1, 1]} : vector<32x32xf32> to vector<16x32xf32>
    %980 = vector.extract_strided_slice %902 {offsets = [16, 0], sizes = [16, 32], strides = [1, 1]} : vector<32x32xf32> to vector<16x32xf32>
    %981 = vector.extract_strided_slice %903 {offsets = [16, 0], sizes = [16, 32], strides = [1, 1]} : vector<32x32xf32> to vector<16x32xf32>
    %982 = vector.extract_strided_slice %979 {offsets = [0, 0], sizes = [16, 8], strides = [1, 1]} : vector<16x32xf32> to vector<16x8xf32>
    %983 = vector.extract_strided_slice %980 {offsets = [0, 0], sizes = [16, 8], strides = [1, 1]} : vector<16x32xf32> to vector<16x8xf32>
    %cst_381 = arith.constant dense<0.000000e+00> : vector<16x16xf32>
    %984 = tpu.matmul %982, %983, %cst_381 {dimension_numbers = #tpu.dot_dimension_numbers<[1], [1], [0], [0], [0, 0, 1, 0], [], []>} : vector<16x8xf32>, vector<16x8xf32>, vector<16x16xf32> -> vector<16x16xf32>
    %cst_382 = arith.constant -1.000000e+30 : f32
    %985 = vector.broadcast %cst_382 : f32 to vector<16x16xf32>
    %986 = arith.select %906, %984, %985 : vector<16x16xi1>, vector<16x16xf32>
    %cst_383 = arith.constant dense<0xFF800000> : vector<16xf32>
    %987 = vector.multi_reduction <maximumf>, %986, %cst_383 [1] : vector<16x16xf32> to vector<16xf32>
    %988 = vector.shape_cast %987 : vector<16xf32> to vector<16x1xf32>
    %989 = vector.broadcast %988 : vector<16x1xf32> to vector<16x16xf32>
    %990 = arith.subf %986, %989 : vector<16x16xf32>
    %991 = math.exp %990 : vector<16x16xf32>
    %cst_384 = arith.constant dense<0.000000e+00> : vector<16xf32>
    %992 = vector.multi_reduction <add>, %991, %cst_384 [1] : vector<16x16xf32> to vector<16xf32>
    %993 = vector.shape_cast %992 : vector<16xf32> to vector<16x1xf32>
    %994 = tpu.reciprocal %993 {approx = true} : vector<16x1xf32> -> vector<16x1xf32>
    %995 = vector.broadcast %994 : vector<16x1xf32> to vector<16x16xf32>
    %996 = arith.mulf %991, %995 : vector<16x16xf32>
    %997 = vector.extract_strided_slice %981 {offsets = [0, 0], sizes = [16, 8], strides = [1, 1]} : vector<16x32xf32> to vector<16x8xf32>
    %cst_385 = arith.constant dense<0.000000e+00> : vector<16x8xf32>
    %998 = tpu.matmul %996, %997, %cst_385 {dimension_numbers = #tpu.dot_dimension_numbers<[1], [0], [0], [1], [0, 0, 1, 1], [], []>} : vector<16x16xf32>, vector<16x8xf32>, vector<16x8xf32> -> vector<16x8xf32>
    %999 = vector.extract_strided_slice %979 {offsets = [0, 8], sizes = [16, 8], strides = [1, 1]} : vector<16x32xf32> to vector<16x8xf32>
    %1000 = vector.extract_strided_slice %980 {offsets = [0, 8], sizes = [16, 8], strides = [1, 1]} : vector<16x32xf32> to vector<16x8xf32>
    %cst_386 = arith.constant dense<0.000000e+00> : vector<16x16xf32>
    %1001 = tpu.matmul %999, %1000, %cst_386 {dimension_numbers = #tpu.dot_dimension_numbers<[1], [1], [0], [0], [0, 0, 1, 0], [], []>} : vector<16x8xf32>, vector<16x8xf32>, vector<16x16xf32> -> vector<16x16xf32>
    %cst_387 = arith.constant -1.000000e+30 : f32
    %1002 = vector.broadcast %cst_387 : f32 to vector<16x16xf32>
    %1003 = arith.select %906, %1001, %1002 : vector<16x16xi1>, vector<16x16xf32>
    %cst_388 = arith.constant dense<0xFF800000> : vector<16xf32>
    %1004 = vector.multi_reduction <maximumf>, %1003, %cst_388 [1] : vector<16x16xf32> to vector<16xf32>
    %1005 = vector.shape_cast %1004 : vector<16xf32> to vector<16x1xf32>
    %1006 = vector.broadcast %1005 : vector<16x1xf32> to vector<16x16xf32>
    %1007 = arith.subf %1003, %1006 : vector<16x16xf32>
    %1008 = math.exp %1007 : vector<16x16xf32>
    %cst_389 = arith.constant dense<0.000000e+00> : vector<16xf32>
    %1009 = vector.multi_reduction <add>, %1008, %cst_389 [1] : vector<16x16xf32> to vector<16xf32>
    %1010 = vector.shape_cast %1009 : vector<16xf32> to vector<16x1xf32>
    %1011 = tpu.reciprocal %1010 {approx = true} : vector<16x1xf32> -> vector<16x1xf32>
    %1012 = vector.broadcast %1011 : vector<16x1xf32> to vector<16x16xf32>
    %1013 = arith.mulf %1008, %1012 : vector<16x16xf32>
    %1014 = vector.extract_strided_slice %981 {offsets = [0, 8], sizes = [16, 8], strides = [1, 1]} : vector<16x32xf32> to vector<16x8xf32>
    %cst_390 = arith.constant dense<0.000000e+00> : vector<16x8xf32>
    %1015 = tpu.matmul %1013, %1014, %cst_390 {dimension_numbers = #tpu.dot_dimension_numbers<[1], [0], [0], [1], [0, 0, 1, 1], [], []>} : vector<16x16xf32>, vector<16x8xf32>, vector<16x8xf32> -> vector<16x8xf32>
    %1016 = vector.extract_strided_slice %979 {offsets = [0, 16], sizes = [16, 8], strides = [1, 1]} : vector<16x32xf32> to vector<16x8xf32>
    %1017 = vector.extract_strided_slice %980 {offsets = [0, 16], sizes = [16, 8], strides = [1, 1]} : vector<16x32xf32> to vector<16x8xf32>
    %cst_391 = arith.constant dense<0.000000e+00> : vector<16x16xf32>
    %1018 = tpu.matmul %1016, %1017, %cst_391 {dimension_numbers = #tpu.dot_dimension_numbers<[1], [1], [0], [0], [0, 0, 1, 0], [], []>} : vector<16x8xf32>, vector<16x8xf32>, vector<16x16xf32> -> vector<16x16xf32>
    %cst_392 = arith.constant -1.000000e+30 : f32
    %1019 = vector.broadcast %cst_392 : f32 to vector<16x16xf32>
    %1020 = arith.select %906, %1018, %1019 : vector<16x16xi1>, vector<16x16xf32>
    %cst_393 = arith.constant dense<0xFF800000> : vector<16xf32>
    %1021 = vector.multi_reduction <maximumf>, %1020, %cst_393 [1] : vector<16x16xf32> to vector<16xf32>
    %1022 = vector.shape_cast %1021 : vector<16xf32> to vector<16x1xf32>
    %1023 = vector.broadcast %1022 : vector<16x1xf32> to vector<16x16xf32>
    %1024 = arith.subf %1020, %1023 : vector<16x16xf32>
    %1025 = math.exp %1024 : vector<16x16xf32>
    %cst_394 = arith.constant dense<0.000000e+00> : vector<16xf32>
    %1026 = vector.multi_reduction <add>, %1025, %cst_394 [1] : vector<16x16xf32> to vector<16xf32>
    %1027 = vector.shape_cast %1026 : vector<16xf32> to vector<16x1xf32>
    %1028 = tpu.reciprocal %1027 {approx = true} : vector<16x1xf32> -> vector<16x1xf32>
    %1029 = vector.broadcast %1028 : vector<16x1xf32> to vector<16x16xf32>
    %1030 = arith.mulf %1025, %1029 : vector<16x16xf32>
    %1031 = vector.extract_strided_slice %981 {offsets = [0, 16], sizes = [16, 8], strides = [1, 1]} : vector<16x32xf32> to vector<16x8xf32>
    %cst_395 = arith.constant dense<0.000000e+00> : vector<16x8xf32>
    %1032 = tpu.matmul %1030, %1031, %cst_395 {dimension_numbers = #tpu.dot_dimension_numbers<[1], [0], [0], [1], [0, 0, 1, 1], [], []>} : vector<16x16xf32>, vector<16x8xf32>, vector<16x8xf32> -> vector<16x8xf32>
    %1033 = vector.extract_strided_slice %979 {offsets = [0, 24], sizes = [16, 8], strides = [1, 1]} : vector<16x32xf32> to vector<16x8xf32>
    %1034 = vector.extract_strided_slice %980 {offsets = [0, 24], sizes = [16, 8], strides = [1, 1]} : vector<16x32xf32> to vector<16x8xf32>
    %cst_396 = arith.constant dense<0.000000e+00> : vector<16x16xf32>
    %1035 = tpu.matmul %1033, %1034, %cst_396 {dimension_numbers = #tpu.dot_dimension_numbers<[1], [1], [0], [0], [0, 0, 1, 0], [], []>} : vector<16x8xf32>, vector<16x8xf32>, vector<16x16xf32> -> vector<16x16xf32>
    %cst_397 = arith.constant -1.000000e+30 : f32
    %1036 = vector.broadcast %cst_397 : f32 to vector<16x16xf32>
    %1037 = arith.select %906, %1035, %1036 : vector<16x16xi1>, vector<16x16xf32>
    %cst_398 = arith.constant dense<0xFF800000> : vector<16xf32>
    %1038 = vector.multi_reduction <maximumf>, %1037, %cst_398 [1] : vector<16x16xf32> to vector<16xf32>
    %1039 = vector.shape_cast %1038 : vector<16xf32> to vector<16x1xf32>
    %1040 = vector.broadcast %1039 : vector<16x1xf32> to vector<16x16xf32>
    %1041 = arith.subf %1037, %1040 : vector<16x16xf32>
    %1042 = math.exp %1041 : vector<16x16xf32>
    %cst_399 = arith.constant dense<0.000000e+00> : vector<16xf32>
    %1043 = vector.multi_reduction <add>, %1042, %cst_399 [1] : vector<16x16xf32> to vector<16xf32>
    %1044 = vector.shape_cast %1043 : vector<16xf32> to vector<16x1xf32>
    %1045 = tpu.reciprocal %1044 {approx = true} : vector<16x1xf32> -> vector<16x1xf32>
    %1046 = vector.broadcast %1045 : vector<16x1xf32> to vector<16x16xf32>
    %1047 = arith.mulf %1042, %1046 : vector<16x16xf32>
    %1048 = vector.extract_strided_slice %981 {offsets = [0, 24], sizes = [16, 8], strides = [1, 1]} : vector<16x32xf32> to vector<16x8xf32>
    %cst_400 = arith.constant dense<0.000000e+00> : vector<16x8xf32>
    %1049 = tpu.matmul %1047, %1048, %cst_400 {dimension_numbers = #tpu.dot_dimension_numbers<[1], [0], [0], [1], [0, 0, 1, 1], [], []>} : vector<16x16xf32>, vector<16x8xf32>, vector<16x8xf32> -> vector<16x8xf32>
    %1050 = tpu.concatenate %998, %1015, %1032, %1049 in 1 : vector<16x8xf32>, vector<16x8xf32>, vector<16x8xf32>, vector<16x8xf32> -> vector<16x32xf32>
    %1051 = tpu.concatenate %978, %1050 in 0 : vector<16x32xf32>, vector<16x32xf32> -> vector<32x32xf32>
    %cst_401 = arith.constant dense<0.000000e+00> : vector<32x32xf32>
    %1052 = tpu.matmul %1051, %895, %cst_401 {dimension_numbers = #tpu.dot_dimension_numbers<[1], [0], [0], [1], [0, 0, 1, 1], [], []>} : vector<32x32xf32>, vector<32x32xf32>, vector<32x32xf32> -> vector<32x32xf32>
    %1053 = vector.broadcast %897 : vector<1x32xf32> to vector<32x32xf32>
    %1054 = arith.addf %1052, %1053 : vector<32x32xf32>
    %1055 = arith.addf %889, %1054 : vector<32x32xf32>
    %c1_402 = arith.constant 1 : index
    %c0_403 = arith.constant 0 : index
    %c0_404 = arith.constant 0 : index
    %1056 = vector.load %arg31[%c1_402, %c0_403, %c0_404] : memref<2x1x32xf32, #tpu.memory_space<vmem>>, vector<1x1x32xf32>
    %1057 = vector.shape_cast %1056 : vector<1x1x32xf32> to vector<1x32xf32>
    %c1_405 = arith.constant 1 : index
    %c0_406 = arith.constant 0 : index
    %c0_407 = arith.constant 0 : index
    %1058 = vector.load %arg32[%c1_405, %c0_406, %c0_407] : memref<2x1x32xf32, #tpu.memory_space<vmem>>, vector<1x1x32xf32>
    %1059 = vector.shape_cast %1058 : vector<1x1x32xf32> to vector<1x32xf32>
    %cst_408 = arith.constant dense<0.000000e+00> : vector<32xf32>
    %1060 = vector.multi_reduction <add>, %1055, %cst_408 [1] : vector<32x32xf32> to vector<32xf32>
    %1061 = vector.shape_cast %1060 : vector<32xf32> to vector<32x1xf32>
    %cst_409 = arith.constant 3.200000e+01 : f32
    %1062 = vector.broadcast %cst_409 : f32 to vector<32x1xf32>
    %1063 = arith.divf %1061, %1062 : vector<32x1xf32>
    %1064 = vector.broadcast %1063 : vector<32x1xf32> to vector<32x32xf32>
    %1065 = arith.subf %1055, %1064 : vector<32x32xf32>
    %1066 = arith.mulf %1065, %1065 : vector<32x32xf32>
    %cst_410 = arith.constant dense<0.000000e+00> : vector<32xf32>
    %1067 = vector.multi_reduction <add>, %1066, %cst_410 [1] : vector<32x32xf32> to vector<32xf32>
    %1068 = vector.shape_cast %1067 : vector<32xf32> to vector<32x1xf32>
    %cst_411 = arith.constant 3.200000e+01 : f32
    %1069 = vector.broadcast %cst_411 : f32 to vector<32x1xf32>
    %1070 = arith.divf %1068, %1069 : vector<32x1xf32>
    %1071 = vector.broadcast %1063 : vector<32x1xf32> to vector<32x32xf32>
    %1072 = arith.subf %1055, %1071 : vector<32x32xf32>
    %cst_412 = arith.constant 9.99999974E-6 : f32
    %1073 = vector.broadcast %cst_412 : f32 to vector<32x1xf32>
    %1074 = arith.addf %1070, %1073 : vector<32x1xf32>
    %1075 = math.rsqrt %1074 : vector<32x1xf32>
    %1076 = vector.broadcast %1075 : vector<32x1xf32> to vector<32x32xf32>
    %1077 = arith.mulf %1072, %1076 : vector<32x32xf32>
    %1078 = vector.broadcast %1057 : vector<1x32xf32> to vector<32x32xf32>
    %1079 = arith.mulf %1077, %1078 : vector<32x32xf32>
    %1080 = vector.broadcast %1059 : vector<1x32xf32> to vector<32x32xf32>
    %1081 = arith.addf %1079, %1080 : vector<32x32xf32>
    %c1_413 = arith.constant 1 : index
    %c0_414 = arith.constant 0 : index
    %c0_415 = arith.constant 0 : index
    %1082 = vector.load %arg33[%c1_413, %c0_414, %c0_415] : memref<2x32x96xf32, #tpu.memory_space<vmem>>, vector<1x32x96xf32>
    %1083 = vector.shape_cast %1082 : vector<1x32x96xf32> to vector<32x96xf32>
    %c1_416 = arith.constant 1 : index
    %c0_417 = arith.constant 0 : index
    %c0_418 = arith.constant 0 : index
    %1084 = vector.load %arg34[%c1_416, %c0_417, %c0_418] : memref<2x1x96xf32, #tpu.memory_space<vmem>>, vector<1x1x96xf32>
    %1085 = vector.shape_cast %1084 : vector<1x1x96xf32> to vector<1x96xf32>
    %c1_419 = arith.constant 1 : index
    %c0_420 = arith.constant 0 : index
    %c0_421 = arith.constant 0 : index
    %1086 = vector.load %arg35[%c1_419, %c0_420, %c0_421] : memref<2x32x32xf32, #tpu.memory_space<vmem>>, vector<1x32x32xf32>
    %1087 = vector.shape_cast %1086 : vector<1x32x32xf32> to vector<32x32xf32>
    %c1_422 = arith.constant 1 : index
    %c0_423 = arith.constant 0 : index
    %c0_424 = arith.constant 0 : index
    %1088 = vector.load %arg36[%c1_422, %c0_423, %c0_424] : memref<2x1x32xf32, #tpu.memory_space<vmem>>, vector<1x1x32xf32>
    %1089 = vector.shape_cast %1088 : vector<1x1x32xf32> to vector<1x32xf32>
    %1090 = vector.extract_strided_slice %1083 {offsets = [0, 0], sizes = [32, 32], strides = [1, 1]} : vector<32x96xf32> to vector<32x32xf32>
    %cst_425 = arith.constant dense<0.000000e+00> : vector<32x32xf32>
    %1091 = tpu.matmul %1081, %1090, %cst_425 {dimension_numbers = #tpu.dot_dimension_numbers<[1], [0], [0], [1], [0, 0, 1, 1], [], []>} : vector<32x32xf32>, vector<32x32xf32>, vector<32x32xf32> -> vector<32x32xf32>
    %1092 = vector.extract_strided_slice %1085 {offsets = [0, 0], sizes = [1, 32], strides = [1, 1]} : vector<1x96xf32> to vector<1x32xf32>
    %1093 = vector.broadcast %1092 : vector<1x32xf32> to vector<32x32xf32>
    %1094 = arith.addf %1091, %1093 : vector<32x32xf32>
    %1095 = vector.extract_strided_slice %1083 {offsets = [0, 32], sizes = [32, 64], strides = [1, 1]} : vector<32x96xf32> to vector<32x64xf32>
    %cst_426 = arith.constant dense<0.000000e+00> : vector<16x64xf32>
    %1096 = tpu.matmul %475, %1095, %cst_426 {dimension_numbers = #tpu.dot_dimension_numbers<[1], [0], [0], [1], [0, 0, 1, 1], [], []>} : vector<16x32xf32>, vector<32x64xf32>, vector<16x64xf32> -> vector<16x64xf32>
    %1097 = vector.extract_strided_slice %1085 {offsets = [0, 32], sizes = [1, 64], strides = [1, 1]} : vector<1x96xf32> to vector<1x64xf32>
    %1098 = vector.broadcast %1097 : vector<1x64xf32> to vector<16x64xf32>
    %1099 = arith.addf %1096, %1098 : vector<16x64xf32>
    %1100 = vector.extract_strided_slice %1099 {offsets = [0, 0], sizes = [16, 32], strides = [1, 1]} : vector<16x64xf32> to vector<16x32xf32>
    %1101 = vector.extract_strided_slice %1099 {offsets = [0, 32], sizes = [16, 32], strides = [1, 1]} : vector<16x64xf32> to vector<16x32xf32>
    %1102 = vector.extract_strided_slice %1094 {offsets = [0, 0], sizes = [16, 32], strides = [1, 1]} : vector<32x32xf32> to vector<16x32xf32>
    %1103 = vector.extract_strided_slice %1100 {offsets = [0, 0], sizes = [8, 32], strides = [1, 1]} : vector<16x32xf32> to vector<8x32xf32>
    %1104 = vector.extract_strided_slice %1101 {offsets = [0, 0], sizes = [8, 32], strides = [1, 1]} : vector<16x32xf32> to vector<8x32xf32>
    %1105 = vector.extract_strided_slice %1102 {offsets = [0, 0], sizes = [16, 8], strides = [1, 1]} : vector<16x32xf32> to vector<16x8xf32>
    %1106 = vector.extract_strided_slice %1103 {offsets = [0, 0], sizes = [8, 8], strides = [1, 1]} : vector<8x32xf32> to vector<8x8xf32>
    %cst_427 = arith.constant dense<0.000000e+00> : vector<16x8xf32>
    %1107 = tpu.matmul %1105, %1106, %cst_427 {dimension_numbers = #tpu.dot_dimension_numbers<[1], [1], [0], [0], [0, 0, 1, 0], [], []>} : vector<16x8xf32>, vector<8x8xf32>, vector<16x8xf32> -> vector<16x8xf32>
    %cst_428 = arith.constant dense<0xFF800000> : vector<16xf32>
    %1108 = vector.multi_reduction <maximumf>, %1107, %cst_428 [1] : vector<16x8xf32> to vector<16xf32>
    %1109 = vector.shape_cast %1108 : vector<16xf32> to vector<16x1xf32>
    %1110 = vector.broadcast %1109 : vector<16x1xf32> to vector<16x8xf32>
    %1111 = arith.subf %1107, %1110 : vector<16x8xf32>
    %1112 = math.exp %1111 : vector<16x8xf32>
    %cst_429 = arith.constant dense<0.000000e+00> : vector<16xf32>
    %1113 = vector.multi_reduction <add>, %1112, %cst_429 [1] : vector<16x8xf32> to vector<16xf32>
    %1114 = vector.shape_cast %1113 : vector<16xf32> to vector<16x1xf32>
    %1115 = tpu.reciprocal %1114 {approx = true} : vector<16x1xf32> -> vector<16x1xf32>
    %1116 = vector.broadcast %1115 : vector<16x1xf32> to vector<16x8xf32>
    %1117 = arith.mulf %1112, %1116 : vector<16x8xf32>
    %1118 = vector.extract_strided_slice %1104 {offsets = [0, 0], sizes = [8, 8], strides = [1, 1]} : vector<8x32xf32> to vector<8x8xf32>
    %cst_430 = arith.constant dense<0.000000e+00> : vector<16x8xf32>
    %1119 = tpu.matmul %1117, %1118, %cst_430 {dimension_numbers = #tpu.dot_dimension_numbers<[1], [0], [0], [1], [0, 0, 1, 1], [], []>} : vector<16x8xf32>, vector<8x8xf32>, vector<16x8xf32> -> vector<16x8xf32>
    %1120 = vector.extract_strided_slice %1102 {offsets = [0, 8], sizes = [16, 8], strides = [1, 1]} : vector<16x32xf32> to vector<16x8xf32>
    %1121 = vector.extract_strided_slice %1103 {offsets = [0, 8], sizes = [8, 8], strides = [1, 1]} : vector<8x32xf32> to vector<8x8xf32>
    %cst_431 = arith.constant dense<0.000000e+00> : vector<16x8xf32>
    %1122 = tpu.matmul %1120, %1121, %cst_431 {dimension_numbers = #tpu.dot_dimension_numbers<[1], [1], [0], [0], [0, 0, 1, 0], [], []>} : vector<16x8xf32>, vector<8x8xf32>, vector<16x8xf32> -> vector<16x8xf32>
    %cst_432 = arith.constant dense<0xFF800000> : vector<16xf32>
    %1123 = vector.multi_reduction <maximumf>, %1122, %cst_432 [1] : vector<16x8xf32> to vector<16xf32>
    %1124 = vector.shape_cast %1123 : vector<16xf32> to vector<16x1xf32>
    %1125 = vector.broadcast %1124 : vector<16x1xf32> to vector<16x8xf32>
    %1126 = arith.subf %1122, %1125 : vector<16x8xf32>
    %1127 = math.exp %1126 : vector<16x8xf32>
    %cst_433 = arith.constant dense<0.000000e+00> : vector<16xf32>
    %1128 = vector.multi_reduction <add>, %1127, %cst_433 [1] : vector<16x8xf32> to vector<16xf32>
    %1129 = vector.shape_cast %1128 : vector<16xf32> to vector<16x1xf32>
    %1130 = tpu.reciprocal %1129 {approx = true} : vector<16x1xf32> -> vector<16x1xf32>
    %1131 = vector.broadcast %1130 : vector<16x1xf32> to vector<16x8xf32>
    %1132 = arith.mulf %1127, %1131 : vector<16x8xf32>
    %1133 = vector.extract_strided_slice %1104 {offsets = [0, 8], sizes = [8, 8], strides = [1, 1]} : vector<8x32xf32> to vector<8x8xf32>
    %cst_434 = arith.constant dense<0.000000e+00> : vector<16x8xf32>
    %1134 = tpu.matmul %1132, %1133, %cst_434 {dimension_numbers = #tpu.dot_dimension_numbers<[1], [0], [0], [1], [0, 0, 1, 1], [], []>} : vector<16x8xf32>, vector<8x8xf32>, vector<16x8xf32> -> vector<16x8xf32>
    %1135 = vector.extract_strided_slice %1102 {offsets = [0, 16], sizes = [16, 8], strides = [1, 1]} : vector<16x32xf32> to vector<16x8xf32>
    %1136 = vector.extract_strided_slice %1103 {offsets = [0, 16], sizes = [8, 8], strides = [1, 1]} : vector<8x32xf32> to vector<8x8xf32>
    %cst_435 = arith.constant dense<0.000000e+00> : vector<16x8xf32>
    %1137 = tpu.matmul %1135, %1136, %cst_435 {dimension_numbers = #tpu.dot_dimension_numbers<[1], [1], [0], [0], [0, 0, 1, 0], [], []>} : vector<16x8xf32>, vector<8x8xf32>, vector<16x8xf32> -> vector<16x8xf32>
    %cst_436 = arith.constant dense<0xFF800000> : vector<16xf32>
    %1138 = vector.multi_reduction <maximumf>, %1137, %cst_436 [1] : vector<16x8xf32> to vector<16xf32>
    %1139 = vector.shape_cast %1138 : vector<16xf32> to vector<16x1xf32>
    %1140 = vector.broadcast %1139 : vector<16x1xf32> to vector<16x8xf32>
    %1141 = arith.subf %1137, %1140 : vector<16x8xf32>
    %1142 = math.exp %1141 : vector<16x8xf32>
    %cst_437 = arith.constant dense<0.000000e+00> : vector<16xf32>
    %1143 = vector.multi_reduction <add>, %1142, %cst_437 [1] : vector<16x8xf32> to vector<16xf32>
    %1144 = vector.shape_cast %1143 : vector<16xf32> to vector<16x1xf32>
    %1145 = tpu.reciprocal %1144 {approx = true} : vector<16x1xf32> -> vector<16x1xf32>
    %1146 = vector.broadcast %1145 : vector<16x1xf32> to vector<16x8xf32>
    %1147 = arith.mulf %1142, %1146 : vector<16x8xf32>
    %1148 = vector.extract_strided_slice %1104 {offsets = [0, 16], sizes = [8, 8], strides = [1, 1]} : vector<8x32xf32> to vector<8x8xf32>
    %cst_438 = arith.constant dense<0.000000e+00> : vector<16x8xf32>
    %1149 = tpu.matmul %1147, %1148, %cst_438 {dimension_numbers = #tpu.dot_dimension_numbers<[1], [0], [0], [1], [0, 0, 1, 1], [], []>} : vector<16x8xf32>, vector<8x8xf32>, vector<16x8xf32> -> vector<16x8xf32>
    %1150 = vector.extract_strided_slice %1102 {offsets = [0, 24], sizes = [16, 8], strides = [1, 1]} : vector<16x32xf32> to vector<16x8xf32>
    %1151 = vector.extract_strided_slice %1103 {offsets = [0, 24], sizes = [8, 8], strides = [1, 1]} : vector<8x32xf32> to vector<8x8xf32>
    %cst_439 = arith.constant dense<0.000000e+00> : vector<16x8xf32>
    %1152 = tpu.matmul %1150, %1151, %cst_439 {dimension_numbers = #tpu.dot_dimension_numbers<[1], [1], [0], [0], [0, 0, 1, 0], [], []>} : vector<16x8xf32>, vector<8x8xf32>, vector<16x8xf32> -> vector<16x8xf32>
    %cst_440 = arith.constant dense<0xFF800000> : vector<16xf32>
    %1153 = vector.multi_reduction <maximumf>, %1152, %cst_440 [1] : vector<16x8xf32> to vector<16xf32>
    %1154 = vector.shape_cast %1153 : vector<16xf32> to vector<16x1xf32>
    %1155 = vector.broadcast %1154 : vector<16x1xf32> to vector<16x8xf32>
    %1156 = arith.subf %1152, %1155 : vector<16x8xf32>
    %1157 = math.exp %1156 : vector<16x8xf32>
    %cst_441 = arith.constant dense<0.000000e+00> : vector<16xf32>
    %1158 = vector.multi_reduction <add>, %1157, %cst_441 [1] : vector<16x8xf32> to vector<16xf32>
    %1159 = vector.shape_cast %1158 : vector<16xf32> to vector<16x1xf32>
    %1160 = tpu.reciprocal %1159 {approx = true} : vector<16x1xf32> -> vector<16x1xf32>
    %1161 = vector.broadcast %1160 : vector<16x1xf32> to vector<16x8xf32>
    %1162 = arith.mulf %1157, %1161 : vector<16x8xf32>
    %1163 = vector.extract_strided_slice %1104 {offsets = [0, 24], sizes = [8, 8], strides = [1, 1]} : vector<8x32xf32> to vector<8x8xf32>
    %cst_442 = arith.constant dense<0.000000e+00> : vector<16x8xf32>
    %1164 = tpu.matmul %1162, %1163, %cst_442 {dimension_numbers = #tpu.dot_dimension_numbers<[1], [0], [0], [1], [0, 0, 1, 1], [], []>} : vector<16x8xf32>, vector<8x8xf32>, vector<16x8xf32> -> vector<16x8xf32>
    %1165 = tpu.concatenate %1119, %1134, %1149, %1164 in 1 : vector<16x8xf32>, vector<16x8xf32>, vector<16x8xf32>, vector<16x8xf32> -> vector<16x32xf32>
    %1166 = vector.extract_strided_slice %1094 {offsets = [16, 0], sizes = [16, 32], strides = [1, 1]} : vector<32x32xf32> to vector<16x32xf32>
    %1167 = vector.extract_strided_slice %1100 {offsets = [8, 0], sizes = [8, 32], strides = [1, 1]} : vector<16x32xf32> to vector<8x32xf32>
    %1168 = vector.extract_strided_slice %1101 {offsets = [8, 0], sizes = [8, 32], strides = [1, 1]} : vector<16x32xf32> to vector<8x32xf32>
    %1169 = vector.extract_strided_slice %1166 {offsets = [0, 0], sizes = [16, 8], strides = [1, 1]} : vector<16x32xf32> to vector<16x8xf32>
    %1170 = vector.extract_strided_slice %1167 {offsets = [0, 0], sizes = [8, 8], strides = [1, 1]} : vector<8x32xf32> to vector<8x8xf32>
    %cst_443 = arith.constant dense<0.000000e+00> : vector<16x8xf32>
    %1171 = tpu.matmul %1169, %1170, %cst_443 {dimension_numbers = #tpu.dot_dimension_numbers<[1], [1], [0], [0], [0, 0, 1, 0], [], []>} : vector<16x8xf32>, vector<8x8xf32>, vector<16x8xf32> -> vector<16x8xf32>
    %cst_444 = arith.constant dense<0xFF800000> : vector<16xf32>
    %1172 = vector.multi_reduction <maximumf>, %1171, %cst_444 [1] : vector<16x8xf32> to vector<16xf32>
    %1173 = vector.shape_cast %1172 : vector<16xf32> to vector<16x1xf32>
    %1174 = vector.broadcast %1173 : vector<16x1xf32> to vector<16x8xf32>
    %1175 = arith.subf %1171, %1174 : vector<16x8xf32>
    %1176 = math.exp %1175 : vector<16x8xf32>
    %cst_445 = arith.constant dense<0.000000e+00> : vector<16xf32>
    %1177 = vector.multi_reduction <add>, %1176, %cst_445 [1] : vector<16x8xf32> to vector<16xf32>
    %1178 = vector.shape_cast %1177 : vector<16xf32> to vector<16x1xf32>
    %1179 = tpu.reciprocal %1178 {approx = true} : vector<16x1xf32> -> vector<16x1xf32>
    %1180 = vector.broadcast %1179 : vector<16x1xf32> to vector<16x8xf32>
    %1181 = arith.mulf %1176, %1180 : vector<16x8xf32>
    %1182 = vector.extract_strided_slice %1168 {offsets = [0, 0], sizes = [8, 8], strides = [1, 1]} : vector<8x32xf32> to vector<8x8xf32>
    %cst_446 = arith.constant dense<0.000000e+00> : vector<16x8xf32>
    %1183 = tpu.matmul %1181, %1182, %cst_446 {dimension_numbers = #tpu.dot_dimension_numbers<[1], [0], [0], [1], [0, 0, 1, 1], [], []>} : vector<16x8xf32>, vector<8x8xf32>, vector<16x8xf32> -> vector<16x8xf32>
    %1184 = vector.extract_strided_slice %1166 {offsets = [0, 8], sizes = [16, 8], strides = [1, 1]} : vector<16x32xf32> to vector<16x8xf32>
    %1185 = vector.extract_strided_slice %1167 {offsets = [0, 8], sizes = [8, 8], strides = [1, 1]} : vector<8x32xf32> to vector<8x8xf32>
    %cst_447 = arith.constant dense<0.000000e+00> : vector<16x8xf32>
    %1186 = tpu.matmul %1184, %1185, %cst_447 {dimension_numbers = #tpu.dot_dimension_numbers<[1], [1], [0], [0], [0, 0, 1, 0], [], []>} : vector<16x8xf32>, vector<8x8xf32>, vector<16x8xf32> -> vector<16x8xf32>
    %cst_448 = arith.constant dense<0xFF800000> : vector<16xf32>
    %1187 = vector.multi_reduction <maximumf>, %1186, %cst_448 [1] : vector<16x8xf32> to vector<16xf32>
    %1188 = vector.shape_cast %1187 : vector<16xf32> to vector<16x1xf32>
    %1189 = vector.broadcast %1188 : vector<16x1xf32> to vector<16x8xf32>
    %1190 = arith.subf %1186, %1189 : vector<16x8xf32>
    %1191 = math.exp %1190 : vector<16x8xf32>
    %cst_449 = arith.constant dense<0.000000e+00> : vector<16xf32>
    %1192 = vector.multi_reduction <add>, %1191, %cst_449 [1] : vector<16x8xf32> to vector<16xf32>
    %1193 = vector.shape_cast %1192 : vector<16xf32> to vector<16x1xf32>
    %1194 = tpu.reciprocal %1193 {approx = true} : vector<16x1xf32> -> vector<16x1xf32>
    %1195 = vector.broadcast %1194 : vector<16x1xf32> to vector<16x8xf32>
    %1196 = arith.mulf %1191, %1195 : vector<16x8xf32>
    %1197 = vector.extract_strided_slice %1168 {offsets = [0, 8], sizes = [8, 8], strides = [1, 1]} : vector<8x32xf32> to vector<8x8xf32>
    %cst_450 = arith.constant dense<0.000000e+00> : vector<16x8xf32>
    %1198 = tpu.matmul %1196, %1197, %cst_450 {dimension_numbers = #tpu.dot_dimension_numbers<[1], [0], [0], [1], [0, 0, 1, 1], [], []>} : vector<16x8xf32>, vector<8x8xf32>, vector<16x8xf32> -> vector<16x8xf32>
    %1199 = vector.extract_strided_slice %1166 {offsets = [0, 16], sizes = [16, 8], strides = [1, 1]} : vector<16x32xf32> to vector<16x8xf32>
    %1200 = vector.extract_strided_slice %1167 {offsets = [0, 16], sizes = [8, 8], strides = [1, 1]} : vector<8x32xf32> to vector<8x8xf32>
    %cst_451 = arith.constant dense<0.000000e+00> : vector<16x8xf32>
    %1201 = tpu.matmul %1199, %1200, %cst_451 {dimension_numbers = #tpu.dot_dimension_numbers<[1], [1], [0], [0], [0, 0, 1, 0], [], []>} : vector<16x8xf32>, vector<8x8xf32>, vector<16x8xf32> -> vector<16x8xf32>
    %cst_452 = arith.constant dense<0xFF800000> : vector<16xf32>
    %1202 = vector.multi_reduction <maximumf>, %1201, %cst_452 [1] : vector<16x8xf32> to vector<16xf32>
    %1203 = vector.shape_cast %1202 : vector<16xf32> to vector<16x1xf32>
    %1204 = vector.broadcast %1203 : vector<16x1xf32> to vector<16x8xf32>
    %1205 = arith.subf %1201, %1204 : vector<16x8xf32>
    %1206 = math.exp %1205 : vector<16x8xf32>
    %cst_453 = arith.constant dense<0.000000e+00> : vector<16xf32>
    %1207 = vector.multi_reduction <add>, %1206, %cst_453 [1] : vector<16x8xf32> to vector<16xf32>
    %1208 = vector.shape_cast %1207 : vector<16xf32> to vector<16x1xf32>
    %1209 = tpu.reciprocal %1208 {approx = true} : vector<16x1xf32> -> vector<16x1xf32>
    %1210 = vector.broadcast %1209 : vector<16x1xf32> to vector<16x8xf32>
    %1211 = arith.mulf %1206, %1210 : vector<16x8xf32>
    %1212 = vector.extract_strided_slice %1168 {offsets = [0, 16], sizes = [8, 8], strides = [1, 1]} : vector<8x32xf32> to vector<8x8xf32>
    %cst_454 = arith.constant dense<0.000000e+00> : vector<16x8xf32>
    %1213 = tpu.matmul %1211, %1212, %cst_454 {dimension_numbers = #tpu.dot_dimension_numbers<[1], [0], [0], [1], [0, 0, 1, 1], [], []>} : vector<16x8xf32>, vector<8x8xf32>, vector<16x8xf32> -> vector<16x8xf32>
    %1214 = vector.extract_strided_slice %1166 {offsets = [0, 24], sizes = [16, 8], strides = [1, 1]} : vector<16x32xf32> to vector<16x8xf32>
    %1215 = vector.extract_strided_slice %1167 {offsets = [0, 24], sizes = [8, 8], strides = [1, 1]} : vector<8x32xf32> to vector<8x8xf32>
    %cst_455 = arith.constant dense<0.000000e+00> : vector<16x8xf32>
    %1216 = tpu.matmul %1214, %1215, %cst_455 {dimension_numbers = #tpu.dot_dimension_numbers<[1], [1], [0], [0], [0, 0, 1, 0], [], []>} : vector<16x8xf32>, vector<8x8xf32>, vector<16x8xf32> -> vector<16x8xf32>
    %cst_456 = arith.constant dense<0xFF800000> : vector<16xf32>
    %1217 = vector.multi_reduction <maximumf>, %1216, %cst_456 [1] : vector<16x8xf32> to vector<16xf32>
    %1218 = vector.shape_cast %1217 : vector<16xf32> to vector<16x1xf32>
    %1219 = vector.broadcast %1218 : vector<16x1xf32> to vector<16x8xf32>
    %1220 = arith.subf %1216, %1219 : vector<16x8xf32>
    %1221 = math.exp %1220 : vector<16x8xf32>
    %cst_457 = arith.constant dense<0.000000e+00> : vector<16xf32>
    %1222 = vector.multi_reduction <add>, %1221, %cst_457 [1] : vector<16x8xf32> to vector<16xf32>
    %1223 = vector.shape_cast %1222 : vector<16xf32> to vector<16x1xf32>
    %1224 = tpu.reciprocal %1223 {approx = true} : vector<16x1xf32> -> vector<16x1xf32>
    %1225 = vector.broadcast %1224 : vector<16x1xf32> to vector<16x8xf32>
    %1226 = arith.mulf %1221, %1225 : vector<16x8xf32>
    %1227 = vector.extract_strided_slice %1168 {offsets = [0, 24], sizes = [8, 8], strides = [1, 1]} : vector<8x32xf32> to vector<8x8xf32>
    %cst_458 = arith.constant dense<0.000000e+00> : vector<16x8xf32>
    %1228 = tpu.matmul %1226, %1227, %cst_458 {dimension_numbers = #tpu.dot_dimension_numbers<[1], [0], [0], [1], [0, 0, 1, 1], [], []>} : vector<16x8xf32>, vector<8x8xf32>, vector<16x8xf32> -> vector<16x8xf32>
    %1229 = tpu.concatenate %1183, %1198, %1213, %1228 in 1 : vector<16x8xf32>, vector<16x8xf32>, vector<16x8xf32>, vector<16x8xf32> -> vector<16x32xf32>
    %1230 = tpu.concatenate %1165, %1229 in 0 : vector<16x32xf32>, vector<16x32xf32> -> vector<32x32xf32>
    %cst_459 = arith.constant dense<0.000000e+00> : vector<32x32xf32>
    %1231 = tpu.matmul %1230, %1087, %cst_459 {dimension_numbers = #tpu.dot_dimension_numbers<[1], [0], [0], [1], [0, 0, 1, 1], [], []>} : vector<32x32xf32>, vector<32x32xf32>, vector<32x32xf32> -> vector<32x32xf32>
    %1232 = vector.broadcast %1089 : vector<1x32xf32> to vector<32x32xf32>
    %1233 = arith.addf %1231, %1232 : vector<32x32xf32>
    %1234 = arith.addf %1081, %1233 : vector<32x32xf32>
    %c1_460 = arith.constant 1 : index
    %c0_461 = arith.constant 0 : index
    %c0_462 = arith.constant 0 : index
    %1235 = vector.load %arg37[%c1_460, %c0_461, %c0_462] : memref<2x1x32xf32, #tpu.memory_space<vmem>>, vector<1x1x32xf32>
    %1236 = vector.shape_cast %1235 : vector<1x1x32xf32> to vector<1x32xf32>
    %c1_463 = arith.constant 1 : index
    %c0_464 = arith.constant 0 : index
    %c0_465 = arith.constant 0 : index
    %1237 = vector.load %arg38[%c1_463, %c0_464, %c0_465] : memref<2x1x32xf32, #tpu.memory_space<vmem>>, vector<1x1x32xf32>
    %1238 = vector.shape_cast %1237 : vector<1x1x32xf32> to vector<1x32xf32>
    %cst_466 = arith.constant dense<0.000000e+00> : vector<32xf32>
    %1239 = vector.multi_reduction <add>, %1234, %cst_466 [1] : vector<32x32xf32> to vector<32xf32>
    %1240 = vector.shape_cast %1239 : vector<32xf32> to vector<32x1xf32>
    %cst_467 = arith.constant 3.200000e+01 : f32
    %1241 = vector.broadcast %cst_467 : f32 to vector<32x1xf32>
    %1242 = arith.divf %1240, %1241 : vector<32x1xf32>
    %1243 = vector.broadcast %1242 : vector<32x1xf32> to vector<32x32xf32>
    %1244 = arith.subf %1234, %1243 : vector<32x32xf32>
    %1245 = arith.mulf %1244, %1244 : vector<32x32xf32>
    %cst_468 = arith.constant dense<0.000000e+00> : vector<32xf32>
    %1246 = vector.multi_reduction <add>, %1245, %cst_468 [1] : vector<32x32xf32> to vector<32xf32>
    %1247 = vector.shape_cast %1246 : vector<32xf32> to vector<32x1xf32>
    %cst_469 = arith.constant 3.200000e+01 : f32
    %1248 = vector.broadcast %cst_469 : f32 to vector<32x1xf32>
    %1249 = arith.divf %1247, %1248 : vector<32x1xf32>
    %1250 = vector.broadcast %1242 : vector<32x1xf32> to vector<32x32xf32>
    %1251 = arith.subf %1234, %1250 : vector<32x32xf32>
    %cst_470 = arith.constant 9.99999974E-6 : f32
    %1252 = vector.broadcast %cst_470 : f32 to vector<32x1xf32>
    %1253 = arith.addf %1249, %1252 : vector<32x1xf32>
    %1254 = math.rsqrt %1253 : vector<32x1xf32>
    %1255 = vector.broadcast %1254 : vector<32x1xf32> to vector<32x32xf32>
    %1256 = arith.mulf %1251, %1255 : vector<32x32xf32>
    %1257 = vector.broadcast %1236 : vector<1x32xf32> to vector<32x32xf32>
    %1258 = arith.mulf %1256, %1257 : vector<32x32xf32>
    %1259 = vector.broadcast %1238 : vector<1x32xf32> to vector<32x32xf32>
    %1260 = arith.addf %1258, %1259 : vector<32x32xf32>
    %c1_471 = arith.constant 1 : index
    %c0_472 = arith.constant 0 : index
    %c0_473 = arith.constant 0 : index
    %1261 = vector.load %arg39[%c1_471, %c0_472, %c0_473] : memref<2x32x32xf32, #tpu.memory_space<vmem>>, vector<1x32x32xf32>
    %1262 = vector.shape_cast %1261 : vector<1x32x32xf32> to vector<32x32xf32>
    %cst_474 = arith.constant dense<0.000000e+00> : vector<32x32xf32>
    %1263 = tpu.matmul %1260, %1262, %cst_474 {dimension_numbers = #tpu.dot_dimension_numbers<[1], [0], [0], [1], [0, 0, 1, 1], [], []>} : vector<32x32xf32>, vector<32x32xf32>, vector<32x32xf32> -> vector<32x32xf32>
    %c1_475 = arith.constant 1 : index
    %c0_476 = arith.constant 0 : index
    %c0_477 = arith.constant 0 : index
    %1264 = vector.load %arg40[%c1_475, %c0_476, %c0_477] : memref<2x1x32xf32, #tpu.memory_space<vmem>>, vector<1x1x32xf32>
    %1265 = vector.shape_cast %1264 : vector<1x1x32xf32> to vector<1x32xf32>
    %1266 = vector.broadcast %1265 : vector<1x32xf32> to vector<32x32xf32>
    %1267 = arith.addf %1263, %1266 : vector<32x32xf32>
    %cst_478 = arith.constant 0.000000e+00 : f32
    %1268 = vector.broadcast %cst_478 : f32 to vector<32x32xf32>
    %1269 = arith.maximumf %1267, %1268 : vector<32x32xf32>
    %c1_479 = arith.constant 1 : index
    %c0_480 = arith.constant 0 : index
    %c0_481 = arith.constant 0 : index
    %1270 = vector.load %arg41[%c1_479, %c0_480, %c0_481] : memref<2x32x32xf32, #tpu.memory_space<vmem>>, vector<1x32x32xf32>
    %1271 = vector.shape_cast %1270 : vector<1x32x32xf32> to vector<32x32xf32>
    %cst_482 = arith.constant dense<0.000000e+00> : vector<32x32xf32>
    %1272 = tpu.matmul %1269, %1271, %cst_482 {dimension_numbers = #tpu.dot_dimension_numbers<[1], [0], [0], [1], [0, 0, 1, 1], [], []>} : vector<32x32xf32>, vector<32x32xf32>, vector<32x32xf32> -> vector<32x32xf32>
    %c1_483 = arith.constant 1 : index
    %c0_484 = arith.constant 0 : index
    %c0_485 = arith.constant 0 : index
    %1273 = vector.load %arg42[%c1_483, %c0_484, %c0_485] : memref<2x1x32xf32, #tpu.memory_space<vmem>>, vector<1x1x32xf32>
    %1274 = vector.shape_cast %1273 : vector<1x1x32xf32> to vector<1x32xf32>
    %1275 = vector.broadcast %1274 : vector<1x32xf32> to vector<32x32xf32>
    %1276 = arith.addf %1272, %1275 : vector<32x32xf32>
    %1277 = arith.addf %1260, %1276 : vector<32x32xf32>
    %c1_486 = arith.constant 1 : index
    %c0_487 = arith.constant 0 : index
    %c0_488 = arith.constant 0 : index
    %1278 = vector.load %arg43[%c1_486, %c0_487, %c0_488] : memref<2x1x32xf32, #tpu.memory_space<vmem>>, vector<1x1x32xf32>
    %1279 = vector.shape_cast %1278 : vector<1x1x32xf32> to vector<1x32xf32>
    %c1_489 = arith.constant 1 : index
    %c0_490 = arith.constant 0 : index
    %c0_491 = arith.constant 0 : index
    %1280 = vector.load %arg44[%c1_489, %c0_490, %c0_491] : memref<2x1x32xf32, #tpu.memory_space<vmem>>, vector<1x1x32xf32>
    %1281 = vector.shape_cast %1280 : vector<1x1x32xf32> to vector<1x32xf32>
    %cst_492 = arith.constant dense<0.000000e+00> : vector<32xf32>
    %1282 = vector.multi_reduction <add>, %1277, %cst_492 [1] : vector<32x32xf32> to vector<32xf32>
    %1283 = vector.shape_cast %1282 : vector<32xf32> to vector<32x1xf32>
    %cst_493 = arith.constant 3.200000e+01 : f32
    %1284 = vector.broadcast %cst_493 : f32 to vector<32x1xf32>
    %1285 = arith.divf %1283, %1284 : vector<32x1xf32>
    %1286 = vector.broadcast %1285 : vector<32x1xf32> to vector<32x32xf32>
    %1287 = arith.subf %1277, %1286 : vector<32x32xf32>
    %1288 = arith.mulf %1287, %1287 : vector<32x32xf32>
    %cst_494 = arith.constant dense<0.000000e+00> : vector<32xf32>
    %1289 = vector.multi_reduction <add>, %1288, %cst_494 [1] : vector<32x32xf32> to vector<32xf32>
    %1290 = vector.shape_cast %1289 : vector<32xf32> to vector<32x1xf32>
    %cst_495 = arith.constant 3.200000e+01 : f32
    %1291 = vector.broadcast %cst_495 : f32 to vector<32x1xf32>
    %1292 = arith.divf %1290, %1291 : vector<32x1xf32>
    %1293 = vector.broadcast %1285 : vector<32x1xf32> to vector<32x32xf32>
    %1294 = arith.subf %1277, %1293 : vector<32x32xf32>
    %cst_496 = arith.constant 9.99999974E-6 : f32
    %1295 = vector.broadcast %cst_496 : f32 to vector<32x1xf32>
    %1296 = arith.addf %1292, %1295 : vector<32x1xf32>
    %1297 = math.rsqrt %1296 : vector<32x1xf32>
    %1298 = vector.broadcast %1297 : vector<32x1xf32> to vector<32x32xf32>
    %1299 = arith.mulf %1294, %1298 : vector<32x32xf32>
    %1300 = vector.broadcast %1279 : vector<1x32xf32> to vector<32x32xf32>
    %1301 = arith.mulf %1299, %1300 : vector<32x32xf32>
    %1302 = vector.broadcast %1281 : vector<1x32xf32> to vector<32x32xf32>
    %1303 = arith.addf %1301, %1302 : vector<32x32xf32>
    %c0_497 = arith.constant 0 : index
    %c0_498 = arith.constant 0 : index
    %c0_499 = arith.constant 0 : index
    %1304 = vector.load %arg14[%c0_497, %c0_498, %c0_499] : memref<2x9x32xf32, #tpu.memory_space<vmem>>, vector<1x9x32xf32>
    %1305 = vector.shape_cast %1304 : vector<1x9x32xf32> to vector<9x32xf32>
    %cst_500 = arith.constant 0.000000e+00 : f32
    %1306 = vector.broadcast %cst_500 : f32 to vector<7x32xf32>
    %1307 = tpu.concatenate %1305, %1306 in 0 : vector<9x32xf32>, vector<7x32xf32> -> vector<16x32xf32>
    %c1_501 = arith.constant 1 : index
    %c0_502 = arith.constant 0 : index
    %c0_503 = arith.constant 0 : index
    %1308 = vector.load %arg14[%c1_501, %c0_502, %c0_503] : memref<2x9x32xf32, #tpu.memory_space<vmem>>, vector<1x9x32xf32>
    %1309 = vector.shape_cast %1308 : vector<1x9x32xf32> to vector<9x32xf32>
    %cst_504 = arith.constant 0.000000e+00 : f32
    %1310 = vector.broadcast %cst_504 : f32 to vector<7x32xf32>
    %1311 = tpu.concatenate %1309, %1310 in 0 : vector<9x32xf32>, vector<7x32xf32> -> vector<16x32xf32>
    %c0_505 = arith.constant 0 : index
    %c0_506 = arith.constant 0 : index
    %1312 = vector.load %arg13[%c0_505, %c0_506] : memref<1x32xf32, #tpu.memory_space<vmem>>, vector<1x32xf32>
    %1313 = tpu.concatenate %1307, %1311 in 0 : vector<16x32xf32>, vector<16x32xf32> -> vector<32x32xf32>
    %1314 = vector.broadcast %1312 : vector<1x32xf32> to vector<32x32xf32>
    %1315 = arith.mulf %1314, %1313 : vector<32x32xf32>
    %1316 = arith.subf %1303, %1315 : vector<32x32xf32>
    %c0_507 = arith.constant 0 : index
    %c0_508 = arith.constant 0 : index
    %1317 = vector.load %arg45[%c0_507, %c0_508] : memref<32x16xf32, #tpu.memory_space<vmem>>, vector<32x16xf32>
    %cst_509 = arith.constant dense<0.000000e+00> : vector<32x16xf32>
    %1318 = tpu.matmul %1316, %1317, %cst_509 {dimension_numbers = #tpu.dot_dimension_numbers<[1], [0], [0], [1], [0, 0, 1, 1], [], []>} : vector<32x32xf32>, vector<32x16xf32>, vector<32x16xf32> -> vector<32x16xf32>
    %c0_510 = arith.constant 0 : index
    %c0_511 = arith.constant 0 : index
    %1319 = vector.load %arg46[%c0_510, %c0_511] : memref<1x16xf32, #tpu.memory_space<vmem>>, vector<1x16xf32>
    %1320 = vector.broadcast %1319 : vector<1x16xf32> to vector<32x16xf32>
    %1321 = arith.addf %1318, %1320 : vector<32x16xf32>
    %cst_512 = arith.constant 0.000000e+00 : f32
    %1322 = vector.broadcast %cst_512 : f32 to vector<32x16xf32>
    %1323 = arith.maximumf %1321, %1322 : vector<32x16xf32>
    %c0_513 = arith.constant 0 : index
    %c0_514 = arith.constant 0 : index
    %1324 = vector.load %arg47[%c0_513, %c0_514] : memref<16x128xf32, #tpu.memory_space<vmem>>, vector<16x128xf32>
    %cst_515 = arith.constant dense<0.000000e+00> : vector<32x128xf32>
    %1325 = tpu.matmul %1323, %1324, %cst_515 {dimension_numbers = #tpu.dot_dimension_numbers<[1], [0], [0], [1], [0, 0, 1, 1], [], []>} : vector<32x16xf32>, vector<16x128xf32>, vector<32x128xf32> -> vector<32x128xf32>
    %c0_516 = arith.constant 0 : index
    %c0_517 = arith.constant 0 : index
    %1326 = vector.load %arg48[%c0_516, %c0_517] : memref<1x128xf32, #tpu.memory_space<vmem>>, vector<1x128xf32>
    %1327 = vector.broadcast %1326 : vector<1x128xf32> to vector<32x128xf32>
    %1328 = arith.addf %1325, %1327 : vector<32x128xf32>
    %1329 = vector.extract_strided_slice %1328 {offsets = [0, 0], sizes = [9, 128], strides = [1, 1]} : vector<32x128xf32> to vector<9x128xf32>
    %c0_518 = arith.constant 0 : index
    %c0_519 = arith.constant 0 : index
    %c0_520 = arith.constant 0 : index
    %1330 = vector.load %arg49[%c0_518, %c0_519, %c0_520] : memref<2x9x128xf32, #tpu.memory_space<vmem>>, vector<1x9x128xf32>
    %1331 = vector.shape_cast %1330 : vector<1x9x128xf32> to vector<9x128xf32>
    %1332 = vector.shape_cast %1329 : vector<9x128xf32> to vector<1x9x128xf32>
    tpu.vector_store %arg49[%c0_518, %c0_519, %c0_520], %1332 {strides = array<i32>} : memref<2x9x128xf32, #tpu.memory_space<vmem>>, vector<1x9x128xf32>,
    %1333 = vector.extract_strided_slice %1328 {offsets = [16, 0], sizes = [9, 128], strides = [1, 1]} : vector<32x128xf32> to vector<9x128xf32>
    %c1_521 = arith.constant 1 : index
    %c0_522 = arith.constant 0 : index
    %c0_523 = arith.constant 0 : index
    %1334 = vector.load %arg49[%c1_521, %c0_522, %c0_523] : memref<2x9x128xf32, #tpu.memory_space<vmem>>, vector<1x9x128xf32>
    %1335 = vector.shape_cast %1334 : vector<1x9x128xf32> to vector<9x128xf32>
    %1336 = vector.shape_cast %1333 : vector<9x128xf32> to vector<1x9x128xf32>
    tpu.vector_store %arg49[%c1_521, %c0_522, %c0_523], %1336 {strides = array<i32>} : memref<2x9x128xf32, #tpu.memory_space<vmem>>, vector<1x9x128xf32>,
    return
  }
}

</mosaic_0001>

<bundles_post_ra>
// kernel: _lambda_.1
= control target key start
LH: loop header
LB: loop body
LE: loop exit
PB: predicated region body
PF: predicated region fallthrough
CT: control target
= control target key end

     0   :  { %s17149_s6 = smov 1   ;;  %s17150_s10 = smov 2   ;;  %s19540_s0 = inlined_call_operand.smem [shape: u32[50], index: -1, kind: input, shape index: {}] }
   0x1   :  { %s17260_s5 = sld [smem:[%s19540_s0]]   ;;  %s17151_s14 = smov 3  }
   0x2   :  { %s17265_s9 = sld [smem:[%s19540_s0 + %s17149_s6]]   ;;  %s17152_s18 = smov 4  }
   0x3   :  { %s17270_s13 = sld [smem:[%s19540_s0 + %s17150_s10]]   ;;  %s17153_s22 = smov 5  }
   0x4   :  { %s17275_s17 = sld [smem:[%s19540_s0 + %s17151_s14]]   ;;  %s17154_s26 = smov 6  }
   0x5   :  { %s17280_s21 = sld [smem:[%s19540_s0 + %s17152_s18]]   ;;  %s17155_s30 = smov 7  }
   0x6   :  { %s17285_s25 = sld [smem:[%s19540_s0 + %s17153_s22]]   ;;  %s17156_s4 = smov 8  }
   0x7   :  { %19571 = sst [smem:[#allocation76_spill]] %s17260_s5  ;;  %s17157_s10 = smov 9  }
   0x8   :  { %19572 = sst [smem:[#allocation77_spill]] %s17265_s9  ;;  %s17158_s15 = smov 10  }
   0x9   :  { %19573 = sst [smem:[#allocation78_spill]] %s17270_s13  ;;  %s17159_s20 = smov 11  }
   0xa   :  { %s17290_s29 = sld [smem:[%s19540_s0 + %s17154_s26]]   ;;  %s17160_s26 = smov 12  }
   0xb   :  { %19574 = sst [smem:[#allocation79_spill]] %s17280_s21  ;;  %s17161_s1 = smov 13  }
   0xc   :  { %19575 = sst [smem:[#allocation80_spill]] %s17285_s25  ;;  %s17162_s7 = smov 14  }
   0xd   :  { %s17295_s3 = sld [smem:[%s19540_s0 + %s17155_s30]]   ;;  %s17164_s22 = smov 16  }
   0xe   :  { %s17300_s8 = sld [smem:[%s19540_s0 + %s17156_s4]]   ;;  %s17165_s28 = smov 17  }
   0xf   :  { %s17305_s14 = sld [smem:[%s19540_s0 + %s17157_s10]]  }
  0x10   :  { %s17310_s19 = sld [smem:[%s19540_s0 + %s17158_s15]]   ;;  %s17163_s15 = smov 15  }
  0x11   :  { %s17315_s24 = sld [smem:[%s19540_s0 + %s17159_s20]]  }
  0x12   :  { %s17320_s30 = sld [smem:[%s19540_s0 + %s17160_s26]]  }
  0x13   :  { %19576 = sst [smem:[#allocation81_spill]] %s17295_s3 }
  0x14   :  { %s17325_s6 = sld [smem:[%s19540_s0 + %s17161_s1]]  }
  0x15   :  { %19577 = sst [smem:[#allocation82_spill]] %s17305_s14 }
  0x16   :  { %19578 = sst [smem:[#allocation83_spill]] %s17310_s19 }
  0x17   :  { %s17330_s12 = sld [smem:[%s19540_s0 + %s17162_s7]]   ;;  %s17166_s7 = smov 18  }
  0x18   :  { %19579 = sst [smem:[#allocation84_spill]] %s17320_s30 }
  0x19   :  { %s17335_s20 = sld [smem:[%s19540_s0 + %s17163_s15]]   ;;  %s17167_s15 = smov 19  }
  0x1a   :  { %19580 = sst [smem:[#allocation85_spill]] %s17325_s6 }
  0x1b   :  { %s17340_s27 = sld [smem:[%s19540_s0 + %s17164_s22]]   ;;  %s17168_s22 = smov 20  }
  0x1c   :  { %s17345_s4 = sld [smem:[%s19540_s0 + %s17165_s28]]   ;;  %s17169_s28 = smov 21  }
  0x1d   :  { %19581 = sst [smem:[#allocation86_spill]] %s17330_s12 }
  0x1e   :  { %s17350_s12 = sld [smem:[%s19540_s0 + %s17166_s7]]   ;;  %s17170_s7 = smov 22  }
  0x1f   :  { %19582 = sst [smem:[#allocation87_spill]] %s17335_s20 }
  0x20   :  { %s17355_s30 = sld [smem:[%s19540_s0 + %s17167_s15]]   ;;  %s17171_s15 = smov 23  }
  0x21   :  { %s17360_s19 = sld [smem:[%s19540_s0 + %s17168_s22]]   ;;  %s17172_s22 = smov 24  }
  0x22   :  { %19583 = sst [smem:[#allocation88_spill]] %s17345_s4 }
  0x23   :  { %s17365_s4 = sld [smem:[%s19540_s0 + %s17169_s28]]   ;;  %s17173_s28 = smov 25  }
  0x24   :  { %19584 = sst [smem:[#allocation89_spill]] %s17350_s12 }
  0x25   :  { %s17370_s9 = sld [smem:[%s19540_s0 + %s17170_s7]]   ;;  %s17174_s7 = smov 26  }
  0x26   :  { %s17375_s20 = sld [smem:[%s19540_s0 + %s17171_s15]]   ;;  %s17175_s15 = smov 27  }
  0x27   :  { %19585 = sst [smem:[#allocation90_spill]] %s17360_s19 }
  0x28   :  { %s17380_s21 = sld [smem:[%s19540_s0 + %s17172_s22]]   ;;  %s17176_s22 = smov 28  }
  0x29   :  { %19586 = sst [smem:[#allocation91_spill]] %s17365_s4 }
  0x2a   :  { %s17385_s4 = sld [smem:[%s19540_s0 + %s17173_s28]]   ;;  %s17177_s28 = smov 29  }
  0x2b   :  { %s17390_s5 = sld [smem:[%s19540_s0 + %s17174_s7]]   ;;  %s17178_s7 = smov 30  }
  0x2c   :  { %19587 = sst [smem:[#allocation92_spill]] %s17375_s20 }
  0x2d   :  { %s17395_s20 = sld [smem:[%s19540_s0 + %s17175_s15]]   ;;  %s17179_s15 = smov 31  }
  0x2e   :  { %s17400_s19 = sld [smem:[%s19540_s0 + %s17176_s22]]   ;;  %s17180_s22 = smov 32  }
  0x2f   :  { %s17410_s12 = sld [smem:[%s19540_s0 + %s17178_s7]]   ;;  %s17182_s7 = smov 34  }
  0x30   :  { %19588 = sst [smem:[#allocation93_spill]] %s17385_s4 }
  0x31   :  { %s17405_s4 = sld [smem:[%s19540_s0 + %s17177_s28]]   ;;  %s17181_s28 = smov 33  }
  0x32   :  { %s17420_s6 = sld [smem:[%s19540_s0 + %s17180_s22]]   ;;  %s17184_s22 = smov 36  }
  0x33   :  { %19589 = sst [smem:[#allocation94_spill]] %s17395_s20 }
  0x34   :  { %s17415_s20 = sld [smem:[%s19540_s0 + %s17179_s15]]   ;;  %s17183_s15 = smov 35  }
  0x35   :  { %s17430_s14 = sld [smem:[%s19540_s0 + %s17182_s7]]   ;;  %s17186_s7 = smov 38  }
  0x36   :  { %s17440_s3 = sld [smem:[%s19540_s0 + %s17184_s22]]   ;;  %s17188_s22 = smov 40  }
  0x37   :  { %19590 = sst [smem:[#allocation95_spill]] %s17405_s4 }
  0x38   :  { %s17425_s4 = sld [smem:[%s19540_s0 + %s17181_s28]]   ;;  %s17185_s28 = smov 37  }
  0x39   :  { %s17450_s25 = sld [smem:[%s19540_s0 + %s17186_s7]]   ;;  %s17190_s7 = smov 42  }
  0x3a   :  { %19591 = sst [smem:[#allocation96_spill]] %s17415_s20 }
  0x3b   :  { %s17435_s20 = sld [smem:[%s19540_s0 + %s17183_s15]]   ;;  %s17187_s15 = smov 39  }
  0x3c   :  { %s17460_s13 = sld [smem:[%s19540_s0 + %s17188_s22]]   ;;  %s17192_s22 = smov 44  }
  0x3e   :  { %19592 = sst [smem:[#allocation97_spill]] %s17425_s4 }
  0x3f   :  { %s17445_s4 = sld [smem:[%s19540_s0 + %s17185_s28]]   ;;  %s17189_s28 = smov 41  }
  0x40   :  { %19595 = sst [smem:[#allocation100_spill]] %s17450_s25 }
  0x41   :  { %19593 = sst [smem:[#allocation98_spill]] %s17435_s20 }
  0x42   :  { %s17455_s20 = sld [smem:[%s19540_s0 + %s17187_s15]]   ;;  %s17191_s15 = smov 43  }
  0x43   :  { %19597 = sst [smem:[#allocation102_spill]] %s17460_s13 }
  0x44   :  { %s17470_s25 = sld [smem:[%s19540_s0 + %s17190_s7]]   ;;  %s17194_s7 = smov 46  }
  0x45   :  { %19594 = sst [smem:[#allocation99_spill]] %s17445_s4 }
  0x46   :  { %s17465_s4 = sld [smem:[%s19540_s0 + %s17189_s28]]   ;;  %s17193_s28 = smov 45  }
  0x47   :  { %s17480_s13 = sld [smem:[%s19540_s0 + %s17192_s22]]   ;;  %s17196_s22 = smov 48  }
  0x48   :  { %19596 = sst [smem:[#allocation101_spill]] %s17455_s20 }
  0x49   :  { %s17475_s20 = sld [smem:[%s19540_s0 + %s17191_s15]]   ;;  %s17195_s15 = smov 47  }
  0x4a   :  { %19599 = sst [smem:[#allocation104_spill]] %s17470_s25 }
  0x4b   :  { %s17490_s25 = sld [smem:[%s19540_s0 + %s17194_s7]]  }
  0x4c   :  { %19598 = sst [smem:[#allocation103_spill]] %s17465_s4 }
  0x4d   :  { %19601 = sst [smem:[#allocation106_spill]] %s17480_s13 }
  0x4e   :  { %s17485_s4 = sld [smem:[%s19540_s0 + %s17193_s28]]   ;;  %s17197_s28 = smov 49  }
  0x4f   :  { %19600 = sst [smem:[#allocation105_spill]] %s17475_s20 }
  0x50   :  { %s17495_s20 = sld [smem:[%s19540_s0 + %s17195_s15]]  }
  0x51   :  { %s17500_s13 = sld [smem:[%s19540_s0 + %s17196_s22]]  }
  0x54   :  { %19602 = sst [smem:[#allocation107_spill]] %s17485_s4 }
  0x55   :  { %s17505_s4 = sld [smem:[%s19540_s0 + %s17197_s28]]  }
  0x56   :  { %104 = vsyncpa [#allocation3], 0 }
  0x57   :  { %105 = vsyncpa [#allocation5], 0 }
  0x58   :  { %106 = vsyncpa [#allocation8], 0 }
  0x59   :  { %107 = vsyncpa [#allocation11], 0 }
  0x5a   :  { %108 = vsyncpa [#allocation14], 0 }
  0x5b   :  { %109 = vsyncpa [#allocation17], 0 }
  0x5c   :  { %110 = vsyncpa [#allocation20], 0 }
  0x5d   :  { %111 = vsyncpa [#allocation23], 0 }
  0x5e   :  { %112 = vsyncpa [#allocation26], 0 }
  0x5f   :  { %113 = vsyncpa [#allocation29], 0 }
  0x60   :  { %114 = vsyncpa [#allocation32], 0 }
  0x61   :  { %115 = vsyncpa [#allocation35], 0 }
  0x62   :  { %116 = vsyncpa [#allocation38], 0 }
  0x63   :  { %117 = vsyncpa [#allocation41], 0 }
  0x64   :  { %118 = vsyncpa [#allocation44], 0 }
  0x65   :  { %119 = vsyncpa [#allocation47], 0 }
  0x66   :  { %120 = vsyncpa [#allocation50], 0 }
  0x67   :  { %121 = vsyncpa [#allocation53], 0 }
  0x68   :  { %122 = vsyncpa [#allocation56], 0  ;;  %s17198_s0 = smov [#allocation4]   ;;  %s17199_s10 = smov [#allocation7]  }
  0x69   :  { %s143_s7 = sshll.u32 %s17198_s0, 4  ;;  %s165_s11 = sshll.u32 %s17199_s10, 4  ;;  %s144_s7 = int_to_ptr.vmem [resolvable:$true] %s143_s7  ;;  %s166_s11 = int_to_ptr.vmem [resolvable:$true] %s165_s11 }
  0x6a   :  { %s16319_s15 = scalar_lea.hbm %s17275_s17, 16 }
  0x6b   :  { %p16320_p0 = scmp.ne.s32.totalorder %s17275_s17, %s16319_s15  ;;  %p16323_p1 = scmp.lt.u32.totalorder %s16319_s15, %s17275_s17 }
  0x6d   :  { %p16325_p2 = pnand %p16323_p1, %p16320_p0 }
  0x6f   :  { %16328 = shalt.err (!%p16325_p2)
}
  0x70   :  { %s16329_s16 = scalar_lea.vmem %s144_s7, 16  ;;  %s16333_s18 = scalar_lea.vmem %s144_s7, 32 }
  0x71   :  { %p16330_p3 = scmp.ne.s32.totalorder %s144_s7, %s16329_s16  ;;  %p16334_p4 = scmp.lt.s32.totalorder %s144_s7, %s144_s7 }
  0x72   :  { %p16335_p5 = scmp.lt.s32.totalorder %s16333_s18, %s16329_s16 }
  0x74   :  { %p16336_p6 = por %p16335_p5, %p16334_p4 }
  0x76   :  { %p16337_p7 = pnand %p16336_p6, %p16330_p3 }
  0x78   :  { %16340 = shalt.err (!%p16337_p7)
}
  0x79   :  { %146 = dma.hbm_to_vmem [thread:$0]  %s17275_s17, 16, %s144_s7, [#allocation5]  }
  0x7a   :  { %s16341_s22 = scalar_lea.hbm %s17290_s29, 64 }
  0x7b   :  { %p16342_p8 = scmp.ne.s32.totalorder %s17290_s29, %s16341_s22  ;;  %p16345_p9 = scmp.lt.u32.totalorder %s16341_s22, %s17290_s29 }
  0x7d   :  { %p16347_p10 = pnand %p16345_p9, %p16342_p8 }
  0x7f   :  { %16350 = shalt.err (!%p16347_p10)
}
  0x80   :  { %s16351_s23 = scalar_lea.vmem %s166_s11, 64  ;;  %p16356_p12 = scmp.lt.s32.totalorder %s166_s11, %s166_s11 }
  0x81   :  { %p16352_p11 = scmp.ne.s32.totalorder %s166_s11, %s16351_s23  ;;  %p16357_p13 = scmp.lt.s32.totalorder %s16351_s23, %s16351_s23 }
  0x83   :  { %p16358_p0 = por %p16357_p13, %p16356_p12 }
  0x85   :  { %p16359_p1 = pnand %p16358_p0, %p16352_p11 }
  0x87   :  { %16362 = shalt.err (!%p16359_p1)
}
  0x88   :  { %168 = dma.hbm_to_vmem [thread:$0]  %s17290_s29, 64, %s166_s11, [#allocation8]  }
  0x89   :  { %s17200_s26 = smov [#allocation10]   ;;  %s16363_s17 = scalar_lea.hbm %s17300_s8, 512 }
  0x8a   :  { %s184_s28 = sshll.u32 %s17200_s26, 4  ;;  %p16364_p2 = scmp.ne.s32.totalorder %s17300_s8, %s16363_s17  ;;  %s185_s28 = int_to_ptr.vmem [resolvable:$true] %s184_s28 }
  0x8b   :  { %p16367_p3 = scmp.lt.u32.totalorder %s16363_s17, %s17300_s8 }
  0x8d   :  { %p16369_p4 = pnand %p16367_p3, %p16364_p2 }
  0x8f   :  { %16372 = shalt.err (!%p16369_p4)
}
  0x90   :  { %s16373_s1 = scalar_lea.vmem %s185_s28, 512  ;;  %p16378_p6 = scmp.lt.s32.totalorder %s185_s28, %s185_s28 }
  0x91   :  { %p16374_p5 = scmp.ne.s32.totalorder %s185_s28, %s16373_s1  ;;  %p16379_p7 = scmp.lt.s32.totalorder %s16373_s1, %s16373_s1 }
  0x93   :  { %p16380_p8 = por %p16379_p7, %p16378_p6 }
  0x95   :  { %p16381_p9 = pnand %p16380_p8, %p16374_p5 }
  0x97   :  { %16384 = shalt.err (!%p16381_p9)
}
  0x98   :  { %s17201_s2 = smov 128   ;;  %s17202_s29 = smov 8  }
  0x99   :  { %190 = dma.hbm_to_vmem [thread:$0]  %s17300_s8, 512, %s185_s28, [#allocation11], %s17201_s2, %s17201_s2, %s17202_s29  }
  0x9a   :  { %s17203_s0 = smov [#allocation13]   ;;  %s17204_s10 = smov [#allocation16]  }
  0x9b   :  { %s208_s7 = sshll.u32 %s17203_s0, 4  ;;  %s236_s11 = sshll.u32 %s17204_s10, 4  ;;  %s209_s7 = int_to_ptr.vmem [resolvable:$true] %s208_s7  ;;  %s237_s11 = int_to_ptr.vmem [resolvable:$true] %s236_s11 }
  0x9c   :  { %s16385_s15 = scalar_lea.hbm %s17315_s24, 256 }
  0x9d   :  { %p16386_p10 = scmp.ne.s32.totalorder %s17315_s24, %s16385_s15  ;;  %p16389_p11 = scmp.lt.u32.totalorder %s16385_s15, %s17315_s24 }
  0x9f   :  { %p16391_p12 = pnand %p16389_p11, %p16386_p10 }
  0xa1   :  { %16394 = shalt.err (!%p16391_p12)
}
  0xa2   :  { %s16395_s16 = scalar_lea.vmem %s209_s7, 256  ;;  %p16400_p0 = scmp.lt.s32.totalorder %s209_s7, %s209_s7 }
  0xa3   :  { %p16396_p13 = scmp.ne.s32.totalorder %s209_s7, %s16395_s16  ;;  %p16401_p1 = scmp.lt.s32.totalorder %s16395_s16, %s16395_s16 }
  0xa5   :  { %p16402_p2 = por %p16401_p1, %p16400_p0 }
  0xa7   :  { %p16403_p3 = pnand %p16402_p2, %p16396_p13 }
  0xa9   :  { %16406 = shalt.err (!%p16403_p3)
}
  0xaa   :  { %214 = dma.hbm_to_vmem [thread:$0]  %s17315_s24, 256, %s209_s7, [#allocation14], %s17201_s2, %s17201_s2, %s17202_s29  }
  0xab   :  { %s16407_s8 = scalar_lea.hbm %s17340_s27, 32 }
  0xac   :  { %p16408_p4 = scmp.ne.s32.totalorder %s17340_s27, %s16407_s8  ;;  %p16411_p5 = scmp.lt.u32.totalorder %s16407_s8, %s17340_s27 }
  0xae   :  { %p16413_p6 = pnand %p16411_p5, %p16408_p4 }
  0xb0   :  { %16416 = shalt.err (!%p16413_p6)
}
  0xb1   :  { %s16417_s18 = scalar_lea.vmem %s237_s11, 32  ;;  %p16422_p8 = scmp.lt.s32.totalorder %s237_s11, %s237_s11 }
  0xb2   :  { %p16418_p7 = scmp.ne.s32.totalorder %s237_s11, %s16417_s18  ;;  %p16423_p9 = scmp.lt.s32.totalorder %s16417_s18, %s16417_s18 }
  0xb4   :  { %p16424_p10 = por %p16423_p9, %p16422_p8 }
  0xb6   :  { %p16425_p11 = pnand %p16424_p10, %p16418_p7 }
  0xb8   :  { %16428 = shalt.err (!%p16425_p11)
}
  0xb9   :  { %s17205_s22 = smov 16   ;;  %s17206_s23 = smov 1  }
  0xba   :  { %242 = dma.hbm_to_vmem [thread:$0]  %s17340_s27, 32, %s237_s11, [#allocation17], %s17205_s22, %s17205_s22, %s17206_s23  }
  0xbb   :  { %s17207_s24 = smov [#allocation19]   ;;  %s17208_s28 = smov [#allocation22]  }
  0xbc   :  { %s262_s26 = sshll.u32 %s17207_s24, 4  ;;  %s288_s17 = sshll.u32 %s17208_s28, 4  ;;  %s263_s26 = int_to_ptr.vmem [resolvable:$true] %s262_s26  ;;  %s289_s17 = int_to_ptr.vmem [resolvable:$true] %s288_s17 }
  0xbd   :  { %s16429_s1 = scalar_lea.hbm %s17355_s30, 32 }
  0xbe   :  { %p16430_p12 = scmp.ne.s32.totalorder %s17355_s30, %s16429_s1  ;;  %p16433_p13 = scmp.lt.u32.totalorder %s16429_s1, %s17355_s30 }
  0xc0   :  { %p16435_p0 = pnand %p16433_p13, %p16430_p12 }
  0xc2   :  { %16438 = shalt.err (!%p16435_p0)
}
  0xc3   :  { %s16439_s0 = scalar_lea.vmem %s263_s26, 32  ;;  %p16444_p2 = scmp.lt.s32.totalorder %s263_s26, %s263_s26 }
  0xc4   :  { %p16440_p1 = scmp.ne.s32.totalorder %s263_s26, %s16439_s0  ;;  %p16445_p3 = scmp.lt.s32.totalorder %s16439_s0, %s16439_s0 }
  0xc6   :  { %p16446_p4 = por %p16445_p3, %p16444_p2 }
  0xc8   :  { %p16447_p5 = pnand %p16446_p4, %p16440_p1 }
  0xca   :  { %16450 = shalt.err (!%p16447_p5)
}
  0xcb   :  { %268 = dma.hbm_to_vmem [thread:$0]  %s17355_s30, 32, %s263_s26, [#allocation20], %s17205_s22, %s17205_s22, %s17206_s23  }
  0xcc   :  { %s16451_s27 = scalar_lea.hbm %s17370_s9, 32 }
  0xcd   :  { %p16452_p6 = scmp.ne.s32.totalorder %s17370_s9, %s16451_s27  ;;  %p16455_p7 = scmp.lt.u32.totalorder %s16451_s27, %s17370_s9 }
  0xcf   :  { %p16457_p8 = pnand %p16455_p7, %p16452_p6 }
  0xd1   :  { %16460 = shalt.err (!%p16457_p8)
}
  0xd2   :  { %s16461_s7 = scalar_lea.vmem %s289_s17, 32  ;;  %p16466_p10 = scmp.lt.s32.totalorder %s289_s17, %s289_s17 }
  0xd3   :  { %p16462_p9 = scmp.ne.s32.totalorder %s289_s17, %s16461_s7  ;;  %p16467_p11 = scmp.lt.s32.totalorder %s16461_s7, %s16461_s7 }
  0xd5   :  { %p16468_p12 = por %p16467_p11, %p16466_p10 }
  0xd7   :  { %p16469_p13 = pnand %p16468_p12, %p16462_p9 }
  0xd9   :  { %16472 = shalt.err (!%p16469_p13)
}
  0xda   :  { %294 = dma.hbm_to_vmem [thread:$0]  %s17370_s9, 32, %s289_s17, [#allocation23], %s17205_s22, %s17205_s22, %s17206_s23  }
  0xdb   :  { %s17209_s30 = smov [#allocation25]   ;;  %s17210_s11 = smov [#allocation28]  }
  0xdc   :  { %s312_s10 = sshll.u32 %s17209_s30, 4  ;;  %s336_s15 = sshll.u32 %s17210_s11, 4  ;;  %s313_s10 = int_to_ptr.vmem [resolvable:$true] %s312_s10  ;;  %s337_s15 = int_to_ptr.vmem [resolvable:$true] %s336_s15 }
  0xdd   :  { %s16473_s16 = scalar_lea.hbm %s17380_s21, 32 }
  0xde   :  { %p16474_p0 = scmp.ne.s32.totalorder %s17380_s21, %s16473_s16  ;;  %p16477_p1 = scmp.lt.u32.totalorder %s16473_s16, %s17380_s21 }
  0xe0   :  { %p16479_p2 = pnand %p16477_p1, %p16474_p0 }
  0xe2   :  { %16482 = shalt.err (!%p16479_p2)
}
  0xe3   :  { %s16483_s8 = scalar_lea.vmem %s313_s10, 32  ;;  %p16488_p4 = scmp.lt.s32.totalorder %s313_s10, %s313_s10 }
  0xe4   :  { %p16484_p3 = scmp.ne.s32.totalorder %s313_s10, %s16483_s8  ;;  %p16489_p5 = scmp.lt.s32.totalorder %s16483_s8, %s16483_s8 }
  0xe6   :  { %p16490_p6 = por %p16489_p5, %p16488_p4 }
  0xe8   :  { %p16491_p7 = pnand %p16490_p6, %p16484_p3 }
  0xea   :  { %16494 = shalt.err (!%p16491_p7)
}
  0xeb   :  { %318 = dma.hbm_to_vmem [thread:$0]  %s17380_s21, 32, %s313_s10, [#allocation26], %s17205_s22, %s17205_s22, %s17206_s23  }
  0xec   :  { %s16495_s9 = scalar_lea.hbm %s17390_s5, 32 }
  0xed   :  { %p16496_p8 = scmp.ne.s32.totalorder %s17390_s5, %s16495_s9  ;;  %p16499_p9 = scmp.lt.u32.totalorder %s16495_s9, %s17390_s5 }
  0xef   :  { %p16501_p10 = pnand %p16499_p9, %p16496_p8 }
  0xf1   :  { %16504 = shalt.err (!%p16501_p10)
}
  0xf2   :  { %s16505_s18 = scalar_lea.vmem %s337_s15, 32  ;;  %p16510_p12 = scmp.lt.s32.totalorder %s337_s15, %s337_s15 }
  0xf3   :  { %p16506_p11 = scmp.ne.s32.totalorder %s337_s15, %s16505_s18  ;;  %p16511_p13 = scmp.lt.s32.totalorder %s16505_s18, %s16505_s18 }
  0xf5   :  { %p16512_p0 = por %p16511_p13, %p16510_p12 }
  0xf7   :  { %p16513_p1 = pnand %p16512_p0, %p16506_p11 }
  0xf9   :  { %16516 = shalt.err (!%p16513_p1)
}
  0xfa   :  { %342 = dma.hbm_to_vmem [thread:$0]  %s17390_s5, 32, %s337_s15, [#allocation29], %s17205_s22, %s17205_s22, %s17206_s23  }
  0xfb   :  { %s17211_s21 = smov [#allocation31]   ;;  %s17212_s26 = smov [#allocation34]  }
  0xfc   :  { %s360_s24 = sshll.u32 %s17211_s21, 4  ;;  %s384_s28 = sshll.u32 %s17212_s26, 4  ;;  %s361_s24 = int_to_ptr.vmem [resolvable:$true] %s360_s24  ;;  %s385_s28 = int_to_ptr.vmem [resolvable:$true] %s384_s28 }
  0xfd   :  { %s16517_s17 = scalar_lea.hbm %s17400_s19, 32 }
  0xfe   :  { %p16518_p2 = scmp.ne.s32.totalorder %s17400_s19, %s16517_s17  ;;  %p16521_p3 = scmp.lt.u32.totalorder %s16517_s17, %s17400_s19 }
 0x100   :  { %p16523_p4 = pnand %p16521_p3, %p16518_p2 }
 0x102   :  { %16526 = shalt.err (!%p16523_p4)
}
 0x103   :  { %s16527_s1 = scalar_lea.vmem %s361_s24, 32  ;;  %p16532_p6 = scmp.lt.s32.totalorder %s361_s24, %s361_s24 }
 0x104   :  { %p16528_p5 = scmp.ne.s32.totalorder %s361_s24, %s16527_s1  ;;  %p16533_p7 = scmp.lt.s32.totalorder %s16527_s1, %s16527_s1 }
 0x106   :  { %p16534_p8 = por %p16533_p7, %p16532_p6 }
 0x108   :  { %p16535_p9 = pnand %p16534_p8, %p16528_p5 }
 0x10a   :  { %16538 = shalt.err (!%p16535_p9)
}
 0x10b   :  { %366 = dma.hbm_to_vmem [thread:$0]  %s17400_s19, 32, %s361_s24, [#allocation32], %s17205_s22, %s17205_s22, %s17206_s23  }
 0x10c   :  { %s16539_s5 = scalar_lea.hbm %s17410_s12, 32 }
 0x10d   :  { %p16540_p10 = scmp.ne.s32.totalorder %s17410_s12, %s16539_s5  ;;  %p16543_p11 = scmp.lt.u32.totalorder %s16539_s5, %s17410_s12 }
 0x10f   :  { %p16545_p12 = pnand %p16543_p11, %p16540_p10 }
 0x111   :  { %16548 = shalt.err (!%p16545_p12)
}
 0x112   :  { %s16549_s0 = scalar_lea.vmem %s385_s28, 32  ;;  %p16554_p0 = scmp.lt.s32.totalorder %s385_s28, %s385_s28 }
 0x113   :  { %p16550_p13 = scmp.ne.s32.totalorder %s385_s28, %s16549_s0  ;;  %p16555_p1 = scmp.lt.s32.totalorder %s16549_s0, %s16549_s0 }
 0x115   :  { %p16556_p2 = por %p16555_p1, %p16554_p0 }
 0x117   :  { %p16557_p3 = pnand %p16556_p2, %p16550_p13 }
 0x119   :  { %16560 = shalt.err (!%p16557_p3)
}
 0x11a   :  { %390 = dma.hbm_to_vmem [thread:$0]  %s17410_s12, 32, %s385_s28, [#allocation35], %s17205_s22, %s17205_s22, %s17206_s23  }
 0x11b   :  { %s17213_s19 = smov [#allocation37]   ;;  %s17214_s7 = smov [#allocation40]  }
 0x11c   :  { %s408_s27 = sshll.u32 %s17213_s19, 4  ;;  %s432_s30 = sshll.u32 %s17214_s7, 4  ;;  %s409_s27 = int_to_ptr.vmem [resolvable:$true] %s408_s27  ;;  %s433_s30 = int_to_ptr.vmem [resolvable:$true] %s432_s30 }
 0x11d   :  { %s16561_s10 = scalar_lea.hbm %s17420_s6, 32 }
 0x11e   :  { %p16562_p4 = scmp.ne.s32.totalorder %s17420_s6, %s16561_s10  ;;  %p16565_p5 = scmp.lt.u32.totalorder %s16561_s10, %s17420_s6 }
 0x120   :  { %p16567_p6 = pnand %p16565_p5, %p16562_p4 }
 0x122   :  { %16570 = shalt.err (!%p16567_p6)
}
 0x123   :  { %s16571_s11 = scalar_lea.vmem %s409_s27, 32  ;;  %p16576_p8 = scmp.lt.s32.totalorder %s409_s27, %s409_s27 }
 0x124   :  { %p16572_p7 = scmp.ne.s32.totalorder %s409_s27, %s16571_s11  ;;  %p16577_p9 = scmp.lt.s32.totalorder %s16571_s11, %s16571_s11 }
 0x126   :  { %p16578_p10 = por %p16577_p9, %p16576_p8 }
 0x128   :  { %p16579_p11 = pnand %p16578_p10, %p16572_p7 }
 0x12a   :  { %16582 = shalt.err (!%p16579_p11)
}
 0x12b   :  { %414 = dma.hbm_to_vmem [thread:$0]  %s17420_s6, 32, %s409_s27, [#allocation38], %s17205_s22, %s17205_s22, %s17206_s23  }
 0x12c   :  { %s16583_s12 = scalar_lea.hbm %s17430_s14, 32 }
 0x12d   :  { %p16584_p12 = scmp.ne.s32.totalorder %s17430_s14, %s16583_s12  ;;  %p16587_p13 = scmp.lt.u32.totalorder %s16583_s12, %s17430_s14 }
 0x12f   :  { %p16589_p0 = pnand %p16587_p13, %p16584_p12 }
 0x131   :  { %16592 = shalt.err (!%p16589_p0)
}
 0x132   :  { %s16593_s15 = scalar_lea.vmem %s433_s30, 32  ;;  %p16598_p2 = scmp.lt.s32.totalorder %s433_s30, %s433_s30 }
 0x133   :  { %p16594_p1 = scmp.ne.s32.totalorder %s433_s30, %s16593_s15  ;;  %p16599_p3 = scmp.lt.s32.totalorder %s16593_s15, %s16593_s15 }
 0x135   :  { %p16600_p4 = por %p16599_p3, %p16598_p2 }
 0x137   :  { %p16601_p5 = pnand %p16600_p4, %p16594_p1 }
 0x139   :  { %16604 = shalt.err (!%p16601_p5)
}
 0x13a   :  { %438 = dma.hbm_to_vmem [thread:$0]  %s17430_s14, 32, %s433_s30, [#allocation41], %s17205_s22, %s17205_s22, %s17206_s23  }
 0x13b   :  { %s17215_s6 = smov [#allocation43]   ;;  %s17216_s8 = smov [#allocation46]  }
 0x13c   :  { %s456_s16 = sshll.u32 %s17215_s6, 4  ;;  %s480_s9 = sshll.u32 %s17216_s8, 4  ;;  %s457_s16 = int_to_ptr.vmem [resolvable:$true] %s456_s16  ;;  %s481_s9 = int_to_ptr.vmem [resolvable:$true] %s480_s9 }
 0x13d   :  { %s16605_s18 = scalar_lea.hbm %s17440_s3, 32 }
 0x13e   :  { %p16606_p6 = scmp.ne.s32.totalorder %s17440_s3, %s16605_s18  ;;  %p16609_p7 = scmp.lt.u32.totalorder %s16605_s18, %s17440_s3 }
 0x140   :  { %p16611_p8 = pnand %p16609_p7, %p16606_p6 }
 0x142   :  { %16614 = shalt.err (!%p16611_p8)
}
 0x143   :  { %s16615_s21 = scalar_lea.vmem %s457_s16, 32  ;;  %p16620_p10 = scmp.lt.s32.totalorder %s457_s16, %s457_s16 }
 0x144   :  { %p16616_p9 = scmp.ne.s32.totalorder %s457_s16, %s16615_s21  ;;  %p16621_p11 = scmp.lt.s32.totalorder %s16615_s21, %s16615_s21 }
 0x146   :  { %p16622_p12 = por %p16621_p11, %p16620_p10 }
 0x148   :  { %p16623_p13 = pnand %p16622_p12, %p16616_p9 }
 0x14a   :  { %16626 = shalt.err (!%p16623_p13)
}
 0x14b   :  { %s19603_s14 = sld [smem:[#allocation100_spill]] }
 0x14c   :  { %462 = dma.hbm_to_vmem [thread:$0]  %s17440_s3, 32, %s457_s16, [#allocation44], %s17205_s22, %s17205_s22, %s17206_s23  }
 0x151   :  { %s16627_s24 = scalar_lea.hbm %s19603_s14, 32 }
 0x152   :  { %p16628_p0 = scmp.ne.s32.totalorder %s19603_s14, %s16627_s24  ;;  %p16631_p1 = scmp.lt.u32.totalorder %s16627_s24, %s19603_s14 }
 0x154   :  { %p16633_p2 = pnand %p16631_p1, %p16628_p0 }
 0x156   :  { %16636 = shalt.err (!%p16633_p2)
}
 0x157   :  { %s16637_s26 = scalar_lea.vmem %s481_s9, 32  ;;  %p16642_p4 = scmp.lt.s32.totalorder %s481_s9, %s481_s9 }
 0x158   :  { %p16638_p3 = scmp.ne.s32.totalorder %s481_s9, %s16637_s26  ;;  %p16643_p5 = scmp.lt.s32.totalorder %s16637_s26, %s16637_s26 }
 0x15a   :  { %p16644_p6 = por %p16643_p5, %p16642_p4 }
 0x15c   :  { %p16645_p7 = pnand %p16644_p6, %p16638_p3 }
 0x15e   :  { %16648 = shalt.err (!%p16645_p7)
}
 0x15f   :  { %s19604_s28 = sld [smem:[#allocation102_spill]]  ;;  %s17217_s3 = smov [#allocation49]  }
 0x160   :  { %486 = dma.hbm_to_vmem [thread:$0]  %s19603_s14, 32, %s481_s9, [#allocation47], %s17205_s22, %s17205_s22, %s17206_s23  }
 0x161   :  { %s504_s17 = sshll.u32 %s17217_s3, 4  ;;  %s17218_s1 = smov [#allocation52]   ;;  %s505_s17 = int_to_ptr.vmem [resolvable:$true] %s504_s17 }
 0x162   :  { %s528_s5 = sshll.u32 %s17218_s1, 4  ;;  %s529_s5 = int_to_ptr.vmem [resolvable:$true] %s528_s5 }
 0x165   :  { %s16649_s0 = scalar_lea.hbm %s19604_s28, 32 }
 0x166   :  { %p16650_p8 = scmp.ne.s32.totalorder %s19604_s28, %s16649_s0  ;;  %p16653_p9 = scmp.lt.u32.totalorder %s16649_s0, %s19604_s28 }
 0x168   :  { %p16655_p10 = pnand %p16653_p9, %p16650_p8 }
 0x16a   :  { %16658 = shalt.err (!%p16655_p10)
}
 0x16b   :  { %s16659_s19 = scalar_lea.vmem %s505_s17, 32  ;;  %p16664_p12 = scmp.lt.s32.totalorder %s505_s17, %s505_s17 }
 0x16c   :  { %p16660_p11 = scmp.ne.s32.totalorder %s505_s17, %s16659_s19  ;;  %p16665_p13 = scmp.lt.s32.totalorder %s16659_s19, %s16659_s19 }
 0x16e   :  { %p16666_p0 = por %p16665_p13, %p16664_p12 }
 0x170   :  { %p16667_p1 = pnand %p16666_p0, %p16660_p11 }
 0x172   :  { %16670 = shalt.err (!%p16667_p1)
}
 0x173   :  { %s19605_s27 = sld [smem:[#allocation104_spill]] }
 0x174   :  { %510 = dma.hbm_to_vmem [thread:$0]  %s19604_s28, 32, %s505_s17, [#allocation50], %s17205_s22, %s17205_s22, %s17206_s23  }
 0x179   :  { %s16671_s7 = scalar_lea.hbm %s19605_s27, 32 }
 0x17a   :  { %p16672_p2 = scmp.ne.s32.totalorder %s19605_s27, %s16671_s7  ;;  %p16675_p3 = scmp.lt.u32.totalorder %s16671_s7, %s19605_s27 }
 0x17c   :  { %p16677_p4 = pnand %p16675_p3, %p16672_p2 }
 0x17e   :  { %16680 = shalt.err (!%p16677_p4)
}
 0x17f   :  { %s16681_s30 = scalar_lea.vmem %s529_s5, 32  ;;  %p16686_p6 = scmp.lt.s32.totalorder %s529_s5, %s529_s5 }
 0x180   :  { %p16682_p5 = scmp.ne.s32.totalorder %s529_s5, %s16681_s30  ;;  %p16687_p7 = scmp.lt.s32.totalorder %s16681_s30, %s16681_s30 }
 0x182   :  { %p16688_p8 = por %p16687_p7, %p16686_p6 }
 0x184   :  { %p16689_p9 = pnand %p16688_p8, %p16682_p5 }
 0x186   :  { %16692 = shalt.err (!%p16689_p9)
}
 0x187   :  { %s19606_s10 = sld [smem:[#allocation78_spill]]  ;;  %s17219_s11 = smov [#allocation2]  }
 0x188   :  { %534 = dma.hbm_to_vmem [thread:$0]  %s19605_s27, 32, %s529_s5, [#allocation53], %s17205_s22, %s17205_s22, %s17206_s23  }
 0x189   :  { %s133_s12 = sshll.u32 %s17219_s11, 4  ;;  %s17220_s15 = smov [#allocation6]   ;;  %s134_s12 = int_to_ptr.vmem [resolvable:$true] %s133_s12 }
 0x18a   :  { %s155_s6 = sshll.u32 %s17220_s15, 4  ;;  %s156_s6 = int_to_ptr.vmem [resolvable:$true] %s155_s6 }
 0x18d   :  { %s16693_s16 = scalar_lea.hbm %s19606_s10, 64 }
 0x18e   :  { %p16694_p10 = scmp.ne.s32.totalorder %s19606_s10, %s16693_s16  ;;  %p16697_p11 = scmp.lt.u32.totalorder %s16693_s16, %s19606_s10 }
 0x190   :  { %p16699_p12 = pnand %p16697_p11, %p16694_p10 }
 0x192   :  { %16702 = shalt.err (!%p16699_p12)
}
 0x193   :  { %s16703_s8 = scalar_lea.vmem %s134_s12, 64  ;;  %p16708_p0 = scmp.lt.s32.totalorder %s134_s12, %s134_s12 }
 0x194   :  { %p16704_p13 = scmp.ne.s32.totalorder %s134_s12, %s16703_s8  ;;  %p16709_p1 = scmp.lt.s32.totalorder %s16703_s8, %s16703_s8 }
 0x196   :  { %p16710_p2 = por %p16709_p1, %p16708_p0 }
 0x198   :  { %p16711_p3 = pnand %p16710_p2, %p16704_p13 }
 0x19a   :  { %16714 = shalt.err (!%p16711_p3)
}
 0x19b   :  { %s19607_s9 = sld [smem:[#allocation80_spill]] }
 0x19c   :  { %136 = dma.hbm_to_vmem [thread:$0]  %s19606_s10, 64, %s134_s12, [#allocation3]  }
 0x1a1   :  { %s16715_s18 = scalar_lea.hbm %s19607_s9, 16 }
 0x1a2   :  { %p16716_p4 = scmp.ne.s32.totalorder %s19607_s9, %s16715_s18  ;;  %p16719_p5 = scmp.lt.u32.totalorder %s16715_s18, %s19607_s9 }
 0x1a4   :  { %p16721_p6 = pnand %p16719_p5, %p16716_p4 }
 0x1a6   :  { %16724 = shalt.err (!%p16721_p6)
}
 0x1a7   :  { %s16725_s21 = scalar_lea.vmem %s156_s6, 16  ;;  %s16729_s14 = scalar_lea.vmem %s156_s6, 32 }
 0x1a8   :  { %p16726_p7 = scmp.ne.s32.totalorder %s156_s6, %s16725_s21  ;;  %p16730_p8 = scmp.lt.s32.totalorder %s156_s6, %s156_s6 }
 0x1a9   :  { %p16731_p9 = scmp.lt.s32.totalorder %s16729_s14, %s16725_s21 }
 0x1ab   :  { %p16732_p10 = por %p16731_p9, %p16730_p8 }
 0x1ad   :  { %p16733_p11 = pnand %p16732_p10, %p16726_p7 }
 0x1af   :  { %16736 = shalt.err (!%p16733_p11)
}
 0x1b0   :  { %s19608_s24 = sld [smem:[#allocation81_spill]]  ;;  %s17221_s26 = smov [#allocation9]  }
 0x1b1   :  { %158 = dma.hbm_to_vmem [thread:$0]  %s19607_s9, 16, %s156_s6, [#allocation5]  }
 0x1b2   :  { %s175_s28 = sshll.u32 %s17221_s26, 4  ;;  %s17222_s3 = smov [#allocation12]   ;;  %s176_s28 = int_to_ptr.vmem [resolvable:$true] %s175_s28 }
 0x1b3   :  { %s197_s17 = sshll.u32 %s17222_s3, 4  ;;  %s198_s17 = int_to_ptr.vmem [resolvable:$true] %s197_s17 }
 0x1b6   :  { %s16737_s1 = scalar_lea.hbm %s19608_s24, 16 }
 0x1b7   :  { %p16738_p12 = scmp.ne.s32.totalorder %s19608_s24, %s16737_s1  ;;  %p16741_p13 = scmp.lt.u32.totalorder %s16737_s1, %s19608_s24 }
 0x1b9   :  { %p16743_p0 = pnand %p16741_p13, %p16738_p12 }
 0x1bb   :  { %16746 = shalt.err (!%p16743_p0)
}
 0x1bc   :  { %s16747_s5 = scalar_lea.vmem %s176_s28, 16  ;;  %s16751_s0 = scalar_lea.vmem %s176_s28, 32 }
 0x1bd   :  { %p16748_p1 = scmp.ne.s32.totalorder %s176_s28, %s16747_s5  ;;  %p16752_p2 = scmp.lt.s32.totalorder %s176_s28, %s176_s28 }
 0x1be   :  { %p16753_p3 = scmp.lt.s32.totalorder %s16751_s0, %s16747_s5 }
 0x1c0   :  { %p16754_p4 = por %p16753_p3, %p16752_p2 }
 0x1c2   :  { %p16755_p5 = pnand %p16754_p4, %p16748_p1 }
 0x1c4   :  { %16758 = shalt.err (!%p16755_p5)
}
 0x1c5   :  { %s19609_s19 = sld [smem:[#allocation82_spill]] }
 0x1c6   :  { %178 = dma.hbm_to_vmem [thread:$0]  %s19608_s24, 16, %s176_s28, [#allocation8]  }
 0x1cb   :  { %s16759_s27 = scalar_lea.hbm %s19609_s19, 16 }
 0x1cc   :  { %p16760_p6 = scmp.ne.s32.totalorder %s19609_s19, %s16759_s27  ;;  %p16763_p7 = scmp.lt.u32.totalorder %s16759_s27, %s19609_s19 }
 0x1ce   :  { %p16765_p8 = pnand %p16763_p7, %p16760_p6 }
 0x1d0   :  { %16768 = shalt.err (!%p16765_p8)
}
 0x1d1   :  { %s16769_s7 = scalar_lea.vmem %s198_s17, 16  ;;  %s16773_s30 = scalar_lea.vmem %s198_s17, 32 }
 0x1d2   :  { %p16770_p9 = scmp.ne.s32.totalorder %s198_s17, %s16769_s7  ;;  %p16774_p10 = scmp.lt.s32.totalorder %s198_s17, %s198_s17 }
 0x1d3   :  { %p16775_p11 = scmp.lt.s32.totalorder %s16773_s30, %s16769_s7 }
 0x1d5   :  { %p16776_p12 = por %p16775_p11, %p16774_p10 }
 0x1d7   :  { %p16777_p13 = pnand %p16776_p12, %p16770_p9 }
 0x1d9   :  { %16780 = shalt.err (!%p16777_p13)
}
 0x1da   :  { %s19610_s10 = sld [smem:[#allocation85_spill]]  ;;  %s17223_s11 = smov [#allocation15]  }
 0x1db   :  { %200 = dma.hbm_to_vmem [thread:$0]  %s19609_s19, 16, %s198_s17, [#allocation11]  }
 0x1dc   :  { %s223_s12 = sshll.u32 %s17223_s11, 4  ;;  %s17224_s15 = smov [#allocation18]   ;;  %s224_s12 = int_to_ptr.vmem [resolvable:$true] %s223_s12 }
 0x1dd   :  { %s250_s6 = sshll.u32 %s17224_s15, 4  ;;  %s251_s6 = int_to_ptr.vmem [resolvable:$true] %s250_s6 }
 0x1e0   :  { %s16781_s16 = scalar_lea.hbm %s19610_s10, 16 }
 0x1e1   :  { %p16782_p0 = scmp.ne.s32.totalorder %s19610_s10, %s16781_s16  ;;  %p16785_p1 = scmp.lt.u32.totalorder %s16781_s16, %s19610_s10 }
 0x1e3   :  { %p16787_p2 = pnand %p16785_p1, %p16782_p0 }
 0x1e5   :  { %16790 = shalt.err (!%p16787_p2)
}
 0x1e6   :  { %s16791_s8 = scalar_lea.vmem %s224_s12, 16  ;;  %s16795_s9 = scalar_lea.vmem %s224_s12, 32 }
 0x1e7   :  { %p16792_p3 = scmp.ne.s32.totalorder %s224_s12, %s16791_s8  ;;  %p16796_p4 = scmp.lt.s32.totalorder %s224_s12, %s224_s12 }
 0x1e8   :  { %p16797_p5 = scmp.lt.s32.totalorder %s16795_s9, %s16791_s8 }
 0x1ea   :  { %p16798_p6 = por %p16797_p5, %p16796_p4 }
 0x1ec   :  { %p16799_p7 = pnand %p16798_p6, %p16792_p3 }
 0x1ee   :  { %16802 = shalt.err (!%p16799_p7)
}
 0x1ef   :  { %s19611_s18 = sld [smem:[#allocation89_spill]] }
 0x1f0   :  { %226 = dma.hbm_to_vmem [thread:$0]  %s19610_s10, 16, %s224_s12, [#allocation14]  }
 0x1f5   :  { %s16803_s21 = scalar_lea.hbm %s19611_s18, 32 }
 0x1f6   :  { %p16804_p8 = scmp.ne.s32.totalorder %s19611_s18, %s16803_s21  ;;  %p16807_p9 = scmp.lt.u32.totalorder %s16803_s21, %s19611_s18 }
 0x1f8   :  { %p16809_p10 = pnand %p16807_p9, %p16804_p8 }
 0x1fa   :  { %16812 = shalt.err (!%p16809_p10)
}
 0x1fb   :  { %s16813_s14 = scalar_lea.vmem %s251_s6, 32  ;;  %p16818_p12 = scmp.lt.s32.totalorder %s251_s6, %s251_s6 }
 0x1fc   :  { %p16814_p11 = scmp.ne.s32.totalorder %s251_s6, %s16813_s14  ;;  %p16819_p13 = scmp.lt.s32.totalorder %s16813_s14, %s16813_s14 }
 0x1fe   :  { %p16820_p0 = por %p16819_p13, %p16818_p12 }
 0x200   :  { %p16821_p1 = pnand %p16820_p0, %p16814_p11 }
 0x202   :  { %16824 = shalt.err (!%p16821_p1)
}
 0x203   :  { %s19612_s24 = sld [smem:[#allocation90_spill]]  ;;  %s17225_s26 = smov [#allocation21]  }
 0x204   :  { %256 = dma.hbm_to_vmem [thread:$0]  %s19611_s18, 32, %s251_s6, [#allocation17], %s17205_s22, %s17205_s22, %s17206_s23  }
 0x205   :  { %s274_s28 = sshll.u32 %s17225_s26, 4  ;;  %s17226_s3 = smov [#allocation24]   ;;  %s275_s28 = int_to_ptr.vmem [resolvable:$true] %s274_s28 }
 0x206   :  { %s300_s17 = sshll.u32 %s17226_s3, 4  ;;  %s301_s17 = int_to_ptr.vmem [resolvable:$true] %s300_s17 }
 0x209   :  { %s16825_s1 = scalar_lea.hbm %s19612_s24, 32 }
 0x20a   :  { %p16826_p2 = scmp.ne.s32.totalorder %s19612_s24, %s16825_s1  ;;  %p16829_p3 = scmp.lt.u32.totalorder %s16825_s1, %s19612_s24 }
 0x20c   :  { %p16831_p4 = pnand %p16829_p3, %p16826_p2 }
 0x20e   :  { %16834 = shalt.err (!%p16831_p4)
}
 0x20f   :  { %s16835_s5 = scalar_lea.vmem %s275_s28, 32  ;;  %p16840_p6 = scmp.lt.s32.totalorder %s275_s28, %s275_s28 }
 0x210   :  { %p16836_p5 = scmp.ne.s32.totalorder %s275_s28, %s16835_s5  ;;  %p16841_p7 = scmp.lt.s32.totalorder %s16835_s5, %s16835_s5 }
 0x212   :  { %p16842_p8 = por %p16841_p7, %p16840_p6 }
 0x214   :  { %p16843_p9 = pnand %p16842_p8, %p16836_p5 }
 0x216   :  { %16846 = shalt.err (!%p16843_p9)
}
 0x217   :  { %s19613_s0 = sld [smem:[#allocation92_spill]] }
 0x218   :  { %280 = dma.hbm_to_vmem [thread:$0]  %s19612_s24, 32, %s275_s28, [#allocation20], %s17205_s22, %s17205_s22, %s17206_s23  }
 0x21d   :  { %s16847_s19 = scalar_lea.hbm %s19613_s0, 1024 }
 0x21e   :  { %p16848_p10 = scmp.ne.s32.totalorder %s19613_s0, %s16847_s19  ;;  %p16851_p11 = scmp.lt.u32.totalorder %s16847_s19, %s19613_s0 }
 0x220   :  { %p16853_p12 = pnand %p16851_p11, %p16848_p10 }
 0x222   :  { %16856 = shalt.err (!%p16853_p12)
}
 0x223   :  { %s16857_s27 = scalar_lea.vmem %s301_s17, 1024  ;;  %p16862_p0 = scmp.lt.s32.totalorder %s301_s17, %s301_s17 }
 0x224   :  { %p16858_p13 = scmp.ne.s32.totalorder %s301_s17, %s16857_s27  ;;  %p16863_p1 = scmp.lt.s32.totalorder %s16857_s27, %s16857_s27 }
 0x226   :  { %p16864_p2 = por %p16863_p1, %p16862_p0 }
 0x228   :  { %p16865_p3 = pnand %p16864_p2, %p16858_p13 }
 0x22a   :  { %16868 = shalt.err (!%p16865_p3)
}
 0x22b   :  { %s19614_s7 = sld [smem:[#allocation93_spill]]  ;;  %s17227_s30 = smov [#allocation27]  }
 0x22c   :  { %306 = dma.hbm_to_vmem [thread:$0]  %s19613_s0, 1024, %s301_s17, [#allocation23], %s17201_s2, %s17201_s2, %s17202_s29  }
 0x22d   :  { %s324_s10 = sshll.u32 %s17227_s30, 4  ;;  %s17228_s11 = smov [#allocation30]   ;;  %s325_s10 = int_to_ptr.vmem [resolvable:$true] %s324_s10 }
 0x22e   :  { %s348_s12 = sshll.u32 %s17228_s11, 4  ;;  %s349_s12 = int_to_ptr.vmem [resolvable:$true] %s348_s12 }
 0x231   :  { %s16869_s15 = scalar_lea.hbm %s19614_s7, 32 }
 0x232   :  { %p16870_p4 = scmp.ne.s32.totalorder %s19614_s7, %s16869_s15  ;;  %p16873_p5 = scmp.lt.u32.totalorder %s16869_s15, %s19614_s7 }
 0x234   :  { %p16875_p6 = pnand %p16873_p5, %p16870_p4 }
 0x236   :  { %16878 = shalt.err (!%p16875_p6)
}
 0x237   :  { %s16879_s6 = scalar_lea.vmem %s325_s10, 32  ;;  %p16884_p8 = scmp.lt.s32.totalorder %s325_s10, %s325_s10 }
 0x238   :  { %p16880_p7 = scmp.ne.s32.totalorder %s325_s10, %s16879_s6  ;;  %p16885_p9 = scmp.lt.s32.totalorder %s16879_s6, %s16879_s6 }
 0x23a   :  { %p16886_p10 = por %p16885_p9, %p16884_p8 }
 0x23c   :  { %p16887_p11 = pnand %p16886_p10, %p16880_p7 }
 0x23e   :  { %16890 = shalt.err (!%p16887_p11)
}
 0x23f   :  { %s19615_s16 = sld [smem:[#allocation94_spill]] }
 0x240   :  { %330 = dma.hbm_to_vmem [thread:$0]  %s19614_s7, 32, %s325_s10, [#allocation26], %s17205_s22, %s17205_s22, %s17206_s23  }
 0x245   :  { %s16891_s8 = scalar_lea.hbm %s19615_s16, 1024 }
 0x246   :  { %p16892_p12 = scmp.ne.s32.totalorder %s19615_s16, %s16891_s8  ;;  %p16895_p13 = scmp.lt.u32.totalorder %s16891_s8, %s19615_s16 }
 0x248   :  { %p16897_p0 = pnand %p16895_p13, %p16892_p12 }
 0x24a   :  { %16900 = shalt.err (!%p16897_p0)
}
 0x24b   :  { %s16901_s9 = scalar_lea.vmem %s349_s12, 1024  ;;  %p16906_p2 = scmp.lt.s32.totalorder %s349_s12, %s349_s12 }
 0x24c   :  { %p16902_p1 = scmp.ne.s32.totalorder %s349_s12, %s16901_s9  ;;  %p16907_p3 = scmp.lt.s32.totalorder %s16901_s9, %s16901_s9 }
 0x24e   :  { %p16908_p4 = por %p16907_p3, %p16906_p2 }
 0x250   :  { %p16909_p5 = pnand %p16908_p4, %p16902_p1 }
 0x252   :  { %16912 = shalt.err (!%p16909_p5)
}
 0x253   :  { %s19616_s18 = sld [smem:[#allocation95_spill]]  ;;  %s17229_s21 = smov [#allocation33]  }
 0x254   :  { %354 = dma.hbm_to_vmem [thread:$0]  %s19615_s16, 1024, %s349_s12, [#allocation29], %s17201_s2, %s17201_s2, %s17202_s29  }
 0x255   :  { %s372_s14 = sshll.u32 %s17229_s21, 4  ;;  %s17230_s24 = smov [#allocation36]   ;;  %s373_s14 = int_to_ptr.vmem [resolvable:$true] %s372_s14 }
 0x256   :  { %s396_s26 = sshll.u32 %s17230_s24, 4  ;;  %s397_s26 = int_to_ptr.vmem [resolvable:$true] %s396_s26 }
 0x259   :  { %s16913_s28 = scalar_lea.hbm %s19616_s18, 1024 }
 0x25a   :  { %p16914_p6 = scmp.ne.s32.totalorder %s19616_s18, %s16913_s28  ;;  %p16917_p7 = scmp.lt.u32.totalorder %s16913_s28, %s19616_s18 }
 0x25c   :  { %p16919_p8 = pnand %p16917_p7, %p16914_p6 }
 0x25e   :  { %16922 = shalt.err (!%p16919_p8)
}
 0x25f   :  { %s16923_s3 = scalar_lea.vmem %s373_s14, 1024  ;;  %p16928_p10 = scmp.lt.s32.totalorder %s373_s14, %s373_s14 }
 0x260   :  { %p16924_p9 = scmp.ne.s32.totalorder %s373_s14, %s16923_s3  ;;  %p16929_p11 = scmp.lt.s32.totalorder %s16923_s3, %s16923_s3 }
 0x262   :  { %p16930_p12 = por %p16929_p11, %p16928_p10 }
 0x264   :  { %p16931_p13 = pnand %p16930_p12, %p16924_p9 }
 0x266   :  { %16934 = shalt.err (!%p16931_p13)
}
 0x267   :  { %s19617_s17 = sld [smem:[#allocation96_spill]] }
 0x268   :  { %378 = dma.hbm_to_vmem [thread:$0]  %s19616_s18, 1024, %s373_s14, [#allocation32], %s17201_s2, %s17201_s2, %s17202_s29  }
 0x26d   :  { %s16935_s1 = scalar_lea.hbm %s19617_s17, 32 }
 0x26e   :  { %p16936_p0 = scmp.ne.s32.totalorder %s19617_s17, %s16935_s1  ;;  %p16939_p1 = scmp.lt.u32.totalorder %s16935_s1, %s19617_s17 }
 0x270   :  { %p16941_p2 = pnand %p16939_p1, %p16936_p0 }
 0x272   :  { %16944 = shalt.err (!%p16941_p2)
}
 0x273   :  { %s16945_s5 = scalar_lea.vmem %s397_s26, 32  ;;  %p16950_p4 = scmp.lt.s32.totalorder %s397_s26, %s397_s26 }
 0x274   :  { %p16946_p3 = scmp.ne.s32.totalorder %s397_s26, %s16945_s5  ;;  %p16951_p5 = scmp.lt.s32.totalorder %s16945_s5, %s16945_s5 }
 0x276   :  { %p16952_p6 = por %p16951_p5, %p16950_p4 }
 0x278   :  { %p16953_p7 = pnand %p16952_p6, %p16946_p3 }
 0x27a   :  { %16956 = shalt.err (!%p16953_p7)
}
 0x27b   :  { %s19618_s0 = sld [smem:[#allocation97_spill]]  ;;  %s17231_s19 = smov [#allocation39]  }
 0x27c   :  { %402 = dma.hbm_to_vmem [thread:$0]  %s19617_s17, 32, %s397_s26, [#allocation35], %s17205_s22, %s17205_s22, %s17206_s23  }
 0x27d   :  { %s420_s27 = sshll.u32 %s17231_s19, 4  ;;  %s17232_s7 = smov [#allocation42]   ;;  %s421_s27 = int_to_ptr.vmem [resolvable:$true] %s420_s27 }
 0x27e   :  { %s444_s30 = sshll.u32 %s17232_s7, 4  ;;  %s445_s30 = int_to_ptr.vmem [resolvable:$true] %s444_s30 }
 0x281   :  { %s16957_s10 = scalar_lea.hbm %s19618_s0, 1024 }
 0x282   :  { %p16958_p8 = scmp.ne.s32.totalorder %s19618_s0, %s16957_s10  ;;  %p16961_p9 = scmp.lt.u32.totalorder %s16957_s10, %s19618_s0 }
 0x284   :  { %p16963_p10 = pnand %p16961_p9, %p16958_p8 }
 0x286   :  { %16966 = shalt.err (!%p16963_p10)
}
 0x287   :  { %s16967_s11 = scalar_lea.vmem %s421_s27, 1024  ;;  %p16972_p12 = scmp.lt.s32.totalorder %s421_s27, %s421_s27 }
 0x288   :  { %p16968_p11 = scmp.ne.s32.totalorder %s421_s27, %s16967_s11  ;;  %p16973_p13 = scmp.lt.s32.totalorder %s16967_s11, %s16967_s11 }
 0x28a   :  { %p16974_p0 = por %p16973_p13, %p16972_p12 }
 0x28c   :  { %p16975_p1 = pnand %p16974_p0, %p16968_p11 }
 0x28e   :  { %16978 = shalt.err (!%p16975_p1)
}
 0x28f   :  { %s19619_s12 = sld [smem:[#allocation98_spill]] }
 0x290   :  { %426 = dma.hbm_to_vmem [thread:$0]  %s19618_s0, 1024, %s421_s27, [#allocation38], %s17201_s2, %s17201_s2, %s17202_s29  }
 0x295   :  { %s16979_s15 = scalar_lea.hbm %s19619_s12, 1024 }
 0x296   :  { %p16980_p2 = scmp.ne.s32.totalorder %s19619_s12, %s16979_s15  ;;  %p16983_p3 = scmp.lt.u32.totalorder %s16979_s15, %s19619_s12 }
 0x298   :  { %p16985_p4 = pnand %p16983_p3, %p16980_p2 }
 0x29a   :  { %16988 = shalt.err (!%p16985_p4)
}
 0x29b   :  { %s16989_s6 = scalar_lea.vmem %s445_s30, 1024  ;;  %p16994_p6 = scmp.lt.s32.totalorder %s445_s30, %s445_s30 }
 0x29c   :  { %p16990_p5 = scmp.ne.s32.totalorder %s445_s30, %s16989_s6  ;;  %p16995_p7 = scmp.lt.s32.totalorder %s16989_s6, %s16989_s6 }
 0x29e   :  { %p16996_p8 = por %p16995_p7, %p16994_p6 }
 0x2a0   :  { %p16997_p9 = pnand %p16996_p8, %p16990_p5 }
 0x2a2   :  { %17000 = shalt.err (!%p16997_p9)
}
 0x2a3   :  { %s19620_s16 = sld [smem:[#allocation99_spill]]  ;;  %s17233_s8 = smov [#allocation45]  }
 0x2a4   :  { %450 = dma.hbm_to_vmem [thread:$0]  %s19619_s12, 1024, %s445_s30, [#allocation41], %s17201_s2, %s17201_s2, %s17202_s29  }
 0x2a5   :  { %s468_s9 = sshll.u32 %s17233_s8, 4  ;;  %s17234_s18 = smov [#allocation48]   ;;  %s469_s9 = int_to_ptr.vmem [resolvable:$true] %s468_s9 }
 0x2a6   :  { %s492_s21 = sshll.u32 %s17234_s18, 4  ;;  %s493_s21 = int_to_ptr.vmem [resolvable:$true] %s492_s21 }
 0x2a9   :  { %s17001_s14 = scalar_lea.hbm %s19620_s16, 32 }
 0x2aa   :  { %p17002_p10 = scmp.ne.s32.totalorder %s19620_s16, %s17001_s14  ;;  %p17005_p11 = scmp.lt.u32.totalorder %s17001_s14, %s19620_s16 }
 0x2ac   :  { %p17007_p12 = pnand %p17005_p11, %p17002_p10 }
 0x2ae   :  { %17010 = shalt.err (!%p17007_p12)
}
 0x2af   :  { %s17011_s24 = scalar_lea.vmem %s469_s9, 32  ;;  %p17016_p0 = scmp.lt.s32.totalorder %s469_s9, %s469_s9 }
 0x2b0   :  { %p17012_p13 = scmp.ne.s32.totalorder %s469_s9, %s17011_s24  ;;  %p17017_p1 = scmp.lt.s32.totalorder %s17011_s24, %s17011_s24 }
 0x2b2   :  { %p17018_p2 = por %p17017_p1, %p17016_p0 }
 0x2b4   :  { %p17019_p3 = pnand %p17018_p2, %p17012_p13 }
 0x2b6   :  { %17022 = shalt.err (!%p17019_p3)
}
 0x2b7   :  { %s19621_s26 = sld [smem:[#allocation101_spill]] }
 0x2b8   :  { %474 = dma.hbm_to_vmem [thread:$0]  %s19620_s16, 32, %s469_s9, [#allocation44], %s17205_s22, %s17205_s22, %s17206_s23  }
 0x2bd   :  { %s17023_s28 = scalar_lea.hbm %s19621_s26, 1024 }
 0x2be   :  { %p17024_p4 = scmp.ne.s32.totalorder %s19621_s26, %s17023_s28  ;;  %p17027_p5 = scmp.lt.u32.totalorder %s17023_s28, %s19621_s26 }
 0x2c0   :  { %p17029_p6 = pnand %p17027_p5, %p17024_p4 }
 0x2c2   :  { %17032 = shalt.err (!%p17029_p6)
}
 0x2c3   :  { %s17033_s3 = scalar_lea.vmem %s493_s21, 1024  ;;  %p17038_p8 = scmp.lt.s32.totalorder %s493_s21, %s493_s21 }
 0x2c4   :  { %p17034_p7 = scmp.ne.s32.totalorder %s493_s21, %s17033_s3  ;;  %p17039_p9 = scmp.lt.s32.totalorder %s17033_s3, %s17033_s3 }
 0x2c6   :  { %p17040_p10 = por %p17039_p9, %p17038_p8 }
 0x2c8   :  { %p17041_p11 = pnand %p17040_p10, %p17034_p7 }
 0x2ca   :  { %17044 = shalt.err (!%p17041_p11)
}
 0x2cb   :  { %s19622_s17 = sld [smem:[#allocation103_spill]]  ;;  %s17235_s1 = smov [#allocation51]  }
 0x2cc   :  { %498 = dma.hbm_to_vmem [thread:$0]  %s19621_s26, 1024, %s493_s21, [#allocation47], %s17201_s2, %s17201_s2, %s17202_s29  }
 0x2cd   :  { %s516_s5 = sshll.u32 %s17235_s1, 4  ;;  %s17236_s0 = smov [#allocation54]   ;;  %s517_s5 = int_to_ptr.vmem [resolvable:$true] %s516_s5 }
 0x2ce   :  { %s540_s19 = sshll.u32 %s17236_s0, 4  ;;  %s541_s19 = int_to_ptr.vmem [resolvable:$true] %s540_s19 }
 0x2d1   :  { %s17045_s27 = scalar_lea.hbm %s19622_s17, 1024 }
 0x2d2   :  { %p17046_p12 = scmp.ne.s32.totalorder %s19622_s17, %s17045_s27  ;;  %p17049_p13 = scmp.lt.u32.totalorder %s17045_s27, %s19622_s17 }
 0x2d4   :  { %p17051_p0 = pnand %p17049_p13, %p17046_p12 }
 0x2d6   :  { %17054 = shalt.err (!%p17051_p0)
}
 0x2d7   :  { %s17055_s7 = scalar_lea.vmem %s517_s5, 1024  ;;  %p17060_p2 = scmp.lt.s32.totalorder %s517_s5, %s517_s5 }
 0x2d8   :  { %p17056_p1 = scmp.ne.s32.totalorder %s517_s5, %s17055_s7  ;;  %p17061_p3 = scmp.lt.s32.totalorder %s17055_s7, %s17055_s7 }
 0x2da   :  { %p17062_p4 = por %p17061_p3, %p17060_p2 }
 0x2dc   :  { %p17063_p5 = pnand %p17062_p4, %p17056_p1 }
 0x2de   :  { %17066 = shalt.err (!%p17063_p5)
}
 0x2df   :  { %s19623_s30 = sld [smem:[#allocation105_spill]] }
 0x2e0   :  { %522 = dma.hbm_to_vmem [thread:$0]  %s19622_s17, 1024, %s517_s5, [#allocation50], %s17201_s2, %s17201_s2, %s17202_s29  }
 0x2e5   :  { %s17067_s10 = scalar_lea.hbm %s19623_s30, 32 }
 0x2e6   :  { %p17068_p6 = scmp.ne.s32.totalorder %s19623_s30, %s17067_s10  ;;  %p17071_p7 = scmp.lt.u32.totalorder %s17067_s10, %s19623_s30 }
 0x2e8   :  { %p17073_p8 = pnand %p17071_p7, %p17068_p6 }
 0x2ea   :  { %17076 = shalt.err (!%p17073_p8)
}
 0x2eb   :  { %s17077_s11 = scalar_lea.vmem %s541_s19, 32  ;;  %p17082_p10 = scmp.lt.s32.totalorder %s541_s19, %s541_s19 }
 0x2ec   :  { %p17078_p9 = scmp.ne.s32.totalorder %s541_s19, %s17077_s11  ;;  %p17083_p11 = scmp.lt.s32.totalorder %s17077_s11, %s17077_s11 }
 0x2ee   :  { %p17084_p12 = por %p17083_p11, %p17082_p10 }
 0x2f0   :  { %p17085_p13 = pnand %p17084_p12, %p17078_p9 }
 0x2f2   :  { %17088 = shalt.err (!%p17085_p13)
}
 0x2f3   :  { %s19624_s12 = sld [smem:[#allocation106_spill]]  ;;  %s17237_s2 = smov [#allocation55]  }
 0x2f4   :  { %546 = dma.hbm_to_vmem [thread:$0]  %s19623_s30, 32, %s541_s19, [#allocation53], %s17205_s22, %s17205_s22, %s17206_s23  }
 0x2f5   :  { %s552_s15 = sshll.u32 %s17237_s2, 4  ;;  %s553_s15 = int_to_ptr.vmem [resolvable:$true] %s552_s15 }
 0x2f9   :  { %s17089_s6 = scalar_lea.hbm %s19624_s12, 32 }
 0x2fa   :  { %p17090_p0 = scmp.ne.s32.totalorder %s19624_s12, %s17089_s6  ;;  %p17093_p1 = scmp.lt.u32.totalorder %s17089_s6, %s19624_s12 }
 0x2fc   :  { %p17095_p2 = pnand %p17093_p1, %p17090_p0 }
 0x2fe   :  { %17098 = shalt.err (!%p17095_p2)
}
 0x2ff   :  { %s17099_s16 = scalar_lea.vmem %s553_s15, 32  ;;  %p17104_p4 = scmp.lt.s32.totalorder %s553_s15, %s553_s15 }
 0x300   :  { %p17100_p3 = scmp.ne.s32.totalorder %s553_s15, %s17099_s16  ;;  %p17105_p5 = scmp.lt.s32.totalorder %s17099_s16, %s17099_s16 }
 0x302   :  { %p17106_p6 = por %p17105_p5, %p17104_p4 }
 0x304   :  { %p17107_p7 = pnand %p17106_p6, %p17100_p3 }
 0x306   :  { %17110 = shalt.err (!%p17107_p7)
}
 0x307   :  { %558 = dma.hbm_to_vmem [thread:$0]  %s19624_s12, 32, %s553_s15, [#allocation56], %s17205_s22, %s17205_s22, %s17206_s23  }
 0x308   :  { %17111 = dma.done.wait [#allocation3], 64  }
 0x309   :  { %17112 = vsyncadd [#allocation3], 4294967232 }
 0x30a   :  { %17113 = dma.done.wait [#allocation5], 32  }
 0x30b   :  { %17114 = vsyncadd [#allocation5], 4294967264 }
 0x30c   :  { %17115 = dma.done.wait [#allocation8], 80  }
 0x30d   :  { %17116 = vsyncadd [#allocation8], 4294967216 }
 0x30e   :  { %17117 = dma.done.wait [#allocation11], 528  }
 0x30f   :  { %17118 = vsyncadd [#allocation11], 4294966768 }
 0x310   :  { %17119 = dma.done.wait [#allocation14], 272  }
 0x311   :  { %17120 = vsyncadd [#allocation14], 4294967024 }
 0x312   :  { %17121 = dma.done.wait [#allocation17], 64  }
 0x313   :  { %17122 = vsyncadd [#allocation17], 4294967232 }
 0x314   :  { %17123 = dma.done.wait [#allocation20], 64  }
 0x315   :  { %17124 = vsyncadd [#allocation20], 4294967232 }
 0x316   :  { %17125 = dma.done.wait [#allocation23], 1056  }
 0x317   :  { %17126 = vsyncadd [#allocation23], 4294966240 }
 0x318   :  { %17127 = dma.done.wait [#allocation26], 64  }
 0x319   :  { %17128 = vsyncadd [#allocation26], 4294967232 }
 0x31a   :  { %17129 = dma.done.wait [#allocation29], 1056  }
 0x31b   :  { %17130 = vsyncadd [#allocation29], 4294966240 }
 0x31c   :  { %17131 = dma.done.wait [#allocation32], 1056  }
 0x31d   :  { %17132 = vsyncadd [#allocation32], 4294966240 }
 0x31e   :  { %17133 = dma.done.wait [#allocation35], 64  }
 0x31f   :  { %17134 = vsyncadd [#allocation35], 4294967232 }
 0x320   :  { %17135 = dma.done.wait [#allocation38], 1056  }
 0x321   :  { %17136 = vsyncadd [#allocation38], 4294966240 }
 0x322   :  { %17137 = dma.done.wait [#allocation41], 1056  }
 0x323   :  { %17138 = vsyncadd [#allocation41], 4294966240 }
 0x324   :  { %17139 = dma.done.wait [#allocation44], 64  }
 0x325   :  { %17140 = vsyncadd [#allocation44], 4294967232 }
 0x326   :  { %17141 = dma.done.wait [#allocation47], 1056  }
 0x327   :  { %17142 = vsyncadd [#allocation47], 4294966240 }
 0x328   :  { %17143 = dma.done.wait [#allocation50], 1056  }
 0x329   :  { %17144 = vsyncadd [#allocation50], 4294966240 }
 0x32a   :  { %17145 = dma.done.wait [#allocation53], 64  }
 0x32b   :  { %17146 = vsyncadd [#allocation53], 4294967232 }
 0x32c   :  { %17147 = dma.done.wait [#allocation56], 32  }
 0x32d   :  { %17148 = vsyncadd [#allocation56], 4294967264  ;;  %s19625_s23 = sld [smem:[#allocation76_spill]]  ;;  %s19626_s8 = sld [smem:[#allocation79_spill]]  ;;  %vm692_vm0 = vcmask 1043456   ;;  %vm685_vm1 = vcmask 31744  }
 0x32e   :  { %v677_v0 = vld [vmem:[#allocation2] sm:$0xf]  ;;  %s19627_s9 = sld [smem:[#allocation87_spill]]  ;;  %v13561_v12 = vld [vmem:[#allocation4] ss:$0 sm:$0xff]  ;;  %s19628_s18 = sld [smem:[#allocation77_spill]] }
 0x32f   :  { %14410 = vmatprep.subr.msk.mxu1 %vm692_vm0, %v677_v0  ;;  %vm784_vm2 = vcmask 261120   ;;  %s19629_s21 = sld [smem:[#allocation83_spill]]  ;;  %v871_v22 = vld [vmem:[#allocation7] sm:$0x7]  ;;  %vm886_vm3 = vcmask 1042432   ;;  %vm879_vm4 = vcmask 23552  }
 0x330   :  { %14411 = vmatpush3.msk.msra.mxu1 %vm692_vm0, %v677_v0  ;;  %14426 = vmatprep.subr.msk.mxu0 %vm886_vm3, %v871_v22  ;;  %v13565_v25 = vld [vmem:[#allocation6] ss:$0 sm:$0xff]  ;;  %v967_v33 = vld [vmem:[#allocation10] sm:$0xff]  ;;  %v968_v34 = vld [vmem:[#allocation10 + $0x8] sm:$0xff]  ;;  %v17238_v41 = vmov 0.0   ;;  %vm17239_vm5 = vmmov 0  }
 0x331   :  { %14427 = vmatpush3.msk.msra.mxu0 %vm886_vm3, %v871_v22  ;;  %v13568_v36 = vld [vmem:[#allocation9] ss:$0 sm:$0xff]  ;;  %v15296_v37 = vpack.c.bf16 %v968_v34, %v967_v33  ;;  %v969_v39 = vld [vmem:[#allocation10 + $0x10] sm:$0xff]  ;;  %s17240_s14 = smov 120   ;;  %s17241_s24 = smov 96   ;;  %vm1177_vm6 = vcmask 64512  }
 0x332   :  { %v970_v40 = vld [vmem:[#allocation10 + $0x18] sm:$0xff]  ;;  %v13575_v47 = vld [vmem:[#allocation16] ss:$0 sm:$0xff]  ;;  %s17242_s26 = smov 80   ;;  %s17243_s28 = smov 88   ;;  %vm1847_vm7 = vcmask 130048   ;;  %vm18214_vm10 = vmpackc.low %vm1177_vm6, %vm1177_vm6 }
 0x333   :  { %v675_v1 = vld [vmem:[%s19625_s23] sm:$0xff]  ;;  %v676_v2 = vld [vmem:[%s19625_s23 + $0x8] sm:$0xff]  ;;  %v775_v6 = vld [vmem:[%s19626_s8 + $0x10] sm:$0xff]  ;;  %v15300_v43 = vpack.c.bf16 %v970_v40, %v969_v39  ;;  %15297 = vmatprep.subr.bf16.mxu0 %v15296_v37  ;;  %s17244_s3 = smov 72   ;;  %s17245_s17 = smov 112   ;;  %vm1849_vm8 = vcmask 195584  }
 0x334   :  { %14412 = vmatprep.mubr.msk.f32.mxu1 %vm685_vm1, %v675_v1  ;;  %v773_v3 = vld [vmem:[%s19626_s8] sm:$0xff]  ;;  %v774_v4 = vld [vmem:[%s19626_s8 + $0x8] sm:$0xff]  ;;  %v776_v7 = vld [vmem:[%s19626_s8 + $0x18] sm:$0xff]  ;;  %s17246_s1 = smov 104   ;;  %s17247_s5 = smov 56   ;;  %vm1065_vm9 = vcmask 1040384  }
 0x335   :  { %v15288_v5 = vpack.c.bf16 %v774_v4, %v773_v3  ;;  %14413 = vmatmul.mubr.msk.f32.vlgmr.msra.gmra.mrb[0].mxu1 %vm685_vm1, %v676_v2  ;;  %v15292_v8 = vpack.c.bf16 %v776_v7, %v775_v6  ;;  %v1077_v9 = vld [vmem:[%s19627_s9] sm:$0xff]  ;;  %v1078_v10 = vld [vmem:[%s19627_s9 + $0x8] sm:$0xff]  ;;  %v1079_v19 = vld [vmem:[%s19627_s9 + $0x10] sm:$0xff]  ;;  %s17248_s0 = smov 64   ;;  %s17249_s19 = smov 40  }
 0x336   :  { %v15304_v11 = vpack.c.bf16 %v1078_v10, %v1077_v9  ;;  %v1080_v20 = vld [vmem:[%s19627_s9 + $0x18] sm:$0xff]  ;;  %v869_v23 = vld [vmem:[%s19628_s18] sm:$0xff]  ;;  %v870_v24 = vld [vmem:[%s19628_s18 + $0x8] sm:$0xff]  ;;  %s17250_s27 = smov 48   ;;  %s19630_s7 = sld [smem:[#allocation88_spill]] }
 0x337   :  { %15289 = vmatprep.subr.bf16.mxu1 %v15288_v5  ;;  %v15308_v21 = vpack.c.bf16 %v1080_v20, %v1079_v19  ;;  %14428 = vmatprep.mubr.msk.f32.mxu0 %vm879_vm4, %v869_v23  ;;  %v866_v28 = vld [vmem:[%s19629_s21] sm:$0xff]  ;;  %s17251_s30 = smov 24   ;;  %s19631_s10 = sld [smem:[#allocation91_spill]] }
 0x338   :  { %15291 = vmatpush3.bf16.msra.mxu1 %v15288_v5  ;;  %14429 = vmatmul.mubr.msk.f32.vlgmr.msra.gmra.mrb[0].mxu0 %vm879_vm4, %v870_v24  ;;  %s19632_s11 = sld [smem:[#allocation84_spill]] }
 0x339   :  { %15293 = vmatprep.subr.bf16.mxu1 %v15292_v8  ;;  %15299 = vmatpush3.bf16.msra.mxu0 %v15296_v37 }
 0x33a   :  { %15301 = vmatprep.subr.bf16.mxu0 %v15300_v43 }
 0x33c   :  { %15295 = vmatpush3.bf16.msra.mxu1 %v15292_v8 }
 0x33d   :  { %15305 = vmatprep.subr.bf16.mxu1 %v15304_v11  ;;  %15303 = vmatpush3.bf16.msra.mxu0 %v15300_v43 }
 0x33e   :  { %14453 = vmatprep.subr.mxu0 %v17238_v41 }
 0x408   :  { %v14414_v13 = vpop.f32.mrb[0].mxu1 }
 0x409   :  { %v768_v14 = vadd.f32 %v14414_v13, %v13561_v12  ;;  %v762_v15 = vpop.f32.mrb[1].mxu1 }
 0x40a   :  { %v763_v16 = vadd.f32 %v13561_v12, %v762_v15 }
 0x40b   :  { %v772_v18 = vmax.f32 %v768_v14, 0.0  ;;  %v14430_v35 = vpop.f32.mrb[0].mxu0 }
 0x40c   :  { %v771_v17 = vmax.f32 %v763_v16, 0.0  ;;  %v956_v38 = vpop.f32.mrb[1].mxu0  ;;  %v962_v44 = vadd.f32 %v14430_v35, %v13568_v36 }
 0x40d   :  { %v957_v42 = vadd.f32 %v13568_v36, %v956_v38 }
 0x40e   :  { %14423 = vmatprep.mubr.msk.f32.mxu1 %vm784_vm2, %v771_v17  ;;  %v966_v46 = vmax.f32 %v962_v44, 0.0 }
 0x40f   :  { %14424 = vmatmul.mubr.msk.f32.vlgmr.msra.gmra.mrb[2].mxu1 %vm784_vm2, %v772_v18  ;;  %v965_v45 = vmax.f32 %v957_v42, 0.0 }
 0x410   :  { %15307 = vmatpush3.bf16.msra.mxu1 %v15304_v11 }
 0x411   :  { %15309 = vmatprep.subr.bf16.mxu1 %v15308_v21  ;;  %14439 = vmatprep.mubr.msk.f32.mxu0 %vm784_vm2, %v965_v45 }
 0x412   :  { %14440 = vmatmul.mubr.msk.f32.vlgmr.msra.gmra.mrb[2].mxu0 %vm784_vm2, %v966_v46 }
 0x413   :  { %14455 = vmatprep.mubr.msk.f32.mxu0 %vm17239_vm5, %v17238_v41 }
 0x414   :  { %15311 = vmatpush3.bf16.msra.mxu1 %v15308_v21 }
 0x415   :  { %14458 = vmatprep.subr.mxu1 %v17238_v41 }
 0x4e2   :  { %v14425_v26 = vpop.f32.mrb[2].mxu1 }
 0x4e3   :  { %v863_v27 = vadd.f32 %v14425_v26, %v13565_v25  ;;  %v857_v29 = vpop.f32.mrb[3].mxu1 }
 0x4e4   :  { %v858_v30 = vadd.f32 %v13565_v25, %v857_v29 }
 0x4e5   :  { %v17755_v32 = vadd.f32 %v866_v28, %v863_v27  ;;  %v17817_v58 = vpop.f32.mrb[2].mxu0 }
 0x4e6   :  { %v17753_v31 = vadd.f32 %v866_v28, %v858_v30  ;;  %v17820_v59 = vpop.f32.mrb[3].mxu0 }
 0x4e8   :  { %14450 = vmatprep.mubr.msk.f32.mxu1 %vm784_vm2, %v17753_v31 }
 0x4e9   :  { %14451 = vmatmul.mubr.msk.f32.vlgmr.msra.gmra.mrb[4].mxu1 %vm784_vm2, %v17755_v32 }
 0x4ea   :  { %14460 = vmatprep.mubr.msk.f32.mxu1 %vm17239_vm5, %v17238_v41 }
 0x5bc   :  { %v14452_v48 = vpop.f32.mrb[4].mxu1 }
 0x5bd   :  { %v1165_v49 = vpop.f32.mrb[5].mxu1  ;;  %v17783_v51 = vadd.f32 %v14452_v48, %v13575_v47 }
 0x5be   :  { %v17769_v50 = vadd.f32 %v13575_v47, %v1165_v49 }
 0x5c0   :  { %1339 = vrot.lane.b32.xlu1 %v17769_v50, %s17240_s14  ;;  %1175 = vrot.lane.b32.xlu0 %v17769_v50, %s17241_s24 }
 0x5c4   :  { %1506 = vrot.lane.b32.xlu1 %v17769_v50, %s17242_s26  ;;  %1341 = vrot.lane.b32.xlu0 %v17769_v50, %s17243_s28 }
 0x5c8   :  { %1671 = vrot.lane.b32.xlu1 %v17769_v50, %s17244_s3  ;;  %1504 = vrot.lane.b32.xlu0 %v17769_v50, %s17245_s17 }
 0x5cc   :  { %1852 = vrot.lane.b32.xlu1 %v17783_v51, %s17241_s24  ;;  %1669 = vrot.lane.b32.xlu0 %v17769_v50, %s17246_s1 }
 0x5d0   :  { %2015 = vrot.lane.b32.xlu1 %v17783_v51, %s17240_s14  ;;  %2017 = vrot.lane.b32.xlu0 %v17783_v51, %s17243_s28 }
 0x5d4   :  { %2180 = vrot.lane.b32.xlu1 %v17783_v51, %s17245_s17  ;;  %2182 = vrot.lane.b32.xlu0 %v17783_v51, %s17242_s26 }
 0x5d8   :  { %2345 = vrot.lane.b32.xlu1 %v17783_v51, %s17246_s1  ;;  %2347 = vrot.lane.b32.xlu0 %v17783_v51, %s17244_s3 }
 0x5dc   :  { %1428 = vrot.lane.b32.xlu1 %v17769_v50, %s17247_s5  ;;  %1263 = vrot.lane.b32.xlu0 %v17769_v50, %s17248_s0 }
 0x632   :  { %v1340_v52 = vpop.permute.xlu1 %1339  ;;  %v1176_v53 = vpop.permute.xlu0 %1175 }
 0x633   :  { %14454 = vmatpush3.xpose.msk.msra.mxu0 %vm1177_vm6, %v1176_v53 }
 0x634   :  { %14463 = vmatprep.subr.mxu0 %v17238_v41 }
 0x636   :  { %v1507_v54 = vpop.permute.xlu1 %1506  ;;  %14456 = vmatmul.mubr.msk.f32.vlgmr.msra.gmra.mrb[4].mxu0 %vm1177_vm6, %v17769_v50  ;;  %v1342_v55 = vpop.permute.xlu0 %1341 }
 0x637   :  { %14464 = vmatpush3.xpose.msk.msra.mxu0 %vm1177_vm6, %v1342_v55  ;;  %14465 = vmatprep.mubr.msk.f32.mxu0 %vm17239_vm5, %v17238_v41 }
 0x638   :  { %14473 = vmatprep.subr.mxu0 %v17238_v41 }
 0x63a   :  { %v1672_v56 = vpop.permute.xlu1 %1671  ;;  %14466 = vmatmul.mubr.msk.f32.vlgmr.msra.gmra.mrb[6].mxu0 %vm1177_vm6, %v1340_v52  ;;  %v1505_v57 = vpop.permute.xlu0 %1504 }
 0x63b   :  { %14474 = vmatpush3.xpose.msk.msra.mxu0 %vm1177_vm6, %v1507_v54  ;;  %14475 = vmatprep.mubr.msk.f32.mxu0 %vm17239_vm5, %v17238_v41 }
 0x63c   :  { %14483 = vmatprep.subr.mxu0 %v17238_v41 }
 0x63e   :  { %14476 = vmatmul.mubr.msk.f32.vlgmr.msra.gmra.mrb[8].mxu0 %vm1177_vm6, %v1505_v57  ;;  %v1670_v60 = vpop.permute.xlu0 %1669  ;;  %v1853_v61 = vpop.permute.xlu1 %1852 }
 0x63f   :  { %14484 = vmatpush3.xpose.msk.msra.mxu0 %vm1177_vm6, %v1672_v56  ;;  %14485 = vmatprep.mubr.msk.f32.mxu0 %vm17239_vm5, %v17238_v41 }
 0x640   :  { %14493 = vmatprep.subr.mxu0 %v17238_v41 }
 0x642   :  { %14486 = vmatmul.mubr.msk.f32.vlgmr.msra.gmra.mrb[10].mxu0 %vm1177_vm6, %v1670_v60  ;;  %v2018_v62 = vpop.permute.xlu0 %2017  ;;  %v2016_v63 = vpop.permute.xlu1 %2015 }
 0x643   :  { %14494 = vmatpush3.xpose.msk.msra.mxu0 %vm1177_vm6, %v1853_v61  ;;  %14495 = vmatprep.mubr.msk.f32.mxu0 %vm17239_vm5, %v17238_v41 }
 0x644   :  { %14503 = vmatprep.subr.mxu0 %v17238_v41 }
 0x646   :  { %14496 = vmatmul.mubr.msk.f32.vlgmr.msra.gmra.mrb[12].mxu0 %vm1177_vm6, %v17783_v51  ;;  %v2183_v0 = vpop.permute.xlu0 %2182  ;;  %v2181_v2 = vpop.permute.xlu1 %2180 }
 0x647   :  { %14504 = vmatpush3.xpose.msk.msra.mxu0 %vm1177_vm6, %v2018_v62  ;;  %14505 = vmatprep.mubr.msk.f32.mxu0 %vm17239_vm5, %v17238_v41 }
 0x648   :  { %14513 = vmatprep.subr.mxu0 %v17238_v41 }
 0x64a   :  { %14506 = vmatmul.mubr.msk.f32.vlgmr.msra.gmra.mrb[14].mxu0 %vm1177_vm6, %v2016_v63  ;;  %v2348_v1 = vpop.permute.xlu0 %2347  ;;  %v2346_v4 = vpop.permute.xlu1 %2345 }
 0x64b   :  { %14514 = vmatpush3.xpose.msk.msra.mxu0 %vm1177_vm6, %v2183_v0  ;;  %14515 = vmatprep.mubr.msk.f32.mxu0 %vm17239_vm5, %v17238_v41 }
 0x64c   :  { %14523 = vmatprep.subr.mxu0 %v17238_v41 }
 0x64e   :  { %14516 = vmatmul.mubr.msk.f32.vlgmr.msra.gmra.mrb[16].mxu0 %vm1177_vm6, %v2181_v2  ;;  %v1264_v3 = vpop.permute.xlu0 %1263  ;;  %v17861_v29 = vpop.permute.xlu1 %1428 }
 0x64f   :  { %14459 = vmatpush3.msra.mxu1 %v1264_v3  ;;  %14524 = vmatpush3.xpose.msk.msra.mxu0 %vm1177_vm6, %v2348_v1 }
 0x650   :  { %14525 = vmatprep.mubr.msk.f32.mxu0 %vm17239_vm5, %v17238_v41  ;;  %14468 = vmatprep.subr.mxu1 %v17238_v41 }
 0x652   :  { %14526 = vmatmul.mubr.msk.f32.vlgmr.msra.gmra.mrb[18].mxu0 %vm1177_vm6, %v2346_v4 }
 0x709   :  { %v1248_v5 = vpop.f32.mrb[4].mxu0 }
 0x70a   :  { %v14457_v6 = vpop.f32.mrb[5].mxu0  ;;  %v1252_v7 = vsel %vm1177_vm6, %v1248_v5, -inf }
 0x70b   :  { %1253 = vmax.xlane.f32.xlu0 %v1252_v7 }
 0x70d   :  { %v1413_v8 = vpop.f32.mrb[6].mxu0 }
 0x70e   :  { %v14467_v9 = vpop.f32.mrb[7].mxu0  ;;  %v1417_v10 = vsel %vm1177_vm6, %v1413_v8, -inf }
 0x70f   :  { %1418 = vmax.xlane.f32.xlu1 %v1417_v10 }
 0x711   :  { %v1578_v11 = vpop.f32.mrb[8].mxu0 }
 0x712   :  { %v14477_v12 = vpop.f32.mrb[9].mxu0  ;;  %v1582_v13 = vsel %vm1177_vm6, %v1578_v11, -inf }
 0x713   :  { %1583 = vmax.xlane.f32.xlu0 %v1582_v13 }
 0x715   :  { %v1743_v14 = vpop.f32.mrb[10].mxu0 }
 0x716   :  { %v14487_v15 = vpop.f32.mrb[11].mxu0  ;;  %v1747_v16 = vsel %vm1177_vm6, %v1743_v14, -inf }
 0x717   :  { %1748 = vmax.xlane.f32.xlu0 %v1747_v16 }
 0x719   :  { %v1924_v17 = vpop.f32.mrb[12].mxu0 }
 0x71a   :  { %v14497_v18 = vpop.f32.mrb[13].mxu0  ;;  %v1928_v19 = vsel %vm1177_vm6, %v1924_v17, -inf }
 0x71b   :  { %1929 = vmax.xlane.f32.xlu1 %v1928_v19 }
 0x71d   :  { %v2089_v20 = vpop.f32.mrb[14].mxu0 }
 0x71e   :  { %v14507_v21 = vpop.f32.mrb[15].mxu0  ;;  %v2093_v22 = vsel %vm1177_vm6, %v2089_v20, -inf }
 0x71f   :  { %2094 = vmax.xlane.f32.xlu0 %v2093_v22 }
 0x721   :  { %v2254_v23 = vpop.f32.mrb[16].mxu0 }
 0x722   :  { %v14517_v24 = vpop.f32.mrb[17].mxu0  ;;  %v2258_v25 = vsel %vm1177_vm6, %v2254_v23, -inf }
 0x723   :  { %2259 = vmax.xlane.f32.xlu1 %v2258_v25 }
 0x725   :  { %v2419_v26 = vpop.f32.mrb[18].mxu0 }
 0x726   :  { %v14527_v27 = vpop.f32.mrb[19].mxu0  ;;  %v2423_v28 = vsel %vm1177_vm6, %v2419_v26, -inf }
 0x727   :  { %2424 = vmax.xlane.f32.xlu0 %v2423_v28 }
 0x734   :  { %1758 = vrot.lane.b32.xlu1 %v17769_v50, %s17249_s19 }
 0x73d   :  { %1593 = vrot.lane.b32.xlu0 %v17769_v50, %s17250_s27 }
 0x798   :  { %v1254_v30 = vpop.xlane.xlu0 %1253 }
 0x799   :  { %v1255_v33 = vsub.f32 %v1248_v5, %v1254_v30 }
 0x79b   :  { %v1256_v34 = vmul.f32 1.442695, %v1255_v33 }
 0x79c   :  { %v1419_v35 = vpop.xlane.xlu1 %1418 }
 0x79d   :  { %15935 = vpow2.f32 %v1256_v34  ;;  %v1420_v36 = vsub.f32 %v1413_v8, %v1419_v35 }
 0x79f   :  { %v1421_v37 = vmul.f32 1.442695, %v1420_v36 }
 0x7a0   :  { %v1584_v38 = vpop.xlane.xlu0 %1583 }
 0x7a1   :  { %15937 = vpow2.f32 %v1421_v37  ;;  %v1585_v39 = vsub.f32 %v1578_v11, %v1584_v38 }
 0x7a3   :  { %v1586_v40 = vmul.f32 1.442695, %v1585_v39 }
 0x7a4   :  { %v1749_v42 = vpop.xlane.xlu0 %1748 }
 0x7a5   :  { %15939 = vpow2.f32 %v1586_v40  ;;  %v1750_v43 = vsub.f32 %v1743_v14, %v1749_v42 }
 0x7a7   :  { %v15936_v44 = vpop.eup %15935  ;;  %v1751_v45 = vmul.f32 1.442695, %v1750_v43 }
 0x7a8   :  { %v1258_v46 = vsel %vm1177_vm6, %v15936_v44, 0.0  ;;  %v1930_v54 = vpop.xlane.xlu1 %1929 }
 0x7a9   :  { %15941 = vpow2.f32 %v1751_v45  ;;  %1259 = vadd.xlane.f32.xlu1 %v1258_v46  ;;  %v1931_v55 = vsub.f32 %v1924_v17, %v1930_v54  ;;  %v1083_v54 = vld [vmem:[%s19630_s7 + $0x8] sm:$0xff] }
 0x7ab   :  { %v15938_v47 = vpop.eup %15937  ;;  %v1932_v61 = vmul.f32 1.442695, %v1931_v55 }
 0x7ac   :  { %v1423_v48 = vsel %vm1177_vm6, %v15938_v47, 0.0  ;;  %v2095_v56 = vpop.xlane.xlu0 %2094 }
 0x7ad   :  { %1424 = vadd.xlane.f32.xlu0 %v1423_v48  ;;  %v2096_v60 = vsub.f32 %v2089_v20, %v2095_v56  ;;  %15943 = vpow2.f32 %v1932_v61  ;;  %v1084_v56 = vld [vmem:[%s19630_s7 + $0x10] sm:$0xff] }
 0x7af   :  { %v15940_v49 = vpop.eup %15939  ;;  %v2097_v0 = vmul.f32 1.442695, %v2096_v60 }
 0x7b0   :  { %v1588_v50 = vsel %vm1177_vm6, %v15940_v49, 0.0  ;;  %v2260_v57 = vpop.xlane.xlu1 %2259 }
 0x7b1   :  { %1589 = vadd.xlane.f32.xlu1 %v1588_v50  ;;  %v2261_v62 = vsub.f32 %v2254_v23, %v2260_v57  ;;  %15945 = vpow2.f32 %v2097_v0  ;;  %v1085_v57 = vld [vmem:[%s19630_s7 + $0x18] sm:$0xff] }
 0x7b2   :  { %v15316_v60 = vpack.c.bf16 %v1085_v57, %v1084_v56 }
 0x7b3   :  { %v17866_v52 = vpop.eup %15941  ;;  %v2262_v1 = vmul.f32 1.442695, %v2261_v62 }
 0x7b4   :  { %v1753_v53 = vsel %vm1177_vm6, %v17866_v52, 0.0  ;;  %v2425_v63 = vpop.xlane.xlu0 %2424  ;;  %v1759_v12 = vpop.permute.xlu1 %1758 }
 0x7b5   :  { %1754 = vadd.xlane.f32.xlu0 %v1753_v53  ;;  %v2426_v2 = vsub.f32 %v2419_v26, %v2425_v63  ;;  %15947 = vpow2.f32 %v2262_v1  ;;  %v1082_v53 = vld [vmem:[%s19630_s7] sm:$0xff] }
 0x7b6   :  { %v15312_v55 = vpack.c.bf16 %v1083_v54, %v1082_v53  ;;  %v13605_v53 = vld [vmem:[#allocation19] ss:$0 sm:$0xff] }
 0x7b7   :  { %v2427_v3 = vmul.f32 1.442695, %v2426_v2  ;;  %v15944_v4 = vpop.eup %15943 }
 0x7b8   :  { %v1934_v6 = vsel %vm1177_vm6, %v15944_v4, 0.0  ;;  %v1594_v13 = vpop.permute.xlu0 %1593  ;;  %15313 = vmatprep.subr.bf16.mxu0 %v15312_v55 }
 0x7b9   :  { %15949 = vpow2.f32 %v2427_v3  ;;  %15315 = vmatpush3.bf16.msra.mxu0 %v15312_v55  ;;  %v13606_v55 = vld [vmem:[#allocation21] ss:$0 sm:$0xff] }
 0x7ba   :  { %15317 = vmatprep.subr.bf16.mxu0 %v15316_v60 }
 0x7bb   :  { %v17874_v5 = vpop.eup %15945 }
 0x7bc   :  { %v2099_v9 = vsel %vm1177_vm6, %v17874_v5, 0.0 }
 0x7bd   :  { %15319 = vmatpush3.bf16.msra.mxu0 %v15316_v60 }
 0x7bf   :  { %v17877_v7 = vpop.eup %15947 }
 0x7c0   :  { %v2264_v8 = vsel %vm1177_vm6, %v17877_v7, 0.0 }
 0x7c2   :  { %2104 = vrot.lane.b32.xlu1 %v17783_v51, %s17247_s5 }
 0x7c3   :  { %v17883_v10 = vpop.eup %15949 }
 0x7c4   :  { %v2429_v11 = vsel %vm1177_vm6, %v17883_v10, 0.0 }
 0x7cb   :  { %1939 = vrot.lane.b32.xlu0 %v17783_v51, %s17248_s0 }
 0x7e6   :  { %1935 = vadd.xlane.f32.xlu1 %v1934_v6 }
 0x7ea   :  { %2265 = vadd.xlane.f32.xlu1 %v2264_v8  ;;  %2100 = vadd.xlane.f32.xlu0 %v2099_v9 }
 0x7ee   :  { %2430 = vadd.xlane.f32.xlu1 %v2429_v11 }
 0x7ff   :  { %2434 = vrot.lane.b32.xlu1 %v17783_v51, %s17249_s19 }
 0x800   :  { %2269 = vrot.lane.b32.xlu0 %v17783_v51, %s17250_s27 }
 0x836   :  { %v1260_v14 = vpop.xlane.xlu1 %1259 }
 0x837   :  { %15951 = vrcp.f32 %v1260_v14 }
 0x83a   :  { %v1425_v15 = vpop.xlane.xlu0 %1424 }
 0x83b   :  { %15953 = vrcp.f32 %v1425_v15 }
 0x83e   :  { %v1590_v16 = vpop.xlane.xlu1 %1589 }
 0x83f   :  { %15955 = vrcp.f32 %v1590_v16 }
 0x841   :  { %v15952_v17 = vpop.eup %15951 }
 0x842   :  { %v1755_v18 = vpop.xlane.xlu0 %1754  ;;  %v1262_v19 = vmul.f32 %v15952_v17, %v15936_v44  ;;  %v2105_v26 = vpop.permute.xlu1 %2104  ;;  %v13602_v17 = vld [vmem:[#allocation18] ss:$0 sm:$0xff] }
 0x843   :  { %15957 = vrcp.f32 %v1755_v18 }
 0x844   :  { %14461 = vmatmul.mubr.msk.f32.vlgmr.msra.gmra.mrb[6].mxu1 %vm1177_vm6, %v1262_v19 }
 0x845   :  { %v15954_v20 = vpop.eup %15953  ;;  %14469 = vmatpush3.msra.mxu1 %v17861_v29  ;;  %14470 = vmatprep.mubr.msk.f32.mxu1 %vm17239_vm5, %v17238_v41 }
 0x846   :  { %14478 = vmatprep.subr.mxu1 %v17238_v41  ;;  %v1427_v51 = vmul.f32 %v15954_v20, %v15938_v47  ;;  %v1940_v25 = vpop.permute.xlu0 %1939 }
 0x848   :  { %14471 = vmatmul.mubr.msk.f32.vlgmr.msra.gmra.mrb[8].mxu1 %vm1177_vm6, %v1427_v51 }
 0x849   :  { %v15956_v21 = vpop.eup %15955  ;;  %14479 = vmatpush3.msra.mxu1 %v1594_v13  ;;  %14480 = vmatprep.mubr.msk.f32.mxu1 %vm17239_vm5, %v17238_v41 }
 0x84a   :  { %14488 = vmatprep.subr.mxu1 %v17238_v41  ;;  %v1592_v22 = vmul.f32 %v15956_v21, %v15940_v49 }
 0x84c   :  { %14481 = vmatmul.mubr.msk.f32.vlgmr.msra.gmra.mrb[10].mxu1 %vm1177_vm6, %v1592_v22 }
 0x84d   :  { %v15958_v23 = vpop.eup %15957  ;;  %14489 = vmatpush3.msra.mxu1 %v1759_v12  ;;  %14490 = vmatprep.mubr.msk.f32.mxu1 %vm17239_vm5, %v17238_v41 }
 0x84e   :  { %14498 = vmatprep.subr.mxu1 %v17238_v41  ;;  %v1757_v24 = vmul.f32 %v15958_v23, %v17866_v52 }
 0x850   :  { %14491 = vmatmul.mubr.msk.f32.vlgmr.msra.gmra.mrb[12].mxu1 %vm1177_vm6, %v1757_v24 }
 0x851   :  { %14499 = vmatpush3.msra.mxu1 %v1940_v25  ;;  %14500 = vmatprep.mubr.msk.f32.mxu1 %vm17239_vm5, %v17238_v41 }
 0x852   :  { %14508 = vmatprep.subr.mxu1 %v17238_v41 }
 0x873   :  { %v1936_v27 = vpop.xlane.xlu1 %1935 }
 0x874   :  { %15959 = vrcp.f32 %v1936_v27 }
 0x877   :  { %v2266_v28 = vpop.xlane.xlu1 %2265  ;;  %v2101_v29 = vpop.xlane.xlu0 %2100 }
 0x878   :  { %15961 = vrcp.f32 %v2101_v29 }
 0x879   :  { %15963 = vrcp.f32 %v2266_v28 }
 0x87b   :  { %v2431_v30 = vpop.xlane.xlu1 %2430  ;;  %v2270_v38 = vpop.permute.xlu0 %2269 }
 0x87c   :  { %15965 = vrcp.f32 %v2431_v30 }
 0x87e   :  { %v15960_v33 = vpop.eup %15959 }
 0x87f   :  { %v1938_v34 = vmul.f32 %v15960_v33, %v15944_v4  ;;  %v2435_v42 = vpop.permute.xlu1 %2434 }
 0x881   :  { %14501 = vmatmul.mubr.msk.f32.vlgmr.msra.gmra.mrb[14].mxu1 %vm1177_vm6, %v1938_v34 }
 0x882   :  { %14509 = vmatpush3.msra.mxu1 %v2105_v26  ;;  %14510 = vmatprep.mubr.msk.f32.mxu1 %vm17239_vm5, %v17238_v41  ;;  %v15962_v35 = vpop.eup %15961 }
 0x883   :  { %14518 = vmatprep.subr.mxu1 %v17238_v41  ;;  %v2103_v36 = vmul.f32 %v15962_v35, %v17874_v5  ;;  %v15964_v37 = vpop.eup %15963  ;;  %v2659_v35 = vld [vmem:[%s19631_s10] sm:$0xff] }
 0x884   :  { %v2268_v39 = vmul.f32 %v15964_v37, %v17877_v7  ;;  %v2661_v37 = vld [vmem:[%s19631_s10 + $0x10] sm:$0xff] }
 0x885   :  { %14511 = vmatmul.mubr.msk.f32.vlgmr.msra.gmra.mrb[16].mxu1 %vm1177_vm6, %v2103_v36  ;;  %v2660_v36 = vld [vmem:[%s19631_s10 + $0x8] sm:$0xff] }
 0x886   :  { %14519 = vmatpush3.msra.mxu1 %v2270_v38  ;;  %14520 = vmatprep.mubr.msk.f32.mxu1 %vm17239_vm5, %v17238_v41  ;;  %v15966_v40 = vpop.eup %15965  ;;  %v15320_v38 = vpack.c.bf16 %v2660_v36, %v2659_v35 }
 0x887   :  { %14528 = vmatprep.subr.mxu1 %v17238_v41  ;;  %v2433_v43 = vmul.f32 %v15966_v40, %v17883_v10 }
 0x889   :  { %14521 = vmatmul.mubr.msk.f32.vlgmr.msra.gmra.mrb[18].mxu1 %vm1177_vm6, %v2268_v39  ;;  %v2662_v39 = vld [vmem:[%s19631_s10 + $0x18] sm:$0xff] }
 0x88a   :  { %14529 = vmatpush3.msra.mxu1 %v2435_v42  ;;  %14530 = vmatprep.mubr.msk.f32.mxu1 %vm17239_vm5, %v17238_v41  ;;  %v15324_v40 = vpack.c.bf16 %v2662_v39, %v2661_v37  ;;  %v2753_v42 = vld [vmem:[#allocation24] sm:$0xff] }
 0x88b   :  { %15321 = vmatprep.subr.bf16.mxu1 %v15320_v38 }
 0x88d   :  { %14531 = vmatmul.mubr.msk.f32.vlgmr.msra.gmra.mrb[20].mxu1 %vm1177_vm6, %v2433_v43  ;;  %v2754_v43 = vld [vmem:[#allocation24 + $0x8] sm:$0xff] }
 0x88e   :  { %15323 = vmatpush3.bf16.msra.mxu1 %v15320_v38 }
 0x88f   :  { %15325 = vmatprep.subr.bf16.mxu1 %v15324_v40 }
 0x892   :  { %15327 = vmatpush3.bf16.msra.mxu1 %v15324_v40 }
 0x917   :  { %v1335_v44 = vpop.f32.mrb[6].mxu1 }
 0x918   :  { %v14462_v45 = vpop.f32.mrb[7].mxu1 }
 0x91b   :  { %v1500_v46 = vpop.f32.mrb[8].mxu1 }
 0x91c   :  { %1835 = vrot.lane.b32.xlu0 %v1500_v46, %s17202_s29  ;;  %v14472_v47 = vpop.f32.mrb[9].mxu1 }
 0x91f   :  { %v1665_v48 = vpop.f32.mrb[10].mxu1 }
 0x920   :  { %1839 = vrot.lane.b32.xlu1 %v1665_v48, %s17205_s22  ;;  %v14482_v49 = vpop.f32.mrb[11].mxu1 }
 0x923   :  { %v1830_v50 = vpop.f32.mrb[12].mxu1 }
 0x924   :  { %1843 = vrot.lane.b32.xlu1 %v1830_v50, %s17251_s30  ;;  %v14492_v52 = vpop.f32.mrb[13].mxu1 }
 0x954   :  { %v2011_v61 = vpop.f32.mrb[14].mxu1 }
 0x955   :  { %v14502_v62 = vpop.f32.mrb[15].mxu1 }
 0x958   :  { %v2176_v63 = vpop.f32.mrb[16].mxu1 }
 0x959   :  { %2511 = vrot.lane.b32.xlu0 %v2176_v63, %s17202_s29  ;;  %v14512_v0 = vpop.f32.mrb[17].mxu1 }
 0x95a   :  { %v2755_v0 = vld [vmem:[#allocation24 + $0x10] sm:$0xff] }
 0x95c   :  { %v2341_v1 = vpop.f32.mrb[18].mxu1 }
 0x95d   :  { %2515 = vrot.lane.b32.xlu0 %v2341_v1, %s17205_s22  ;;  %v14522_v2 = vpop.f32.mrb[19].mxu1  ;;  %v2756_v1 = vld [vmem:[#allocation24 + $0x18] sm:$0xff] }
 0x95e   :  { %v15332_v2 = vpack.c.bf16 %v2756_v1, %v2755_v0 }
 0x960   :  { %v2506_v3 = vpop.f32.mrb[20].mxu1 }
 0x961   :  { %2519 = vrot.lane.b32.xlu1 %v2506_v3, %s17251_s30  ;;  %v14532_v4 = vpop.f32.mrb[21].mxu1  ;;  %v13607_v3 = vld [vmem:[#allocation22] ss:$0 sm:$0xff] }
 0x98e   :  { %v1836_v5 = vpop.permute.xlu0 %1835 }
 0x98f   :  { %v1846_v7 = vsel %vm1177_vm6, %v1335_v44, %v1836_v5  ;;  %v15328_v44 = vpack.c.bf16 %v2754_v43, %v2753_v42  ;;  %v13613_v42 = vld [vmem:[#allocation27] ss:$0 sm:$0xff] }
 0x991   :  { %15329 = vmatprep.subr.bf16.mxu0 %v15328_v44 }
 0x992   :  { %v1840_v6 = vpop.permute.xlu1 %1839 }
 0x993   :  { %v1848_v8 = vsel %vm1847_vm7, %v1846_v7, %v1840_v6 }
 0x996   :  { %v1844_v9 = vpop.permute.xlu1 %1843 }
 0x997   :  { %v1850_v10 = vsel %vm1849_vm8, %v1848_v8, %v1844_v9 }
 0x998   :  { %14541 = vmatprep.mubr.msk.f32.mxu0 %vm784_vm2, %v1850_v10  ;;  %v13610_v10 = vld [vmem:[#allocation25] ss:$0 sm:$0xff] }
 0x9cb   :  { %v2512_v11 = vpop.permute.xlu0 %2511 }
 0x9cc   :  { %v2522_v13 = vsel %vm1177_vm6, %v2011_v61, %v2512_v11 }
 0x9cf   :  { %v2516_v12 = vpop.permute.xlu0 %2515 }
 0x9d0   :  { %v2523_v14 = vsel %vm1847_vm7, %v2522_v13, %v2516_v12 }
 0x9d3   :  { %v2520_v15 = vpop.permute.xlu1 %2519 }
 0x9d4   :  { %v2524_v16 = vsel %vm1849_vm8, %v2523_v14, %v2520_v15 }
 0x9d5   :  { %14542 = vmatmul.mubr.msk.f32.vlgmr.msra.gmra.mrb[20].mxu0 %vm784_vm2, %v2524_v16 }
 0x9d6   :  { %15331 = vmatpush3.bf16.msra.mxu0 %v15328_v44 }
 0x9d7   :  { %15333 = vmatprep.subr.bf16.mxu0 %v15332_v2 }
 0x9da   :  { %15335 = vmatpush3.bf16.msra.mxu0 %v15332_v2 }
 0x9db   :  { %14577 = vmatprep.subr.mxu0 %v17238_v41 }
 0xaa8   :  { %v14543_v18 = vpop.f32.mrb[20].mxu0 }
 0xaa9   :  { %v2609_v19 = vadd.f32 %v14543_v18, %v13602_v17  ;;  %v2603_v20 = vpop.f32.mrb[21].mxu0 }
 0xaaa   :  { %v2604_v51 = vadd.f32 %v13602_v17, %v2603_v20 }
 0xaab   :  { %v2613_v21 = vadd.f32 %v2609_v19, %v17755_v32 }
 0xaac   :  { %v2612_v22 = vadd.f32 %v2604_v51, %v17753_v31 }
 0xaad   :  { %v2619_v23 = vsel %vm784_vm2, %v2613_v21, 0.0 }
 0xaae   :  { %2620 = vadd.xlane.f32.xlu1 %v2619_v23  ;;  %v2616_v24 = vsel %vm784_vm2, %v2612_v22, 0.0 }
 0xaaf   :  { %2617 = vadd.xlane.f32.xlu0 %v2616_v24 }
 0xb3b   :  { %v2621_v25 = vpop.xlane.xlu1 %2620 }
 0xb3c   :  { %v2624_v26 = vmul.f32 0.03125, %v2621_v25  ;;  %v2618_v27 = vpop.xlane.xlu0 %2617 }
 0xb3d   :  { %v2623_v28 = vmul.f32 0.03125, %v2618_v27 }
 0xb3e   :  { %v2626_v29 = vsub.f32 %v2613_v21, %v2624_v26 }
 0xb3f   :  { %v2625_v30 = vsub.f32 %v2612_v22, %v2623_v28  ;;  %v13615_v28 = vld [vmem:[%s19627_s9 + $0x20] sm:$0xff] }
 0xb40   :  { %v2628_v31 = vmul.f32 %v2626_v29, %v2626_v29 }
 0xb41   :  { %v2627_v33 = vmul.f32 %v2625_v30, %v2625_v30 }
 0xb42   :  { %v2632_v34 = vsel %vm784_vm2, %v2628_v31, 0.0 }
 0xb43   :  { %v2629_v32 = vsel %vm784_vm2, %v2627_v33, 0.0 }
 0xb44   :  { %2630 = vadd.xlane.f32.xlu0 %v2629_v32  ;;  %v13618_v32 = vld [vmem:[%s19627_s9 + $0x38] sm:$0xff] }
 0xb48   :  { %2633 = vadd.xlane.f32.xlu0 %v2632_v34 }
 0xbd1   :  { %v2631_v45 = vpop.xlane.xlu0 %2630 }
 0xbd2   :  { %v2635_v46 = vmul.f32 0.03125, %v2631_v45 }
 0xbd4   :  { %v2637_v47 = vadd.f32 1e-05, %v2635_v46  ;;  %v13614_v46 = vld [vmem:[#allocation28] ss:$0 sm:$0xff] }
 0xbd5   :  { %v2634_v48 = vpop.xlane.xlu0 %2633 }
 0xbd6   :  { %15967 = vrsqrt.f32 %v2637_v47  ;;  %v2636_v49 = vmul.f32 0.03125, %v2634_v48 }
 0xbd8   :  { %v2638_v50 = vadd.f32 1e-05, %v2636_v49 }
 0xbda   :  { %15969 = vrsqrt.f32 %v2638_v50 }
 0xbe0   :  { %v15968_v52 = vpop.eup %15967 }
 0xbe1   :  { %v2641_v54 = vmul.f32 %v15968_v52, %v2625_v30  ;;  %v13617_v30 = vld [vmem:[%s19627_s9 + $0x30] sm:$0xff]  ;;  %v13623_v52 = vld [vmem:[#allocation16 + $0x1] ss:$0 sm:$0xff] }
 0xbe2   :  { %v15340_v31 = vpack.c.bf16 %v13618_v32, %v13617_v30 }
 0xbe3   :  { %v2649_v56 = vmul.f32 %v13605_v53, %v2641_v54 }
 0xbe4   :  { %v15970_v57 = vpop.eup %15969 }
 0xbe5   :  { %v2642_v60 = vmul.f32 %v15970_v57, %v2626_v29  ;;  %v2657_v61 = vadd.f32 %v13606_v55, %v2649_v56  ;;  %v13616_v29 = vld [vmem:[%s19627_s9 + $0x28] sm:$0xff] }
 0xbe6   :  { %v15336_v33 = vpack.c.bf16 %v13616_v29, %v13615_v28 }
 0xbe7   :  { %v2650_v62 = vmul.f32 %v13605_v53, %v2642_v60  ;;  %14552 = vmatprep.mubr.msk.f32.mxu1 %vm784_vm2, %v2657_v61 }
 0xbe8   :  { %15337 = vmatprep.subr.bf16.mxu1 %v15336_v33 }
 0xbe9   :  { %v2658_v63 = vadd.f32 %v13606_v55, %v2650_v62 }
 0xbeb   :  { %14553 = vmatmul.mubr.msk.f32.vlgmr.msra.gmra.mrb[22].mxu1 %vm784_vm2, %v2658_v63 }
 0xbec   :  { %15339 = vmatpush3.bf16.msra.mxu1 %v15336_v33 }
 0xbed   :  { %15341 = vmatprep.subr.bf16.mxu1 %v15340_v31 }
 0xbf0   :  { %15343 = vmatpush3.bf16.msra.mxu1 %v15340_v31 }
 0xbf1   :  { %14582 = vmatprep.subr.mxu1 %v17238_v41 }
 0xcbe   :  { %v14554_v4 = vpop.f32.mrb[22].mxu1 }
 0xcbf   :  { %v2748_v5 = vadd.f32 %v14554_v4, %v13607_v3  ;;  %v2742_v6 = vpop.f32.mrb[23].mxu1 }
 0xcc0   :  { %v2743_v7 = vadd.f32 %v13607_v3, %v2742_v6 }
 0xcc1   :  { %v2752_v9 = vmax.f32 %v2748_v5, 0.0 }
 0xcc2   :  { %v2751_v8 = vmax.f32 %v2743_v7, 0.0 }
 0xcc4   :  { %14563 = vmatprep.mubr.msk.f32.mxu0 %vm784_vm2, %v2751_v8 }
 0xcc5   :  { %14564 = vmatmul.mubr.msk.f32.vlgmr.msra.gmra.mrb[22].mxu0 %vm784_vm2, %v2752_v9 }
 0xcc6   :  { %14579 = vmatprep.mubr.msk.f32.mxu0 %vm17239_vm5, %v17238_v41 }
 0xd98   :  { %v14565_v11 = vpop.f32.mrb[22].mxu0 }
 0xd99   :  { %v2842_v12 = vadd.f32 %v14565_v11, %v13610_v10  ;;  %v2836_v13 = vpop.f32.mrb[23].mxu0 }
 0xd9a   :  { %v2837_v14 = vadd.f32 %v13610_v10, %v2836_v13 }
 0xd9b   :  { %v2846_v15 = vadd.f32 %v2842_v12, %v2658_v63 }
 0xd9c   :  { %v2845_v16 = vadd.f32 %v2837_v14, %v2657_v61 }
 0xd9d   :  { %v2852_v17 = vsel %vm784_vm2, %v2846_v15, 0.0 }
 0xd9e   :  { %2853 = vadd.xlane.f32.xlu0 %v2852_v17  ;;  %v2849_v18 = vsel %vm784_vm2, %v2845_v16, 0.0 }
 0xd9f   :  { %2850 = vadd.xlane.f32.xlu1 %v2849_v18 }
 0xe2b   :  { %v2854_v19 = vpop.xlane.xlu0 %2853 }
 0xe2c   :  { %v2856_v20 = vmul.f32 0.03125, %v2854_v19  ;;  %v2851_v51 = vpop.xlane.xlu1 %2850 }
 0xe2d   :  { %v2855_v21 = vmul.f32 0.03125, %v2851_v51 }
 0xe2e   :  { %v2858_v22 = vsub.f32 %v2846_v15, %v2856_v20 }
 0xe2f   :  { %v2857_v23 = vsub.f32 %v2845_v16, %v2855_v21 }
 0xe30   :  { %v2860_v24 = vmul.f32 %v2858_v22, %v2858_v22 }
 0xe31   :  { %v2859_v25 = vmul.f32 %v2857_v23, %v2857_v23 }
 0xe32   :  { %v2864_v26 = vsel %vm784_vm2, %v2860_v24, 0.0 }
 0xe33   :  { %2865 = vadd.xlane.f32.xlu0 %v2864_v26  ;;  %v2861_v27 = vsel %vm784_vm2, %v2859_v25, 0.0 }
 0xe34   :  { %2862 = vadd.xlane.f32.xlu1 %v2861_v27 }
 0xec0   :  { %v2866_v34 = vpop.xlane.xlu0 %2865 }
 0xec1   :  { %v2868_v35 = vmul.f32 0.03125, %v2866_v34  ;;  %v2863_v36 = vpop.xlane.xlu1 %2862 }
 0xec2   :  { %v2867_v37 = vmul.f32 0.03125, %v2863_v36 }
 0xec3   :  { %v2870_v38 = vadd.f32 1e-05, %v2868_v35 }
 0xec4   :  { %v2869_v39 = vadd.f32 1e-05, %v2867_v37 }
 0xec5   :  { %15971 = vrsqrt.f32 %v2870_v38 }
 0xec6   :  { %15973 = vrsqrt.f32 %v2869_v39 }
 0xecf   :  { %v15972_v40 = vpop.eup %15971 }
 0xed0   :  { %v15974_v43 = vpop.eup %15973  ;;  %v2874_v44 = vmul.f32 %v15972_v40, %v2858_v22 }
 0xed1   :  { %v2873_v45 = vmul.f32 %v15974_v43, %v2857_v23 }
 0xed2   :  { %v2882_v47 = vmul.f32 %v13613_v42, %v2874_v44 }
 0xed3   :  { %v2881_v48 = vmul.f32 %v13613_v42, %v2873_v45 }
 0xed4   :  { %v17970_v50 = vadd.f32 %v13614_v46, %v2882_v47 }
 0xed5   :  { %v17968_v49 = vadd.f32 %v13614_v46, %v2881_v48 }
 0xed7   :  { %14574 = vmatprep.mubr.msk.f32.mxu1 %vm784_vm2, %v17968_v49 }
 0xed8   :  { %14575 = vmatmul.mubr.msk.f32.vlgmr.msra.gmra.mrb[24].mxu1 %vm784_vm2, %v17970_v50 }
 0xed9   :  { %14584 = vmatprep.mubr.msk.f32.mxu1 %vm17239_vm5, %v17238_v41 }
 0xfab   :  { %v14576_v53 = vpop.f32.mrb[24].mxu1 }
 0xfac   :  { %v2983_v54 = vpop.f32.mrb[25].mxu1  ;;  %v17992_v56 = vadd.f32 %v14576_v53, %v13623_v52 }
 0xfad   :  { %v17978_v55 = vadd.f32 %v13623_v52, %v2983_v54 }
 0xfaf   :  { %3158 = vrot.lane.b32.xlu0 %v17978_v55, %s17243_s28  ;;  %2993 = vrot.lane.b32.xlu1 %v17978_v55, %s17241_s24 }
 0xfb3   :  { %3321 = vrot.lane.b32.xlu0 %v17978_v55, %s17245_s17  ;;  %3156 = vrot.lane.b32.xlu1 %v17978_v55, %s17240_s14 }
 0xfb7   :  { %3486 = vrot.lane.b32.xlu0 %v17978_v55, %s17246_s1  ;;  %3323 = vrot.lane.b32.xlu1 %v17978_v55, %s17242_s26 }
 0xfbb   :  { %3832 = vrot.lane.b32.xlu0 %v17992_v56, %s17243_s28  ;;  %3488 = vrot.lane.b32.xlu1 %v17978_v55, %s17244_s3 }
 0xfbf   :  { %3997 = vrot.lane.b32.xlu0 %v17992_v56, %s17242_s26  ;;  %3667 = vrot.lane.b32.xlu1 %v17992_v56, %s17241_s24 }
 0xfc3   :  { %4162 = vrot.lane.b32.xlu0 %v17992_v56, %s17244_s3  ;;  %3830 = vrot.lane.b32.xlu1 %v17992_v56, %s17240_s14 }
 0xfc7   :  { %3080 = vrot.lane.b32.xlu0 %v17978_v55, %s17248_s0  ;;  %3995 = vrot.lane.b32.xlu1 %v17992_v56, %s17245_s17 }
 0xfcb   :  { %4160 = vrot.lane.b32.xlu1 %v17992_v56, %s17246_s1 }
 0xfcf   :  { %3245 = vrot.lane.b32.xlu1 %v17978_v55, %s17247_s5 }
0x1021   :  { %v3159_v57 = vpop.permute.xlu0 %3158  ;;  %v2994_v60 = vpop.permute.xlu1 %2993 }
0x1022   :  { %14578 = vmatpush3.xpose.msk.msra.mxu0 %vm1177_vm6, %v2994_v60 }
0x1023   :  { %14587 = vmatprep.subr.mxu0 %v17238_v41 }
0x1025   :  { %v3322_v61 = vpop.permute.xlu0 %3321  ;;  %14580 = vmatmul.mubr.msk.f32.vlgmr.msra.gmra.mrb[24].mxu0 %vm1177_vm6, %v17978_v55  ;;  %v3157_v62 = vpop.permute.xlu1 %3156 }
0x1026   :  { %14588 = vmatpush3.xpose.msk.msra.mxu0 %vm1177_vm6, %v3159_v57  ;;  %14589 = vmatprep.mubr.msk.f32.mxu0 %vm17239_vm5, %v17238_v41 }
0x1027   :  { %14597 = vmatprep.subr.mxu0 %v17238_v41 }
0x1029   :  { %v3487_v63 = vpop.permute.xlu0 %3486  ;;  %14590 = vmatmul.mubr.msk.f32.vlgmr.msra.gmra.mrb[26].mxu0 %vm1177_vm6, %v3157_v62  ;;  %v3324_v0 = vpop.permute.xlu1 %3323 }
0x102a   :  { %14598 = vmatpush3.xpose.msk.msra.mxu0 %vm1177_vm6, %v3324_v0  ;;  %14599 = vmatprep.mubr.msk.f32.mxu0 %vm17239_vm5, %v17238_v41 }
0x102b   :  { %14607 = vmatprep.subr.mxu0 %v17238_v41 }
0x102d   :  { %v3833_v1 = vpop.permute.xlu0 %3832  ;;  %14600 = vmatmul.mubr.msk.f32.vlgmr.msra.gmra.mrb[28].mxu0 %vm1177_vm6, %v3322_v61  ;;  %v3489_v2 = vpop.permute.xlu1 %3488 }
0x102e   :  { %14608 = vmatpush3.xpose.msk.msra.mxu0 %vm1177_vm6, %v3489_v2  ;;  %14609 = vmatprep.mubr.msk.f32.mxu0 %vm17239_vm5, %v17238_v41 }
0x102f   :  { %14617 = vmatprep.subr.mxu0 %v17238_v41 }
0x1031   :  { %v3998_v3 = vpop.permute.xlu0 %3997  ;;  %14610 = vmatmul.mubr.msk.f32.vlgmr.msra.gmra.mrb[30].mxu0 %vm1177_vm6, %v3487_v63  ;;  %v3668_v4 = vpop.permute.xlu1 %3667 }
0x1032   :  { %14618 = vmatpush3.xpose.msk.msra.mxu0 %vm1177_vm6, %v3668_v4  ;;  %14619 = vmatprep.mubr.msk.f32.mxu0 %vm17239_vm5, %v17238_v41 }
0x1033   :  { %14627 = vmatprep.subr.mxu0 %v17238_v41 }
0x1035   :  { %v4163_v5 = vpop.permute.xlu0 %4162  ;;  %14620 = vmatmul.mubr.msk.f32.vlgmr.msra.gmra.mrb[32].mxu0 %vm1177_vm6, %v17992_v56  ;;  %v3831_v6 = vpop.permute.xlu1 %3830 }
0x1036   :  { %14628 = vmatpush3.xpose.msk.msra.mxu0 %vm1177_vm6, %v3833_v1  ;;  %14629 = vmatprep.mubr.msk.f32.mxu0 %vm17239_vm5, %v17238_v41 }
0x1037   :  { %14637 = vmatprep.subr.mxu0 %v17238_v41 }
0x1039   :  { %v3081_v7 = vpop.permute.xlu0 %3080  ;;  %14630 = vmatmul.mubr.msk.f32.vlgmr.msra.gmra.mrb[34].mxu0 %vm1177_vm6, %v3831_v6  ;;  %v3996_v8 = vpop.permute.xlu1 %3995 }
0x103a   :  { %14583 = vmatpush3.msra.mxu1 %v3081_v7  ;;  %14638 = vmatpush3.xpose.msk.msra.mxu0 %vm1177_vm6, %v3998_v3 }
0x103b   :  { %14639 = vmatprep.mubr.msk.f32.mxu0 %vm17239_vm5, %v17238_v41  ;;  %14647 = vmatprep.subr.mxu0 %v17238_v41 }
0x103c   :  { %14592 = vmatprep.subr.mxu1 %v17238_v41 }
0x103d   :  { %14640 = vmatmul.mubr.msk.f32.vlgmr.msra.gmra.mrb[36].mxu0 %vm1177_vm6, %v3996_v8  ;;  %v4161_v9 = vpop.permute.xlu1 %4160 }
0x103e   :  { %14648 = vmatpush3.xpose.msk.msra.mxu0 %vm1177_vm6, %v4163_v5  ;;  %14649 = vmatprep.mubr.msk.f32.mxu0 %vm17239_vm5, %v17238_v41 }
0x1041   :  { %14650 = vmatmul.mubr.msk.f32.vlgmr.msra.gmra.mrb[38].mxu0 %vm1177_vm6, %v4161_v9  ;;  %v18066_v31 = vpop.permute.xlu1 %3245 }
0x10f8   :  { %v3065_v10 = vpop.f32.mrb[24].mxu0 }
0x10f9   :  { %v14581_v11 = vpop.f32.mrb[25].mxu0  ;;  %v3069_v12 = vsel %vm1177_vm6, %v3065_v10, -inf }
0x10fa   :  { %3070 = vmax.xlane.f32.xlu0 %v3069_v12 }
0x10fc   :  { %v3230_v13 = vpop.f32.mrb[26].mxu0 }
0x10fd   :  { %v14591_v14 = vpop.f32.mrb[27].mxu0  ;;  %v3234_v15 = vsel %vm1177_vm6, %v3230_v13, -inf }
0x10fe   :  { %3235 = vmax.xlane.f32.xlu1 %v3234_v15 }
0x1100   :  { %v3395_v16 = vpop.f32.mrb[28].mxu0 }
0x1101   :  { %v14601_v17 = vpop.f32.mrb[29].mxu0  ;;  %v3399_v18 = vsel %vm1177_vm6, %v3395_v16, -inf }
0x1102   :  { %3400 = vmax.xlane.f32.xlu0 %v3399_v18 }
0x1104   :  { %v3560_v19 = vpop.f32.mrb[30].mxu0 }
0x1105   :  { %v14611_v20 = vpop.f32.mrb[31].mxu0  ;;  %v3564_v51 = vsel %vm1177_vm6, %v3560_v19, -inf }
0x1106   :  { %3565 = vmax.xlane.f32.xlu0 %v3564_v51 }
0x1108   :  { %v3739_v21 = vpop.f32.mrb[32].mxu0 }
0x1109   :  { %v14621_v22 = vpop.f32.mrb[33].mxu0  ;;  %v3743_v23 = vsel %vm1177_vm6, %v3739_v21, -inf }
0x110a   :  { %3744 = vmax.xlane.f32.xlu1 %v3743_v23 }
0x110c   :  { %v3904_v24 = vpop.f32.mrb[34].mxu0 }
0x110d   :  { %v14631_v25 = vpop.f32.mrb[35].mxu0  ;;  %v3908_v26 = vsel %vm1177_vm6, %v3904_v24, -inf }
0x110e   :  { %3909 = vmax.xlane.f32.xlu0 %v3908_v26 }
0x1110   :  { %v4069_v27 = vpop.f32.mrb[36].mxu0 }
0x1111   :  { %v14641_v28 = vpop.f32.mrb[37].mxu0  ;;  %v4073_v29 = vsel %vm1177_vm6, %v4069_v27, -inf }
0x1112   :  { %4074 = vmax.xlane.f32.xlu1 %v4073_v29 }
0x1114   :  { %v4234_v30 = vpop.f32.mrb[38].mxu0 }
0x1115   :  { %v14651_v33 = vpop.f32.mrb[39].mxu0  ;;  %v4238_v32 = vsel %vm1177_vm6, %v4234_v30, -inf }
0x1116   :  { %4239 = vmax.xlane.f32.xlu0 %v4238_v32 }
0x1123   :  { %3575 = vrot.lane.b32.xlu1 %v17978_v55, %s17249_s19 }
0x112c   :  { %3410 = vrot.lane.b32.xlu0 %v17978_v55, %s17250_s27 }
0x1187   :  { %v3071_v34 = vpop.xlane.xlu0 %3070 }
0x1188   :  { %v3072_v35 = vsub.f32 %v3065_v10, %v3071_v34 }
0x118a   :  { %v3073_v36 = vmul.f32 1.442695, %v3072_v35 }
0x118b   :  { %v3236_v37 = vpop.xlane.xlu1 %3235 }
0x118c   :  { %15975 = vpow2.f32 %v3073_v36  ;;  %v3237_v38 = vsub.f32 %v3230_v13, %v3236_v37 }
0x118e   :  { %v3238_v39 = vmul.f32 1.442695, %v3237_v38 }
0x118f   :  { %v3401_v40 = vpop.xlane.xlu0 %3400 }
0x1190   :  { %15977 = vpow2.f32 %v3238_v39  ;;  %v3402_v42 = vsub.f32 %v3395_v16, %v3401_v40 }
0x1192   :  { %v3403_v43 = vmul.f32 1.442695, %v3402_v42 }
0x1193   :  { %v3566_v44 = vpop.xlane.xlu0 %3565 }
0x1194   :  { %15979 = vpow2.f32 %v3403_v43  ;;  %v3567_v45 = vsub.f32 %v3560_v19, %v3566_v44 }
0x1196   :  { %v15976_v46 = vpop.eup %15975  ;;  %v3568_v47 = vmul.f32 1.442695, %v3567_v45 }
0x1197   :  { %v3075_v48 = vsel %vm1177_vm6, %v15976_v46, 0.0  ;;  %v3745_v61 = vpop.xlane.xlu1 %3744 }
0x1198   :  { %15981 = vpow2.f32 %v3568_v47  ;;  %3076 = vadd.xlane.f32.xlu1 %v3075_v48  ;;  %v3746_v62 = vsub.f32 %v3739_v21, %v3745_v61 }
0x119a   :  { %v15978_v52 = vpop.eup %15977  ;;  %v3747_v2 = vmul.f32 1.442695, %v3746_v62  ;;  %v13621_v62 = vld [vmem:[%s19630_s7 + $0x30] sm:$0xff] }
0x119b   :  { %v3240_v53 = vsel %vm1177_vm6, %v15978_v52, 0.0  ;;  %v3910_v63 = vpop.xlane.xlu0 %3909 }
0x119c   :  { %3241 = vadd.xlane.f32.xlu0 %v3240_v53  ;;  %v3911_v1 = vsub.f32 %v3904_v24, %v3910_v63  ;;  %15983 = vpow2.f32 %v3747_v2  ;;  %v13622_v63 = vld [vmem:[%s19630_s7 + $0x38] sm:$0xff] }
0x119e   :  { %v15980_v54 = vpop.eup %15979  ;;  %v3912_v5 = vmul.f32 1.442695, %v3911_v1 }
0x119f   :  { %v3405_v55 = vsel %vm1177_vm6, %v15980_v54, 0.0  ;;  %v4075_v0 = vpop.xlane.xlu1 %4074 }
0x11a0   :  { %3406 = vadd.xlane.f32.xlu1 %v3405_v55  ;;  %v4076_v3 = vsub.f32 %v4069_v27, %v4075_v0  ;;  %15985 = vpow2.f32 %v3912_v5  ;;  %v15348_v0 = vpack.c.bf16 %v13622_v63, %v13621_v62  ;;  %v13653_v63 = vld [vmem:[#allocation19 + $0x1] ss:$0 sm:$0xff] }
0x11a2   :  { %v18071_v57 = vpop.eup %15981  ;;  %v4077_v6 = vmul.f32 1.442695, %v4076_v3 }
0x11a3   :  { %v3570_v60 = vsel %vm1177_vm6, %v18071_v57, 0.0  ;;  %v4240_v4 = vpop.xlane.xlu0 %4239  ;;  %v3576_v17 = vpop.permute.xlu1 %3575 }
0x11a4   :  { %3571 = vadd.xlane.f32.xlu0 %v3570_v60  ;;  %v4241_v7 = vsub.f32 %v4234_v30, %v4240_v4  ;;  %15987 = vpow2.f32 %v4077_v6  ;;  %v13620_v60 = vld [vmem:[%s19630_s7 + $0x28] sm:$0xff] }
0x11a6   :  { %v4242_v8 = vmul.f32 1.442695, %v4241_v7  ;;  %v15984_v9 = vpop.eup %15983 }
0x11a7   :  { %v3749_v11 = vsel %vm1177_vm6, %v15984_v9, 0.0  ;;  %v3411_v18 = vpop.permute.xlu0 %3410 }
0x11a8   :  { %15989 = vpow2.f32 %v4242_v8 }
0x11aa   :  { %v18079_v10 = vpop.eup %15985 }
0x11ab   :  { %v3914_v13 = vsel %vm1177_vm6, %v18079_v10, 0.0 }
0x11ae   :  { %v18082_v12 = vpop.eup %15987 }
0x11af   :  { %v4079_v14 = vsel %vm1177_vm6, %v18082_v12, 0.0 }
0x11b1   :  { %3919 = vrot.lane.b32.xlu1 %v17992_v56, %s17247_s5 }
0x11b2   :  { %v18088_v15 = vpop.eup %15989 }
0x11b3   :  { %v4244_v16 = vsel %vm1177_vm6, %v18088_v15, 0.0 }
0x11ba   :  { %3754 = vrot.lane.b32.xlu0 %v17992_v56, %s17248_s0 }
0x11d5   :  { %3750 = vadd.xlane.f32.xlu1 %v3749_v11 }
0x11d9   :  { %3915 = vadd.xlane.f32.xlu0 %v3914_v13  ;;  %4080 = vadd.xlane.f32.xlu1 %v4079_v14 }
0x11dd   :  { %4245 = vadd.xlane.f32.xlu1 %v4244_v16 }
0x11ee   :  { %4249 = vrot.lane.b32.xlu1 %v17992_v56, %s17249_s19 }
0x11ef   :  { %4084 = vrot.lane.b32.xlu0 %v17992_v56, %s17250_s27 }
0x1225   :  { %v3077_v19 = vpop.xlane.xlu1 %3076 }
0x1226   :  { %15991 = vrcp.f32 %v3077_v19 }
0x1229   :  { %v3242_v20 = vpop.xlane.xlu0 %3241 }
0x122a   :  { %15993 = vrcp.f32 %v3242_v20 }
0x122d   :  { %v3407_v51 = vpop.xlane.xlu1 %3406 }
0x122e   :  { %15995 = vrcp.f32 %v3407_v51  ;;  %v13650_v51 = vld [vmem:[#allocation18 + $0x1] ss:$0 sm:$0xff] }
0x1230   :  { %v15992_v21 = vpop.eup %15991 }
0x1231   :  { %v3572_v22 = vpop.xlane.xlu0 %3571  ;;  %v3079_v23 = vmul.f32 %v15992_v21, %v15976_v46  ;;  %v3920_v30 = vpop.permute.xlu1 %3919 }
0x1232   :  { %15997 = vrcp.f32 %v3572_v22 }
0x1233   :  { %14585 = vmatmul.mubr.msk.f32.vlgmr.msra.gmra.mrb[26].mxu1 %vm1177_vm6, %v3079_v23 }
0x1234   :  { %v15994_v24 = vpop.eup %15993  ;;  %14593 = vmatpush3.msra.mxu1 %v18066_v31  ;;  %14594 = vmatprep.mubr.msk.f32.mxu1 %vm17239_vm5, %v17238_v41 }
0x1235   :  { %14602 = vmatprep.subr.mxu1 %v17238_v41  ;;  %v3244_v56 = vmul.f32 %v15994_v24, %v15978_v52  ;;  %v3755_v29 = vpop.permute.xlu0 %3754 }
0x1237   :  { %14595 = vmatmul.mubr.msk.f32.vlgmr.msra.gmra.mrb[28].mxu1 %vm1177_vm6, %v3244_v56 }
0x1238   :  { %v15996_v25 = vpop.eup %15995  ;;  %14603 = vmatpush3.msra.mxu1 %v3411_v18  ;;  %14604 = vmatprep.mubr.msk.f32.mxu1 %vm17239_vm5, %v17238_v41 }
0x1239   :  { %14612 = vmatprep.subr.mxu1 %v17238_v41  ;;  %v3409_v26 = vmul.f32 %v15996_v25, %v15980_v54 }
0x123b   :  { %14605 = vmatmul.mubr.msk.f32.vlgmr.msra.gmra.mrb[30].mxu1 %vm1177_vm6, %v3409_v26 }
0x123c   :  { %v15998_v27 = vpop.eup %15997  ;;  %14613 = vmatpush3.msra.mxu1 %v3576_v17  ;;  %14614 = vmatprep.mubr.msk.f32.mxu1 %vm17239_vm5, %v17238_v41 }
0x123d   :  { %14622 = vmatprep.subr.mxu1 %v17238_v41  ;;  %v3574_v28 = vmul.f32 %v15998_v27, %v18071_v57  ;;  %v13619_v57 = vld [vmem:[%s19630_s7 + $0x20] sm:$0xff] }
0x123e   :  { %v15344_v61 = vpack.c.bf16 %v13620_v60, %v13619_v57  ;;  %v13572_v60 = vld [vmem:[#allocation12] ss:$0 sm:$0xff] }
0x123f   :  { %14615 = vmatmul.mubr.msk.f32.vlgmr.msra.gmra.mrb[32].mxu1 %vm1177_vm6, %v3574_v28 }
0x1240   :  { %14623 = vmatpush3.msra.mxu1 %v3755_v29  ;;  %14624 = vmatprep.mubr.msk.f32.mxu1 %vm17239_vm5, %v17238_v41 }
0x1241   :  { %14632 = vmatprep.subr.mxu1 %v17238_v41  ;;  %15345 = vmatprep.subr.bf16.mxu0 %v15344_v61 }
0x1242   :  { %15347 = vmatpush3.bf16.msra.mxu0 %v15344_v61  ;;  %v1051_v61 = vadd.f32 %v13572_v60, %v17820_v59 }
0x1243   :  { %15349 = vmatprep.subr.bf16.mxu0 %v15348_v0 }
0x1246   :  { %15351 = vmatpush3.bf16.msra.mxu0 %v15348_v0 }
0x1262   :  { %v3751_v33 = vpop.xlane.xlu1 %3750 }
0x1263   :  { %15999 = vrcp.f32 %v3751_v33 }
0x1266   :  { %v3916_v32 = vpop.xlane.xlu0 %3915  ;;  %v4081_v31 = vpop.xlane.xlu1 %4080 }
0x1267   :  { %16001 = vrcp.f32 %v3916_v32 }
0x1268   :  { %16003 = vrcp.f32 %v4081_v31 }
0x126a   :  { %v4246_v34 = vpop.xlane.xlu1 %4245  ;;  %v4085_v40 = vpop.permute.xlu0 %4084 }
0x126b   :  { %16005 = vrcp.f32 %v4246_v34 }
0x126d   :  { %v16000_v35 = vpop.eup %15999 }
0x126e   :  { %v3753_v36 = vmul.f32 %v16000_v35, %v15984_v9  ;;  %v4250_v44 = vpop.permute.xlu1 %4249 }
0x1270   :  { %14625 = vmatmul.mubr.msk.f32.vlgmr.msra.gmra.mrb[34].mxu1 %vm1177_vm6, %v3753_v36  ;;  %v13655_v36 = vld [vmem:[%s19631_s10 + $0x20] sm:$0xff] }
0x1271   :  { %v16002_v37 = vpop.eup %16001  ;;  %14633 = vmatpush3.msra.mxu1 %v3920_v30  ;;  %14634 = vmatprep.mubr.msk.f32.mxu1 %vm17239_vm5, %v17238_v41 }
0x1272   :  { %14642 = vmatprep.subr.mxu1 %v17238_v41  ;;  %v3918_v38 = vmul.f32 %v16002_v37, %v18079_v10  ;;  %v16004_v39 = vpop.eup %16003  ;;  %v13656_v37 = vld [vmem:[%s19631_s10 + $0x28] sm:$0xff] }
0x1273   :  { %v4083_v42 = vmul.f32 %v16004_v39, %v18082_v12  ;;  %v15352_v39 = vpack.c.bf16 %v13656_v37, %v13655_v36 }
0x1274   :  { %14635 = vmatmul.mubr.msk.f32.vlgmr.msra.gmra.mrb[36].mxu1 %vm1177_vm6, %v3918_v38  ;;  %v13657_v38 = vld [vmem:[%s19631_s10 + $0x30] sm:$0xff] }
0x1275   :  { %14643 = vmatpush3.msra.mxu1 %v4085_v40  ;;  %14644 = vmatprep.mubr.msk.f32.mxu1 %vm17239_vm5, %v17238_v41  ;;  %v16006_v43 = vpop.eup %16005  ;;  %v13658_v40 = vld [vmem:[%s19631_s10 + $0x38] sm:$0xff] }
0x1276   :  { %14652 = vmatprep.subr.mxu1 %v17238_v41  ;;  %v4248_v45 = vmul.f32 %v16006_v43, %v18088_v15  ;;  %v4713_v43 = vld [vmem:[#allocation30] sm:$0xff] }
0x1278   :  { %14645 = vmatmul.mubr.msk.f32.vlgmr.msra.gmra.mrb[38].mxu1 %vm1177_vm6, %v4083_v42  ;;  %v15356_v42 = vpack.c.bf16 %v13658_v40, %v13657_v38 }
0x1279   :  { %14653 = vmatpush3.msra.mxu1 %v4250_v44  ;;  %14654 = vmatprep.mubr.msk.f32.mxu1 %vm17239_vm5, %v17238_v41  ;;  %v4714_v44 = vld [vmem:[#allocation30 + $0x8] sm:$0xff] }
0x127a   :  { %15353 = vmatprep.subr.bf16.mxu1 %v15352_v39 }
0x127c   :  { %14655 = vmatmul.mubr.msk.f32.vlgmr.msra.gmra.mrb[40].mxu1 %vm1177_vm6, %v4248_v45  ;;  %v15368_v45 = vpack.c.bf16 %v4714_v44, %v4713_v43 }
0x127d   :  { %15355 = vmatpush3.bf16.msra.mxu1 %v15352_v39 }
0x127e   :  { %15357 = vmatprep.subr.bf16.mxu1 %v15356_v42 }
0x1281   :  { %15359 = vmatpush3.bf16.msra.mxu1 %v15356_v42 }
0x1282   :  { %15369 = vmatprep.subr.bf16.mxu1 %v15368_v45 }
0x1306   :  { %v3152_v46 = vpop.f32.mrb[26].mxu1 }
0x1307   :  { %v14586_v47 = vpop.f32.mrb[27].mxu1 }
0x1308   :  { %v4573_v47 = vld [vmem:[#allocation24 + $0x28] sm:$0xff] }
0x130a   :  { %v3317_v48 = vpop.f32.mrb[28].mxu1 }
0x130b   :  { %3652 = vrot.lane.b32.xlu0 %v3317_v48, %s17202_s29  ;;  %v14596_v52 = vpop.f32.mrb[29].mxu1 }
0x130e   :  { %v3482_v53 = vpop.f32.mrb[30].mxu1 }
0x130f   :  { %3656 = vrot.lane.b32.xlu1 %v3482_v53, %s17205_s22  ;;  %v14606_v54 = vpop.f32.mrb[31].mxu1 }
0x1312   :  { %v3647_v55 = vpop.f32.mrb[32].mxu1 }
0x1313   :  { %3660 = vrot.lane.b32.xlu1 %v3647_v55, %s17251_s30  ;;  %v14616_v41 = vpop.f32.mrb[33].mxu1 }
0x1343   :  { %v3826_v1 = vpop.f32.mrb[34].mxu1 }
0x1344   :  { %v14626_v2 = vpop.f32.mrb[35].mxu1 }
0x1345   :  { %v1063_v2 = vrot.slane %v1051_v61, 7 }
0x1347   :  { %v3991_v3 = vpop.f32.mrb[36].mxu1 }
0x1348   :  { %4326 = vrot.lane.b32.xlu0 %v3991_v3, %s17202_s29  ;;  %v14636_v4 = vpop.f32.mrb[37].mxu1 }
0x134b   :  { %v4156_v5 = vpop.f32.mrb[38].mxu1 }
0x134c   :  { %4330 = vrot.lane.b32.xlu0 %v4156_v5, %s17205_s22  ;;  %v14646_v6 = vpop.f32.mrb[39].mxu1  ;;  %v1061_v5 = vld [vmem:[%s19632_s11] sm:$0x1] }
0x134f   :  { %v4321_v7 = vpop.f32.mrb[40].mxu1 }
0x1350   :  { %4334 = vrot.lane.b32.xlu1 %v4321_v7, %s17251_s30  ;;  %v14656_v8 = vpop.f32.mrb[41].mxu1 }
0x1351   :  { %v4715_v8 = vld [vmem:[#allocation30 + $0x10] sm:$0xff] }
0x137d   :  { %v3653_v9 = vpop.permute.xlu0 %3652 }
0x137e   :  { %v3663_v11 = vsel %vm1177_vm6, %v3152_v46, %v3653_v9  ;;  %v4572_v46 = vld [vmem:[#allocation24 + $0x20] sm:$0xff] }
0x137f   :  { %v15360_v48 = vpack.c.bf16 %v4573_v47, %v4572_v46  ;;  %v4716_v9 = vld [vmem:[#allocation30 + $0x18] sm:$0xff] }
0x1381   :  { %v3657_v10 = vpop.permute.xlu1 %3656  ;;  %15361 = vmatprep.subr.bf16.mxu0 %v15360_v48 }
0x1382   :  { %v3664_v12 = vsel %vm1847_vm7, %v3663_v11, %v3657_v10  ;;  %v1056_v10 = vadd.f32 %v17817_v58, %v13572_v60  ;;  %v1059_v11 = vld [vmem:[#allocation13] sm:$0xff]  ;;  %v4826_v60 = vlaneseq }
0x1384   :  { %v4827_v61 = vshrl.u32 %v4826_v60, 7 }
0x1385   :  { %v3661_v13 = vpop.permute.xlu1 %3660 }
0x1386   :  { %v3665_v14 = vsel %vm1849_vm8, %v3664_v12, %v3661_v13  ;;  %v1066_v12 = vsel %vm1065_vm9, %v1061_v5, %v1063_v2 }
0x1387   :  { %14665 = vmatprep.mubr.msk.f32.mxu0 %vm784_vm2, %v3665_v14  ;;  %v15372_v14 = vpack.c.bf16 %v4716_v9, %v4715_v8 }
0x13ba   :  { %v4327_v15 = vpop.permute.xlu0 %4326 }
0x13bb   :  { %v4337_v17 = vsel %vm1177_vm6, %v3826_v1, %v4327_v15  ;;  %v13654_v1 = vld [vmem:[#allocation21 + $0x1] ss:$0 sm:$0xff]  ;;  %v18167_v15 = vadd.f32 %v1066_v12, %v1059_v11 }
0x13be   :  { %v4331_v16 = vpop.permute.xlu0 %4330 }
0x13bf   :  { %v4338_v18 = vsel %vm1847_vm7, %v4337_v17, %v4331_v16  ;;  %v1060_v16 = vld [vmem:[#allocation13 + $0x8] sm:$0x1]  ;;  %v1071_v17 = vrot.slane %v1056_v10, 7 }
0x13c0   :  { %v1068_v58 = vadd.f32 %v1063_v2, %v1060_v16 }
0x13c2   :  { %v4335_v19 = vpop.permute.xlu1 %4334 }
0x13c3   :  { %v4339_v20 = vsel %vm1849_vm8, %v4338_v18, %v4335_v19  ;;  %v1073_v18 = vsel %vm1065_vm9, %v1061_v5, %v1071_v17 }
0x13c4   :  { %14666 = vmatmul.mubr.msk.f32.vlgmr.msra.gmra.mrb[40].mxu0 %vm784_vm2, %v4339_v20  ;;  %v18174_v19 = vadd.f32 %v1073_v18, %v1059_v11  ;;  %v1075_v20 = vadd.f32 %v1071_v17, %v1060_v16 }
0x13c5   :  { %15363 = vmatpush3.bf16.msra.mxu0 %v15360_v48 }
0x1497   :  { %v14667_v21 = vpop.f32.mrb[40].mxu0 }
0x1498   :  { %v4424_v22 = vadd.f32 %v14667_v21, %v13650_v51  ;;  %v4418_v23 = vpop.f32.mrb[41].mxu0  ;;  %v18184_v21 = vsel %vm1065_vm9, %v1075_v20, 0.0 }
0x1499   :  { %v4419_v24 = vadd.f32 %v13650_v51, %v4418_v23  ;;  %v18177_v51 = vsel %vm1065_vm9, %v1068_v58, 0.0  ;;  %v4575_v23 = vld [vmem:[#allocation24 + $0x38] sm:$0xff] }
0x149a   :  { %v4428_v56 = vadd.f32 %v4424_v22, %v17970_v50  ;;  %v4574_v22 = vld [vmem:[#allocation24 + $0x30] sm:$0xff] }
0x149b   :  { %v4427_v25 = vadd.f32 %v4419_v24, %v17968_v49  ;;  %v15364_v24 = vpack.c.bf16 %v4575_v23, %v4574_v22 }
0x149c   :  { %v4436_v26 = vsel %vm784_vm2, %v4428_v56, 0.0 }
0x149d   :  { %4437 = vadd.xlane.f32.xlu1 %v4436_v26  ;;  %v4433_v27 = vsel %vm784_vm2, %v4427_v25, 0.0  ;;  %15365 = vmatprep.subr.bf16.mxu0 %v15364_v24 }
0x149e   :  { %4434 = vadd.xlane.f32.xlu0 %v4433_v27  ;;  %15367 = vmatpush3.bf16.msra.mxu0 %v15364_v24 }
0x152a   :  { %v4438_v28 = vpop.xlane.xlu1 %4437 }
0x152b   :  { %v4440_v29 = vmul.f32 0.03125, %v4438_v28  ;;  %v4435_v30 = vpop.xlane.xlu0 %4434 }
0x152c   :  { %v4439_v33 = vmul.f32 0.03125, %v4435_v30 }
0x152d   :  { %v4442_v32 = vsub.f32 %v4428_v56, %v4440_v29  ;;  %v13659_v56 = vld [vmem:[#allocation22 + $0x1] ss:$0 sm:$0xff] }
0x152e   :  { %v4441_v31 = vsub.f32 %v4427_v25, %v4439_v33  ;;  %v13667_v33 = vld [vmem:[#allocation31] ss:$0 sm:$0xff] }
0x152f   :  { %v4444_v49 = vmul.f32 %v4442_v32, %v4442_v32 }
0x1530   :  { %v4443_v34 = vmul.f32 %v4441_v31, %v4441_v31 }
0x1531   :  { %v4448_v35 = vsel %vm784_vm2, %v4444_v49, 0.0 }
0x1532   :  { %v4445_v50 = vsel %vm784_vm2, %v4443_v34, 0.0 }
0x1533   :  { %4446 = vadd.xlane.f32.xlu0 %v4445_v50 }
0x1537   :  { %4449 = vadd.xlane.f32.xlu0 %v4448_v35 }
0x15c0   :  { %v4447_v52 = vpop.xlane.xlu0 %4446 }
0x15c1   :  { %v4451_v53 = vmul.f32 0.03125, %v4447_v52 }
0x15c3   :  { %v4453_v54 = vadd.f32 1e-05, %v4451_v53 }
0x15c4   :  { %v4450_v55 = vpop.xlane.xlu0 %4449 }
0x15c5   :  { %16007 = vrsqrt.f32 %v4453_v54  ;;  %v4452_v41 = vmul.f32 0.03125, %v4450_v55  ;;  %v18230_v54 = vld [vmem:[#allocation25 + $0x1] ss:$0 sm:$0xff] }
0x15c7   :  { %v4454_v57 = vadd.f32 1e-05, %v4452_v41 }
0x15c9   :  { %16009 = vrsqrt.f32 %v4454_v57 }
0x15cf   :  { %v16008_v62 = vpop.eup %16007 }
0x15d0   :  { %v4457_v0 = vmul.f32 %v16008_v62, %v4441_v31  ;;  %v4828_v62 = vadd.s32 8, %v4827_v61 }
0x15d2   :  { %v4465_v3 = vmul.f32 %v13653_v63, %v4457_v0 }
0x15d3   :  { %v16010_v4 = vpop.eup %16009 }
0x15d4   :  { %v4458_v6 = vmul.f32 %v16010_v4, %v4442_v32  ;;  %v18159_v7 = vadd.f32 %v13654_v1, %v4465_v3 }
0x15d6   :  { %v4466_v59 = vmul.f32 %v13653_v63, %v4458_v6  ;;  %14676 = vmatprep.mubr.msk.f32.mxu1 %vm784_vm2, %v18159_v7  ;;  %v4830_v63 = vand.u32 127, %v4826_v60 }
0x15d8   :  { %v18165_v13 = vadd.f32 %v13654_v1, %v4466_v59  ;;  %vm18237_vm11 = vcmp.le.s32.totalorder %v4830_v63, %v4828_v62  ;;  %vm18241_vm12 = vcmp.le.s32.totalorder %v4830_v63, %v4827_v61 }
0x15da   :  { %14677 = vmatmul.mubr.msk.f32.vlgmr.msra.gmra.mrb[42].mxu1 %vm784_vm2, %v18165_v13 }
0x15db   :  { %15371 = vmatpush3.bf16.msra.mxu1 %v15368_v45  ;;  %14698 = vmatprep.mubr.msk.f32.mxu1 %vm784_vm2, %v18167_v15 }
0x15dc   :  { %15373 = vmatprep.subr.bf16.mxu1 %v15372_v14 }
0x15df   :  { %15375 = vmatpush3.bf16.msra.mxu1 %v15372_v14 }
0x15e2   :  { %14699 = vmatmul.mubr.msk.f32.vlgmr.msra.gmra.mrb[44].mxu1 %vm784_vm2, %v18177_v51 }
0x15e3   :  { %14701 = vmatprep.mubr.msk.f32.mxu1 %vm784_vm2, %v18174_v19 }
0x15e6   :  { %14702 = vmatmul.mubr.msk.f32.gmra.mrb[46].mxu1 %vm784_vm2, %v18184_v21 }
0x16ad   :  { %v14678_v25 = vpop.f32.mrb[42].mxu1 }
0x16ae   :  { %v4566_v26 = vadd.f32 %v14678_v25, %v13659_v56  ;;  %v4560_v27 = vpop.f32.mrb[43].mxu1 }
0x16af   :  { %v4561_v28 = vadd.f32 %v13659_v56, %v4560_v27 }
0x16b0   :  { %v4570_v30 = vmax.f32 %v4566_v26, 0.0 }
0x16b1   :  { %v4569_v29 = vmax.f32 %v4561_v28, 0.0 }
0x16b3   :  { %14687 = vmatprep.mubr.msk.f32.mxu0 %vm784_vm2, %v4569_v29 }
0x16b4   :  { %14688 = vmatmul.mubr.msk.f32.vlgmr.msra.gmra.mrb[42].mxu0 %vm784_vm2, %v4570_v30 }
0x16b5   :  { %v14700_v32 = vpop.f32.mrb[44].mxu1 }
0x16b6   :  { %v18190_v31 = vadd.f32 %v14700_v32, %v13667_v33  ;;  %v4807_v34 = vpop.f32.mrb[45].mxu1 }
0x16b7   :  { %v18192_v50 = vadd.f32 %v13667_v33, %v4807_v34 }
0x16b9   :  { %v14703_v49 = vpop.f32.mrb[46].mxu1  ;;  %14708 = vmatprep.mubr.msk.f32.mxu0 %vm1177_vm6, %v18192_v50  ;;  %v18198_v35 = vpack.i.bf16 %v18190_v31, %v18192_v50 }
0x16ba   :  { %v18200_v36 = vadd.f32 %v14703_v49, %v13667_v33  ;;  %v4817_v37 = vpop.f32.mrb[47].mxu1 }
0x16bb   :  { %v18202_v38 = vadd.f32 %v13667_v33, %v4817_v37  ;;  %15761 = vrot.lane.b32.xlu0 %v18198_v35, %s17243_s28  ;;  %15756 = vrot.lane.b32.xlu1 %v18198_v35, %s17241_s24 }
0x16bf   :  { %5033 = vrot.lane.b32.xlu1 %v18192_v50, %s17240_s14 }
0x16c3   :  { %5035 = vrot.lane.b32.xlu1 %v18190_v31, %s17240_s14 }
0x172d   :  { %v15762_v39 = vpop.permute.xlu0 %15761  ;;  %v15757_v40 = vpop.permute.xlu1 %15756 }
0x172e   :  { %v15764_v42 = vunpack.i.h.bf16 %v15762_v39  ;;  %v15763_v43 = vunpack.i.l.bf16 %v15762_v39  ;;  %v15759_v44 = vunpack.i.h.bf16 %v15757_v40  ;;  %v15758_v45 = vunpack.i.l.bf16 %v15757_v40 }
0x1730   :  { %v15376_v47 = vpack.c.bf16 %v15759_v44, %v15758_v45  ;;  %v15386_v48 = vpack.c.bf16 %v15764_v42, %v15763_v43 }
0x1731   :  { %v5034_v52 = vpop.permute.xlu1 %5033 }
0x1732   :  { %15378 = vmatprep.subr.msk.bf16.mxu0 %vm18214_vm10, %v15376_v47 }
0x1733   :  { %15381 = vmatpush3.bf16.xpose.msk.msra.mxu0 %vm18214_vm10, %v15376_v47 }
0x1734   :  { %15388 = vmatprep.subr.msk.bf16.mxu0 %vm18214_vm10, %v15386_v48 }
0x1735   :  { %v5036_v53 = vpop.permute.xlu1 %5035 }
0x173a   :  { %14709 = vmatmul.mubr.msk.f32.vlgmr.msra.gmra.mrb[44].mxu0 %vm1177_vm6, %v18190_v31 }
0x173b   :  { %15391 = vmatpush3.bf16.xpose.msk.msra.mxu0 %vm18214_vm10, %v15386_v48  ;;  %14722 = vmatprep.mubr.msk.f32.mxu0 %vm1177_vm6, %v5034_v52 }
0x1742   :  { %14723 = vmatmul.mubr.msk.f32.vlgmr.msra.gmra.mrb[46].mxu0 %vm1177_vm6, %v5036_v53 }
0x1787   :  { %v14689_v55 = vpop.f32.mrb[42].mxu0 }
0x1788   :  { %v18233_v41 = vadd.f32 %v14689_v55, %v18230_v54  ;;  %v18235_v57 = vpop.f32.mrb[43].mxu0 }
0x180d   :  { %v14710_v2 = vpop.f32.mrb[44].mxu0 }
0x180e   :  { %v4923_v3 = vsel %vm18237_vm11, %v14710_v2, -1e+30  ;;  %v4913_v4 = vpop.f32.mrb[45].mxu0 }
0x180f   :  { %v4927_v5 = vsel %vm1847_vm7, %v4923_v3, -inf  ;;  %v4922_v6 = vsel %vm18241_vm12, %v4913_v4, -1e+30 }
0x1810   :  { %v4924_v8 = vsel %vm1847_vm7, %v4922_v6, -inf  ;;  %4928 = vmax.xlane.f32.xlu1 %v4927_v5 }
0x1811   :  { %4925 = vmax.xlane.f32.xlu0 %v4924_v8 }
0x1815   :  { %v14724_v9 = vpop.f32.mrb[46].mxu0 }
0x1816   :  { %v5115_v10 = vpop.f32.mrb[47].mxu0  ;;  %v5125_v59 = vsel %vm18237_vm11, %v14724_v9, -1e+30 }
0x1817   :  { %v5124_v11 = vsel %vm18241_vm12, %v5115_v10, -1e+30  ;;  %v5129_v14 = vsel %vm1847_vm7, %v5125_v59, -inf }
0x1818   :  { %v5126_v12 = vsel %vm1847_vm7, %v5124_v11, -inf }
0x1819   :  { %5127 = vmax.xlane.f32.xlu0 %v5126_v12 }
0x181d   :  { %5130 = vmax.xlane.f32.xlu0 %v5129_v14 }
0x1821   :  { %15766 = vrot.lane.b32.xlu1 %v18198_v35, %s17248_s0 }
0x189d   :  { %v4929_v16 = vpop.xlane.xlu1 %4928 }
0x189e   :  { %v4931_v17 = vsub.f32 %v4923_v3, %v4929_v16  ;;  %v4926_v58 = vpop.xlane.xlu0 %4925 }
0x189f   :  { %v4930_v18 = vsub.f32 %v4922_v6, %v4926_v58 }
0x18a0   :  { %v4934_v20 = vmul.f32 1.442695, %v4931_v17 }
0x18a1   :  { %v4932_v22 = vmul.f32 1.442695, %v4930_v18  ;;  %v15767_v23 = vpop.permute.xlu1 %15766 }
0x18a2   :  { %16011 = vpow2.f32 %v4934_v20  ;;  %v15769_v24 = vunpack.i.h.bf16 %v15767_v23  ;;  %v15768_v56 = vunpack.i.l.bf16 %v15767_v23 }
0x18a3   :  { %16013 = vpow2.f32 %v4932_v22 }
0x18a4   :  { %v15382_v25 = vpack.c.bf16 %v15769_v24, %v15768_v56 }
0x18a6   :  { %15383 = vmatprep.subr.bf16.mxu1 %v15382_v25  ;;  %v5128_v26 = vpop.xlane.xlu0 %5127 }
0x18a7   :  { %15385 = vmatpush3.bf16.msra.mxu1 %v15382_v25  ;;  %v5132_v39 = vsub.f32 %v5124_v11, %v5128_v26 }
0x18a9   :  { %v5134_v40 = vmul.f32 1.442695, %v5132_v39 }
0x18aa   :  { %v5131_v27 = vpop.xlane.xlu0 %5130 }
0x18ab   :  { %v5133_v28 = vsub.f32 %v5125_v59, %v5131_v27 }
0x18ac   :  { %v16012_v29 = vpop.eup %16011 }
0x18ad   :  { %v16014_v30 = vpop.eup %16013  ;;  %v5136_v33 = vmul.f32 1.442695, %v5133_v28  ;;  %v4939_v32 = vsel %vm1847_vm7, %v16012_v29, 0.0 }
0x18ae   :  { %4940 = vadd.xlane.f32.xlu0 %v4939_v32  ;;  %v4936_v34 = vsel %vm1847_vm7, %v16014_v30, 0.0 }
0x18af   :  { %16015 = vpow2.f32 %v5136_v33  ;;  %4937 = vadd.xlane.f32.xlu1 %v4936_v34 }
0x18b0   :  { %16017 = vpow2.f32 %v5134_v40 }
0x18b9   :  { %v16016_v49 = vpop.eup %16015 }
0x18ba   :  { %v5141_v37 = vsel %vm1847_vm7, %v16016_v49, 0.0  ;;  %v16018_v42 = vpop.eup %16017 }
0x18bb   :  { %5142 = vadd.xlane.f32.xlu0 %v5141_v37  ;;  %v5138_v43 = vsel %vm1847_vm7, %v16018_v42, 0.0 }
0x18c0   :  { %15776 = vrot.lane.b32.xlu1 %v18198_v35, %s17242_s26 }
0x18d1   :  { %15771 = vrot.lane.b32.xlu0 %v18198_v35, %s17247_s5 }
0x18d5   :  { %5237 = vrot.lane.b32.xlu0 %v18190_v31, %s17245_s17 }
0x18e4   :  { %5139 = vadd.xlane.f32.xlu1 %v5138_v43 }
0x18f5   :  { %5235 = vrot.lane.b32.xlu1 %v18192_v50, %s17245_s17 }
0x193b   :  { %v4941_v44 = vpop.xlane.xlu0 %4940 }
0x193c   :  { %16019 = vrcp.f32 %v4941_v44  ;;  %v4938_v45 = vpop.xlane.xlu1 %4937 }
0x193d   :  { %16021 = vrcp.f32 %v4938_v45 }
0x1940   :  { %v15777_v60 = vpop.permute.xlu1 %15776 }
0x1941   :  { %v15779_v62 = vunpack.i.h.bf16 %v15777_v60  ;;  %v15778_v63 = vunpack.i.l.bf16 %v15777_v60 }
0x1943   :  { %v15396_v5 = vpack.c.bf16 %v15779_v62, %v15778_v63 }
0x1946   :  { %v16020_v47 = vpop.eup %16019 }
0x1947   :  { %v16022_v48 = vpop.eup %16021  ;;  %v4945_v55 = vmul.f32 %v16020_v47, %v16012_v29 }
0x1948   :  { %v5143_v52 = vpop.xlane.xlu0 %5142  ;;  %v4944_v53 = vmul.f32 %v16022_v48, %v16014_v30 }
0x1949   :  { %16023 = vrcp.f32 %v5143_v52 }
0x194a   :  { %14715 = vmatprep.mubr.msk.f32.mxu1 %vm1847_vm7, %v4944_v53 }
0x194b   :  { %14716 = vmatmul.mubr.msk.f32.vlgmr.msra.gmra.mrb[48].mxu1 %vm1847_vm7, %v4945_v55 }
0x194c   :  { %v15772_v61 = vpop.permute.xlu0 %15771 }
0x194d   :  { %v15774_v2 = vunpack.i.h.bf16 %v15772_v61  ;;  %v15773_v3 = vunpack.i.l.bf16 %v15772_v61 }
0x194f   :  { %v15392_v4 = vpack.c.bf16 %v15774_v2, %v15773_v3 }
0x1950   :  { %v5238_v59 = vpop.permute.xlu0 %5237 }
0x1951   :  { %15393 = vmatprep.subr.bf16.mxu1 %v15392_v4 }
0x1952   :  { %15395 = vmatpush3.bf16.msra.mxu1 %v15392_v4 }
0x1953   :  { %15398 = vmatprep.subr.msk.bf16.mxu1 %vm18214_vm10, %v15396_v5  ;;  %v16024_v8 = vpop.eup %16023 }
0x1954   :  { %v5147_v11 = vmul.f32 %v16024_v8, %v16016_v49 }
0x1971   :  { %v5140_v6 = vpop.xlane.xlu1 %5139 }
0x1972   :  { %16025 = vrcp.f32 %v5140_v6 }
0x1975   :  { %v5236_v12 = vpop.permute.xlu1 %5235 }
0x197c   :  { %v16026_v9 = vpop.eup %16025 }
0x197d   :  { %v5146_v10 = vmul.f32 %v16026_v9, %v16018_v42 }
0x197f   :  { %14729 = vmatprep.mubr.msk.f32.mxu1 %vm1847_vm7, %v5146_v10 }
0x1980   :  { %14730 = vmatmul.mubr.msk.f32.vlgmr.msra.gmra.mrb[50].mxu1 %vm1847_vm7, %v5147_v11 }
0x1981   :  { %15401 = vmatpush3.bf16.xpose.msk.msra.mxu1 %vm18214_vm10, %v15396_v5  ;;  %14736 = vmatprep.mubr.msk.f32.mxu1 %vm1177_vm6, %v5236_v12 }
0x1988   :  { %14737 = vmatmul.mubr.msk.f32.vlgmr.msra.gmra.mrb[52].mxu1 %vm1177_vm6, %v5238_v59 }
0x1a1e   :  { %v18281_v14 = vpop.f32.mrb[48].mxu1 }
0x1a1f   :  { %v18283_v16 = vpop.f32.mrb[49].mxu1 }
0x1a53   :  { %v18285_v17 = vpop.f32.mrb[50].mxu1 }
0x1a54   :  { %v18287_v58 = vpop.f32.mrb[51].mxu1 }
0x1a5b   :  { %v14738_v18 = vpop.f32.mrb[52].mxu1 }
0x1a5c   :  { %v5327_v20 = vsel %vm18237_vm11, %v14738_v18, -1e+30  ;;  %v5317_v22 = vpop.f32.mrb[53].mxu1 }
0x1a5d   :  { %v5331_v23 = vsel %vm1847_vm7, %v5327_v20, -inf  ;;  %v5326_v24 = vsel %vm18241_vm12, %v5317_v22, -1e+30 }
0x1a5e   :  { %v5328_v56 = vsel %vm1847_vm7, %v5326_v24, -inf  ;;  %5332 = vmax.xlane.f32.xlu0 %v5331_v23 }
0x1a5f   :  { %5329 = vmax.xlane.f32.xlu1 %v5328_v56  ;;  %v18327_v56 = vpack.i.bf16 %v18200_v36, %v18202_v38 }
0x1aeb   :  { %v5333_v25 = vpop.xlane.xlu0 %5332 }
0x1aec   :  { %v5335_v26 = vsub.f32 %v5327_v20, %v5333_v25  ;;  %v5330_v27 = vpop.xlane.xlu1 %5329 }
0x1aed   :  { %v5334_v28 = vsub.f32 %v5326_v24, %v5330_v27 }
0x1aee   :  { %v5338_v29 = vmul.f32 1.442695, %v5335_v26 }
0x1aef   :  { %v5336_v30 = vmul.f32 1.442695, %v5334_v28 }
0x1af0   :  { %16027 = vpow2.f32 %v5338_v29 }
0x1af1   :  { %16029 = vpow2.f32 %v5336_v30 }
0x1afa   :  { %v16028_v33 = vpop.eup %16027 }
0x1afb   :  { %v16030_v32 = vpop.eup %16029  ;;  %v5343_v34 = vsel %vm1847_vm7, %v16028_v33, 0.0 }
0x1afc   :  { %5344 = vadd.xlane.f32.xlu1 %v5343_v34  ;;  %v5340_v49 = vsel %vm1847_vm7, %v16030_v32, 0.0 }
0x1afd   :  { %5341 = vadd.xlane.f32.xlu0 %v5340_v49 }
0x1b0d   :  { %15786 = vrot.lane.b32.xlu1 %v18198_v35, %s17244_s3 }
0x1b11   :  { %5437 = vrot.lane.b32.xlu1 %v18192_v50, %s17246_s1 }
0x1b13   :  { %15781 = vrot.lane.b32.xlu0 %v18198_v35, %s17250_s27 }
0x1b17   :  { %5439 = vrot.lane.b32.xlu0 %v18190_v31, %s17246_s1 }
0x1b89   :  { %v5345_v37 = vpop.xlane.xlu1 %5344 }
0x1b8a   :  { %16031 = vrcp.f32 %v5345_v37  ;;  %v5342_v39 = vpop.xlane.xlu0 %5341 }
0x1b8b   :  { %16033 = vrcp.f32 %v5342_v39 }
0x1b8d   :  { %v15787_v40 = vpop.permute.xlu1 %15786 }
0x1b8e   :  { %v15782_v42 = vpop.permute.xlu0 %15781  ;;  %v15789_v43 = vunpack.i.h.bf16 %v15787_v40  ;;  %v15788_v44 = vunpack.i.l.bf16 %v15787_v40 }
0x1b8f   :  { %v15784_v45 = vunpack.i.h.bf16 %v15782_v42  ;;  %v15783_v47 = vunpack.i.l.bf16 %v15782_v42 }
0x1b90   :  { %v15406_v52 = vpack.c.bf16 %v15789_v43, %v15788_v44 }
0x1b91   :  { %v15402_v48 = vpack.c.bf16 %v15784_v45, %v15783_v47  ;;  %v5438_v60 = vpop.permute.xlu1 %5437 }
0x1b92   :  { %v5440_v61 = vpop.permute.xlu0 %5439 }
0x1b93   :  { %15403 = vmatprep.subr.bf16.mxu0 %v15402_v48 }
0x1b94   :  { %v16032_v50 = vpop.eup %16031  ;;  %15405 = vmatpush3.bf16.msra.mxu0 %v15402_v48 }
0x1b95   :  { %v16034_v53 = vpop.eup %16033  ;;  %15408 = vmatprep.subr.msk.bf16.mxu0 %vm18214_vm10, %v15406_v52  ;;  %v5349_v55 = vmul.f32 %v16032_v50, %v16028_v33 }
0x1b96   :  { %v5348_v31 = vmul.f32 %v16034_v53, %v16030_v32 }
0x1b98   :  { %14743 = vmatprep.mubr.msk.f32.mxu0 %vm1847_vm7, %v5348_v31 }
0x1b99   :  { %14744 = vmatmul.mubr.msk.f32.vlgmr.msra.gmra.mrb[48].mxu0 %vm1847_vm7, %v5349_v55 }
0x1b9a   :  { %14750 = vmatprep.mubr.msk.f32.mxu0 %vm1177_vm6, %v5438_v60 }
0x1b9d   :  { %15411 = vmatpush3.bf16.xpose.msk.msra.mxu0 %vm18214_vm10, %v15406_v52 }
0x1ba4   :  { %14751 = vmatmul.mubr.msk.f32.vlgmr.msra.gmra.mrb[50].mxu0 %vm1177_vm6, %v5440_v61 }
0x1c6c   :  { %v18313_v62 = vpop.f32.mrb[48].mxu0 }
0x1c6d   :  { %v18315_v63 = vpop.f32.mrb[49].mxu0 }
0x1c77   :  { %v14752_v2 = vpop.f32.mrb[50].mxu0 }
0x1c78   :  { %v5529_v3 = vsel %vm18237_vm11, %v14752_v2, -1e+30  ;;  %v5519_v4 = vpop.f32.mrb[51].mxu0 }
0x1c79   :  { %v5533_v5 = vsel %vm1847_vm7, %v5529_v3, -inf  ;;  %v5528_v6 = vsel %vm18241_vm12, %v5519_v4, -1e+30 }
0x1c7a   :  { %v5530_v8 = vsel %vm1847_vm7, %v5528_v6, -inf  ;;  %5534 = vmax.xlane.f32.xlu0 %v5533_v5 }
0x1c7b   :  { %5531 = vmax.xlane.f32.xlu1 %v5530_v8 }
0x1d07   :  { %v5535_v9 = vpop.xlane.xlu0 %5534 }
0x1d08   :  { %v5537_v10 = vsub.f32 %v5529_v3, %v5535_v9  ;;  %v5532_v11 = vpop.xlane.xlu1 %5531 }
0x1d09   :  { %v5536_v12 = vsub.f32 %v5528_v6, %v5532_v11 }
0x1d0a   :  { %v5540_v59 = vmul.f32 1.442695, %v5537_v10 }
0x1d0b   :  { %v5538_v18 = vmul.f32 1.442695, %v5536_v12 }
0x1d0c   :  { %16035 = vpow2.f32 %v5540_v59 }
0x1d0d   :  { %16037 = vpow2.f32 %v5538_v18 }
0x1d16   :  { %v16036_v20 = vpop.eup %16035 }
0x1d17   :  { %v16038_v22 = vpop.eup %16037  ;;  %v5545_v23 = vsel %vm1847_vm7, %v16036_v20, 0.0 }
0x1d18   :  { %5546 = vadd.xlane.f32.xlu1 %v5545_v23  ;;  %v5542_v24 = vsel %vm1847_vm7, %v16038_v22, 0.0 }
0x1d19   :  { %5543 = vadd.xlane.f32.xlu0 %v5542_v24 }
0x1d29   :  { %15796 = vrot.lane.b32.xlu1 %v18327_v56, %s17241_s24 }
0x1d2f   :  { %15791 = vrot.lane.b32.xlu0 %v18198_v35, %s17249_s19 }
0x1da5   :  { %v5547_v25 = vpop.xlane.xlu1 %5546 }
0x1da6   :  { %16039 = vrcp.f32 %v5547_v25  ;;  %v5544_v26 = vpop.xlane.xlu0 %5543 }
0x1da7   :  { %16041 = vrcp.f32 %v5544_v26 }
0x1da9   :  { %v15797_v27 = vpop.permute.xlu1 %15796 }
0x1daa   :  { %v15792_v28 = vpop.permute.xlu0 %15791  ;;  %v15799_v29 = vunpack.i.h.bf16 %v15797_v27  ;;  %v15798_v30 = vunpack.i.l.bf16 %v15797_v27 }
0x1dab   :  { %v15794_v33 = vunpack.i.h.bf16 %v15792_v28  ;;  %v15793_v32 = vunpack.i.l.bf16 %v15792_v28 }
0x1dac   :  { %v15416_v49 = vpack.c.bf16 %v15799_v29, %v15798_v30 }
0x1dad   :  { %v15412_v34 = vpack.c.bf16 %v15794_v33, %v15793_v32 }
0x1daf   :  { %15413 = vmatprep.subr.bf16.mxu1 %v15412_v34 }
0x1db0   :  { %v16040_v37 = vpop.eup %16039  ;;  %15415 = vmatpush3.bf16.msra.mxu1 %v15412_v34 }
0x1db1   :  { %v16042_v39 = vpop.eup %16041  ;;  %15418 = vmatprep.subr.msk.bf16.mxu1 %vm18214_vm10, %v15416_v49  ;;  %v5551_v40 = vmul.f32 %v16040_v37, %v16036_v20 }
0x1db2   :  { %v5550_v35 = vmul.f32 %v16042_v39, %v16038_v22 }
0x1db4   :  { %14757 = vmatprep.mubr.msk.f32.mxu1 %vm1847_vm7, %v5550_v35 }
0x1db5   :  { %14758 = vmatmul.mubr.msk.f32.vlgmr.msra.gmra.mrb[54].mxu1 %vm1847_vm7, %v5551_v40 }
0x1db6   :  { %14764 = vmatprep.mubr.msk.f32.mxu1 %vm1177_vm6, %v18202_v38 }
0x1db9   :  { %15421 = vmatpush3.bf16.xpose.msk.msra.mxu1 %vm18214_vm10, %v15416_v49 }
0x1dc0   :  { %14765 = vmatmul.mubr.msk.f32.vlgmr.msra.gmra.mrb[56].mxu1 %vm1177_vm6, %v18200_v36 }
0x1e88   :  { %v18343_v42 = vpop.f32.mrb[54].mxu1 }
0x1e89   :  { %v18345_v43 = vpop.f32.mrb[55].mxu1 }
0x1e93   :  { %v14766_v44 = vpop.f32.mrb[56].mxu1 }
0x1e94   :  { %v5759_v45 = vsel %vm18237_vm11, %v14766_v44, -1e+30  ;;  %v5749_v47 = vpop.f32.mrb[57].mxu1 }
0x1e95   :  { %v5763_v48 = vsel %vm1847_vm7, %v5759_v45, -inf  ;;  %v5758_v52 = vsel %vm18241_vm12, %v5749_v47, -1e+30 }
0x1e96   :  { %v5760_v50 = vsel %vm1847_vm7, %v5758_v52, -inf  ;;  %5764 = vmax.xlane.f32.xlu0 %v5763_v48 }
0x1e97   :  { %5761 = vmax.xlane.f32.xlu1 %v5760_v50 }
0x1f23   :  { %v5765_v53 = vpop.xlane.xlu0 %5764 }
0x1f24   :  { %v5767_v31 = vsub.f32 %v5759_v45, %v5765_v53  ;;  %v5762_v55 = vpop.xlane.xlu1 %5761 }
0x1f25   :  { %v5766_v60 = vsub.f32 %v5758_v52, %v5762_v55 }
0x1f26   :  { %v5770_v61 = vmul.f32 1.442695, %v5767_v31 }
0x1f27   :  { %v5768_v2 = vmul.f32 1.442695, %v5766_v60 }
0x1f28   :  { %16043 = vpow2.f32 %v5770_v61 }
0x1f29   :  { %16045 = vpow2.f32 %v5768_v2 }
0x1f32   :  { %v16044_v3 = vpop.eup %16043 }
0x1f33   :  { %v16046_v4 = vpop.eup %16045  ;;  %v5775_v5 = vsel %vm1847_vm7, %v16044_v3, 0.0 }
0x1f34   :  { %5776 = vadd.xlane.f32.xlu1 %v5775_v5  ;;  %v5772_v6 = vsel %vm1847_vm7, %v16046_v4, 0.0 }
0x1f35   :  { %5773 = vadd.xlane.f32.xlu0 %v5772_v6 }
0x1f45   :  { %15806 = vrot.lane.b32.xlu1 %v18327_v56, %s17243_s28 }
0x1f49   :  { %5869 = vrot.lane.b32.xlu1 %v18202_v38, %s17240_s14 }
0x1f4b   :  { %15801 = vrot.lane.b32.xlu0 %v18327_v56, %s17248_s0 }
0x1f4f   :  { %5871 = vrot.lane.b32.xlu0 %v18200_v36, %s17240_s14 }
0x1fc1   :  { %v5777_v8 = vpop.xlane.xlu1 %5776 }
0x1fc2   :  { %16047 = vrcp.f32 %v5777_v8  ;;  %v5774_v9 = vpop.xlane.xlu0 %5773 }
0x1fc3   :  { %16049 = vrcp.f32 %v5774_v9 }
0x1fc5   :  { %v15807_v10 = vpop.permute.xlu1 %15806 }
0x1fc6   :  { %v15802_v11 = vpop.permute.xlu0 %15801  ;;  %v15809_v12 = vunpack.i.h.bf16 %v15807_v10  ;;  %v15808_v59 = vunpack.i.l.bf16 %v15807_v10 }
0x1fc7   :  { %v15804_v18 = vunpack.i.h.bf16 %v15802_v11  ;;  %v15803_v20 = vunpack.i.l.bf16 %v15802_v11 }
0x1fc8   :  { %v15426_v23 = vpack.c.bf16 %v15809_v12, %v15808_v59 }
0x1fc9   :  { %v15422_v22 = vpack.c.bf16 %v15804_v18, %v15803_v20  ;;  %v5870_v28 = vpop.permute.xlu1 %5869 }
0x1fca   :  { %v5872_v29 = vpop.permute.xlu0 %5871 }
0x1fcb   :  { %15423 = vmatprep.subr.bf16.mxu0 %v15422_v22 }
0x1fcc   :  { %v16048_v24 = vpop.eup %16047  ;;  %15425 = vmatpush3.bf16.msra.mxu0 %v15422_v22 }
0x1fcd   :  { %v16050_v25 = vpop.eup %16049  ;;  %15428 = vmatprep.subr.msk.bf16.mxu0 %vm18214_vm10, %v15426_v23  ;;  %v5781_v27 = vmul.f32 %v16048_v24, %v16044_v3 }
0x1fce   :  { %v5780_v26 = vmul.f32 %v16050_v25, %v16046_v4 }
0x1fd0   :  { %14771 = vmatprep.mubr.msk.f32.mxu0 %vm1847_vm7, %v5780_v26 }
0x1fd1   :  { %14772 = vmatmul.mubr.msk.f32.vlgmr.msra.gmra.mrb[52].mxu0 %vm1847_vm7, %v5781_v27 }
0x1fd2   :  { %14778 = vmatprep.mubr.msk.f32.mxu0 %vm1177_vm6, %v5870_v28 }
0x1fd5   :  { %15431 = vmatpush3.bf16.xpose.msk.msra.mxu0 %vm18214_vm10, %v15426_v23 }
0x1fdc   :  { %14779 = vmatmul.mubr.msk.f32.vlgmr.msra.gmra.mrb[54].mxu0 %vm1177_vm6, %v5872_v29 }
0x20a4   :  { %v18371_v30 = vpop.f32.mrb[52].mxu0 }
0x20a5   :  { %v18373_v33 = vpop.f32.mrb[53].mxu0 }
0x20af   :  { %v14780_v32 = vpop.f32.mrb[54].mxu0 }
0x20b0   :  { %v5961_v34 = vsel %vm18237_vm11, %v14780_v32, -1e+30  ;;  %v5951_v49 = vpop.f32.mrb[55].mxu0 }
0x20b1   :  { %v5965_v37 = vsel %vm1847_vm7, %v5961_v34, -inf  ;;  %v5960_v39 = vsel %vm18241_vm12, %v5951_v49, -1e+30 }
0x20b2   :  { %v5962_v35 = vsel %vm1847_vm7, %v5960_v39, -inf  ;;  %5966 = vmax.xlane.f32.xlu0 %v5965_v37 }
0x20b3   :  { %5963 = vmax.xlane.f32.xlu1 %v5962_v35 }
0x213f   :  { %v5967_v40 = vpop.xlane.xlu0 %5966 }
0x2140   :  { %v5969_v44 = vsub.f32 %v5961_v34, %v5967_v40  ;;  %v5964_v45 = vpop.xlane.xlu1 %5963 }
0x2141   :  { %v5968_v47 = vsub.f32 %v5960_v39, %v5964_v45 }
0x2142   :  { %v5972_v48 = vmul.f32 1.442695, %v5969_v44 }
0x2143   :  { %v5970_v52 = vmul.f32 1.442695, %v5968_v47 }
0x2144   :  { %16051 = vpow2.f32 %v5972_v48 }
0x2145   :  { %16053 = vpow2.f32 %v5970_v52 }
0x214e   :  { %v16052_v50 = vpop.eup %16051 }
0x214f   :  { %v16054_v53 = vpop.eup %16053  ;;  %v5977_v31 = vsel %vm1847_vm7, %v16052_v50, 0.0 }
0x2150   :  { %5978 = vadd.xlane.f32.xlu1 %v5977_v31  ;;  %v5974_v55 = vsel %vm1847_vm7, %v16054_v53, 0.0 }
0x2151   :  { %5975 = vadd.xlane.f32.xlu0 %v5974_v55 }
0x2161   :  { %15816 = vrot.lane.b32.xlu1 %v18327_v56, %s17242_s26 }
0x2165   :  { %6071 = vrot.lane.b32.xlu1 %v18202_v38, %s17245_s17 }
0x2167   :  { %15811 = vrot.lane.b32.xlu0 %v18327_v56, %s17247_s5 }
0x216b   :  { %6073 = vrot.lane.b32.xlu0 %v18200_v36, %s17245_s17 }
0x21dd   :  { %v5979_v60 = vpop.xlane.xlu1 %5978 }
0x21de   :  { %16055 = vrcp.f32 %v5979_v60  ;;  %v5976_v61 = vpop.xlane.xlu0 %5975 }
0x21df   :  { %16057 = vrcp.f32 %v5976_v61 }
0x21e1   :  { %v15817_v2 = vpop.permute.xlu1 %15816 }
0x21e2   :  { %v15812_v3 = vpop.permute.xlu0 %15811  ;;  %v15819_v4 = vunpack.i.h.bf16 %v15817_v2  ;;  %v15818_v5 = vunpack.i.l.bf16 %v15817_v2 }
0x21e3   :  { %v15814_v6 = vunpack.i.h.bf16 %v15812_v3  ;;  %v15813_v8 = vunpack.i.l.bf16 %v15812_v3 }
0x21e4   :  { %v15436_v10 = vpack.c.bf16 %v15819_v4, %v15818_v5 }
0x21e5   :  { %v15432_v9 = vpack.c.bf16 %v15814_v6, %v15813_v8  ;;  %v6072_v20 = vpop.permute.xlu1 %6071 }
0x21e6   :  { %v6074_v22 = vpop.permute.xlu0 %6073 }
0x21e7   :  { %15433 = vmatprep.subr.bf16.mxu1 %v15432_v9 }
0x21e8   :  { %v16056_v11 = vpop.eup %16055  ;;  %15435 = vmatpush3.bf16.msra.mxu1 %v15432_v9 }
0x21e9   :  { %v16058_v12 = vpop.eup %16057  ;;  %15438 = vmatprep.subr.msk.bf16.mxu1 %vm18214_vm10, %v15436_v10  ;;  %v5983_v18 = vmul.f32 %v16056_v11, %v16052_v50 }
0x21ea   :  { %v5982_v59 = vmul.f32 %v16058_v12, %v16054_v53 }
0x21ec   :  { %14785 = vmatprep.mubr.msk.f32.mxu1 %vm1847_vm7, %v5982_v59 }
0x21ed   :  { %14786 = vmatmul.mubr.msk.f32.vlgmr.msra.gmra.mrb[58].mxu1 %vm1847_vm7, %v5983_v18 }
0x21ee   :  { %14792 = vmatprep.mubr.msk.f32.mxu1 %vm1177_vm6, %v6072_v20 }
0x21f1   :  { %15441 = vmatpush3.bf16.xpose.msk.msra.mxu1 %vm18214_vm10, %v15436_v10 }
0x21f8   :  { %14793 = vmatmul.mubr.msk.f32.vlgmr.msra.gmra.mrb[60].mxu1 %vm1177_vm6, %v6074_v22 }
0x22c0   :  { %v18399_v23 = vpop.f32.mrb[58].mxu1 }
0x22c1   :  { %v18401_v24 = vpop.f32.mrb[59].mxu1 }
0x22cb   :  { %v14794_v25 = vpop.f32.mrb[60].mxu1 }
0x22cc   :  { %v6163_v26 = vsel %vm18237_vm11, %v14794_v25, -1e+30  ;;  %v6153_v27 = vpop.f32.mrb[61].mxu1 }
0x22cd   :  { %v6167_v28 = vsel %vm1847_vm7, %v6163_v26, -inf  ;;  %v6162_v29 = vsel %vm18241_vm12, %v6153_v27, -1e+30 }
0x22ce   :  { %v6164_v32 = vsel %vm1847_vm7, %v6162_v29, -inf  ;;  %6168 = vmax.xlane.f32.xlu0 %v6167_v28 }
0x22cf   :  { %6165 = vmax.xlane.f32.xlu1 %v6164_v32 }
0x235b   :  { %v6169_v34 = vpop.xlane.xlu0 %6168 }
0x235c   :  { %v6171_v49 = vsub.f32 %v6163_v26, %v6169_v34  ;;  %v6166_v37 = vpop.xlane.xlu1 %6165 }
0x235d   :  { %v6170_v39 = vsub.f32 %v6162_v29, %v6166_v37 }
0x235e   :  { %v6174_v35 = vmul.f32 1.442695, %v6171_v49 }
0x235f   :  { %v6172_v40 = vmul.f32 1.442695, %v6170_v39 }
0x2360   :  { %16059 = vpow2.f32 %v6174_v35 }
0x2361   :  { %16061 = vpow2.f32 %v6172_v40 }
0x236a   :  { %v16060_v44 = vpop.eup %16059 }
0x236b   :  { %v16062_v45 = vpop.eup %16061  ;;  %v6179_v47 = vsel %vm1847_vm7, %v16060_v44, 0.0 }
0x236c   :  { %6180 = vadd.xlane.f32.xlu1 %v6179_v47  ;;  %v6176_v48 = vsel %vm1847_vm7, %v16062_v45, 0.0 }
0x236d   :  { %6177 = vadd.xlane.f32.xlu0 %v6176_v48 }
0x237d   :  { %15826 = vrot.lane.b32.xlu1 %v18327_v56, %s17244_s3 }
0x2381   :  { %6273 = vrot.lane.b32.xlu1 %v18202_v38, %s17246_s1 }
0x2383   :  { %15821 = vrot.lane.b32.xlu0 %v18327_v56, %s17250_s27 }
0x2387   :  { %6275 = vrot.lane.b32.xlu0 %v18200_v36, %s17246_s1 }
0x23f9   :  { %v6181_v52 = vpop.xlane.xlu1 %6180 }
0x23fa   :  { %16063 = vrcp.f32 %v6181_v52  ;;  %v6178_v50 = vpop.xlane.xlu0 %6177 }
0x23fb   :  { %16065 = vrcp.f32 %v6178_v50 }
0x23fd   :  { %v15827_v53 = vpop.permute.xlu1 %15826 }
0x23fe   :  { %v15822_v31 = vpop.permute.xlu0 %15821  ;;  %v15829_v55 = vunpack.i.h.bf16 %v15827_v53  ;;  %v15828_v60 = vunpack.i.l.bf16 %v15827_v53 }
0x23ff   :  { %v15824_v61 = vunpack.i.h.bf16 %v15822_v31  ;;  %v15823_v2 = vunpack.i.l.bf16 %v15822_v31  ;;  %v4720_v31 = vld [vmem:[#allocation33 + $0x10] sm:$0xff] }
0x2400   :  { %v15446_v4 = vpack.c.bf16 %v15829_v55, %v15828_v60 }
0x2401   :  { %v15442_v3 = vpack.c.bf16 %v15824_v61, %v15823_v2  ;;  %v6274_v8 = vpop.permute.xlu1 %6273 }
0x2402   :  { %v6276_v9 = vpop.permute.xlu0 %6275 }
0x2403   :  { %15443 = vmatprep.subr.bf16.mxu0 %v15442_v3 }
0x2404   :  { %v16064_v38 = vpop.eup %16063  ;;  %15445 = vmatpush3.bf16.msra.mxu0 %v15442_v3 }
0x2405   :  { %v16066_v5 = vpop.eup %16065  ;;  %15448 = vmatprep.subr.msk.bf16.mxu0 %vm18214_vm10, %v15446_v4  ;;  %v6185_v6 = vmul.f32 %v16064_v38, %v16060_v44  ;;  %v4718_v44 = vld [vmem:[#allocation33] sm:$0xff] }
0x2406   :  { %v6184_v36 = vmul.f32 %v16066_v5, %v16062_v45  ;;  %v4719_v45 = vld [vmem:[#allocation33 + $0x8] sm:$0xff] }
0x2407   :  { %v15456_v47 = vpack.c.bf16 %v4719_v45, %v4718_v44 }
0x2408   :  { %14799 = vmatprep.mubr.msk.f32.mxu0 %vm1847_vm7, %v6184_v36 }
0x2409   :  { %14800 = vmatmul.mubr.msk.f32.vlgmr.msra.gmra.mrb[56].mxu0 %vm1847_vm7, %v6185_v6 }
0x240a   :  { %14806 = vmatprep.mubr.msk.f32.mxu0 %vm1177_vm6, %v6274_v8 }
0x240d   :  { %15451 = vmatpush3.bf16.xpose.msk.msra.mxu0 %vm18214_vm10, %v15446_v4 }
0x2414   :  { %14807 = vmatmul.mubr.msk.f32.vlgmr.msra.gmra.mrb[58].mxu0 %vm1177_vm6, %v6276_v9 }
0x24dc   :  { %v14801_v10 = vpop.f32.mrb[56].mxu0 }
0x24dd   :  { %v6264_v11 = vpop.f32.mrb[57].mxu0 }
0x24e7   :  { %v14808_v12 = vpop.f32.mrb[58].mxu0 }
0x24e8   :  { %v6365_v59 = vsel %vm18237_vm11, %v14808_v12, -1e+30  ;;  %v6355_v18 = vpop.f32.mrb[59].mxu0 }
0x24e9   :  { %v6369_v20 = vsel %vm1847_vm7, %v6365_v59, -inf  ;;  %v6364_v22 = vsel %vm18241_vm12, %v6355_v18, -1e+30 }
0x24ea   :  { %v6366_v25 = vsel %vm1847_vm7, %v6364_v22, -inf  ;;  %6370 = vmax.xlane.f32.xlu0 %v6369_v20 }
0x24eb   :  { %6367 = vmax.xlane.f32.xlu1 %v6366_v25 }
0x24fc   :  { %5641 = vrot.lane.b32.xlu1 %v18287_v58, %s17202_s29 }
0x2500   :  { %15831 = vrot.lane.b32.xlu0 %v18327_v56, %s17249_s19  ;;  %5643 = vrot.lane.b32.xlu1 %v18285_v17, %s17202_s29 }
0x2577   :  { %v6371_v26 = vpop.xlane.xlu0 %6370 }
0x2578   :  { %v6373_v27 = vsub.f32 %v6365_v59, %v6371_v26  ;;  %v6368_v28 = vpop.xlane.xlu1 %6367  ;;  %v18473_v59 = vld [vmem:[#allocation34] ss:$0 sm:$0xff]  ;;  %v4666_v26 = vadd.f32 %v18233_v41, %v18165_v13 }
0x2579   :  { %v6372_v29 = vsub.f32 %v6364_v22, %v6368_v28 }
0x257a   :  { %v6376_v32 = vmul.f32 1.442695, %v6373_v27 }
0x257b   :  { %v6374_v34 = vmul.f32 1.442695, %v6372_v29  ;;  %v15832_v49 = vpop.permute.xlu0 %15831 }
0x257c   :  { %16067 = vpow2.f32 %v6376_v32  ;;  %v15834_v37 = vunpack.i.h.bf16 %v15832_v49  ;;  %v15833_v39 = vunpack.i.l.bf16 %v15832_v49  ;;  %v4674_v32 = vsel %vm784_vm2, %v4666_v26, 0.0 }
0x257d   :  { %16069 = vpow2.f32 %v6374_v34 }
0x257e   :  { %v15452_v35 = vpack.c.bf16 %v15834_v37, %v15833_v39 }
0x2580   :  { %15453 = vmatprep.subr.bf16.mxu1 %v15452_v35 }
0x2581   :  { %15455 = vmatpush3.bf16.msra.mxu1 %v15452_v35 }
0x2582   :  { %15457 = vmatprep.subr.bf16.mxu1 %v15456_v47 }
0x2586   :  { %v16068_v58 = vpop.eup %16067 }
0x2587   :  { %v16070_v40 = vpop.eup %16069  ;;  %v6381_v56 = vsel %vm1847_vm7, %v16068_v58, 0.0 }
0x2588   :  { %6382 = vadd.xlane.f32.xlu1 %v6381_v56  ;;  %v6378_v17 = vsel %vm1847_vm7, %v16070_v40, 0.0 }
0x2589   :  { %6379 = vadd.xlane.f32.xlu0 %v6378_v17 }
0x2599   :  { %5651 = vrot.lane.b32.xlu1 %v18313_v62, %s17205_s22  ;;  %v4657_v62 = vadd.f32 %v18230_v54, %v18235_v57 }
0x259d   :  { %5659 = vrot.lane.b32.xlu1 %v18343_v42, %s17251_s30 }
0x259f   :  { %5649 = vrot.lane.b32.xlu0 %v18315_v63, %s17205_s22  ;;  %v4665_v63 = vadd.f32 %v4657_v62, %v18159_v7 }
0x25a1   :  { %6479 = vrot.lane.b32.xlu1 %v18399_v23, %s17202_s29  ;;  %v4671_v42 = vsel %vm784_vm2, %v4665_v63, 0.0  ;;  %v5642_v23 = vpop.permute.xlu1 %5641 }
0x25a2   :  { %v5663_v54 = vsel %vm1177_vm6, %v18283_v16, %v5642_v23 }
0x25a3   :  { %5657 = vrot.lane.b32.xlu0 %v18345_v43, %s17251_s30 }
0x25a5   :  { %6487 = vrot.lane.b32.xlu1 %v14801_v10, %s17205_s22  ;;  %v5644_v48 = vpop.permute.xlu1 %5643 }
0x25a6   :  { %v5664_v5 = vsel %vm1177_vm6, %v18281_v14, %v5644_v48 }
0x25a7   :  { %6477 = vrot.lane.b32.xlu0 %v18401_v24, %s17202_s29  ;;  %v4721_v24 = vld [vmem:[#allocation33 + $0x18] sm:$0xff] }
0x25a8   :  { %v15460_v2 = vpack.c.bf16 %v4721_v24, %v4720_v31 }
0x25ab   :  { %6485 = vrot.lane.b32.xlu0 %v6264_v11, %s17205_s22 }
0x25ca   :  { %4672 = vadd.xlane.f32.xlu0 %v4671_v42 }
0x2615   :  { %v6383_v43 = vpop.xlane.xlu1 %6382 }
0x2616   :  { %16071 = vrcp.f32 %v6383_v43  ;;  %v6380_v52 = vpop.xlane.xlu0 %6379 }
0x2617   :  { %16073 = vrcp.f32 %v6380_v52 }
0x2619   :  { %v5652_v7 = vpop.permute.xlu1 %5651 }
0x261a   :  { %v5650_v50 = vpop.permute.xlu0 %5649  ;;  %v5666_v16 = vsel %vm1847_vm7, %v5664_v5, %v5652_v7 }
0x261b   :  { %v5665_v3 = vsel %vm1847_vm7, %v5663_v54, %v5650_v50  ;;  %v6687_v54 = vld [vmem:[#allocation39 + $0x8] sm:$0xff] }
0x261d   :  { %v5660_v38 = vpop.permute.xlu1 %5659 }
0x261e   :  { %v5658_v60 = vpop.permute.xlu0 %5657  ;;  %v5668_v36 = vsel %vm1849_vm8, %v5666_v16, %v5660_v38  ;;  %v6688_v16 = vld [vmem:[#allocation39 + $0x10] sm:$0xff] }
0x261f   :  { %v5667_v4 = vsel %vm1849_vm8, %v5665_v3, %v5658_v60 }
0x2620   :  { %v16072_v53 = vpop.eup %16071 }
0x2621   :  { %v16074_v55 = vpop.eup %16073  ;;  %v6387_v57 = vmul.f32 %v16072_v53, %v16068_v58 }
0x2622   :  { %v6386_v61 = vmul.f32 %v16074_v55, %v16070_v40  ;;  %v6478_v11 = vpop.permute.xlu0 %6477 }
0x2623   :  { %v6499_v13 = vsel %vm1177_vm6, %v18373_v33, %v6478_v11 }
0x2624   :  { %14813 = vmatprep.mubr.msk.f32.mxu1 %vm1847_vm7, %v6386_v61  ;;  %v6686_v61 = vld [vmem:[#allocation39] sm:$0xff] }
0x2625   :  { %14814 = vmatmul.mubr.msk.f32.vlgmr.msra.gmra.mrb[62].mxu1 %vm1847_vm7, %v6387_v57  ;;  %v15835_v7 = vpack.i.bf16 %v6687_v54, %v6686_v61 }
0x2626   :  { %15459 = vmatpush3.bf16.msra.mxu1 %v15456_v47  ;;  %14824 = vmatprep.mubr.msk.f32.mxu1 %vm784_vm2, %v5667_v4  ;;  %v6486_v12 = vpop.permute.xlu0 %6485  ;;  %v13666_v4 = vld [vmem:[#allocation28 + $0x1] ss:$0 sm:$0xff] }
0x2627   :  { %15461 = vmatprep.subr.bf16.mxu1 %v15460_v2  ;;  %v6501_v35 = vsel %vm1847_vm7, %v6499_v13, %v6486_v12 }
0x262a   :  { %15463 = vmatpush3.bf16.msra.mxu1 %v15460_v2  ;;  %v13665_v2 = vld [vmem:[#allocation27 + $0x1] ss:$0 sm:$0xff] }
0x262d   :  { %14825 = vmatmul.mubr.msk.f32.vlgmr.msra.gmra.mrb[64].mxu1 %vm784_vm2, %v5668_v36  ;;  %v6689_v36 = vld [vmem:[#allocation39 + $0x18] sm:$0xff] }
0x2657   :  { %v4673_v18 = vpop.xlane.xlu0 %4672 }
0x2658   :  { %v4677_v20 = vmul.f32 0.03125, %v4673_v18 }
0x265a   :  { %v4679_v27 = vsub.f32 %v4665_v63, %v4677_v20 }
0x265c   :  { %v4681_v49 = vmul.f32 %v4679_v27, %v4679_v27 }
0x265e   :  { %v4683_v37 = vsel %vm784_vm2, %v4681_v49, 0.0 }
0x26f8   :  { %v14815_v6 = vpop.f32.mrb[62].mxu1 }
0x26f9   :  { %6495 = vrot.lane.b32.xlu1 %v14815_v6, %s17251_s30  ;;  %v6466_v8 = vpop.f32.mrb[63].mxu1  ;;  %v15840_v6 = vpack.i.bf16 %v6689_v36, %v6688_v16 }
0x26fa   :  { %6493 = vrot.lane.b32.xlu0 %v6466_v8, %s17251_s30  ;;  %v15464_v8 = vpack.c.bf16 %v6687_v54, %v6686_v61 }
0x26fc   :  { %15465 = vmatprep.subr.bf16.mxu0 %v15464_v8 }
0x26fd   :  { %15467 = vmatpush3.bf16.msra.mxu0 %v15464_v8 }
0x2700   :  { %v14826_v9 = vpop.f32.mrb[64].mxu1 }
0x2701   :  { %v6589_v10 = vpop.f32.mrb[65].mxu1  ;;  %v6595_v22 = vadd.f32 %v14826_v9, %v18473_v59  ;;  %v15468_v9 = vpack.c.bf16 %v6689_v36, %v6688_v16 }
0x2702   :  { %v6590_v14 = vadd.f32 %v18473_v59, %v6589_v10 }
0x2703   :  { %v6609_v28 = vadd.f32 %v6595_v22, %v18177_v51  ;;  %15469 = vmatprep.subr.bf16.mxu0 %v15468_v9 }
0x2704   :  { %v6608_v25 = vadd.f32 %v6590_v14, %v18167_v15  ;;  %v6480_v15 = vpop.permute.xlu1 %6479  ;;  %15471 = vmatpush3.bf16.msra.mxu0 %v15468_v9 }
0x2705   :  { %v6617_v34 = vsel %vm784_vm2, %v6609_v28, 0.0  ;;  %v6500_v51 = vsel %vm1177_vm6, %v18371_v30, %v6480_v15 }
0x2706   :  { %v6614_v29 = vsel %vm784_vm2, %v6608_v25, 0.0 }
0x2708   :  { %v6488_v39 = vpop.permute.xlu1 %6487 }
0x2709   :  { %v6502_v40 = vsel %vm1847_vm7, %v6500_v51, %v6488_v39 }
0x2719   :  { %6615 = vadd.xlane.f32.xlu0 %v6614_v29 }
0x271d   :  { %4675 = vadd.xlane.f32.xlu1 %v4674_v32  ;;  %6618 = vadd.xlane.f32.xlu0 %v6617_v34 }
0x2721   :  { %4684 = vadd.xlane.f32.xlu1 %v4683_v37 }
0x276b   :  { %v6496_v41 = vpop.permute.xlu1 %6495 }
0x276c   :  { %v6494_v58 = vpop.permute.xlu0 %6493  ;;  %v6504_v17 = vsel %vm1849_vm8, %v6502_v40, %v6496_v41 }
0x276d   :  { %v6503_v56 = vsel %vm1849_vm8, %v6501_v35, %v6494_v58 }
0x276e   :  { %14827 = vmatprep.mubr.msk.f32.mxu1 %vm784_vm2, %v6503_v56 }
0x276f   :  { %14828 = vmatmul.mubr.msk.f32.gmra.mrb[66].mxu1 %vm784_vm2, %v6504_v17  ;;  %v18522_v17 = vld [vmem:[#allocation36] ss:$0 sm:$0xff] }
0x27a6   :  { %v6616_v44 = vpop.xlane.xlu0 %6615 }
0x27a7   :  { %v6626_v45 = vmul.f32 0.03125, %v6616_v44  ;;  %v18525_v44 = vld [vmem:[#allocation37] ss:$0 sm:$0xff] }
0x27a9   :  { %v18495_v33 = vsub.f32 %v6608_v25, %v6626_v45 }
0x27aa   :  { %v4676_v47 = vpop.xlane.xlu1 %4675  ;;  %v6619_v62 = vpop.xlane.xlu0 %6618 }
0x27ab   :  { %v4678_v30 = vmul.f32 0.03125, %v4676_v47  ;;  %v6627_v63 = vmul.f32 0.03125, %v6619_v62  ;;  %v6634_v42 = vmul.f32 %v18495_v33, %v18495_v33 }
0x27ad   :  { %v18499_v23 = vsub.f32 %v4666_v26, %v4678_v30  ;;  %v18501_v48 = vsub.f32 %v6609_v28, %v6627_v63  ;;  %v6638_v43 = vsel %vm784_vm2, %v6634_v42, 0.0 }
0x27ae   :  { %v4685_v52 = vpop.xlane.xlu1 %4684  ;;  %6639 = vadd.xlane.f32.xlu1 %v6638_v43 }
0x27af   :  { %v4689_v50 = vmul.f32 0.03125, %v4685_v52  ;;  %v4682_v53 = vmul.f32 %v18499_v23, %v18499_v23  ;;  %v6635_v55 = vmul.f32 %v18501_v48, %v18501_v48 }
0x27b1   :  { %v4691_v31 = vadd.f32 1e-05, %v4689_v50  ;;  %v4686_v24 = vsel %vm784_vm2, %v4682_v53, 0.0  ;;  %v6641_v60 = vsel %vm784_vm2, %v6635_v55, 0.0 }
0x27b2   :  { %4687 = vadd.xlane.f32.xlu0 %v4686_v24 }
0x27b3   :  { %16075 = vrsqrt.f32 %v4691_v31 }
0x27b6   :  { %6642 = vadd.xlane.f32.xlu0 %v6641_v60 }
0x27bd   :  { %v16076_v57 = vpop.eup %16075 }
0x27be   :  { %v4695_v3 = vmul.f32 %v16076_v57, %v4679_v27 }
0x27bf   :  { %15836 = vrot.lane.b32.xlu1 %v15835_v7, %s17241_s24 }
0x27c0   :  { %v4703_v38 = vmul.f32 %v13665_v2, %v4695_v3 }
0x27c2   :  { %v18511_v5 = vadd.f32 %v13666_v4, %v4703_v38 }
0x27c4   :  { %14852 = vmatprep.mubr.msk.f32.mxu1 %vm784_vm2, %v18511_v5 }
0x27cc   :  { %15841 = vrot.lane.b32.xlu0 %v15840_v6, %s17241_s24 }
0x283b   :  { %v6640_v10 = vpop.xlane.xlu1 %6639 }
0x283c   :  { %v6650_v11 = vmul.f32 0.03125, %v6640_v10 }
0x283e   :  { %v6654_v12 = vadd.f32 1e-05, %v6650_v11 }
0x283f   :  { %v4688_v14 = vpop.xlane.xlu0 %4687  ;;  %v15837_v18 = vpop.permute.xlu1 %15836 }
0x2840   :  { %16077 = vrsqrt.f32 %v6654_v12  ;;  %v4690_v20 = vmul.f32 0.03125, %v4688_v14  ;;  %v15839_v22 = vunpack.i.h.bf16 %v15837_v18  ;;  %v15838_v25 = vunpack.i.l.bf16 %v15837_v18 }
0x2842   :  { %v4692_v26 = vadd.f32 1e-05, %v4690_v20  ;;  %v14829_v27 = vpop.f32.mrb[66].mxu1  ;;  %v15472_v28 = vpack.c.bf16 %v15839_v22, %v15838_v25 }
0x2843   :  { %v6605_v29 = vadd.f32 %v14829_v27, %v18473_v59  ;;  %v6599_v32 = vpop.f32.mrb[67].mxu1  ;;  %v6643_v34 = vpop.xlane.xlu0 %6642 }
0x2844   :  { %16079 = vrsqrt.f32 %v4692_v26  ;;  %v6600_v49 = vadd.f32 %v18473_v59, %v6599_v32  ;;  %v6651_v37 = vmul.f32 0.03125, %v6643_v34  ;;  %15473 = vmatprep.subr.bf16.mxu1 %v15472_v28 }
0x2845   :  { %v6611_v15 = vadd.f32 %v6605_v29, %v18184_v21  ;;  %15475 = vmatpush3.bf16.msra.mxu1 %v15472_v28 }
0x2846   :  { %v6610_v39 = vadd.f32 %v6600_v49, %v18174_v19  ;;  %v6655_v13 = vadd.f32 1e-05, %v6651_v37 }
0x2847   :  { %v6623_v41 = vsel %vm784_vm2, %v6611_v15, 0.0  ;;  %v15842_v51 = vpop.permute.xlu0 %15841 }
0x2848   :  { %16081 = vrsqrt.f32 %v6655_v13  ;;  %6624 = vadd.xlane.f32.xlu0 %v6623_v41  ;;  %v6620_v35 = vsel %vm784_vm2, %v6610_v39, 0.0  ;;  %v15844_v58 = vunpack.i.h.bf16 %v15842_v51  ;;  %v15843_v40 = vunpack.i.l.bf16 %v15842_v51 }
0x2849   :  { %6621 = vadd.xlane.f32.xlu1 %v6620_v35 }
0x284a   :  { %v16078_v56 = vpop.eup %16077  ;;  %v15476_v59 = vpack.c.bf16 %v15844_v58, %v15843_v40 }
0x284b   :  { %v6662_v21 = vmul.f32 %v16078_v56, %v18495_v33 }
0x284c   :  { %15477 = vmatprep.subr.bf16.mxu1 %v15476_v59 }
0x284d   :  { %v6672_v19 = vmul.f32 %v18522_v17, %v6662_v21  ;;  %15479 = vmatpush3.bf16.msra.mxu1 %v15476_v59 }
0x284e   :  { %v16080_v45 = vpop.eup %16079 }
0x284f   :  { %v4696_v47 = vmul.f32 %v16080_v45, %v18499_v23  ;;  %v18530_v62 = vadd.f32 %v18525_v44, %v6672_v19  ;;  %v18543_v23 = vld [vmem:[#allocation40] ss:$0 sm:$0xff] }
0x2851   :  { %v4704_v30 = vmul.f32 %v13665_v2, %v4696_v47  ;;  %14838 = vmatprep.mubr.msk.f32.mxu0 %vm784_vm2, %v18530_v62 }
0x2852   :  { %v16082_v63 = vpop.eup %16081 }
0x2853   :  { %v6663_v42 = vmul.f32 %v16082_v63, %v18501_v48  ;;  %v18535_v33 = vadd.f32 %v13666_v4, %v4704_v30 }
0x2855   :  { %14853 = vmatmul.mubr.msk.f32.vlgmr.msra.gmra.mrb[68].mxu1 %vm784_vm2, %v18535_v33  ;;  %v6673_v43 = vmul.f32 %v18522_v17, %v6663_v42 }
0x2857   :  { %v18541_v52 = vadd.f32 %v18525_v44, %v6673_v43 }
0x2859   :  { %14839 = vmatmul.mubr.msk.f32.vlgmr.msra.gmra.mrb[60].mxu0 %vm784_vm2, %v18541_v52 }
0x285a   :  { %6815 = vrot.lane.b32.xlu1 %v18543_v23, %s17241_s24 }
0x28d5   :  { %v6625_v50 = vpop.xlane.xlu0 %6624 }
0x28d6   :  { %v6629_v48 = vmul.f32 0.03125, %v6625_v50  ;;  %v6622_v53 = vpop.xlane.xlu1 %6621 }
0x28d7   :  { %v6628_v31 = vmul.f32 0.03125, %v6622_v53 }
0x28d8   :  { %v6633_v24 = vsub.f32 %v6611_v15, %v6629_v48 }
0x28d9   :  { %v6632_v55 = vsub.f32 %v6610_v39, %v6628_v31 }
0x28da   :  { %v6637_v54 = vmul.f32 %v6633_v24, %v6633_v24  ;;  %v6816_v57 = vpop.permute.xlu1 %6815 }
0x28db   :  { %v6636_v60 = vmul.f32 %v6632_v55, %v6632_v55 }
0x28dc   :  { %v6647_v7 = vsel %vm784_vm2, %v6637_v54, 0.0 }
0x28dd   :  { %v6644_v61 = vsel %vm784_vm2, %v6636_v60, 0.0 }
0x28de   :  { %6645 = vadd.xlane.f32.xlu0 %v6644_v61 }
0x28e2   :  { %6648 = vadd.xlane.f32.xlu0 %v6647_v7 }
0x2928   :  { %v14854_v2 = vpop.f32.mrb[68].mxu1 }
0x2929   :  { %v6890_v3 = vpop.f32.mrb[69].mxu1  ;;  %v18594_v51 = vadd.f32 %v14854_v2, %v6816_v57 }
0x292a   :  { %v18551_v4 = vadd.f32 %v6890_v3, %v6816_v57 }
0x292c   :  { %v14840_v38 = vpop.f32.mrb[60].mxu0  ;;  %7286 = vrot.lane.b32.xlu1 %v18551_v4, %s17245_s17  ;;  %7093 = vrot.lane.b32.xlu0 %v18551_v4, %s17240_s14 }
0x292d   :  { %v6786_v16 = vadd.f32 %v14840_v38, %v18543_v23  ;;  %14855 = vmatprep.subr.msk.mxu0 %vm1177_vm6, %v18551_v4  ;;  %v6780_v36 = vpop.f32.mrb[61].mxu0 }
0x292e   :  { %14856 = vmatpush3.xpose.msk.msra.mxu0 %vm1177_vm6, %v18551_v4  ;;  %v6781_v6 = vadd.f32 %v18543_v23, %v6780_v36 }
0x2930   :  { %7091 = vrot.lane.b32.xlu1 %v6786_v16, %s17240_s14  ;;  %7284 = vrot.lane.b32.xlu0 %v6786_v16, %s17245_s17 }
0x2934   :  { %7089 = vrot.lane.b32.xlu1 %v6781_v6, %s17240_s14  ;;  %7475 = vrot.lane.b32.xlu0 %v6781_v6, %s17246_s1 }
0x2938   :  { %7282 = vrot.lane.b32.xlu1 %v6781_v6, %s17245_s17 }
0x293c   :  { %7479 = vrot.lane.b32.xlu1 %v18551_v4, %s17246_s1 }
0x2940   :  { %7477 = vrot.lane.b32.xlu1 %v6786_v16, %s17246_s1 }
0x296b   :  { %v6646_v8 = vpop.xlane.xlu0 %6645 }
0x296c   :  { %v6652_v9 = vmul.f32 0.03125, %v6646_v8 }
0x296e   :  { %v6656_v10 = vadd.f32 1e-05, %v6652_v9 }
0x296f   :  { %v6649_v11 = vpop.xlane.xlu0 %6648 }
0x2970   :  { %16083 = vrsqrt.f32 %v6656_v10  ;;  %v6653_v12 = vmul.f32 0.03125, %v6649_v11 }
0x2972   :  { %v6657_v14 = vadd.f32 1e-05, %v6653_v12 }
0x2974   :  { %16085 = vrsqrt.f32 %v6657_v14 }
0x297a   :  { %v16084_v18 = vpop.eup %16083 }
0x297b   :  { %v6664_v20 = vmul.f32 %v16084_v18, %v6632_v55 }
0x297d   :  { %v6674_v22 = vmul.f32 %v18522_v17, %v6664_v20 }
0x297e   :  { %v16086_v25 = vpop.eup %16085 }
0x297f   :  { %v18573_v26 = vadd.f32 %v18525_v44, %v6674_v22  ;;  %v6665_v27 = vmul.f32 %v16086_v25, %v6633_v24 }
0x2981   :  { %14841 = vmatprep.mubr.msk.f32.mxu0 %vm784_vm2, %v18573_v26  ;;  %v6675_v28 = vmul.f32 %v18522_v17, %v6665_v27 }
0x2983   :  { %v18579_v29 = vadd.f32 %v18525_v44, %v6675_v28 }
0x2985   :  { %14842 = vmatmul.mubr.msk.f32.gmra.mrb[62].mxu0 %vm784_vm2, %v18579_v29 }
0x2986   :  { %14857 = vmatprep.mubr.msk.f32.mxu0 %vm1177_vm6, %v6781_v6 }
0x2989   :  { %14858 = vmatmul.mubr.msk.f32.vlgmr.msra.gmra.mrb[64].mxu0 %vm1177_vm6, %v6786_v16 }
0x299e   :  { %v7287_v32 = vpop.permute.xlu1 %7286  ;;  %v7094_v34 = vpop.permute.xlu0 %7093 }
0x299f   :  { %14865 = vmatprep.subr.msk.mxu0 %vm1177_vm6, %v7094_v34 }
0x29a0   :  { %14866 = vmatpush3.xpose.msk.msra.mxu0 %vm1177_vm6, %v7094_v34 }
0x29a1   :  { %14875 = vmatprep.subr.msk.mxu0 %vm1177_vm6, %v7287_v32 }
0x29a2   :  { %v7092_v49 = vpop.permute.xlu1 %7091  ;;  %v7285_v37 = vpop.permute.xlu0 %7284 }
0x29a6   :  { %v7090_v15 = vpop.permute.xlu1 %7089  ;;  %v7476_v13 = vpop.permute.xlu0 %7475 }
0x29a7   :  { %14867 = vmatprep.mubr.msk.f32.mxu0 %vm1177_vm6, %v7090_v15 }
0x29a8   :  { %14868 = vmatmul.mubr.msk.f32.vlgmr.msra.gmra.mrb[66].mxu0 %vm1177_vm6, %v7092_v49 }
0x29a9   :  { %14876 = vmatpush3.xpose.msk.msra.mxu0 %vm1177_vm6, %v7287_v32 }
0x29aa   :  { %v7283_v39 = vpop.permute.xlu1 %7282 }
0x29ab   :  { %14877 = vmatprep.mubr.msk.f32.mxu0 %vm1177_vm6, %v7283_v39 }
0x29ac   :  { %14878 = vmatmul.mubr.msk.f32.vlgmr.msra.gmra.mrb[68].mxu0 %vm1177_vm6, %v7285_v37 }
0x29ad   :  { %14887 = vmatprep.mubr.msk.f32.mxu0 %vm1177_vm6, %v7476_v13 }
0x29ae   :  { %v7480_v41 = vpop.permute.xlu1 %7479 }
0x29af   :  { %14885 = vmatprep.subr.msk.mxu0 %vm1177_vm6, %v7480_v41 }
0x29b0   :  { %14886 = vmatpush3.xpose.msk.msra.mxu0 %vm1177_vm6, %v7480_v41 }
0x29b1   :  { %14895 = vmatprep.subr.msk.mxu0 %vm1177_vm6, %v18594_v51 }
0x29b2   :  { %v7478_v35 = vpop.permute.xlu1 %7477 }
0x29b3   :  { %14888 = vmatmul.mubr.msk.f32.vlgmr.msra.gmra.mrb[70].mxu0 %vm1177_vm6, %v7478_v35 }
0x29b4   :  { %14896 = vmatpush3.xpose.msk.msra.mxu0 %vm1177_vm6, %v18594_v51 }
0x2a58   :  { %v14843_v58 = vpop.f32.mrb[62].mxu0 }
0x2a59   :  { %v6790_v40 = vpop.f32.mrb[63].mxu0  ;;  %v18607_v59 = vadd.f32 %v14843_v58, %v18543_v23 }
0x2a5a   :  { %v18604_v56 = vadd.f32 %v18543_v23, %v6790_v40 }
0x2a5c   :  { %v14859_v17 = vpop.f32.mrb[64].mxu0  ;;  %14897 = vmatprep.mubr.msk.f32.mxu0 %vm1177_vm6, %v18604_v56 }
0x2a5d   :  { %v6974_v21 = vpop.f32.mrb[65].mxu0  ;;  %14898 = vmatmul.mubr.msk.f32.vlgmr.msra.gmra.mrb[72].mxu0 %vm1177_vm6, %v18607_v59  ;;  %v6986_v44 = vsel %vm1177_vm6, %v14859_v17, -inf }
0x2a5e   :  { %6987 = vmax.xlane.f32.xlu1 %v6986_v44  ;;  %v6983_v19 = vsel %vm1177_vm6, %v6974_v21, -inf }
0x2a5f   :  { %6984 = vmax.xlane.f32.xlu0 %v6983_v19 }
0x2a7b   :  { %v14869_v45 = vpop.f32.mrb[66].mxu0 }
0x2a7c   :  { %v7167_v47 = vpop.f32.mrb[67].mxu0  ;;  %v7179_v23 = vsel %vm1177_vm6, %v14869_v45, -inf }
0x2a7d   :  { %v7176_v30 = vsel %vm1177_vm6, %v7167_v47, -inf }
0x2a7e   :  { %7177 = vmax.xlane.f32.xlu0 %v7176_v30 }
0x2a7f   :  { %v14879_v63 = vpop.f32.mrb[68].mxu0 }
0x2a80   :  { %v7360_v42 = vpop.f32.mrb[69].mxu0  ;;  %v7372_v50 = vsel %vm1177_vm6, %v14879_v63, -inf }
0x2a81   :  { %v7369_v43 = vsel %vm1177_vm6, %v7360_v42, -inf }
0x2a82   :  { %7370 = vmax.xlane.f32.xlu1 %v7369_v43  ;;  %7180 = vmax.xlane.f32.xlu0 %v7179_v23 }
0x2a86   :  { %v14889_v48 = vpop.f32.mrb[70].mxu0  ;;  %7373 = vmax.xlane.f32.xlu0 %v7372_v50 }
0x2a87   :  { %v18619_v53 = vpop.f32.mrb[71].mxu0  ;;  %v7565_v24 = vsel %vm1177_vm6, %v14889_v48, -inf }
0x2a88   :  { %v7562_v31 = vsel %vm1177_vm6, %v18619_v53, -inf }
0x2a89   :  { %7563 = vmax.xlane.f32.xlu1 %v7562_v31 }
0x2a8a   :  { %7566 = vmax.xlane.f32.xlu0 %v7565_v24 }
0x2a9a   :  { %7005 = vrot.lane.b32.xlu1 %v18551_v4, %s17241_s24 }
0x2aeb   :  { %v6988_v55 = vpop.xlane.xlu1 %6987 }
0x2aec   :  { %v6990_v60 = vsub.f32 %v14859_v17, %v6988_v55  ;;  %v6985_v61 = vpop.xlane.xlu0 %6984 }
0x2aed   :  { %v6989_v54 = vsub.f32 %v6974_v21, %v6985_v61 }
0x2aee   :  { %v6993_v7 = vmul.f32 1.442695, %v6990_v60 }
0x2aef   :  { %v6991_v57 = vmul.f32 1.442695, %v6989_v54 }
0x2af0   :  { %16087 = vpow2.f32 %v6993_v7 }
0x2af1   :  { %16089 = vpow2.f32 %v6991_v57 }
0x2afa   :  { %v18626_v2 = vpop.eup %16087 }
0x2afb   :  { %v18628_v3 = vpop.eup %16089  ;;  %v6998_v38 = vsel %vm1177_vm6, %v18626_v2, 0.0 }
0x2afc   :  { %6999 = vadd.xlane.f32.xlu0 %v6998_v38  ;;  %v6995_v16 = vsel %vm1177_vm6, %v18628_v3, 0.0 }
0x2afd   :  { %6996 = vadd.xlane.f32.xlu1 %v6995_v16 }
0x2b0b   :  { %v7178_v36 = vpop.xlane.xlu0 %7177 }
0x2b0c   :  { %v7182_v6 = vsub.f32 %v7167_v47, %v7178_v36 }
0x2b0e   :  { %v7184_v8 = vmul.f32 1.442695, %v7182_v6 }
0x2b0f   :  { %v7371_v9 = vpop.xlane.xlu1 %7370  ;;  %v7181_v10 = vpop.xlane.xlu0 %7180 }
0x2b10   :  { %16091 = vpow2.f32 %v7184_v8  ;;  %v7375_v11 = vsub.f32 %v7360_v42, %v7371_v9  ;;  %v7183_v12 = vsub.f32 %v14869_v45, %v7181_v10 }
0x2b12   :  { %v7377_v14 = vmul.f32 1.442695, %v7375_v11  ;;  %v7186_v18 = vmul.f32 1.442695, %v7183_v12 }
0x2b13   :  { %v7374_v20 = vpop.xlane.xlu0 %7373 }
0x2b14   :  { %16093 = vpow2.f32 %v7377_v14  ;;  %v7376_v22 = vsub.f32 %v14879_v63, %v7374_v20 }
0x2b15   :  { %16095 = vpow2.f32 %v7186_v18 }
0x2b16   :  { %v7379_v25 = vmul.f32 1.442695, %v7376_v22  ;;  %v7564_v27 = vpop.xlane.xlu1 %7563 }
0x2b17   :  { %v7567_v28 = vpop.xlane.xlu0 %7566  ;;  %v7568_v45 = vsub.f32 %v18619_v53, %v7564_v27 }
0x2b18   :  { %16097 = vpow2.f32 %v7379_v25  ;;  %v7569_v32 = vsub.f32 %v14889_v48, %v7567_v28 }
0x2b19   :  { %v7570_v47 = vmul.f32 1.442695, %v7568_v45 }
0x2b1a   :  { %v16092_v34 = vpop.eup %16091  ;;  %v7572_v49 = vmul.f32 1.442695, %v7569_v32  ;;  %v7006_v37 = vpop.permute.xlu1 %7005 }
0x2b1b   :  { %14860 = vmatprep.subr.mxu1 %v7006_v37  ;;  %v7188_v15 = vsel %vm1177_vm6, %v16092_v34, 0.0 }
0x2b1c   :  { %16099 = vpow2.f32 %v7572_v49  ;;  %14861 = vmatpush3.msra.mxu1 %v7006_v37  ;;  %7189 = vadd.xlane.f32.xlu1 %v7188_v15  ;;  %v6691_v37 = vld [vmem:[#allocation42] sm:$0xff]  ;;  %v6692_v15 = vld [vmem:[#allocation42 + $0x8] sm:$0xff] }
0x2b1d   :  { %16101 = vpow2.f32 %v7570_v47 }
0x2b1e   :  { %v16094_v39 = vpop.eup %16093 }
0x2b1f   :  { %v16096_v13 = vpop.eup %16095  ;;  %v7381_v41 = vsel %vm1177_vm6, %v16094_v39, 0.0 }
0x2b20   :  { %7382 = vadd.xlane.f32.xlu1 %v7381_v41  ;;  %v7191_v35 = vsel %vm1177_vm6, %v16096_v13, 0.0  ;;  %v6694_v41 = vld [vmem:[#allocation42 + $0x18] sm:$0xff] }
0x2b21   :  { %7192 = vadd.xlane.f32.xlu0 %v7191_v35 }
0x2b22   :  { %v16098_v58 = vpop.eup %16097 }
0x2b23   :  { %v7384_v40 = vsel %vm1177_vm6, %v16098_v58, 0.0 }
0x2b25   :  { %7385 = vadd.xlane.f32.xlu0 %v7384_v40 }
0x2b26   :  { %v18638_v17 = vpop.eup %16099 }
0x2b27   :  { %v7577_v21 = vsel %vm1177_vm6, %v18638_v17, 0.0  ;;  %v18659_v30 = vpop.eup %16101 }
0x2b28   :  { %v7574_v63 = vsel %vm1177_vm6, %v18659_v30, 0.0 }
0x2b29   :  { %7578 = vadd.xlane.f32.xlu0 %v7577_v21 }
0x2b30   :  { %v18642_v44 = vpop.f32.mrb[72].mxu0 }
0x2b31   :  { %v18644_v19 = vpop.f32.mrb[73].mxu0  ;;  %7391 = vrot.lane.b32.xlu1 %v18551_v4, %s17242_s26 }
0x2b3f   :  { %7198 = vrot.lane.b32.xlu0 %v18551_v4, %s17243_s28 }
0x2b43   :  { %7892 = vrot.lane.b32.xlu0 %v18594_v51, %s17240_s14 }
0x2b47   :  { %7890 = vrot.lane.b32.xlu0 %v18607_v59, %s17240_s14 }
0x2b4b   :  { %8081 = vrot.lane.b32.xlu0 %v18604_v56, %s17245_s17 }
0x2b4f   :  { %8278 = vrot.lane.b32.xlu0 %v18594_v51, %s17246_s1 }
0x2b53   :  { %8276 = vrot.lane.b32.xlu0 %v18607_v59, %s17246_s1 }
0x2b55   :  { %7575 = vadd.xlane.f32.xlu1 %v7574_v63 }
0x2b66   :  { %7584 = vrot.lane.b32.xlu1 %v18551_v4, %s17244_s3 }
0x2b6a   :  { %7888 = vrot.lane.b32.xlu1 %v18604_v56, %s17240_s14 }
0x2b6e   :  { %8085 = vrot.lane.b32.xlu1 %v18594_v51, %s17245_s17 }
0x2b72   :  { %8083 = vrot.lane.b32.xlu1 %v18607_v59, %s17245_s17 }
0x2b76   :  { %8274 = vrot.lane.b32.xlu1 %v18604_v56, %s17246_s1 }
0x2b89   :  { %v7000_v42 = vpop.xlane.xlu0 %6999 }
0x2b8a   :  { %16103 = vrcp.f32 %v7000_v42  ;;  %v6997_v43 = vpop.xlane.xlu1 %6996 }
0x2b8b   :  { %16105 = vrcp.f32 %v6997_v43 }
0x2b94   :  { %v16104_v23 = vpop.eup %16103 }
0x2b95   :  { %v16106_v50 = vpop.eup %16105  ;;  %v7004_v48 = vmul.f32 %v16104_v23, %v18626_v2 }
0x2b96   :  { %v7003_v4 = vmul.f32 %v16106_v50, %v18628_v3 }
0x2b98   :  { %14862 = vmatprep.mubr.msk.f32.mxu1 %vm1177_vm6, %v7003_v4  ;;  %v7785_v4 = vsel %vm1177_vm6, %v18642_v44, -inf }
0x2b99   :  { %14863 = vmatmul.mubr.msk.f32.vlgmr.msra.gmra.mrb[70].mxu1 %vm1177_vm6, %v7004_v48 }
0x2ba9   :  { %v7190_v53 = vpop.xlane.xlu1 %7189 }
0x2baa   :  { %16107 = vrcp.f32 %v7190_v53  ;;  %v7782_v53 = vsel %vm1177_vm6, %v18644_v19, -inf }
0x2bad   :  { %v7383_v59 = vpop.xlane.xlu1 %7382 }
0x2bae   :  { %16109 = vrcp.f32 %v7383_v59  ;;  %v7193_v31 = vpop.xlane.xlu0 %7192 }
0x2baf   :  { %16111 = vrcp.f32 %v7193_v31 }
0x2bb1   :  { %v7392_v2 = vpop.permute.xlu1 %7391 }
0x2bb2   :  { %v7386_v56 = vpop.xlane.xlu0 %7385 }
0x2bb3   :  { %16113 = vrcp.f32 %v7386_v56 }
0x2bb4   :  { %v16108_v24 = vpop.eup %16107 }
0x2bb5   :  { %v7196_v55 = vmul.f32 %v16108_v24, %v16092_v34 }
0x2bb6   :  { %v7579_v60 = vpop.xlane.xlu0 %7578 }
0x2bb7   :  { %14872 = vmatprep.mubr.msk.f32.mxu1 %vm1177_vm6, %v7196_v55  ;;  %16115 = vrcp.f32 %v7579_v60 }
0x2bb8   :  { %v16110_v61 = vpop.eup %16109 }
0x2bb9   :  { %v16112_v54 = vpop.eup %16111  ;;  %v7389_v3 = vmul.f32 %v16110_v61, %v16094_v39  ;;  %v6693_v39 = vld [vmem:[#allocation42 + $0x10] sm:$0xff] }
0x2bba   :  { %v7199_v7 = vpop.permute.xlu0 %7198  ;;  %v7197_v57 = vmul.f32 %v16112_v54, %v16096_v13  ;;  %v15480_v13 = vpack.c.bf16 %v6692_v15, %v6691_v37  ;;  %v15484_v35 = vpack.c.bf16 %v6694_v41, %v6693_v39 }
0x2bbb   :  { %14870 = vmatprep.subr.mxu1 %v7199_v7 }
0x2bbc   :  { %14871 = vmatpush3.msra.mxu1 %v7199_v7 }
0x2bbd   :  { %v16114_v38 = vpop.eup %16113  ;;  %14873 = vmatmul.mubr.msk.f32.vlgmr.msra.gmra.mrb[72].mxu1 %vm1177_vm6, %v7197_v57  ;;  %14880 = vmatprep.subr.mxu1 %v7392_v2 }
0x2bbe   :  { %14881 = vmatpush3.msra.mxu1 %v7392_v2  ;;  %14882 = vmatprep.mubr.msk.f32.mxu1 %vm1177_vm6, %v7389_v3  ;;  %v7893_v16 = vpop.permute.xlu0 %7892  ;;  %v7390_v36 = vmul.f32 %v16114_v38, %v16098_v58 }
0x2bbf   :  { %14905 = vmatprep.subr.msk.mxu0 %vm1177_vm6, %v7893_v16 }
0x2bc0   :  { %14906 = vmatpush3.xpose.msk.msra.mxu0 %vm1177_vm6, %v7893_v16 }
0x2bc1   :  { %14883 = vmatmul.mubr.msk.f32.vlgmr.msra.gmra.mrb[74].mxu1 %vm1177_vm6, %v7390_v36  ;;  %v16116_v12 = vpop.eup %16115 }
0x2bc2   :  { %v7891_v8 = vpop.permute.xlu0 %7890  ;;  %v7583_v22 = vmul.f32 %v16116_v12, %v18638_v17 }
0x2bc6   :  { %v8082_v10 = vpop.permute.xlu0 %8081 }
0x2bca   :  { %v8279_v25 = vpop.permute.xlu0 %8278 }
0x2bce   :  { %v8277_v32 = vpop.permute.xlu0 %8276 }
0x2be2   :  { %v7576_v6 = vpop.xlane.xlu1 %7575 }
0x2be3   :  { %16117 = vrcp.f32 %v7576_v6 }
0x2be6   :  { %v7585_v9 = vpop.permute.xlu1 %7584 }
0x2be7   :  { %14890 = vmatprep.subr.mxu1 %v7585_v9 }
0x2be8   :  { %14891 = vmatpush3.msra.mxu1 %v7585_v9 }
0x2bea   :  { %v7889_v11 = vpop.permute.xlu1 %7888 }
0x2beb   :  { %14907 = vmatprep.mubr.msk.f32.mxu0 %vm1177_vm6, %v7889_v11 }
0x2bec   :  { %14908 = vmatmul.mubr.msk.f32.vlgmr.msra.gmra.mrb[74].mxu0 %vm1177_vm6, %v7891_v8 }
0x2bed   :  { %v16118_v14 = vpop.eup %16117  ;;  %14917 = vmatprep.mubr.msk.f32.mxu0 %vm1177_vm6, %v8082_v10 }
0x2bee   :  { %v8086_v18 = vpop.permute.xlu1 %8085  ;;  %v7582_v20 = vmul.f32 %v16118_v14, %v18659_v30 }
0x2bef   :  { %14915 = vmatprep.subr.msk.mxu0 %vm1177_vm6, %v8086_v18 }
0x2bf0   :  { %14892 = vmatprep.mubr.msk.f32.mxu1 %vm1177_vm6, %v7582_v20  ;;  %14916 = vmatpush3.xpose.msk.msra.mxu0 %vm1177_vm6, %v8086_v18 }
0x2bf1   :  { %14893 = vmatmul.mubr.msk.f32.vlgmr.msra.gmra.mrb[76].mxu1 %vm1177_vm6, %v7583_v22  ;;  %14925 = vmatprep.subr.msk.mxu0 %vm1177_vm6, %v8279_v25 }
0x2bf2   :  { %v8084_v27 = vpop.permute.xlu1 %8083 }
0x2bf3   :  { %14918 = vmatmul.mubr.msk.f32.vlgmr.msra.gmra.mrb[76].mxu0 %vm1177_vm6, %v8084_v27 }
0x2bf4   :  { %14926 = vmatpush3.xpose.msk.msra.mxu0 %vm1177_vm6, %v8279_v25 }
0x2bf5   :  { %15481 = vmatprep.subr.bf16.mxu0 %v15480_v13 }
0x2bf6   :  { %v8275_v28 = vpop.permute.xlu1 %8274 }
0x2bf7   :  { %14927 = vmatprep.mubr.msk.f32.mxu0 %vm1177_vm6, %v8275_v28 }
0x2bf8   :  { %14928 = vmatmul.mubr.msk.f32.vlgmr.msra.gmra.mrb[78].mxu0 %vm1177_vm6, %v8277_v32 }
0x2bf9   :  { %15483 = vmatpush3.bf16.msra.mxu0 %v15480_v13 }
0x2bfa   :  { %15485 = vmatprep.subr.bf16.mxu0 %v15484_v35 }
0x2bfd   :  { %15487 = vmatpush3.bf16.msra.mxu0 %v15484_v35 }
0x2c6c   :  { %v14864_v34 = vpop.f32.mrb[70].mxu1 }
0x2c6d   :  { %v7080_v49 = vpop.f32.mrb[71].mxu1 }
0x2c90   :  { %v14874_v58 = vpop.f32.mrb[72].mxu1 }
0x2c91   :  { %7672 = vrot.lane.b32.xlu0 %v14874_v58, %s17202_s29  ;;  %v7273_v40 = vpop.f32.mrb[73].mxu1 }
0x2c92   :  { %7670 = vrot.lane.b32.xlu1 %v7273_v40, %s17202_s29 }
0x2c94   :  { %v14884_v17 = vpop.f32.mrb[74].mxu1 }
0x2c95   :  { %7680 = vrot.lane.b32.xlu0 %v14884_v17, %s17205_s22  ;;  %v7466_v21 = vpop.f32.mrb[75].mxu1 }
0x2c96   :  { %7678 = vrot.lane.b32.xlu1 %v7466_v21, %s17205_s22 }
0x2cbf   :  { %v14909_v45 = vpop.f32.mrb[74].mxu0 }
0x2cc0   :  { %v7966_v47 = vpop.f32.mrb[75].mxu0  ;;  %v7978_v31 = vsel %vm1177_vm6, %v14909_v45, -inf }
0x2cc1   :  { %v7975_v48 = vsel %vm1177_vm6, %v7966_v47, -inf }
0x2cc4   :  { %v14894_v30 = vpop.f32.mrb[76].mxu1 }
0x2cc5   :  { %7688 = vrot.lane.b32.xlu0 %v14894_v30, %s17251_s30  ;;  %v7659_v63 = vpop.f32.mrb[77].mxu1  ;;  %v18742_v30 = vld [vmem:[#allocation43] ss:$0 sm:$0xff] }
0x2cc6   :  { %7686 = vrot.lane.b32.xlu1 %v7659_v63, %s17251_s30  ;;  %v14919_v42 = vpop.f32.mrb[76].mxu0 }
0x2cc7   :  { %v18705_v43 = vpop.f32.mrb[77].mxu0  ;;  %v8171_v24 = vsel %vm1177_vm6, %v14919_v42, -inf }
0x2cc8   :  { %v8168_v59 = vsel %vm1177_vm6, %v18705_v43, -inf }
0x2ccb   :  { %v18707_v23 = vpop.f32.mrb[78].mxu0 }
0x2ccc   :  { %v18709_v50 = vpop.f32.mrb[79].mxu0  ;;  %v8364_v55 = vsel %vm1177_vm6, %v18707_v23, -inf }
0x2ccd   :  { %v8361_v56 = vsel %vm1177_vm6, %v18709_v50, -inf }
0x2ce4   :  { %7786 = vmax.xlane.f32.xlu0 %v7785_v4 }
0x2ce8   :  { %7976 = vmax.xlane.f32.xlu0 %v7975_v48 }
0x2cea   :  { %7783 = vmax.xlane.f32.xlu1 %v7782_v53 }
0x2cec   :  { %8169 = vmax.xlane.f32.xlu0 %v8168_v59 }
0x2cee   :  { %7979 = vmax.xlane.f32.xlu1 %v7978_v31 }
0x2cf0   :  { %8362 = vmax.xlane.f32.xlu0 %v8361_v56 }
0x2cf2   :  { %8172 = vmax.xlane.f32.xlu1 %v8171_v24 }
0x2cf6   :  { %8365 = vmax.xlane.f32.xlu1 %v8364_v55 }
0x2d03   :  { %v7673_v60 = vpop.permute.xlu0 %7672 }
0x2d04   :  { %v7671_v61 = vpop.permute.xlu1 %7670  ;;  %v7693_v3 = vsel %vm1177_vm6, %v14864_v34, %v7673_v60 }
0x2d05   :  { %v7692_v57 = vsel %vm1177_vm6, %v7080_v49, %v7671_v61 }
0x2d07   :  { %v7681_v54 = vpop.permute.xlu0 %7680 }
0x2d08   :  { %v7679_v7 = vpop.permute.xlu1 %7678  ;;  %v7695_v36 = vsel %vm1847_vm7, %v7693_v3, %v7681_v54 }
0x2d09   :  { %v7694_v38 = vsel %vm1847_vm7, %v7692_v57, %v7679_v7 }
0x2d37   :  { %v7689_v2 = vpop.permute.xlu0 %7688 }
0x2d38   :  { %v7687_v16 = vpop.permute.xlu1 %7686  ;;  %v7697_v8 = vsel %vm1849_vm8, %v7695_v36, %v7689_v2 }
0x2d39   :  { %v7696_v6 = vsel %vm1849_vm8, %v7694_v38, %v7687_v16 }
0x2d3a   :  { %14943 = vmatprep.mubr.msk.f32.mxu0 %vm784_vm2, %v7696_v6 }
0x2d3b   :  { %14944 = vmatmul.mubr.msk.f32.vlgmr.msra.gmra.mrb[80].mxu0 %vm784_vm2, %v7697_v8 }
0x2d71   :  { %v7787_v9 = vpop.xlane.xlu0 %7786 }
0x2d72   :  { %v7789_v10 = vsub.f32 %v18642_v44, %v7787_v9 }
0x2d74   :  { %v7792_v11 = vmul.f32 1.442695, %v7789_v10 }
0x2d75   :  { %v7977_v32 = vpop.xlane.xlu0 %7976 }
0x2d76   :  { %16119 = vpow2.f32 %v7792_v11  ;;  %v7981_v37 = vsub.f32 %v7966_v47, %v7977_v32 }
0x2d77   :  { %v7784_v12 = vpop.xlane.xlu1 %7783 }
0x2d78   :  { %v7788_v14 = vsub.f32 %v18644_v19, %v7784_v12  ;;  %v7983_v39 = vmul.f32 1.442695, %v7981_v37 }
0x2d79   :  { %v8170_v34 = vpop.xlane.xlu0 %8169 }
0x2d7a   :  { %v7790_v18 = vmul.f32 1.442695, %v7788_v14  ;;  %v8174_v13 = vsub.f32 %v18705_v43, %v8170_v34 }
0x2d7b   :  { %v7980_v28 = vpop.xlane.xlu1 %7979 }
0x2d7c   :  { %16121 = vpow2.f32 %v7790_v18  ;;  %v7982_v49 = vsub.f32 %v14909_v45, %v7980_v28  ;;  %v8176_v17 = vmul.f32 1.442695, %v8174_v13 }
0x2d7d   :  { %v8363_v35 = vpop.xlane.xlu0 %8362 }
0x2d7e   :  { %v7985_v15 = vmul.f32 1.442695, %v7982_v49  ;;  %v8367_v21 = vsub.f32 %v18709_v50, %v8363_v35 }
0x2d7f   :  { %v8173_v44 = vpop.xlane.xlu1 %8172 }
0x2d80   :  { %v18734_v20 = vpop.eup %16119  ;;  %v8175_v19 = vsub.f32 %v14919_v42, %v8173_v44  ;;  %16123 = vpow2.f32 %v7985_v15  ;;  %v8369_v63 = vmul.f32 1.442695, %v8367_v21 }
0x2d81   :  { %v7797_v22 = vsel %vm1177_vm6, %v18734_v20, 0.0  ;;  %16125 = vpow2.f32 %v7983_v39 }
0x2d82   :  { %7798 = vadd.xlane.f32.xlu1 %v7797_v22  ;;  %v8178_v58 = vmul.f32 1.442695, %v8175_v19 }
0x2d83   :  { %v8366_v41 = vpop.xlane.xlu1 %8365 }
0x2d84   :  { %v8368_v40 = vsub.f32 %v18707_v23, %v8366_v41  ;;  %16127 = vpow2.f32 %v8178_v58 }
0x2d85   :  { %16129 = vpow2.f32 %v8176_v17 }
0x2d86   :  { %v16122_v25 = vpop.eup %16121  ;;  %v8371_v45 = vmul.f32 1.442695, %v8368_v40 }
0x2d87   :  { %v7794_v27 = vsel %vm1177_vm6, %v16122_v25, 0.0 }
0x2d88   :  { %7795 = vadd.xlane.f32.xlu0 %v7794_v27  ;;  %16131 = vpow2.f32 %v8371_v45 }
0x2d89   :  { %16133 = vpow2.f32 %v8369_v63 }
0x2d8a   :  { %v18749_v53 = vpop.eup %16123 }
0x2d8b   :  { %v16126_v31 = vpop.eup %16125  ;;  %v7990_v24 = vsel %vm1177_vm6, %v18749_v53, 0.0 }
0x2d8e   :  { %v18754_v55 = vpop.eup %16127 }
0x2d8f   :  { %v8183_v60 = vsel %vm1177_vm6, %v18754_v55, 0.0 }
0x2e0e   :  { %v14945_v47 = vpop.f32.mrb[80].mxu0 }
0x2e0f   :  { %v8587_v42 = vadd.f32 %v14945_v47, %v18742_v30  ;;  %v8581_v43 = vpop.f32.mrb[81].mxu0  ;;  %v7799_v16 = vpop.xlane.xlu1 %7798 }
0x2e10   :  { %v8582_v4 = vadd.f32 %v18742_v30, %v8581_v43  ;;  %v8678_v43 = vld [vmem:[#allocation48] sm:$0xff] }
0x2e11   :  { %v8601_v48 = vadd.f32 %v8587_v42, %v18541_v52  ;;  %v18757_v52 = vpop.eup %16129 }
0x2e12   :  { %v8600_v23 = vadd.f32 %v8582_v4, %v18530_v62  ;;  %v7987_v62 = vsel %vm1177_vm6, %v16126_v31, 0.0  ;;  %v18761_v61 = vpop.eup %16131  ;;  %v8180_v54 = vsel %vm1177_vm6, %v18757_v52, 0.0  ;;  %v8679_v4 = vld [vmem:[#allocation48 + $0x8] sm:$0xff] }
0x2e13   :  { %v8609_v50 = vsel %vm784_vm2, %v8601_v48, 0.0  ;;  %v18765_v7 = vpop.eup %16133  ;;  %v8376_v57 = vsel %vm1177_vm6, %v18761_v61, 0.0 }
0x2e14   :  { %8610 = vadd.xlane.f32.xlu1 %v8609_v50  ;;  %v8606_v59 = vsel %vm784_vm2, %v8600_v23, 0.0  ;;  %v8373_v3 = vsel %vm1177_vm6, %v18765_v7, 0.0  ;;  %v8681_v50 = vld [vmem:[#allocation48 + $0x18] sm:$0xff] }
0x2e15   :  { %8607 = vadd.xlane.f32.xlu0 %v8606_v59  ;;  %v7796_v56 = vpop.xlane.xlu0 %7795 }
0x2e16   :  { %16135 = vrcp.f32 %v7796_v56 }
0x2e17   :  { %16137 = vrcp.f32 %v7799_v16 }
0x2e18   :  { %7991 = vadd.xlane.f32.xlu1 %v7990_v24 }
0x2e19   :  { %7988 = vadd.xlane.f32.xlu0 %v7987_v62 }
0x2e1c   :  { %8184 = vadd.xlane.f32.xlu1 %v8183_v60  ;;  %v18803_v60 = vld [vmem:[#allocation45] ss:$0 sm:$0xff] }
0x2e1d   :  { %8181 = vadd.xlane.f32.xlu0 %v8180_v54 }
0x2e20   :  { %v16136_v2 = vpop.eup %16135  ;;  %8377 = vadd.xlane.f32.xlu1 %v8376_v57  ;;  %v18807_v57 = vld [vmem:[#allocation46] ss:$0 sm:$0xff] }
0x2e21   :  { %8374 = vadd.xlane.f32.xlu0 %v8373_v3  ;;  %v7802_v38 = vmul.f32 %v16136_v2, %v16122_v25  ;;  %v16138_v34 = vpop.eup %16137 }
0x2e22   :  { %v7803_v19 = vmul.f32 %v16138_v34, %v18734_v20 }
0x2e23   :  { %14902 = vmatprep.mubr.msk.f32.mxu1 %vm1177_vm6, %v7802_v38 }
0x2e31   :  { %7997 = vrot.lane.b32.xlu1 %v18594_v51, %s17243_s28 }
0x2e35   :  { %8190 = vrot.lane.b32.xlu1 %v18594_v51, %s17242_s26 }
0x2e37   :  { %7804 = vrot.lane.b32.xlu0 %v18594_v51, %s17241_s24 }
0x2e3b   :  { %8383 = vrot.lane.b32.xlu0 %v18594_v51, %s17244_s3 }
0x2ea1   :  { %v8611_v36 = vpop.xlane.xlu1 %8610 }
0x2ea2   :  { %v8619_v6 = vmul.f32 0.03125, %v8611_v36  ;;  %v8608_v8 = vpop.xlane.xlu0 %8607 }
0x2ea3   :  { %v8618_v9 = vmul.f32 0.03125, %v8608_v8  ;;  %v8790_v8 = vld [vmem:[#allocation51] sm:$0xff] }
0x2ea4   :  { %v18780_v10 = vsub.f32 %v8601_v48, %v8619_v6  ;;  %v15488_v48 = vpack.c.bf16 %v8679_v4, %v8678_v43 }
0x2ea5   :  { %v18782_v11 = vsub.f32 %v8600_v23, %v8618_v9  ;;  %v7992_v12 = vpop.xlane.xlu1 %7991  ;;  %v8680_v23 = vld [vmem:[#allocation48 + $0x10] sm:$0xff] }
0x2ea6   :  { %v7989_v14 = vpop.xlane.xlu0 %7988  ;;  %v8627_v18 = vmul.f32 %v18780_v10, %v18780_v10  ;;  %v8791_v9 = vld [vmem:[#allocation51 + $0x8] sm:$0xff] }
0x2ea7   :  { %16139 = vrcp.f32 %v7989_v14  ;;  %v8626_v22 = vmul.f32 %v18782_v11, %v18782_v11 }
0x2ea8   :  { %v8633_v51 = vsel %vm784_vm2, %v8627_v18, 0.0  ;;  %16141 = vrcp.f32 %v7992_v12 }
0x2ea9   :  { %v8185_v25 = vpop.xlane.xlu1 %8184  ;;  %8634 = vadd.xlane.f32.xlu0 %v8633_v51  ;;  %v8630_v27 = vsel %vm784_vm2, %v8626_v22, 0.0 }
0x2eaa   :  { %8631 = vadd.xlane.f32.xlu1 %v8630_v27  ;;  %v8182_v28 = vpop.xlane.xlu0 %8181  ;;  %v8793_v27 = vld [vmem:[#allocation51 + $0x18] sm:$0xff] }
0x2eab   :  { %16143 = vrcp.f32 %v8182_v28 }
0x2eac   :  { %16145 = vrcp.f32 %v8185_v25  ;;  %v8792_v25 = vld [vmem:[#allocation51 + $0x10] sm:$0xff] }
0x2ead   :  { %v8378_v32 = vpop.xlane.xlu1 %8377  ;;  %v15500_v28 = vpack.c.bf16 %v8793_v27, %v8792_v25 }
0x2eae   :  { %v8375_v44 = vpop.xlane.xlu0 %8374 }
0x2eaf   :  { %16147 = vrcp.f32 %v8375_v44 }
0x2eb0   :  { %16149 = vrcp.f32 %v8378_v32 }
0x2eb1   :  { %v16140_v49 = vpop.eup %16139  ;;  %v7998_v37 = vpop.permute.xlu1 %7997 }
0x2eb2   :  { %v7805_v15 = vpop.permute.xlu0 %7804  ;;  %v16142_v39 = vpop.eup %16141  ;;  %v7995_v13 = vmul.f32 %v16140_v49, %v16126_v31 }
0x2eb3   :  { %14900 = vmatprep.subr.mxu1 %v7805_v15  ;;  %v7996_v58 = vmul.f32 %v16142_v39, %v18749_v53  ;;  %v15492_v53 = vpack.c.bf16 %v8681_v50, %v8680_v23 }
0x2eb4   :  { %14901 = vmatpush3.msra.mxu1 %v7805_v15 }
0x2eb5   :  { %v16144_v41 = vpop.eup %16143  ;;  %v8191_v35 = vpop.permute.xlu1 %8190  ;;  %14903 = vmatmul.mubr.msk.f32.vlgmr.msra.gmra.mrb[78].mxu1 %vm1177_vm6, %v7803_v19  ;;  %14910 = vmatprep.subr.mxu1 %v7998_v37 }
0x2eb6   :  { %14911 = vmatpush3.msra.mxu1 %v7998_v37  ;;  %14912 = vmatprep.mubr.msk.f32.mxu1 %vm1177_vm6, %v7995_v13  ;;  %v16146_v40 = vpop.eup %16145  ;;  %v8188_v17 = vmul.f32 %v16144_v41, %v18757_v52  ;;  %v8384_v20 = vpop.permute.xlu0 %8383 }
0x2eb7   :  { %14920 = vmatprep.subr.mxu1 %v8191_v35  ;;  %v8189_v45 = vmul.f32 %v16146_v40, %v18754_v55  ;;  %v18835_v40 = vld [vmem:[#allocation49] ss:$0 sm:$0xff] }
0x2eb9   :  { %v16148_v21 = vpop.eup %16147  ;;  %14913 = vmatmul.mubr.msk.f32.vlgmr.msra.gmra.mrb[80].mxu1 %vm1177_vm6, %v7996_v58 }
0x2eba   :  { %14921 = vmatpush3.msra.mxu1 %v8191_v35  ;;  %14922 = vmatprep.mubr.msk.f32.mxu1 %vm1177_vm6, %v8188_v17  ;;  %v16150_v47 = vpop.eup %16149  ;;  %v8381_v63 = vmul.f32 %v16148_v21, %v18765_v7 }
0x2ebb   :  { %14930 = vmatprep.subr.mxu1 %v8384_v20  ;;  %v8382_v42 = vmul.f32 %v16150_v47, %v18761_v61 }
0x2ebd   :  { %14923 = vmatmul.mubr.msk.f32.vlgmr.msra.gmra.mrb[82].mxu1 %vm1177_vm6, %v8189_v45 }
0x2ebe   :  { %14931 = vmatpush3.msra.mxu1 %v8384_v20  ;;  %14932 = vmatprep.mubr.msk.f32.mxu1 %vm1177_vm6, %v8381_v63 }
0x2ebf   :  { %15489 = vmatprep.subr.bf16.mxu1 %v15488_v48 }
0x2ec1   :  { %14933 = vmatmul.mubr.msk.f32.vlgmr.msra.gmra.mrb[84].mxu1 %vm1177_vm6, %v8382_v42 }
0x2ec2   :  { %15491 = vmatpush3.bf16.msra.mxu1 %v15488_v48 }
0x2ec3   :  { %15493 = vmatprep.subr.bf16.mxu1 %v15492_v53 }
0x2ec6   :  { %15495 = vmatpush3.bf16.msra.mxu1 %v15492_v53 }
0x2f36   :  { %v8635_v59 = vpop.xlane.xlu0 %8634 }
0x2f37   :  { %v8643_v31 = vmul.f32 0.03125, %v8635_v59  ;;  %v8632_v56 = vpop.xlane.xlu1 %8631 }
0x2f38   :  { %v8642_v24 = vmul.f32 0.03125, %v8632_v56 }
0x2f39   :  { %v8647_v55 = vadd.f32 1e-05, %v8643_v31  ;;  %v18847_v31 = vld [vmem:[#allocation52] ss:$0 sm:$0xff] }
0x2f3a   :  { %v8646_v62 = vadd.f32 1e-05, %v8642_v24 }
0x2f3b   :  { %16151 = vrsqrt.f32 %v8647_v55 }
0x2f3c   :  { %16153 = vrsqrt.f32 %v8646_v62 }
0x2f45   :  { %v16152_v52 = vpop.eup %16151 }
0x2f46   :  { %v16154_v61 = vpop.eup %16153  ;;  %v8655_v54 = vmul.f32 %v16152_v52, %v18780_v10 }
0x2f47   :  { %v8654_v7 = vmul.f32 %v16154_v61, %v18782_v11  ;;  %v15496_v11 = vpack.c.bf16 %v8791_v9, %v8790_v8 }
0x2f48   :  { %v8665_v2 = vmul.f32 %v18803_v60, %v8655_v54 }
0x2f49   :  { %v8664_v3 = vmul.f32 %v18803_v60, %v8654_v7  ;;  %15497 = vmatprep.subr.bf16.mxu0 %v15496_v11 }
0x2f4a   :  { %v18815_v16 = vadd.f32 %v18807_v57, %v8665_v2  ;;  %15499 = vmatpush3.bf16.msra.mxu0 %v15496_v11 }
0x2f4b   :  { %v18812_v38 = vadd.f32 %v18807_v57, %v8664_v3  ;;  %15501 = vmatprep.subr.bf16.mxu0 %v15500_v28 }
0x2f4d   :  { %14957 = vmatprep.mubr.msk.f32.mxu1 %vm784_vm2, %v18812_v38 }
0x2f4e   :  { %14958 = vmatmul.mubr.msk.f32.vlgmr.msra.gmra.mrb[86].mxu1 %vm784_vm2, %v18815_v16  ;;  %15503 = vmatpush3.bf16.msra.mxu0 %v15500_v28  ;;  %v8977_v28 = vld [vmem:[#allocation30 + $0x20] sm:$0xff] }
0x2f88   :  { %v14904_v36 = vpop.f32.mrb[78].mxu1 }
0x2f89   :  { %v7879_v6 = vpop.f32.mrb[79].mxu1 }
0x2f8c   :  { %v14914_v10 = vpop.f32.mrb[80].mxu1 }
0x2f8d   :  { %8471 = vrot.lane.b32.xlu1 %v14914_v10, %s17202_s29  ;;  %v8072_v12 = vpop.f32.mrb[81].mxu1 }
0x2f8e   :  { %8469 = vrot.lane.b32.xlu0 %v8072_v12, %s17202_s29 }
0x2f90   :  { %v14924_v14 = vpop.f32.mrb[82].mxu1 }
0x2f91   :  { %v8265_v18 = vpop.f32.mrb[83].mxu1 }
0x2f92   :  { %8479 = vrot.lane.b32.xlu0 %v14924_v14, %s17205_s22  ;;  %8477 = vrot.lane.b32.xlu1 %v8265_v18, %s17205_s22 }
0x2f94   :  { %v14934_v22 = vpop.f32.mrb[84].mxu1 }
0x2f95   :  { %v8458_v51 = vpop.f32.mrb[85].mxu1 }
0x2f96   :  { %8487 = vrot.lane.b32.xlu0 %v14934_v22, %s17251_s30  ;;  %8485 = vrot.lane.b32.xlu1 %v8458_v51, %s17251_s30 }
0x2fff   :  { %v8472_v32 = vpop.permute.xlu1 %8471 }
0x3000   :  { %v8470_v44 = vpop.permute.xlu0 %8469  ;;  %v8492_v37 = vsel %vm1177_vm6, %v14904_v36, %v8472_v32  ;;  %v8978_v32 = vld [vmem:[#allocation30 + $0x28] sm:$0xff] }
0x3001   :  { %v8491_v15 = vsel %vm1177_vm6, %v7879_v6, %v8470_v44  ;;  %v15504_v44 = vpack.c.bf16 %v8978_v32, %v8977_v28 }
0x3003   :  { %15505 = vmatprep.subr.bf16.mxu1 %v15504_v44 }
0x3004   :  { %v8478_v34 = vpop.permute.xlu1 %8477  ;;  %v8480_v49 = vpop.permute.xlu0 %8479  ;;  %15507 = vmatpush3.bf16.msra.mxu1 %v15504_v44 }
0x3005   :  { %v8493_v19 = vsel %vm1847_vm7, %v8491_v15, %v8478_v34  ;;  %v8494_v39 = vsel %vm1847_vm7, %v8492_v37, %v8480_v49  ;;  %v8979_v34 = vld [vmem:[#allocation30 + $0x30] sm:$0xff]  ;;  %v8980_v49 = vld [vmem:[#allocation30 + $0x38] sm:$0xff] }
0x3006   :  { %v15508_v37 = vpack.c.bf16 %v8980_v49, %v8979_v34 }
0x3008   :  { %v8486_v13 = vpop.permute.xlu1 %8485  ;;  %v8488_v41 = vpop.permute.xlu0 %8487  ;;  %15509 = vmatprep.subr.bf16.mxu1 %v15508_v37 }
0x3009   :  { %v8495_v35 = vsel %vm1849_vm8, %v8493_v19, %v8486_v13  ;;  %v8496_v58 = vsel %vm1849_vm8, %v8494_v39, %v8488_v41  ;;  %15511 = vmatpush3.bf16.msra.mxu1 %v15508_v37 }
0x300a   :  { %14946 = vmatprep.mubr.msk.f32.mxu0 %vm784_vm2, %v8495_v35 }
0x300b   :  { %14947 = vmatmul.mubr.msk.f32.gmra.mrb[82].mxu0 %vm784_vm2, %v8496_v58 }
0x3021   :  { %v14959_v17 = vpop.f32.mrb[86].mxu1 }
0x3022   :  { %v8773_v21 = vadd.f32 %v14959_v17, %v18835_v40  ;;  %v8767_v20 = vpop.f32.mrb[87].mxu1 }
0x3023   :  { %v8768_v45 = vadd.f32 %v18835_v40, %v8767_v20 }
0x3024   :  { %v8787_v63 = vmax.f32 %v8773_v21, 0.0 }
0x3025   :  { %v8786_v47 = vmax.f32 %v8768_v45, 0.0 }
0x3027   :  { %14971 = vmatprep.mubr.msk.f32.mxu0 %vm784_vm2, %v8786_v47 }
0x3028   :  { %14972 = vmatmul.mubr.msk.f32.vlgmr.msra.gmra.mrb[84].mxu0 %vm784_vm2, %v8787_v63 }
0x30de   :  { %v14948_v42 = vpop.f32.mrb[82].mxu0 }
0x30df   :  { %v8597_v43 = vadd.f32 %v14948_v42, %v18742_v30  ;;  %v8591_v4 = vpop.f32.mrb[83].mxu0 }
0x30e0   :  { %v8592_v48 = vadd.f32 %v18742_v30, %v8591_v4 }
0x30e1   :  { %v8603_v23 = vadd.f32 %v8597_v43, %v18579_v29 }
0x30e2   :  { %v8602_v50 = vadd.f32 %v8592_v48, %v18573_v26 }
0x30e3   :  { %v8615_v53 = vsel %vm784_vm2, %v8603_v23, 0.0 }
0x30e4   :  { %8616 = vadd.xlane.f32.xlu0 %v8615_v53  ;;  %v8612_v59 = vsel %vm784_vm2, %v8602_v50, 0.0 }
0x30e5   :  { %8613 = vadd.xlane.f32.xlu1 %v8612_v59  ;;  %v18871_v59 = vld [vmem:[#allocation54] ss:$0 sm:$0xff] }
0x30fb   :  { %v14973_v56 = vpop.f32.mrb[84].mxu0 }
0x30fc   :  { %v8885_v24 = vadd.f32 %v14973_v56, %v18847_v31  ;;  %v8879_v55 = vpop.f32.mrb[85].mxu0 }
0x30fd   :  { %v8880_v62 = vadd.f32 %v18847_v31, %v8879_v55  ;;  %v18873_v55 = vld [vmem:[#allocation55] ss:$0 sm:$0xff] }
0x30fe   :  { %v8899_v30 = vadd.f32 %v8885_v24, %v18815_v16 }
0x30ff   :  { %v8898_v29 = vadd.f32 %v8880_v62, %v18812_v38 }
0x3100   :  { %v8907_v26 = vsel %vm784_vm2, %v8899_v30, 0.0 }
0x3101   :  { %8908 = vadd.xlane.f32.xlu1 %v8907_v26  ;;  %v8904_v52 = vsel %vm784_vm2, %v8898_v29, 0.0 }
0x3102   :  { %8905 = vadd.xlane.f32.xlu0 %v8904_v52 }
0x3171   :  { %v8617_v61 = vpop.xlane.xlu0 %8616 }
0x3172   :  { %v8621_v54 = vmul.f32 0.03125, %v8617_v61  ;;  %v8614_v7 = vpop.xlane.xlu1 %8613 }
0x3173   :  { %v8620_v2 = vmul.f32 0.03125, %v8614_v7 }
0x3174   :  { %v8625_v3 = vsub.f32 %v8603_v23, %v8621_v54 }
0x3175   :  { %v8624_v36 = vsub.f32 %v8602_v50, %v8620_v2 }
0x3176   :  { %v8629_v6 = vmul.f32 %v8625_v3, %v8625_v3 }
0x3177   :  { %v8628_v8 = vmul.f32 %v8624_v36, %v8624_v36 }
0x3178   :  { %v8639_v9 = vsel %vm784_vm2, %v8629_v6, 0.0 }
0x3179   :  { %8640 = vadd.xlane.f32.xlu1 %v8639_v9  ;;  %v8636_v16 = vsel %vm784_vm2, %v8628_v8, 0.0 }
0x317a   :  { %8637 = vadd.xlane.f32.xlu0 %v8636_v16 }
0x318e   :  { %v8909_v38 = vpop.xlane.xlu1 %8908 }
0x318f   :  { %v8917_v10 = vmul.f32 0.03125, %v8909_v38  ;;  %v8906_v11 = vpop.xlane.xlu0 %8905 }
0x3190   :  { %v8916_v12 = vmul.f32 0.03125, %v8906_v11 }
0x3191   :  { %v8921_v14 = vsub.f32 %v8899_v30, %v8917_v10 }
0x3192   :  { %v8920_v18 = vsub.f32 %v8898_v29, %v8916_v12 }
0x3193   :  { %v8925_v22 = vmul.f32 %v8921_v14, %v8921_v14 }
0x3194   :  { %v8924_v51 = vmul.f32 %v8920_v18, %v8920_v18 }
0x3195   :  { %v8931_v25 = vsel %vm784_vm2, %v8925_v22, 0.0 }
0x3196   :  { %8932 = vadd.xlane.f32.xlu1 %v8931_v25  ;;  %v8928_v27 = vsel %vm784_vm2, %v8924_v51, 0.0 }
0x3197   :  { %8929 = vadd.xlane.f32.xlu0 %v8928_v27 }
0x3206   :  { %v8641_v15 = vpop.xlane.xlu1 %8640 }
0x3207   :  { %v8645_v19 = vmul.f32 0.03125, %v8641_v15  ;;  %v8638_v39 = vpop.xlane.xlu0 %8637 }
0x3208   :  { %v8644_v13 = vmul.f32 0.03125, %v8638_v39 }
0x3209   :  { %v8649_v41 = vadd.f32 1e-05, %v8645_v19 }
0x320a   :  { %v8648_v35 = vadd.f32 1e-05, %v8644_v13 }
0x320b   :  { %16155 = vrsqrt.f32 %v8649_v41 }
0x320c   :  { %16157 = vrsqrt.f32 %v8648_v35 }
0x3215   :  { %v16156_v58 = vpop.eup %16155 }
0x3216   :  { %v16158_v17 = vpop.eup %16157  ;;  %v8657_v21 = vmul.f32 %v16156_v58, %v8625_v3 }
0x3217   :  { %v8656_v20 = vmul.f32 %v16158_v17, %v8624_v36  ;;  %v18891_v36 = vld [vmem:[#allocation31 + $0x1] ss:$0 sm:$0xff] }
0x3218   :  { %v8667_v45 = vmul.f32 %v18803_v60, %v8657_v21 }
0x3219   :  { %v8666_v47 = vmul.f32 %v18803_v60, %v8656_v20 }
0x321a   :  { %v18865_v42 = vadd.f32 %v18807_v57, %v8667_v45 }
0x321b   :  { %v18862_v63 = vadd.f32 %v18807_v57, %v8666_v47 }
0x321d   :  { %14960 = vmatprep.mubr.msk.f32.mxu1 %vm784_vm2, %v18862_v63 }
0x321e   :  { %14961 = vmatmul.mubr.msk.f32.gmra.mrb[88].mxu1 %vm784_vm2, %v18865_v42 }
0x3223   :  { %v8933_v43 = vpop.xlane.xlu1 %8932 }
0x3224   :  { %v8941_v4 = vmul.f32 0.03125, %v8933_v43  ;;  %v8930_v48 = vpop.xlane.xlu0 %8929 }
0x3225   :  { %v8940_v23 = vmul.f32 0.03125, %v8930_v48 }
0x3226   :  { %v8945_v50 = vadd.f32 1e-05, %v8941_v4 }
0x3227   :  { %v8944_v53 = vadd.f32 1e-05, %v8940_v23 }
0x3228   :  { %16159 = vrsqrt.f32 %v8945_v50 }
0x3229   :  { %16161 = vrsqrt.f32 %v8944_v53 }
0x3232   :  { %v16160_v60 = vpop.eup %16159 }
0x3233   :  { %v16162_v56 = vpop.eup %16161  ;;  %v8953_v57 = vmul.f32 %v16160_v60, %v8921_v14 }
0x3234   :  { %v8952_v24 = vmul.f32 %v16162_v56, %v8920_v18 }
0x3235   :  { %v8963_v62 = vmul.f32 %v18871_v59, %v8953_v57 }
0x3236   :  { %v8962_v30 = vmul.f32 %v18871_v59, %v8952_v24 }
0x3237   :  { %v18881_v26 = vadd.f32 %v18873_v55, %v8963_v62 }
0x3238   :  { %v18878_v29 = vadd.f32 %v18873_v55, %v8962_v30 }
0x323a   :  { %14985 = vmatprep.mubr.msk.f32.mxu1 %vm784_vm2, %v18878_v29 }
0x323b   :  { %14986 = vmatmul.mubr.msk.f32.vlgmr.msra.gmra.mrb[90].mxu1 %vm784_vm2, %v18881_v26 }
0x32f1   :  { %v14962_v52 = vpop.f32.mrb[88].mxu1 }
0x32f2   :  { %v8783_v61 = vadd.f32 %v14962_v52, %v18835_v40  ;;  %v8777_v54 = vpop.f32.mrb[89].mxu1 }
0x32f3   :  { %v8778_v7 = vadd.f32 %v18835_v40, %v8777_v54 }
0x32f4   :  { %v8789_v3 = vmax.f32 %v8783_v61, 0.0 }
0x32f5   :  { %v8788_v2 = vmax.f32 %v8778_v7, 0.0 }
0x32f7   :  { %14974 = vmatprep.mubr.msk.f32.mxu0 %vm784_vm2, %v8788_v2 }
0x32f8   :  { %14975 = vmatmul.mubr.msk.f32.gmra.mrb[86].mxu0 %vm784_vm2, %v8789_v3 }
0x330e   :  { %v14987_v6 = vpop.f32.mrb[90].mxu1 }
0x330f   :  { %v18894_v8 = vadd.f32 %v14987_v6, %v18891_v36  ;;  %v9074_v9 = vpop.f32.mrb[91].mxu1 }
0x3310   :  { %v18897_v16 = vadd.f32 %v18891_v36, %v9074_v9 }
0x3312   :  { %14995 = vmatprep.mubr.msk.f32.mxu0 %vm1177_vm6, %v18897_v16  ;;  %v18903_v40 = vpack.i.bf16 %v18894_v8, %v18897_v16 }
0x3314   :  { %15851 = vrot.lane.b32.xlu1 %v18903_v40, %s17243_s28  ;;  %15846 = vrot.lane.b32.xlu0 %v18903_v40, %s17241_s24 }
0x3318   :  { %9293 = vrot.lane.b32.xlu1 %v18897_v16, %s17240_s14  ;;  %9295 = vrot.lane.b32.xlu0 %v18894_v8, %s17240_s14 }
0x3386   :  { %v15852_v38 = vpop.permute.xlu1 %15851  ;;  %v15847_v10 = vpop.permute.xlu0 %15846 }
0x3387   :  { %v15854_v11 = vunpack.i.h.bf16 %v15852_v38  ;;  %v15853_v12 = vunpack.i.l.bf16 %v15852_v38  ;;  %v15849_v14 = vunpack.i.h.bf16 %v15847_v10  ;;  %v15848_v18 = vunpack.i.l.bf16 %v15847_v10 }
0x3389   :  { %v15512_v22 = vpack.c.bf16 %v15849_v14, %v15848_v18  ;;  %v15522_v51 = vpack.c.bf16 %v15854_v11, %v15853_v12 }
0x338a   :  { %v9294_v25 = vpop.permute.xlu1 %9293  ;;  %v9296_v27 = vpop.permute.xlu0 %9295 }
0x338b   :  { %15514 = vmatprep.subr.msk.bf16.mxu0 %vm18214_vm10, %v15512_v22 }
0x338c   :  { %15517 = vmatpush3.bf16.xpose.msk.msra.mxu0 %vm18214_vm10, %v15512_v22 }
0x338d   :  { %15524 = vmatprep.subr.msk.bf16.mxu0 %vm18214_vm10, %v15522_v51 }
0x3393   :  { %14996 = vmatmul.mubr.msk.f32.vlgmr.msra.gmra.mrb[88].mxu0 %vm1177_vm6, %v18894_v8 }
0x3394   :  { %15527 = vmatpush3.bf16.xpose.msk.msra.mxu0 %vm18214_vm10, %v15522_v51  ;;  %15009 = vmatprep.mubr.msk.f32.mxu0 %vm1177_vm6, %v9294_v25 }
0x339b   :  { %15010 = vmatmul.mubr.msk.f32.vlgmr.msra.gmra.mrb[90].mxu0 %vm1177_vm6, %v9296_v27 }
0x33cb   :  { %v14976_v28 = vpop.f32.mrb[86].mxu0 }
0x33cc   :  { %v8895_v32 = vadd.f32 %v14976_v28, %v18847_v31  ;;  %v8889_v44 = vpop.f32.mrb[87].mxu0 }
0x33cd   :  { %v8890_v34 = vadd.f32 %v18847_v31, %v8889_v44 }
0x33ce   :  { %v8901_v49 = vadd.f32 %v8895_v32, %v18865_v42 }
0x33cf   :  { %v8900_v37 = vadd.f32 %v8890_v34, %v18862_v63 }
0x33d0   :  { %v8913_v15 = vsel %vm784_vm2, %v8901_v49, 0.0 }
0x33d1   :  { %8914 = vadd.xlane.f32.xlu0 %v8913_v15  ;;  %v8910_v19 = vsel %vm784_vm2, %v8900_v37, 0.0 }
0x33d2   :  { %8911 = vadd.xlane.f32.xlu1 %v8910_v19 }
0x345e   :  { %v8915_v39 = vpop.xlane.xlu0 %8914 }
0x345f   :  { %v8912_v13 = vpop.xlane.xlu1 %8911  ;;  %v8919_v17 = vmul.f32 0.03125, %v8915_v39 }
0x3460   :  { %v8918_v20 = vmul.f32 0.03125, %v8912_v13 }
0x3461   :  { %v8923_v47 = vsub.f32 %v8901_v49, %v8919_v17 }
0x3462   :  { %v8922_v63 = vsub.f32 %v8900_v37, %v8918_v20 }
0x3463   :  { %v8927_v50 = vmul.f32 %v8923_v47, %v8923_v47 }
0x3464   :  { %v8926_v60 = vmul.f32 %v8922_v63, %v8922_v63 }
0x3465   :  { %v8937_v56 = vsel %vm784_vm2, %v8927_v50, 0.0 }
0x3466   :  { %v14997_v41 = vpop.f32.mrb[88].mxu0  ;;  %v8934_v57 = vsel %vm784_vm2, %v8926_v60, 0.0 }
0x3467   :  { %v9183_v35 = vsel %vm18237_vm11, %v14997_v41, -1e+30  ;;  %v9173_v58 = vpop.f32.mrb[89].mxu0 }
0x3468   :  { %v9187_v31 = vsel %vm1847_vm7, %v9183_v35, -inf  ;;  %v9182_v21 = vsel %vm18241_vm12, %v9173_v58, -1e+30 }
0x3469   :  { %v9184_v45 = vsel %vm1847_vm7, %v9182_v21, -inf  ;;  %9188 = vmax.xlane.f32.xlu1 %v9187_v31 }
0x346a   :  { %9185 = vmax.xlane.f32.xlu0 %v9184_v45 }
0x346e   :  { %v15011_v42 = vpop.f32.mrb[90].mxu0 }
0x346f   :  { %v9385_v43 = vsel %vm18237_vm11, %v15011_v42, -1e+30  ;;  %v9375_v4 = vpop.f32.mrb[91].mxu0 }
0x3470   :  { %v9389_v48 = vsel %vm1847_vm7, %v9385_v43, -inf  ;;  %v9384_v23 = vsel %vm18241_vm12, %v9375_v4, -1e+30 }
0x3471   :  { %v9386_v53 = vsel %vm1847_vm7, %v9384_v23, -inf  ;;  %9390 = vmax.xlane.f32.xlu1 %v9389_v48 }
0x3472   :  { %9387 = vmax.xlane.f32.xlu0 %v9386_v53 }
0x3475   :  { %8938 = vadd.xlane.f32.xlu1 %v8937_v56 }
0x3476   :  { %8935 = vadd.xlane.f32.xlu0 %v8934_v57 }
0x34f6   :  { %v9189_v24 = vpop.xlane.xlu1 %9188 }
0x34f7   :  { %v9191_v62 = vsub.f32 %v9183_v35, %v9189_v24  ;;  %v9186_v30 = vpop.xlane.xlu0 %9185 }
0x34f8   :  { %v9190_v52 = vsub.f32 %v9182_v21, %v9186_v30 }
0x34f9   :  { %v9194_v61 = vmul.f32 1.442695, %v9191_v62 }
0x34fa   :  { %v9192_v54 = vmul.f32 1.442695, %v9190_v52 }
0x34fb   :  { %16163 = vpow2.f32 %v9194_v61 }
0x34fc   :  { %16165 = vpow2.f32 %v9192_v54 }
0x34fe   :  { %v9391_v7 = vpop.xlane.xlu1 %9390 }
0x34ff   :  { %v9393_v2 = vsub.f32 %v9385_v43, %v9391_v7  ;;  %v9388_v3 = vpop.xlane.xlu0 %9387 }
0x3500   :  { %v9392_v6 = vsub.f32 %v9384_v23, %v9388_v3 }
0x3501   :  { %v9396_v9 = vmul.f32 1.442695, %v9393_v2 }
0x3502   :  { %v9394_v38 = vmul.f32 1.442695, %v9392_v6  ;;  %v8939_v10 = vpop.xlane.xlu1 %8938 }
0x3503   :  { %16167 = vpow2.f32 %v9396_v9  ;;  %v8943_v11 = vmul.f32 0.03125, %v8939_v10  ;;  %v8936_v12 = vpop.xlane.xlu0 %8935 }
0x3504   :  { %16169 = vpow2.f32 %v9394_v38  ;;  %v8942_v14 = vmul.f32 0.03125, %v8936_v12 }
0x3505   :  { %v16164_v18 = vpop.eup %16163  ;;  %v8947_v22 = vadd.f32 1e-05, %v8943_v11 }
0x3506   :  { %v16166_v51 = vpop.eup %16165  ;;  %v8946_v25 = vadd.f32 1e-05, %v8942_v14  ;;  %v9199_v27 = vsel %vm1847_vm7, %v16164_v18, 0.0 }
0x3507   :  { %16171 = vrsqrt.f32 %v8947_v22  ;;  %9200 = vadd.xlane.f32.xlu1 %v9199_v27  ;;  %v9196_v28 = vsel %vm1847_vm7, %v16166_v51, 0.0 }
0x3508   :  { %16173 = vrsqrt.f32 %v8946_v25  ;;  %9197 = vadd.xlane.f32.xlu0 %v9196_v28 }
0x350d   :  { %v16168_v32 = vpop.eup %16167 }
0x350e   :  { %v16170_v44 = vpop.eup %16169  ;;  %v9401_v34 = vsel %vm1847_vm7, %v16168_v32, 0.0 }
0x350f   :  { %9402 = vadd.xlane.f32.xlu1 %v9401_v34  ;;  %v9398_v49 = vsel %vm1847_vm7, %v16170_v44, 0.0 }
0x3510   :  { %9399 = vadd.xlane.f32.xlu0 %v9398_v49 }
0x3511   :  { %v16172_v37 = vpop.eup %16171 }
0x3512   :  { %v16174_v15 = vpop.eup %16173  ;;  %v8955_v19 = vmul.f32 %v16172_v37, %v8923_v47 }
0x3513   :  { %v8954_v39 = vmul.f32 %v16174_v15, %v8922_v63 }
0x3514   :  { %v8965_v13 = vmul.f32 %v18871_v59, %v8955_v19 }
0x3515   :  { %v8964_v41 = vmul.f32 %v18871_v59, %v8954_v39 }
0x3516   :  { %v18955_v58 = vadd.f32 %v18873_v55, %v8965_v13 }
0x3517   :  { %v18952_v35 = vadd.f32 %v18873_v55, %v8964_v41 }
0x3519   :  { %14988 = vmatprep.mubr.msk.f32.mxu1 %vm784_vm2, %v18952_v35 }
0x351a   :  { %14989 = vmatmul.mubr.msk.f32.gmra.mrb[92].mxu1 %vm784_vm2, %v18955_v58 }
0x3520   :  { %15861 = vrot.lane.b32.xlu1 %v18903_v40, %s17247_s5 }
0x3524   :  { %15866 = vrot.lane.b32.xlu1 %v18903_v40, %s17242_s26 }
0x3526   :  { %15856 = vrot.lane.b32.xlu0 %v18903_v40, %s17248_s0 }
0x3528   :  { %9497 = vrot.lane.b32.xlu1 %v18894_v8, %s17245_s17 }
0x352a   :  { %9495 = vrot.lane.b32.xlu0 %v18897_v16, %s17245_s17 }
0x3594   :  { %v9201_v55 = vpop.xlane.xlu1 %9200 }
0x3595   :  { %v9198_v59 = vpop.xlane.xlu0 %9197 }
0x3596   :  { %16175 = vrcp.f32 %v9198_v59 }
0x3597   :  { %16177 = vrcp.f32 %v9201_v55 }
0x359c   :  { %v9403_v17 = vpop.xlane.xlu1 %9402 }
0x359d   :  { %v9400_v31 = vpop.xlane.xlu0 %9399 }
0x359e   :  { %16179 = vrcp.f32 %v9400_v31 }
0x359f   :  { %16181 = vrcp.f32 %v9403_v17 }
0x35a0   :  { %v16176_v21 = vpop.eup %16175  ;;  %v15862_v20 = vpop.permute.xlu1 %15861 }
0x35a1   :  { %v15857_v45 = vpop.permute.xlu0 %15856  ;;  %v9204_v47 = vmul.f32 %v16176_v21, %v16166_v51  ;;  %v15864_v63 = vunpack.i.h.bf16 %v15862_v20  ;;  %v15863_v42 = vunpack.i.l.bf16 %v15862_v20  ;;  %v16178_v50 = vpop.eup %16177 }
0x35a2   :  { %v15859_v43 = vunpack.i.h.bf16 %v15857_v45  ;;  %v15858_v4 = vunpack.i.l.bf16 %v15857_v45  ;;  %v9205_v24 = vmul.f32 %v16178_v50, %v16164_v18 }
0x35a3   :  { %15002 = vmatprep.mubr.msk.f32.mxu1 %vm1847_vm7, %v9204_v47  ;;  %v15528_v56 = vpack.c.bf16 %v15864_v63, %v15863_v42 }
0x35a4   :  { %v15867_v48 = vpop.permute.xlu1 %15866  ;;  %v15518_v23 = vpack.c.bf16 %v15859_v43, %v15858_v4 }
0x35a5   :  { %v15869_v53 = vunpack.i.h.bf16 %v15867_v48  ;;  %v15868_v60 = vunpack.i.l.bf16 %v15867_v48  ;;  %v9496_v54 = vpop.permute.xlu0 %9495 }
0x35a6   :  { %15519 = vmatprep.subr.bf16.mxu1 %v15518_v23 }
0x35a7   :  { %15521 = vmatpush3.bf16.msra.mxu1 %v15518_v23  ;;  %v15532_v52 = vpack.c.bf16 %v15869_v53, %v15868_v60 }
0x35a8   :  { %v16180_v57 = vpop.eup %16179  ;;  %15529 = vmatprep.subr.bf16.mxu1 %v15528_v56  ;;  %v9498_v7 = vpop.permute.xlu1 %9497 }
0x35a9   :  { %v16182_v62 = vpop.eup %16181  ;;  %v9406_v30 = vmul.f32 %v16180_v57, %v16170_v44 }
0x35aa   :  { %15003 = vmatmul.mubr.msk.f32.vlgmr.msra.gmra.mrb[94].mxu1 %vm1847_vm7, %v9205_v24  ;;  %v9407_v61 = vmul.f32 %v16182_v62, %v16168_v32 }
0x35ab   :  { %15531 = vmatpush3.bf16.msra.mxu1 %v15528_v56  ;;  %15016 = vmatprep.mubr.msk.f32.mxu1 %vm1847_vm7, %v9406_v30 }
0x35ac   :  { %15534 = vmatprep.subr.msk.bf16.mxu1 %vm18214_vm10, %v15532_v52 }
0x35ae   :  { %15017 = vmatmul.mubr.msk.f32.vlgmr.msra.gmra.mrb[96].mxu1 %vm1847_vm7, %v9407_v61 }
0x35af   :  { %15023 = vmatprep.mubr.msk.f32.mxu1 %vm1177_vm6, %v9496_v54 }
0x35b4   :  { %15537 = vmatpush3.bf16.xpose.msk.msra.mxu1 %vm18214_vm10, %v15532_v52 }
0x35bb   :  { %15024 = vmatmul.mubr.msk.f32.vlgmr.msra.gmra.mrb[98].mxu1 %vm1177_vm6, %v9498_v7 }
0x35ed   :  { %v18981_v2 = vpop.f32.mrb[92].mxu1 }
0x35ee   :  { %v18983_v3 = vpop.f32.mrb[93].mxu1 }
0x367d   :  { %v18985_v6 = vpop.f32.mrb[94].mxu1 }
0x367e   :  { %v18987_v9 = vpop.f32.mrb[95].mxu1 }
0x3681   :  { %v18989_v38 = vpop.f32.mrb[96].mxu1 }
0x3682   :  { %v18991_v10 = vpop.f32.mrb[97].mxu1 }
0x368e   :  { %v15025_v11 = vpop.f32.mrb[98].mxu1 }
0x368f   :  { %v9587_v12 = vsel %vm18237_vm11, %v15025_v11, -1e+30  ;;  %v9577_v14 = vpop.f32.mrb[99].mxu1 }
0x3690   :  { %v9591_v18 = vsel %vm1847_vm7, %v9587_v12, -inf  ;;  %v9586_v22 = vsel %vm18241_vm12, %v9577_v14, -1e+30 }
0x3691   :  { %v9588_v51 = vsel %vm1847_vm7, %v9586_v22, -inf  ;;  %9592 = vmax.xlane.f32.xlu1 %v9591_v18 }
0x3692   :  { %9589 = vmax.xlane.f32.xlu0 %v9588_v51 }
0x36a2   :  { %15871 = vrot.lane.b32.xlu1 %v18903_v40, %s17250_s27 }
0x36a6   :  { %9697 = vrot.lane.b32.xlu1 %v18897_v16, %s17246_s1 }
0x36aa   :  { %9699 = vrot.lane.b32.xlu1 %v18894_v8, %s17246_s1 }
0x371e   :  { %v9593_v25 = vpop.xlane.xlu1 %9592 }
0x371f   :  { %v9595_v27 = vsub.f32 %v9587_v12, %v9593_v25  ;;  %v9590_v28 = vpop.xlane.xlu0 %9589  ;;  %v19033_v25 = vadd.f32 %v18981_v2, %v18891_v36 }
0x3720   :  { %v9594_v32 = vsub.f32 %v9586_v22, %v9590_v28 }
0x3721   :  { %v9598_v44 = vmul.f32 1.442695, %v9595_v27  ;;  %v19037_v27 = vadd.f32 %v18891_v36, %v18983_v3 }
0x3722   :  { %v9596_v34 = vmul.f32 1.442695, %v9594_v32  ;;  %v15872_v49 = vpop.permute.xlu1 %15871 }
0x3723   :  { %16183 = vpow2.f32 %v9598_v44  ;;  %v15874_v37 = vunpack.i.h.bf16 %v15872_v49  ;;  %v15873_v15 = vunpack.i.l.bf16 %v15872_v49  ;;  %v19041_v28 = vpack.i.bf16 %v19033_v25, %v19037_v27 }
0x3724   :  { %16185 = vpow2.f32 %v9596_v34 }
0x3725   :  { %v15538_v19 = vpack.c.bf16 %v15874_v37, %v15873_v15 }
0x3726   :  { %v9698_v42 = vpop.permute.xlu1 %9697 }
0x3727   :  { %15539 = vmatprep.subr.bf16.mxu0 %v15538_v19 }
0x3728   :  { %15541 = vmatpush3.bf16.msra.mxu0 %v15538_v19 }
0x372a   :  { %v9700_v43 = vpop.permute.xlu1 %9699 }
0x372d   :  { %v16184_v39 = vpop.eup %16183 }
0x372e   :  { %v9603_v16 = vsel %vm1847_vm7, %v16184_v39, 0.0  ;;  %v16186_v13 = vpop.eup %16185 }
0x372f   :  { %9604 = vadd.xlane.f32.xlu0 %v9603_v16  ;;  %v9600_v8 = vsel %vm1847_vm7, %v16186_v13, 0.0 }
0x3733   :  { %9601 = vadd.xlane.f32.xlu0 %v9600_v8 }
0x3749   :  { %15876 = vrot.lane.b32.xlu0 %v18903_v40, %s17244_s3 }
0x37bc   :  { %v9605_v41 = vpop.xlane.xlu0 %9604 }
0x37bd   :  { %16187 = vrcp.f32 %v9605_v41 }
0x37c0   :  { %v9602_v59 = vpop.xlane.xlu0 %9601 }
0x37c1   :  { %16189 = vrcp.f32 %v9602_v59 }
0x37c4   :  { %v15877_v55 = vpop.permute.xlu0 %15876 }
0x37c5   :  { %v15879_v17 = vunpack.i.h.bf16 %v15877_v55  ;;  %v15878_v31 = vunpack.i.l.bf16 %v15877_v55 }
0x37c7   :  { %v15542_v21 = vpack.c.bf16 %v15879_v17, %v15878_v31  ;;  %v16188_v20 = vpop.eup %16187 }
0x37c8   :  { %v9609_v63 = vmul.f32 %v16188_v20, %v16184_v39 }
0x37c9   :  { %15544 = vmatprep.subr.msk.bf16.mxu0 %vm18214_vm10, %v15542_v21 }
0x37cb   :  { %v16190_v45 = vpop.eup %16189 }
0x37cc   :  { %v9608_v47 = vmul.f32 %v16190_v45, %v16186_v13 }
0x37ce   :  { %15030 = vmatprep.mubr.msk.f32.mxu0 %vm1847_vm7, %v9608_v47 }
0x37cf   :  { %15031 = vmatmul.mubr.msk.f32.vlgmr.msra.gmra.mrb[92].mxu0 %vm1847_vm7, %v9609_v63 }
0x37d0   :  { %15547 = vmatpush3.bf16.xpose.msk.msra.mxu0 %vm18214_vm10, %v15542_v21  ;;  %15037 = vmatprep.mubr.msk.f32.mxu0 %vm1177_vm6, %v9698_v42 }
0x37d7   :  { %15038 = vmatmul.mubr.msk.f32.vlgmr.msra.gmra.mrb[94].mxu0 %vm1177_vm6, %v9700_v43 }
0x38a2   :  { %v19017_v4 = vpop.f32.mrb[92].mxu0 }
0x38a3   :  { %v19019_v48 = vpop.f32.mrb[93].mxu0 }
0x38aa   :  { %v15039_v23 = vpop.f32.mrb[94].mxu0 }
0x38ab   :  { %v9789_v50 = vsel %vm18237_vm11, %v15039_v23, -1e+30  ;;  %v9779_v53 = vpop.f32.mrb[95].mxu0 }
0x38ac   :  { %v9793_v60 = vsel %vm1847_vm7, %v9789_v50, -inf  ;;  %v9788_v56 = vsel %vm18241_vm12, %v9779_v53, -1e+30 }
0x38ad   :  { %v9790_v57 = vsel %vm1847_vm7, %v9788_v56, -inf  ;;  %9794 = vmax.xlane.f32.xlu1 %v9793_v60 }
0x38ae   :  { %9791 = vmax.xlane.f32.xlu0 %v9790_v57 }
0x38be   :  { %15881 = vrot.lane.b32.xlu1 %v18903_v40, %s17249_s19 }
0x393a   :  { %v9795_v24 = vpop.xlane.xlu1 %9794 }
0x393b   :  { %v9797_v62 = vsub.f32 %v9789_v50, %v9795_v24  ;;  %v9792_v30 = vpop.xlane.xlu0 %9791 }
0x393c   :  { %v9796_v52 = vsub.f32 %v9788_v56, %v9792_v30 }
0x393d   :  { %v9800_v61 = vmul.f32 1.442695, %v9797_v62 }
0x393e   :  { %v9798_v54 = vmul.f32 1.442695, %v9796_v52  ;;  %v15882_v7 = vpop.permute.xlu1 %15881 }
0x393f   :  { %16191 = vpow2.f32 %v9800_v61  ;;  %v15884_v11 = vunpack.i.h.bf16 %v15882_v7  ;;  %v15883_v12 = vunpack.i.l.bf16 %v15882_v7 }
0x3940   :  { %16193 = vpow2.f32 %v9798_v54 }
0x3941   :  { %v15548_v14 = vpack.c.bf16 %v15884_v11, %v15883_v12 }
0x3943   :  { %15549 = vmatprep.subr.bf16.mxu1 %v15548_v14 }
0x3944   :  { %15551 = vmatpush3.bf16.msra.mxu1 %v15548_v14 }
0x3949   :  { %v16192_v18 = vpop.eup %16191 }
0x394a   :  { %v9805_v22 = vsel %vm1847_vm7, %v16192_v18, 0.0  ;;  %v16194_v51 = vpop.eup %16193 }
0x394b   :  { %9806 = vadd.xlane.f32.xlu0 %v9805_v22  ;;  %v9802_v40 = vsel %vm1847_vm7, %v16194_v51, 0.0 }
0x394f   :  { %9803 = vadd.xlane.f32.xlu0 %v9802_v40 }
0x3965   :  { %15886 = vrot.lane.b32.xlu0 %v19041_v28, %s17241_s24 }
0x39d8   :  { %v9807_v32 = vpop.xlane.xlu0 %9806 }
0x39d9   :  { %16195 = vrcp.f32 %v9807_v32 }
0x39dc   :  { %v9804_v44 = vpop.xlane.xlu0 %9803 }
0x39dd   :  { %16197 = vrcp.f32 %v9804_v44 }
0x39e0   :  { %v15887_v34 = vpop.permute.xlu0 %15886 }
0x39e1   :  { %v15889_v49 = vunpack.i.h.bf16 %v15887_v34  ;;  %v15888_v37 = vunpack.i.l.bf16 %v15887_v34 }
0x39e3   :  { %v15552_v2 = vpack.c.bf16 %v15889_v49, %v15888_v37  ;;  %v16196_v36 = vpop.eup %16195 }
0x39e4   :  { %v9811_v19 = vmul.f32 %v16196_v36, %v16192_v18 }
0x39e5   :  { %15554 = vmatprep.subr.msk.bf16.mxu1 %vm18214_vm10, %v15552_v2 }
0x39e7   :  { %v16198_v3 = vpop.eup %16197 }
0x39e8   :  { %v9810_v15 = vmul.f32 %v16198_v3, %v16194_v51 }
0x39ea   :  { %15044 = vmatprep.mubr.msk.f32.mxu1 %vm1847_vm7, %v9810_v15 }
0x39eb   :  { %15045 = vmatmul.mubr.msk.f32.vlgmr.msra.gmra.mrb[100].mxu1 %vm1847_vm7, %v9811_v19 }
0x39ec   :  { %15557 = vmatpush3.bf16.xpose.msk.msra.mxu1 %vm18214_vm10, %v15552_v2  ;;  %15051 = vmatprep.mubr.msk.f32.mxu1 %vm1177_vm6, %v19037_v27 }
0x39f3   :  { %15052 = vmatmul.mubr.msk.f32.vlgmr.msra.gmra.mrb[102].mxu1 %vm1177_vm6, %v19033_v25 }
0x3abe   :  { %v19055_v39 = vpop.f32.mrb[100].mxu1 }
0x3abf   :  { %v19057_v16 = vpop.f32.mrb[101].mxu1 }
0x3ac6   :  { %v15053_v13 = vpop.f32.mrb[102].mxu1 }
0x3ac7   :  { %v10019_v8 = vsel %vm18237_vm11, %v15053_v13, -1e+30  ;;  %v10009_v41 = vpop.f32.mrb[103].mxu1 }
0x3ac8   :  { %v10023_v59 = vsel %vm1847_vm7, %v10019_v8, -inf  ;;  %v10018_v55 = vsel %vm18241_vm12, %v10009_v41, -1e+30 }
0x3ac9   :  { %v10020_v17 = vsel %vm1847_vm7, %v10018_v55, -inf  ;;  %10024 = vmax.xlane.f32.xlu0 %v10023_v59 }
0x3aca   :  { %10021 = vmax.xlane.f32.xlu1 %v10020_v17 }
0x3adb   :  { %15891 = vrot.lane.b32.xlu1 %v19041_v28, %s17248_s0 }
0x3adf   :  { %10129 = vrot.lane.b32.xlu1 %v19037_v27, %s17240_s14 }
0x3b56   :  { %v10025_v31 = vpop.xlane.xlu0 %10024 }
0x3b57   :  { %v10027_v21 = vsub.f32 %v10019_v8, %v10025_v31  ;;  %v10022_v20 = vpop.xlane.xlu1 %10021 }
0x3b58   :  { %v10026_v45 = vsub.f32 %v10018_v55, %v10022_v20 }
0x3b59   :  { %v10030_v47 = vmul.f32 1.442695, %v10027_v21 }
0x3b5a   :  { %v10028_v63 = vmul.f32 1.442695, %v10026_v45 }
0x3b5b   :  { %16199 = vpow2.f32 %v10030_v47  ;;  %v15892_v42 = vpop.permute.xlu1 %15891 }
0x3b5c   :  { %16201 = vpow2.f32 %v10028_v63  ;;  %v15894_v43 = vunpack.i.h.bf16 %v15892_v42  ;;  %v15893_v23 = vunpack.i.l.bf16 %v15892_v42 }
0x3b5e   :  { %v15558_v50 = vpack.c.bf16 %v15894_v43, %v15893_v23 }
0x3b5f   :  { %v10130_v24 = vpop.permute.xlu1 %10129 }
0x3b60   :  { %15559 = vmatprep.subr.bf16.mxu0 %v15558_v50 }
0x3b61   :  { %15561 = vmatpush3.bf16.msra.mxu0 %v15558_v50 }
0x3b65   :  { %v16200_v53 = vpop.eup %16199 }
0x3b66   :  { %v16202_v60 = vpop.eup %16201  ;;  %v10035_v56 = vsel %vm1847_vm7, %v16200_v53, 0.0 }
0x3b67   :  { %10036 = vadd.xlane.f32.xlu0 %v10035_v56  ;;  %v10032_v57 = vsel %vm1847_vm7, %v16202_v60, 0.0 }
0x3b68   :  { %10033 = vadd.xlane.f32.xlu1 %v10032_v57 }
0x3b79   :  { %10131 = vrot.lane.b32.xlu1 %v19033_v25, %s17240_s14 }
0x3b7d   :  { %15896 = vrot.lane.b32.xlu0 %v19041_v28, %s17243_s28 }
0x3bf4   :  { %v10037_v62 = vpop.xlane.xlu0 %10036 }
0x3bf5   :  { %16203 = vrcp.f32 %v10037_v62  ;;  %v10034_v30 = vpop.xlane.xlu1 %10033 }
0x3bf6   :  { %16205 = vrcp.f32 %v10034_v30 }
0x3bf8   :  { %v15897_v52 = vpop.permute.xlu0 %15896 }
0x3bf9   :  { %v15899_v61 = vunpack.i.h.bf16 %v15897_v52  ;;  %v15898_v54 = vunpack.i.l.bf16 %v15897_v52  ;;  %v10132_v22 = vpop.permute.xlu1 %10131 }
0x3bfb   :  { %v15562_v7 = vpack.c.bf16 %v15899_v61, %v15898_v54 }
0x3bfd   :  { %15564 = vmatprep.subr.msk.bf16.mxu0 %vm18214_vm10, %v15562_v7 }
0x3bff   :  { %v16204_v11 = vpop.eup %16203 }
0x3c00   :  { %v16206_v12 = vpop.eup %16205  ;;  %v10041_v18 = vmul.f32 %v16204_v11, %v16200_v53 }
0x3c01   :  { %v10040_v14 = vmul.f32 %v16206_v12, %v16202_v60 }
0x3c03   :  { %15058 = vmatprep.mubr.msk.f32.mxu0 %vm1847_vm7, %v10040_v14 }
0x3c04   :  { %15059 = vmatmul.mubr.msk.f32.vlgmr.msra.gmra.mrb[96].mxu0 %vm1847_vm7, %v10041_v18 }
0x3c05   :  { %15567 = vmatpush3.bf16.xpose.msk.msra.mxu0 %vm18214_vm10, %v15562_v7  ;;  %15065 = vmatprep.mubr.msk.f32.mxu0 %vm1177_vm6, %v10130_v24 }
0x3c0c   :  { %15066 = vmatmul.mubr.msk.f32.vlgmr.msra.gmra.mrb[98].mxu0 %vm1177_vm6, %v10132_v22 }
0x3cd7   :  { %v19083_v51 = vpop.f32.mrb[96].mxu0 }
0x3cd8   :  { %v19085_v40 = vpop.f32.mrb[97].mxu0 }
0x3cdf   :  { %v15067_v32 = vpop.f32.mrb[98].mxu0 }
0x3ce0   :  { %v10221_v44 = vsel %vm18237_vm11, %v15067_v32, -1e+30  ;;  %v10211_v34 = vpop.f32.mrb[99].mxu0 }
0x3ce1   :  { %v10225_v49 = vsel %vm1847_vm7, %v10221_v44, -inf  ;;  %v10220_v37 = vsel %vm18241_vm12, %v10211_v34, -1e+30 }
0x3ce2   :  { %v10222_v2 = vsel %vm1847_vm7, %v10220_v37, -inf  ;;  %10226 = vmax.xlane.f32.xlu1 %v10225_v49 }
0x3ce3   :  { %10223 = vmax.xlane.f32.xlu0 %v10222_v2 }
0x3cf3   :  { %15901 = vrot.lane.b32.xlu1 %v19041_v28, %s17247_s5 }
0x3cf7   :  { %10331 = vrot.lane.b32.xlu1 %v19037_v27, %s17245_s17 }
0x3cfb   :  { %10333 = vrot.lane.b32.xlu1 %v19033_v25, %s17245_s17 }
0x3d6f   :  { %v10227_v36 = vpop.xlane.xlu1 %10226 }
0x3d70   :  { %v10229_v3 = vsub.f32 %v10221_v44, %v10227_v36  ;;  %v10224_v15 = vpop.xlane.xlu0 %10223 }
0x3d71   :  { %v10228_v19 = vsub.f32 %v10220_v37, %v10224_v15 }
0x3d72   :  { %v10232_v13 = vmul.f32 1.442695, %v10229_v3 }
0x3d73   :  { %v10230_v8 = vmul.f32 1.442695, %v10228_v19  ;;  %v15902_v41 = vpop.permute.xlu1 %15901 }
0x3d74   :  { %16207 = vpow2.f32 %v10232_v13  ;;  %v15904_v59 = vunpack.i.h.bf16 %v15902_v41  ;;  %v15903_v55 = vunpack.i.l.bf16 %v15902_v41 }
0x3d75   :  { %16209 = vpow2.f32 %v10230_v8 }
0x3d76   :  { %v15568_v17 = vpack.c.bf16 %v15904_v59, %v15903_v55 }
0x3d77   :  { %v10332_v24 = vpop.permute.xlu1 %10331 }
0x3d78   :  { %15569 = vmatprep.subr.bf16.mxu1 %v15568_v17 }
0x3d79   :  { %15571 = vmatpush3.bf16.msra.mxu1 %v15568_v17 }
0x3d7b   :  { %v10334_v62 = vpop.permute.xlu1 %10333 }
0x3d7e   :  { %v16208_v31 = vpop.eup %16207 }
0x3d7f   :  { %v10237_v21 = vsel %vm1847_vm7, %v16208_v31, 0.0  ;;  %v16210_v20 = vpop.eup %16209 }
0x3d80   :  { %10238 = vadd.xlane.f32.xlu0 %v10237_v21  ;;  %v10234_v45 = vsel %vm1847_vm7, %v16210_v20, 0.0 }
0x3d84   :  { %10235 = vadd.xlane.f32.xlu0 %v10234_v45 }
0x3d9a   :  { %15906 = vrot.lane.b32.xlu0 %v19041_v28, %s17242_s26 }
0x3e0d   :  { %v10239_v47 = vpop.xlane.xlu0 %10238 }
0x3e0e   :  { %16211 = vrcp.f32 %v10239_v47 }
0x3e11   :  { %v10236_v63 = vpop.xlane.xlu0 %10235 }
0x3e12   :  { %16213 = vrcp.f32 %v10236_v63 }
0x3e15   :  { %v15907_v42 = vpop.permute.xlu0 %15906 }
0x3e16   :  { %v15909_v43 = vunpack.i.h.bf16 %v15907_v42  ;;  %v15908_v23 = vunpack.i.l.bf16 %v15907_v42 }
0x3e18   :  { %v15572_v50 = vpack.c.bf16 %v15909_v43, %v15908_v23  ;;  %v16212_v53 = vpop.eup %16211 }
0x3e19   :  { %v10243_v57 = vmul.f32 %v16212_v53, %v16208_v31 }
0x3e1a   :  { %15574 = vmatprep.subr.msk.bf16.mxu1 %vm18214_vm10, %v15572_v50 }
0x3e1c   :  { %v16214_v60 = vpop.eup %16213 }
0x3e1d   :  { %v10242_v56 = vmul.f32 %v16214_v60, %v16210_v20 }
0x3e1f   :  { %15072 = vmatprep.mubr.msk.f32.mxu1 %vm1847_vm7, %v10242_v56 }
0x3e20   :  { %15073 = vmatmul.mubr.msk.f32.vlgmr.msra.gmra.mrb[104].mxu1 %vm1847_vm7, %v10243_v57 }
0x3e21   :  { %15577 = vmatpush3.bf16.xpose.msk.msra.mxu1 %vm18214_vm10, %v15572_v50  ;;  %15079 = vmatprep.mubr.msk.f32.mxu1 %vm1177_vm6, %v10332_v24 }
0x3e28   :  { %15080 = vmatmul.mubr.msk.f32.vlgmr.msra.gmra.mrb[106].mxu1 %vm1177_vm6, %v10334_v62 }
0x3ef3   :  { %v19111_v30 = vpop.f32.mrb[104].mxu1 }
0x3ef4   :  { %v19113_v52 = vpop.f32.mrb[105].mxu1 }
0x3efb   :  { %v15081_v61 = vpop.f32.mrb[106].mxu1 }
0x3efc   :  { %v10423_v54 = vsel %vm18237_vm11, %v15081_v61, -1e+30  ;;  %v10413_v7 = vpop.f32.mrb[107].mxu1 }
0x3efd   :  { %v10427_v11 = vsel %vm1847_vm7, %v10423_v54, -inf  ;;  %v10422_v12 = vsel %vm18241_vm12, %v10413_v7, -1e+30 }
0x3efe   :  { %v10424_v14 = vsel %vm1847_vm7, %v10422_v12, -inf  ;;  %10428 = vmax.xlane.f32.xlu1 %v10427_v11 }
0x3eff   :  { %10425 = vmax.xlane.f32.xlu0 %v10424_v14  ;;  %v8985_v14 = vld [vmem:[#allocation33 + $0x28] sm:$0xff] }
0x3f0f   :  { %15911 = vrot.lane.b32.xlu1 %v19041_v28, %s17250_s27 }
0x3f13   :  { %10533 = vrot.lane.b32.xlu1 %v19037_v27, %s17246_s1 }
0x3f17   :  { %10535 = vrot.lane.b32.xlu1 %v19033_v25, %s17246_s1 }
0x3f8b   :  { %v10429_v18 = vpop.xlane.xlu1 %10428 }
0x3f8c   :  { %v10431_v22 = vsub.f32 %v10423_v54, %v10429_v18  ;;  %v10426_v32 = vpop.xlane.xlu0 %10425 }
0x3f8d   :  { %v10430_v44 = vsub.f32 %v10422_v12, %v10426_v32  ;;  %v8984_v12 = vld [vmem:[#allocation33 + $0x20] sm:$0xff] }
0x3f8e   :  { %v10434_v34 = vmul.f32 1.442695, %v10431_v22  ;;  %v15592_v18 = vpack.c.bf16 %v8985_v14, %v8984_v12 }
0x3f8f   :  { %v10432_v49 = vmul.f32 1.442695, %v10430_v44  ;;  %v15912_v37 = vpop.permute.xlu1 %15911 }
0x3f90   :  { %16215 = vpow2.f32 %v10434_v34  ;;  %v15914_v2 = vunpack.i.h.bf16 %v15912_v37  ;;  %v15913_v36 = vunpack.i.l.bf16 %v15912_v37 }
0x3f91   :  { %16217 = vpow2.f32 %v10432_v49 }
0x3f92   :  { %v15578_v3 = vpack.c.bf16 %v15914_v2, %v15913_v36  ;;  %v8986_v2 = vld [vmem:[#allocation33 + $0x30] sm:$0xff]  ;;  %v8987_v36 = vld [vmem:[#allocation33 + $0x38] sm:$0xff] }
0x3f93   :  { %v10534_v47 = vpop.permute.xlu1 %10533 }
0x3f94   :  { %15579 = vmatprep.subr.bf16.mxu0 %v15578_v3 }
0x3f95   :  { %15581 = vmatpush3.bf16.msra.mxu0 %v15578_v3 }
0x3f97   :  { %v10536_v63 = vpop.permute.xlu1 %10535 }
0x3f9a   :  { %v16216_v15 = vpop.eup %16215 }
0x3f9b   :  { %v10439_v27 = vsel %vm1847_vm7, %v16216_v15, 0.0  ;;  %v16218_v19 = vpop.eup %16217 }
0x3f9c   :  { %10440 = vadd.xlane.f32.xlu0 %v10439_v27  ;;  %v10436_v25 = vsel %vm1847_vm7, %v16218_v19, 0.0  ;;  %v15596_v27 = vpack.c.bf16 %v8987_v36, %v8986_v2 }
0x3fa0   :  { %10437 = vadd.xlane.f32.xlu0 %v10436_v25 }
0x3fb6   :  { %15916 = vrot.lane.b32.xlu0 %v19041_v28, %s17244_s3 }
0x4029   :  { %v10441_v13 = vpop.xlane.xlu0 %10440 }
0x402a   :  { %16219 = vrcp.f32 %v10441_v13 }
0x402d   :  { %v10438_v8 = vpop.xlane.xlu0 %10437 }
0x402e   :  { %16221 = vrcp.f32 %v10438_v8 }
0x4031   :  { %v15917_v41 = vpop.permute.xlu0 %15916 }
0x4032   :  { %v15919_v59 = vunpack.i.h.bf16 %v15917_v41  ;;  %v15918_v55 = vunpack.i.l.bf16 %v15917_v41 }
0x4034   :  { %v15582_v17 = vpack.c.bf16 %v15919_v59, %v15918_v55  ;;  %v16220_v31 = vpop.eup %16219 }
0x4035   :  { %v10445_v45 = vmul.f32 %v16220_v31, %v16216_v15 }
0x4036   :  { %15584 = vmatprep.subr.msk.bf16.mxu0 %vm18214_vm10, %v15582_v17 }
0x4038   :  { %v16222_v21 = vpop.eup %16221 }
0x4039   :  { %v10444_v20 = vmul.f32 %v16222_v21, %v16218_v19  ;;  %v13846_v21 = vld [vmem:[#allocation34 + $0x1] ss:$0 sm:$0xff] }
0x403b   :  { %15086 = vmatprep.mubr.msk.f32.mxu0 %vm1847_vm7, %v10444_v20 }
0x403c   :  { %15087 = vmatmul.mubr.msk.f32.vlgmr.msra.gmra.mrb[100].mxu0 %vm1847_vm7, %v10445_v45 }
0x403d   :  { %15587 = vmatpush3.bf16.xpose.msk.msra.mxu0 %vm18214_vm10, %v15582_v17  ;;  %15093 = vmatprep.mubr.msk.f32.mxu0 %vm1177_vm6, %v10534_v47 }
0x4044   :  { %15094 = vmatmul.mubr.msk.f32.vlgmr.msra.gmra.mrb[102].mxu0 %vm1177_vm6, %v10536_v63 }
0x410f   :  { %v15088_v42 = vpop.f32.mrb[100].mxu0 }
0x4110   :  { %v10524_v43 = vpop.f32.mrb[101].mxu0 }
0x4117   :  { %v15095_v23 = vpop.f32.mrb[102].mxu0 }
0x4118   :  { %v10625_v50 = vsel %vm18237_vm11, %v15095_v23, -1e+30  ;;  %v10615_v53 = vpop.f32.mrb[103].mxu0 }
0x4119   :  { %v10629_v60 = vsel %vm1847_vm7, %v10625_v50, -inf  ;;  %v10624_v56 = vsel %vm18241_vm12, %v10615_v53, -1e+30 }
0x411a   :  { %v10626_v46 = vsel %vm1847_vm7, %v10624_v56, -inf  ;;  %10630 = vmax.xlane.f32.xlu1 %v10629_v60 }
0x411b   :  { %10627 = vmax.xlane.f32.xlu0 %v10626_v46 }
0x412b   :  { %15921 = vrot.lane.b32.xlu1 %v19041_v28, %s17249_s19 }
0x412f   :  { %9903 = vrot.lane.b32.xlu1 %v18989_v38, %s17202_s29 }
0x4133   :  { %9909 = vrot.lane.b32.xlu1 %v19019_v48, %s17205_s22 }
0x4137   :  { %9917 = vrot.lane.b32.xlu1 %v19057_v16, %s17251_s30 }
0x413b   :  { %10737 = vrot.lane.b32.xlu1 %v19113_v52, %s17202_s29 }
0x413f   :  { %10745 = vrot.lane.b32.xlu1 %v10524_v43, %s17205_s22 }
0x41a7   :  { %v10631_v0 = vpop.xlane.xlu1 %10630 }
0x41a8   :  { %v10633_v1 = vsub.f32 %v10625_v50, %v10631_v0  ;;  %v10628_v57 = vpop.xlane.xlu0 %10627 }
0x41a9   :  { %v10632_v24 = vsub.f32 %v10624_v56, %v10628_v57 }
0x41aa   :  { %v10636_v62 = vmul.f32 1.442695, %v10633_v1 }
0x41ab   :  { %v10634_v28 = vmul.f32 1.442695, %v10632_v24  ;;  %v15922_v61 = vpop.permute.xlu1 %15921 }
0x41ac   :  { %v15924_v54 = vunpack.i.h.bf16 %v15922_v61  ;;  %v15923_v38 = vunpack.i.l.bf16 %v15922_v61 }
0x41ad   :  { %16223 = vpow2.f32 %v10634_v28 }
0x41ae   :  { %v15588_v7 = vpack.c.bf16 %v15924_v54, %v15923_v38  ;;  %16225 = vpow2.f32 %v10636_v62 }
0x41af   :  { %v9904_v44 = vpop.permute.xlu1 %9903 }
0x41b0   :  { %15589 = vmatprep.subr.bf16.mxu1 %v15588_v7  ;;  %v9924_v13 = vsel %vm1177_vm6, %v18985_v6, %v9904_v44  ;;  %v10950_v44 = vld [vmem:[#allocation39 + $0x28] sm:$0xff] }
0x41b1   :  { %15591 = vmatpush3.bf16.msra.mxu1 %v15588_v7 }
0x41b2   :  { %15593 = vmatprep.subr.bf16.mxu1 %v15592_v18 }
0x41b3   :  { %v9910_v49 = vpop.permute.xlu1 %9909 }
0x41b7   :  { %v16224_v48 = vpop.eup %16223  ;;  %v9918_v19 = vpop.permute.xlu1 %9917 }
0x41b8   :  { %v10638_v16 = vsel %vm1847_vm7, %v16224_v48, 0.0  ;;  %v16226_v52 = vpop.eup %16225 }
0x41b9   :  { %10639 = vadd.xlane.f32.xlu0 %v10638_v16  ;;  %v10641_v11 = vsel %vm1847_vm7, %v16226_v52, 0.0 }
0x41bb   :  { %v10738_v23 = vpop.permute.xlu1 %10737 }
0x41bc   :  { %v10759_v60 = vsel %vm1177_vm6, %v19085_v40, %v10738_v23  ;;  %v13853_v23 = vld [vmem:[#allocation40 + $0x1] ss:$0 sm:$0xff] }
0x41bd   :  { %10642 = vadd.xlane.f32.xlu0 %v10641_v11 }
0x41bf   :  { %v10746_v53 = vpop.permute.xlu1 %10745 }
0x41c0   :  { %v10761_v46 = vsel %vm1847_vm7, %v10759_v60, %v10746_v53 }
0x41d3   :  { %9901 = vrot.lane.b32.xlu0 %v18991_v10, %s17202_s29 }
0x41d7   :  { %9911 = vrot.lane.b32.xlu0 %v19017_v4, %s17205_s22 }
0x41db   :  { %9919 = vrot.lane.b32.xlu0 %v19055_v39, %s17251_s30 }
0x41df   :  { %10739 = vrot.lane.b32.xlu0 %v19111_v30, %s17202_s29 }
0x41e3   :  { %10747 = vrot.lane.b32.xlu0 %v15088_v42, %s17205_s22 }
0x4246   :  { %v10640_v22 = vpop.xlane.xlu0 %10639 }
0x4247   :  { %16227 = vrcp.f32 %v10640_v22 }
0x424a   :  { %v10643_v32 = vpop.xlane.xlu0 %10642 }
0x424b   :  { %16229 = vrcp.f32 %v10643_v32  ;;  %v10949_v32 = vld [vmem:[#allocation39 + $0x20] sm:$0xff] }
0x424e   :  { %v9902_v10 = vpop.permute.xlu0 %9901 }
0x424f   :  { %v9923_v4 = vsel %vm1177_vm6, %v18987_v9, %v9902_v10  ;;  %v15600_v10 = vpack.c.bf16 %v10950_v44, %v10949_v32 }
0x4250   :  { %v9925_v30 = vsel %vm1847_vm7, %v9923_v4, %v9910_v49 }
0x4251   :  { %v16228_v34 = vpop.eup %16227  ;;  %v9927_v25 = vsel %vm1849_vm8, %v9925_v30, %v9918_v19  ;;  %15601 = vmatprep.subr.bf16.mxu0 %v15600_v10 }
0x4252   :  { %v10646_v37 = vmul.f32 %v16228_v34, %v16224_v48  ;;  %v9912_v3 = vpop.permute.xlu0 %9911  ;;  %v10951_v34 = vld [vmem:[#allocation39 + $0x30] sm:$0xff]  ;;  %15603 = vmatpush3.bf16.msra.mxu0 %v15600_v10 }
0x4253   :  { %v9926_v8 = vsel %vm1847_vm7, %v9924_v13, %v9912_v3 }
0x4254   :  { %15100 = vmatprep.mubr.msk.f32.mxu1 %vm1847_vm7, %v10646_v37 }
0x4255   :  { %v16230_v39 = vpop.eup %16229 }
0x4256   :  { %v10647_v15 = vmul.f32 %v16230_v39, %v16226_v52  ;;  %v9920_v9 = vpop.permute.xlu0 %9919 }
0x4257   :  { %v9928_v41 = vsel %vm1849_vm8, %v9926_v8, %v9920_v9 }
0x4258   :  { %15101 = vmatmul.mubr.msk.f32.vlgmr.msra.gmra.mrb[108].mxu1 %vm1847_vm7, %v10647_v15 }
0x4259   :  { %15595 = vmatpush3.bf16.msra.mxu1 %v15592_v18  ;;  %15111 = vmatprep.mubr.msk.f32.mxu1 %vm784_vm2, %v9927_v25 }
0x425a   :  { %15597 = vmatprep.subr.bf16.mxu1 %v15596_v27  ;;  %v10740_v43 = vpop.permute.xlu0 %10739 }
0x425d   :  { %15599 = vmatpush3.bf16.msra.mxu1 %v15596_v27 }
0x425e   :  { %v10748_v50 = vpop.permute.xlu0 %10747 }
0x4260   :  { %15112 = vmatmul.mubr.msk.f32.vlgmr.msra.gmra.mrb[110].mxu1 %vm784_vm2, %v9928_v41 }
0x432b   :  { %v15102_v59 = vpop.f32.mrb[108].mxu1 }
0x432c   :  { %10755 = vrot.lane.b32.xlu0 %v15102_v59, %s17251_s30  ;;  %v10726_v55 = vpop.f32.mrb[109].mxu1 }
0x432d   :  { %10753 = vrot.lane.b32.xlu1 %v10726_v55, %s17251_s30 }
0x4333   :  { %v15113_v17 = vpop.f32.mrb[110].mxu1 }
0x4334   :  { %v10849_v31 = vpop.f32.mrb[111].mxu1  ;;  %v10855_v20 = vadd.f32 %v15113_v17, %v13846_v21 }
0x4335   :  { %v10850_v6 = vadd.f32 %v13846_v21, %v10849_v31  ;;  %v13851_v31 = vld [vmem:[#allocation36 + $0x1] ss:$0 sm:$0xff] }
0x4336   :  { %v10869_v45 = vadd.f32 %v10855_v20, %v18881_v26  ;;  %v10760_v26 = vsel %vm1177_vm6, %v19083_v51, %v10740_v43 }
0x4337   :  { %v10868_v63 = vadd.f32 %v10850_v6, %v18878_v29  ;;  %v10762_v1 = vsel %vm1847_vm7, %v10760_v26, %v10748_v50  ;;  %v13852_v6 = vld [vmem:[#allocation37 + $0x1] ss:$0 sm:$0xff] }
0x4338   :  { %v10879_v47 = vsel %vm784_vm2, %v10869_v45, 0.0 }
0x4339   :  { %v10876_v42 = vsel %vm784_vm2, %v10868_v63, 0.0 }
0x434b   :  { %10880 = vadd.xlane.f32.xlu0 %v10879_v47 }
0x4351   :  { %10877 = vadd.xlane.f32.xlu1 %v10876_v42 }
0x439e   :  { %v10756_v56 = vpop.permute.xlu0 %10755 }
0x439f   :  { %v10754_v0 = vpop.permute.xlu1 %10753  ;;  %v10764_v57 = vsel %vm1849_vm8, %v10762_v1, %v10756_v56 }
0x43a0   :  { %v10763_v29 = vsel %vm1849_vm8, %v10761_v46, %v10754_v0 }
0x43a1   :  { %15114 = vmatprep.mubr.msk.f32.mxu1 %vm784_vm2, %v10763_v29 }
0x43a2   :  { %15115 = vmatmul.mubr.msk.f32.gmra.mrb[112].mxu1 %vm784_vm2, %v10764_v57 }
0x43a3   :  { %15139 = vmatprep.mubr.msk.f32.mxu1 %vm784_vm2, %v18511_v5 }
0x43d8   :  { %v10881_v40 = vpop.xlane.xlu0 %10880 }
0x43d9   :  { %v10889_v62 = vmul.f32 0.03125, %v10881_v40 }
0x43db   :  { %v10893_v51 = vsub.f32 %v10869_v45, %v10889_v62 }
0x43dd   :  { %v10897_v12 = vmul.f32 %v10893_v51, %v10893_v51 }
0x43de   :  { %v10878_v24 = vpop.xlane.xlu1 %10877 }
0x43df   :  { %v10888_v28 = vmul.f32 0.03125, %v10878_v24  ;;  %v10903_v18 = vsel %vm784_vm2, %v10897_v12, 0.0 }
0x43e1   :  { %v10892_v7 = vsub.f32 %v10868_v63, %v10888_v28 }
0x43e3   :  { %v10896_v14 = vmul.f32 %v10892_v7, %v10892_v7 }
0x43e5   :  { %v10900_v22 = vsel %vm784_vm2, %v10896_v14, 0.0 }
0x4475   :  { %v15116_v61 = vpop.f32.mrb[112].mxu1 }
0x4476   :  { %v10865_v54 = vadd.f32 %v15116_v61, %v13846_v21  ;;  %v10859_v38 = vpop.f32.mrb[113].mxu1 }
0x4477   :  { %v10860_v48 = vadd.f32 %v13846_v21, %v10859_v38 }
0x4478   :  { %v10871_v16 = vadd.f32 %v10865_v54, %v18955_v58  ;;  %v15925_v58 = vpack.i.bf16 %v10950_v44, %v10949_v32 }
0x4479   :  { %v10870_v52 = vadd.f32 %v10860_v48, %v18952_v35  ;;  %v10952_v35 = vld [vmem:[#allocation39 + $0x38] sm:$0xff] }
0x447a   :  { %v10885_v11 = vsel %vm784_vm2, %v10871_v16, 0.0  ;;  %v15930_v49 = vpack.i.bf16 %v10952_v35, %v10951_v34  ;;  %v15604_v4 = vpack.c.bf16 %v10952_v35, %v10951_v34 }
0x447b   :  { %10886 = vadd.xlane.f32.xlu1 %v10885_v11  ;;  %v10882_v5 = vsel %vm784_vm2, %v10870_v52, 0.0 }
0x447c   :  { %10883 = vadd.xlane.f32.xlu0 %v10882_v5  ;;  %15605 = vmatprep.subr.bf16.mxu0 %v15604_v4 }
0x447d   :  { %15607 = vmatpush3.bf16.msra.mxu0 %v15604_v4 }
0x447f   :  { %10904 = vadd.xlane.f32.xlu1 %v10903_v18 }
0x4480   :  { %10901 = vadd.xlane.f32.xlu0 %v10900_v22 }
0x4508   :  { %v10887_v37 = vpop.xlane.xlu1 %10886 }
0x4509   :  { %v10891_v2 = vmul.f32 0.03125, %v10887_v37  ;;  %v10884_v36 = vpop.xlane.xlu0 %10883 }
0x450a   :  { %v10890_v39 = vmul.f32 0.03125, %v10884_v36 }
0x450b   :  { %v10895_v30 = vsub.f32 %v10871_v16, %v10891_v2 }
0x450c   :  { %v10894_v3 = vsub.f32 %v10870_v52, %v10890_v39  ;;  %v10905_v15 = vpop.xlane.xlu1 %10904 }
0x450d   :  { %v10913_v27 = vmul.f32 0.03125, %v10905_v15  ;;  %v10902_v19 = vpop.xlane.xlu0 %10901  ;;  %v10899_v25 = vmul.f32 %v10895_v30, %v10895_v30 }
0x450e   :  { %v10912_v9 = vmul.f32 0.03125, %v10902_v19  ;;  %v10898_v13 = vmul.f32 %v10894_v3, %v10894_v3 }
0x450f   :  { %v10917_v8 = vadd.f32 1e-05, %v10913_v27  ;;  %v10909_v41 = vsel %vm784_vm2, %v10899_v25, 0.0 }
0x4510   :  { %v10916_v59 = vadd.f32 1e-05, %v10912_v9  ;;  %10910 = vadd.xlane.f32.xlu1 %v10909_v41  ;;  %v10906_v55 = vsel %vm784_vm2, %v10898_v13, 0.0 }
0x4511   :  { %16231 = vrsqrt.f32 %v10917_v8  ;;  %10907 = vadd.xlane.f32.xlu0 %v10906_v55 }
0x4512   :  { %16233 = vrsqrt.f32 %v10916_v59 }
0x451b   :  { %v16232_v17 = vpop.eup %16231 }
0x451c   :  { %v16234_v21 = vpop.eup %16233  ;;  %v10925_v20 = vmul.f32 %v16232_v17, %v10893_v51 }
0x451d   :  { %v10924_v45 = vmul.f32 %v16234_v21, %v10892_v7 }
0x451e   :  { %v10935_v47 = vmul.f32 %v13851_v31, %v10925_v20 }
0x451f   :  { %v10934_v63 = vmul.f32 %v13851_v31, %v10924_v45 }
0x4520   :  { %v19208_v43 = vadd.f32 %v13852_v6, %v10935_v47 }
0x4521   :  { %v19205_v42 = vadd.f32 %v13852_v6, %v10934_v63  ;;  %15931 = vrot.lane.b32.xlu1 %v15930_v49, %s17241_s24 }
0x4523   :  { %15125 = vmatprep.mubr.msk.f32.mxu0 %vm784_vm2, %v19205_v42 }
0x4524   :  { %15126 = vmatmul.mubr.msk.f32.vlgmr.msra.gmra.mrb[104].mxu0 %vm784_vm2, %v19208_v43 }
0x4525   :  { %11081 = vrot.lane.b32.xlu1 %v13853_v23, %s17241_s24 }
0x4527   :  { %15926 = vrot.lane.b32.xlu0 %v15925_v58, %s17241_s24 }
0x459d   :  { %v10911_v50 = vpop.xlane.xlu1 %10910 }
0x459e   :  { %v10915_v53 = vmul.f32 0.03125, %v10911_v50  ;;  %v10908_v60 = vpop.xlane.xlu0 %10907 }
0x459f   :  { %v10914_v56 = vmul.f32 0.03125, %v10908_v60 }
0x45a0   :  { %v10919_v46 = vadd.f32 1e-05, %v10915_v53 }
0x45a1   :  { %v10918_v26 = vadd.f32 1e-05, %v10914_v56  ;;  %v15932_v0 = vpop.permute.xlu1 %15931 }
0x45a2   :  { %16235 = vrsqrt.f32 %v10919_v46  ;;  %v15927_v1 = vpop.permute.xlu0 %15926  ;;  %v15934_v29 = vunpack.i.h.bf16 %v15932_v0  ;;  %v15933_v57 = vunpack.i.l.bf16 %v15932_v0 }
0x45a3   :  { %16237 = vrsqrt.f32 %v10918_v26  ;;  %v15929_v40 = vunpack.i.h.bf16 %v15927_v1  ;;  %v15928_v24 = vunpack.i.l.bf16 %v15927_v1 }
0x45a4   :  { %v15612_v28 = vpack.c.bf16 %v15934_v29, %v15933_v57 }
0x45a5   :  { %v15608_v62 = vpack.c.bf16 %v15929_v40, %v15928_v24  ;;  %v11082_v14 = vpop.permute.xlu1 %11081 }
0x45a7   :  { %15609 = vmatprep.subr.bf16.mxu1 %v15608_v62 }
0x45a8   :  { %15611 = vmatpush3.bf16.msra.mxu1 %v15608_v62 }
0x45a9   :  { %15613 = vmatprep.subr.bf16.mxu1 %v15612_v28 }
0x45ac   :  { %v16236_v61 = vpop.eup %16235  ;;  %15615 = vmatpush3.bf16.msra.mxu1 %v15612_v28 }
0x45ad   :  { %v16238_v51 = vpop.eup %16237  ;;  %v10927_v54 = vmul.f32 %v16236_v61, %v10895_v30 }
0x45ae   :  { %v10926_v38 = vmul.f32 %v16238_v51, %v10894_v3 }
0x45af   :  { %15140 = vmatmul.mubr.msk.f32.vlgmr.msra.gmra.mrb[114].mxu1 %vm784_vm2, %v18535_v33  ;;  %v10937_v7 = vmul.f32 %v13851_v31, %v10927_v54 }
0x45b0   :  { %v10936_v48 = vmul.f32 %v13851_v31, %v10926_v38 }
0x45b1   :  { %v19220_v52 = vadd.f32 %v13852_v6, %v10937_v7 }
0x45b2   :  { %v19218_v16 = vadd.f32 %v13852_v6, %v10936_v48 }
0x45b4   :  { %15128 = vmatprep.mubr.msk.f32.mxu0 %vm784_vm2, %v19218_v16 }
0x45b5   :  { %15129 = vmatmul.mubr.msk.f32.gmra.mrb[106].mxu0 %vm784_vm2, %v19220_v52 }
0x45f7   :  { %v15127_v11 = vpop.f32.mrb[104].mxu0 }
0x45f8   :  { %v11046_v12 = vpop.f32.mrb[105].mxu0  ;;  %v11052_v32 = vadd.f32 %v15127_v11, %v13853_v23 }
0x45f9   :  { %v11047_v5 = vadd.f32 %v13853_v23, %v11046_v12 }
0x45fb   :  { %15144 = vmatprep.mubr.msk.f32.mxu0 %vm1177_vm6, %v11047_v5 }
0x4682   :  { %v15141_v18 = vpop.f32.mrb[114].mxu1 }
0x4683   :  { %v11150_v33 = vpop.f32.mrb[115].mxu1  ;;  %v19245_v58 = vadd.f32 %v15141_v18, %v11082_v14 }
0x4684   :  { %v19227_v22 = vadd.f32 %v11150_v33, %v11082_v14 }
0x4686   :  { %11546 = vrot.lane.b32.xlu1 %v19227_v22, %s17245_s17  ;;  %11353 = vrot.lane.b32.xlu0 %v19227_v22, %s17240_s14 }
0x4687   :  { %15142 = vmatprep.subr.msk.mxu0 %vm1177_vm6, %v19227_v22 }
0x4688   :  { %15143 = vmatpush3.xpose.msk.msra.mxu0 %vm1177_vm6, %v19227_v22  ;;  %v15130_v44 = vpop.f32.mrb[106].mxu0 }
0x4689   :  { %v11056_v10 = vpop.f32.mrb[107].mxu0  ;;  %v11062_v34 = vadd.f32 %v15130_v44, %v13853_v23 }
0x468a   :  { %11349 = vrot.lane.b32.xlu1 %v11047_v5, %s17240_s14  ;;  %11351 = vrot.lane.b32.xlu0 %v11052_v32, %s17240_s14  ;;  %v11057_v35 = vadd.f32 %v13853_v23, %v11056_v10 }
0x468b   :  { %15145 = vmatmul.mubr.msk.f32.vlgmr.msra.gmra.mrb[108].mxu0 %vm1177_vm6, %v11052_v32 }
0x468e   :  { %11544 = vrot.lane.b32.xlu1 %v11052_v32, %s17245_s17  ;;  %11739 = vrot.lane.b32.xlu0 %v19227_v22, %s17246_s1 }
0x4692   :  { %11735 = vrot.lane.b32.xlu1 %v11047_v5, %s17246_s1  ;;  %11542 = vrot.lane.b32.xlu0 %v11047_v5, %s17245_s17 }
0x4696   :  { %12152 = vrot.lane.b32.xlu1 %v19245_v58, %s17240_s14  ;;  %11737 = vrot.lane.b32.xlu0 %v11052_v32, %s17246_s1 }
0x469a   :  { %12150 = vrot.lane.b32.xlu1 %v11062_v34, %s17240_s14  ;;  %12345 = vrot.lane.b32.xlu0 %v19245_v58, %s17245_s17 }
0x469e   :  { %12341 = vrot.lane.b32.xlu1 %v11057_v35, %s17245_s17  ;;  %12148 = vrot.lane.b32.xlu0 %v11057_v35, %s17240_s14 }
0x46a2   :  { %12538 = vrot.lane.b32.xlu1 %v19245_v58, %s17246_s1  ;;  %12343 = vrot.lane.b32.xlu0 %v11062_v34, %s17245_s17 }
0x46a6   :  { %12536 = vrot.lane.b32.xlu1 %v11062_v34, %s17246_s1  ;;  %12534 = vrot.lane.b32.xlu0 %v11057_v35, %s17246_s1 }
0x46f8   :  { %v11547_v49 = vpop.permute.xlu1 %11546  ;;  %v11354_v4 = vpop.permute.xlu0 %11353 }
0x46f9   :  { %15152 = vmatprep.subr.msk.mxu0 %vm1177_vm6, %v11354_v4 }
0x46fa   :  { %15153 = vmatpush3.xpose.msk.msra.mxu0 %vm1177_vm6, %v11354_v4 }
0x46fb   :  { %15162 = vmatprep.subr.msk.mxu0 %vm1177_vm6, %v11547_v49 }
0x46fc   :  { %v11350_v37 = vpop.permute.xlu1 %11349  ;;  %v11352_v2 = vpop.permute.xlu0 %11351 }
0x46fd   :  { %15154 = vmatprep.mubr.msk.f32.mxu0 %vm1177_vm6, %v11350_v37 }
0x46fe   :  { %15155 = vmatmul.mubr.msk.f32.vlgmr.msra.gmra.mrb[110].mxu0 %vm1177_vm6, %v11352_v2 }
0x46ff   :  { %15163 = vmatpush3.xpose.msk.msra.mxu0 %vm1177_vm6, %v11547_v49 }
0x4700   :  { %v11545_v36 = vpop.permute.xlu1 %11544  ;;  %v11740_v39 = vpop.permute.xlu0 %11739 }
0x4701   :  { %15172 = vmatprep.subr.msk.mxu0 %vm1177_vm6, %v11740_v39 }
0x4704   :  { %v11736_v30 = vpop.permute.xlu1 %11735  ;;  %v11543_v3 = vpop.permute.xlu0 %11542 }
0x4705   :  { %15164 = vmatprep.mubr.msk.f32.mxu0 %vm1177_vm6, %v11543_v3 }
0x4706   :  { %15165 = vmatmul.mubr.msk.f32.vlgmr.msra.gmra.mrb[112].mxu0 %vm1177_vm6, %v11545_v36 }
0x4707   :  { %15173 = vmatpush3.xpose.msk.msra.mxu0 %vm1177_vm6, %v11740_v39  ;;  %15174 = vmatprep.mubr.msk.f32.mxu0 %vm1177_vm6, %v11736_v30 }
0x4708   :  { %15182 = vmatprep.subr.msk.mxu0 %vm1177_vm6, %v19245_v58  ;;  %v12153_v15 = vpop.permute.xlu1 %12152  ;;  %v11738_v27 = vpop.permute.xlu0 %11737 }
0x470a   :  { %15175 = vmatmul.mubr.msk.f32.vlgmr.msra.gmra.mrb[114].mxu0 %vm1177_vm6, %v11738_v27 }
0x470b   :  { %15183 = vmatpush3.xpose.msk.msra.mxu0 %vm1177_vm6, %v19245_v58  ;;  %15184 = vmatprep.mubr.msk.f32.mxu0 %vm1177_vm6, %v11057_v35 }
0x470c   :  { %15192 = vmatprep.subr.msk.mxu0 %vm1177_vm6, %v12153_v15  ;;  %v12151_v19 = vpop.permute.xlu1 %12150  ;;  %v12346_v25 = vpop.permute.xlu0 %12345 }
0x470e   :  { %15185 = vmatmul.mubr.msk.f32.vlgmr.msra.gmra.mrb[116].mxu0 %vm1177_vm6, %v11062_v34 }
0x470f   :  { %15193 = vmatpush3.xpose.msk.msra.mxu0 %vm1177_vm6, %v12153_v15 }
0x4710   :  { %15202 = vmatprep.subr.msk.mxu0 %vm1177_vm6, %v12346_v25  ;;  %v12342_v9 = vpop.permute.xlu1 %12341  ;;  %v12149_v13 = vpop.permute.xlu0 %12148 }
0x4711   :  { %15194 = vmatprep.mubr.msk.f32.mxu0 %vm1177_vm6, %v12149_v13 }
0x4712   :  { %15195 = vmatmul.mubr.msk.f32.vlgmr.msra.gmra.mrb[118].mxu0 %vm1177_vm6, %v12151_v19 }
0x4713   :  { %15203 = vmatpush3.xpose.msk.msra.mxu0 %vm1177_vm6, %v12346_v25  ;;  %15204 = vmatprep.mubr.msk.f32.mxu0 %vm1177_vm6, %v12342_v9 }
0x4714   :  { %v12539_v8 = vpop.permute.xlu1 %12538  ;;  %v12344_v41 = vpop.permute.xlu0 %12343 }
0x4715   :  { %15212 = vmatprep.subr.msk.mxu0 %vm1177_vm6, %v12539_v8 }
0x4716   :  { %15205 = vmatmul.mubr.msk.f32.vlgmr.msra.gmra.mrb[120].mxu0 %vm1177_vm6, %v12344_v41 }
0x4717   :  { %15213 = vmatpush3.xpose.msk.msra.mxu0 %vm1177_vm6, %v12539_v8 }
0x4718   :  { %v12537_v59 = vpop.permute.xlu1 %12536  ;;  %v12535_v55 = vpop.permute.xlu0 %12534 }
0x4719   :  { %15214 = vmatprep.mubr.msk.f32.mxu0 %vm1177_vm6, %v12535_v55 }
0x471a   :  { %15215 = vmatmul.mubr.msk.f32.vlgmr.msra.gmra.mrb[122].mxu0 %vm1177_vm6, %v12537_v59 }
0x475e   :  { %v15146_v17 = vpop.f32.mrb[108].mxu0 }
0x475f   :  { %v11234_v31 = vpop.f32.mrb[109].mxu0  ;;  %v11246_v21 = vsel %vm1177_vm6, %v15146_v17, -inf }
0x4760   :  { %11247 = vmax.xlane.f32.xlu1 %v11246_v21  ;;  %v11243_v20 = vsel %vm1177_vm6, %v11234_v31, -inf }
0x4761   :  { %11244 = vmax.xlane.f32.xlu0 %v11243_v20 }
0x47d1   :  { %v15156_v45 = vpop.f32.mrb[110].mxu0 }
0x47d2   :  { %v11427_v6 = vpop.f32.mrb[111].mxu0  ;;  %v11439_v47 = vsel %vm1177_vm6, %v15156_v45, -inf }
0x47d3   :  { %11440 = vmax.xlane.f32.xlu0 %v11439_v47  ;;  %v11436_v63 = vsel %vm1177_vm6, %v11427_v6, -inf }
0x47d7   :  { %11437 = vmax.xlane.f32.xlu0 %v11436_v63 }
0x47d9   :  { %v15166_v23 = vpop.f32.mrb[112].mxu0 }
0x47da   :  { %v19294_v50 = vpop.f32.mrb[113].mxu0  ;;  %v11632_v53 = vsel %vm1177_vm6, %v15166_v23, -inf }
0x47db   :  { %11633 = vmax.xlane.f32.xlu0 %v11632_v53  ;;  %v11629_v60 = vsel %vm1177_vm6, %v19294_v50, -inf }
0x47dc   :  { %11630 = vmax.xlane.f32.xlu1 %v11629_v60 }
0x47dd   :  { %v15176_v56 = vpop.f32.mrb[114].mxu0 }
0x47de   :  { %v19299_v46 = vpop.f32.mrb[115].mxu0  ;;  %v11825_v26 = vsel %vm1177_vm6, %v15176_v56, -inf }
0x47df   :  { %11826 = vmax.xlane.f32.xlu0 %v11825_v26  ;;  %v11822_v0 = vsel %vm1177_vm6, %v19299_v46, -inf }
0x47e0   :  { %11823 = vmax.xlane.f32.xlu1 %v11822_v0 }
0x47e1   :  { %v19304_v1 = vpop.f32.mrb[116].mxu0 }
0x47e2   :  { %v19306_v29 = vpop.f32.mrb[117].mxu0  ;;  %v12045_v33 = vsel %vm1177_vm6, %v19304_v1, -inf }
0x47e3   :  { %v12042_v21 = vsel %vm1177_vm6, %v19306_v29, -inf }
0x47e5   :  { %v19308_v57 = vpop.f32.mrb[118].mxu0 }
0x47e6   :  { %v19310_v40 = vpop.f32.mrb[119].mxu0  ;;  %v12238_v32 = vsel %vm1177_vm6, %v19308_v57, -inf }
0x47e7   :  { %v12235_v47 = vsel %vm1177_vm6, %v19310_v40, -inf }
0x47e9   :  { %v19312_v24 = vpop.f32.mrb[120].mxu0 }
0x47ea   :  { %v19314_v62 = vpop.f32.mrb[121].mxu0  ;;  %v12431_v44 = vsel %vm1177_vm6, %v19312_v24, -inf }
0x47ed   :  { %v11248_v28 = vpop.xlane.xlu1 %11247  ;;  %v19316_v61 = vpop.f32.mrb[122].mxu0 }
0x47ee   :  { %v11250_v51 = vsub.f32 %v15146_v17, %v11248_v28  ;;  %v11245_v54 = vpop.xlane.xlu0 %11244  ;;  %v19318_v38 = vpop.f32.mrb[123].mxu0  ;;  %v12624_v10 = vsel %vm1177_vm6, %v19316_v61, -inf }
0x47ef   :  { %v11249_v7 = vsub.f32 %v11234_v31, %v11245_v54  ;;  %v12621_v60 = vsel %vm1177_vm6, %v19318_v38, -inf }
0x47f0   :  { %v11253_v48 = vmul.f32 1.442695, %v11250_v51 }
0x47f1   :  { %v11251_v11 = vmul.f32 1.442695, %v11249_v7 }
0x47f2   :  { %16239 = vpow2.f32 %v11253_v48 }
0x47f3   :  { %16241 = vpow2.f32 %v11251_v11 }
0x47fc   :  { %v19320_v12 = vpop.eup %16239 }
0x47fd   :  { %v19322_v5 = vpop.eup %16241  ;;  %v11258_v14 = vsel %vm1177_vm6, %v19320_v12, 0.0 }
0x47fe   :  { %11259 = vadd.xlane.f32.xlu0 %v11258_v14  ;;  %v11255_v18 = vsel %vm1177_vm6, %v19322_v5, 0.0 }
0x47ff   :  { %11256 = vadd.xlane.f32.xlu1 %v11255_v18 }
0x4802   :  { %12046 = vmax.xlane.f32.xlu0 %v12045_v33 }
0x4806   :  { %12239 = vmax.xlane.f32.xlu0 %v12238_v32 }
0x480a   :  { %12432 = vmax.xlane.f32.xlu0 %v12431_v44 }
0x480e   :  { %12625 = vmax.xlane.f32.xlu0 %v12624_v10 }
0x4860   :  { %v11441_v34 = vpop.xlane.xlu0 %11440 }
0x4861   :  { %v11443_v35 = vsub.f32 %v15156_v45, %v11441_v34 }
0x4863   :  { %v11446_v49 = vmul.f32 1.442695, %v11443_v35 }
0x4864   :  { %v11438_v4 = vpop.xlane.xlu0 %11437 }
0x4865   :  { %16243 = vpow2.f32 %v11446_v49  ;;  %v11442_v37 = vsub.f32 %v11427_v6, %v11438_v4 }
0x4867   :  { %v11444_v2 = vmul.f32 1.442695, %v11442_v37 }
0x4868   :  { %v11634_v36 = vpop.xlane.xlu0 %11633 }
0x4869   :  { %16245 = vpow2.f32 %v11444_v2  ;;  %v11636_v39 = vsub.f32 %v15166_v23, %v11634_v36  ;;  %v11631_v3 = vpop.xlane.xlu1 %11630  ;;  %v12428_v23 = vsel %vm1177_vm6, %v19314_v62, -inf }
0x486a   :  { %v11635_v25 = vsub.f32 %v19294_v50, %v11631_v3 }
0x486b   :  { %v11639_v30 = vmul.f32 1.442695, %v11636_v39 }
0x486c   :  { %v11827_v15 = vpop.xlane.xlu0 %11826  ;;  %v11637_v41 = vmul.f32 1.442695, %v11635_v25 }
0x486d   :  { %16247 = vpow2.f32 %v11639_v30  ;;  %v11829_v27 = vsub.f32 %v15176_v56, %v11827_v15  ;;  %v11824_v59 = vpop.xlane.xlu1 %11823 }
0x486e   :  { %v11828_v31 = vsub.f32 %v19299_v46, %v11824_v59 }
0x486f   :  { %v19336_v19 = vpop.eup %16243  ;;  %v11832_v9 = vmul.f32 1.442695, %v11829_v27 }
0x4870   :  { %v11451_v13 = vsel %vm1177_vm6, %v19336_v19, 0.0  ;;  %v11830_v6 = vmul.f32 1.442695, %v11828_v31 }
0x4871   :  { %16249 = vpow2.f32 %v11832_v9  ;;  %11452 = vadd.xlane.f32.xlu0 %v11451_v13 }
0x4872   :  { %16251 = vpow2.f32 %v11637_v41 }
0x4873   :  { %v19341_v8 = vpop.eup %16245  ;;  %16253 = vpow2.f32 %v11830_v6 }
0x4874   :  { %v11448_v55 = vsel %vm1177_vm6, %v19341_v8, 0.0 }
0x4875   :  { %11449 = vadd.xlane.f32.xlu1 %v11448_v55 }
0x4877   :  { %v19345_v17 = vpop.eup %16247 }
0x4878   :  { %v11644_v20 = vsel %vm1177_vm6, %v19345_v17, 0.0 }
0x4879   :  { %12043 = vmax.xlane.f32.xlu1 %v12042_v21  ;;  %11645 = vadd.xlane.f32.xlu0 %v11644_v20 }
0x487b   :  { %v19352_v45 = vpop.eup %16249 }
0x487c   :  { %v11837_v63 = vsel %vm1177_vm6, %v19352_v45, 0.0  ;;  %v19360_v50 = vpop.eup %16251 }
0x487d   :  { %12236 = vmax.xlane.f32.xlu1 %v12235_v47  ;;  %11838 = vadd.xlane.f32.xlu0 %v11837_v63  ;;  %v11641_v53 = vsel %vm1177_vm6, %v19360_v50, 0.0  ;;  %v19366_v56 = vpop.eup %16253 }
0x487e   :  { %v11834_v26 = vsel %vm1177_vm6, %v19366_v56, 0.0 }
0x4881   :  { %12429 = vmax.xlane.f32.xlu1 %v12428_v23 }
0x4885   :  { %11642 = vadd.xlane.f32.xlu1 %v11641_v53 }
0x4889   :  { %12622 = vmax.xlane.f32.xlu1 %v12621_v60 }
0x488b   :  { %v11260_v0 = vpop.xlane.xlu0 %11259 }
0x488c   :  { %v11257_v46 = vpop.xlane.xlu1 %11256 }
0x488d   :  { %16255 = vrcp.f32 %v11257_v46  ;;  %11835 = vadd.xlane.f32.xlu1 %v11834_v26 }
0x488f   :  { %v12047_v28 = vpop.xlane.xlu0 %12046 }
0x4890   :  { %v12049_v48 = vsub.f32 %v19304_v1, %v12047_v28 }
0x4892   :  { %v12052_v14 = vmul.f32 1.442695, %v12049_v48 }
0x4893   :  { %11458 = vrot.lane.b32.xlu0 %v19227_v22, %s17243_s28  ;;  %v12240_v7 = vpop.xlane.xlu0 %12239 }
0x4894   :  { %v12242_v18 = vsub.f32 %v19308_v57, %v12240_v7  ;;  %16257 = vpow2.f32 %v12052_v14 }
0x4896   :  { %v12245_v33 = vmul.f32 1.442695, %v12242_v18 }
0x4897   :  { %v16256_v51 = vpop.eup %16255  ;;  %v12433_v11 = vpop.xlane.xlu0 %12432 }
0x4898   :  { %v11263_v54 = vmul.f32 %v16256_v51, %v19322_v5  ;;  %v12435_v32 = vsub.f32 %v19312_v24, %v12433_v11  ;;  %16259 = vpow2.f32 %v12245_v33 }
0x489a   :  { %15149 = vmatprep.mubr.msk.f32.mxu1 %vm1177_vm6, %v11263_v54  ;;  %v12438_v1 = vmul.f32 1.442695, %v12435_v32 }
0x489b   :  { %v12626_v5 = vpop.xlane.xlu0 %12625 }
0x489c   :  { %v12628_v44 = vsub.f32 %v19316_v61, %v12626_v5  ;;  %16261 = vpow2.f32 %v12438_v1 }
0x489e   :  { %11265 = vrot.lane.b32.xlu1 %v19227_v22, %s17241_s24  ;;  %v12631_v57 = vmul.f32 1.442695, %v12628_v44  ;;  %v19386_v10 = vpop.eup %16257 }
0x489f   :  { %v12057_v24 = vsel %vm1177_vm6, %v19386_v10, 0.0 }
0x48a0   :  { %16263 = vpow2.f32 %v12631_v57 }
0x48a2   :  { %11651 = vrot.lane.b32.xlu1 %v19227_v22, %s17242_s26  ;;  %v19392_v34 = vpop.eup %16259 }
0x48a6   :  { %11844 = vrot.lane.b32.xlu1 %v19227_v22, %s17244_s3  ;;  %v12250_v22 = vsel %vm1177_vm6, %v19392_v34, 0.0  ;;  %v19396_v61 = vpop.eup %16261 }
0x48a7   :  { %v12443_v35 = vsel %vm1177_vm6, %v19396_v61, 0.0 }
0x48aa   :  { %12064 = vrot.lane.b32.xlu1 %v19245_v58, %s17241_s24  ;;  %v19400_v49 = vpop.eup %16263 }
0x48ab   :  { %v12636_v4 = vsel %vm1177_vm6, %v19400_v49, 0.0 }
0x48ae   :  { %12257 = vrot.lane.b32.xlu1 %v19245_v58, %s17243_s28 }
0x48b2   :  { %12058 = vadd.xlane.f32.xlu0 %v12057_v24 }
0x48b6   :  { %12251 = vadd.xlane.f32.xlu0 %v12250_v22 }
0x48ba   :  { %12444 = vadd.xlane.f32.xlu0 %v12443_v35 }
0x48be   :  { %12637 = vadd.xlane.f32.xlu0 %v12636_v4 }
0x48fe   :  { %v11453_v9 = vpop.xlane.xlu0 %11452 }
0x4902   :  { %v11450_v37 = vpop.xlane.xlu1 %11449 }
0x4906   :  { %v12044_v2 = vpop.xlane.xlu1 %12043  ;;  %v11646_v59 = vpop.xlane.xlu0 %11645 }
0x4907   :  { %v12048_v36 = vsub.f32 %v19306_v29, %v12044_v2 }
0x4909   :  { %v12050_v39 = vmul.f32 1.442695, %v12048_v36 }
0x490a   :  { %v12237_v30 = vpop.xlane.xlu1 %12236  ;;  %v11839_v20 = vpop.xlane.xlu0 %11838 }
0x490b   :  { %16265 = vpow2.f32 %v12050_v39  ;;  %v12241_v3 = vsub.f32 %v19310_v40, %v12237_v30 }
0x490d   :  { %v12243_v15 = vmul.f32 1.442695, %v12241_v3 }
0x490e   :  { %v12430_v27 = vpop.xlane.xlu1 %12429 }
0x490f   :  { %16267 = vpow2.f32 %v12243_v15  ;;  %v12434_v25 = vsub.f32 %v19314_v62, %v12430_v27 }
0x4910   :  { %16269 = vrcp.f32 %v11260_v0  ;;  %v11459_v0 = vpop.permute.xlu0 %11458 }
0x4911   :  { %v12436_v13 = vmul.f32 1.442695, %v12434_v25  ;;  %16271 = vrcp.f32 %v11450_v37 }
0x4912   :  { %v11643_v41 = vpop.xlane.xlu1 %11642 }
0x4913   :  { %16273 = vpow2.f32 %v12436_v13 }
0x4914   :  { %16275 = vrcp.f32 %v11453_v9 }
0x4915   :  { %v19407_v55 = vpop.eup %16265  ;;  %16277 = vrcp.f32 %v11643_v41 }
0x4916   :  { %v12623_v29 = vpop.xlane.xlu1 %12622  ;;  %v12054_v31 = vsel %vm1177_vm6, %v19407_v55, 0.0  ;;  %16279 = vrcp.f32 %v11646_v59 }
0x4917   :  { %v12627_v40 = vsub.f32 %v19318_v38, %v12623_v29  ;;  %12055 = vadd.xlane.f32.xlu1 %v12054_v31  ;;  %v10957_v29 = vld [vmem:[#allocation42 + $0x28] sm:$0xff] }
0x4919   :  { %v19412_v21 = vpop.eup %16267  ;;  %v12629_v62 = vmul.f32 1.442695, %v12627_v40  ;;  %v10958_v40 = vld [vmem:[#allocation42 + $0x30] sm:$0xff] }
0x491a   :  { %v11836_v6 = vpop.xlane.xlu1 %11835  ;;  %v12247_v47 = vsel %vm1177_vm6, %v19412_v21, 0.0  ;;  %v16270_v63 = vpop.eup %16269 }
0x491b   :  { %16281 = vpow2.f32 %v12629_v62  ;;  %12248 = vadd.xlane.f32.xlu1 %v12247_v47  ;;  %v16272_v23 = vpop.eup %16271  ;;  %v11264_v46 = vmul.f32 %v16270_v63, %v19320_v12 }
0x491c   :  { %16283 = vrcp.f32 %v11836_v6  ;;  %v11456_v28 = vmul.f32 %v16272_v23, %v19341_v8 }
0x491d   :  { %v19416_v53 = vpop.eup %16273  ;;  %16285 = vrcp.f32 %v11839_v20 }
0x491e   :  { %v11266_v60 = vpop.permute.xlu1 %11265  ;;  %v12440_v38 = vsel %vm1177_vm6, %v19416_v53, 0.0  ;;  %v16276_v26 = vpop.eup %16275 }
0x491f   :  { %12441 = vadd.xlane.f32.xlu1 %v12440_v38  ;;  %15147 = vmatprep.subr.mxu1 %v11266_v60  ;;  %v16278_v51 = vpop.eup %16277  ;;  %v11457_v7 = vmul.f32 %v16276_v26, %v19336_v19 }
0x4920   :  { %15148 = vmatpush3.msra.mxu1 %v11266_v60  ;;  %v16280_v48 = vpop.eup %16279  ;;  %v11649_v12 = vmul.f32 %v16278_v51, %v19360_v50 }
0x4921   :  { %15150 = vmatmul.mubr.msk.f32.vlgmr.msra.gmra.mrb[116].mxu1 %vm1177_vm6, %v11264_v46  ;;  %15157 = vmatprep.subr.mxu1 %v11459_v0  ;;  %v11650_v33 = vmul.f32 %v16280_v48, %v19345_v17 }
0x4922   :  { %v11652_v54 = vpop.permute.xlu1 %11651  ;;  %15158 = vmatpush3.msra.mxu1 %v11459_v0  ;;  %15159 = vmatprep.mubr.msk.f32.mxu1 %vm1177_vm6, %v11456_v28 }
0x4923   :  { %15167 = vmatprep.subr.mxu1 %v11652_v54 }
0x4925   :  { %v19426_v11 = vpop.eup %16281  ;;  %15160 = vmatmul.mubr.msk.f32.vlgmr.msra.gmra.mrb[118].mxu1 %vm1177_vm6, %v11457_v7 }
0x4926   :  { %v16284_v14 = vpop.eup %16283  ;;  %15168 = vmatpush3.msra.mxu1 %v11652_v54  ;;  %v11845_v8 = vpop.permute.xlu1 %11844  ;;  %15169 = vmatprep.mubr.msk.f32.mxu1 %vm1177_vm6, %v11649_v12  ;;  %v12633_v18 = vsel %vm1177_vm6, %v19426_v11, 0.0 }
0x4927   :  { %12634 = vadd.xlane.f32.xlu0 %v12633_v18  ;;  %15177 = vmatprep.subr.mxu1 %v11845_v8  ;;  %v16286_v19 = vpop.eup %16285  ;;  %v11842_v32 = vmul.f32 %v16284_v14, %v19366_v56 }
0x4928   :  { %v11843_v5 = vmul.f32 %v16286_v19, %v19352_v45 }
0x4929   :  { %15170 = vmatmul.mubr.msk.f32.vlgmr.msra.gmra.mrb[120].mxu1 %vm1177_vm6, %v11650_v33 }
0x492a   :  { %15178 = vmatpush3.msra.mxu1 %v11845_v8  ;;  %v12065_v50 = vpop.permute.xlu1 %12064  ;;  %15179 = vmatprep.mubr.msk.f32.mxu1 %vm1177_vm6, %v11842_v32 }
0x492b   :  { %15187 = vmatprep.subr.mxu1 %v12065_v50 }
0x492d   :  { %15180 = vmatmul.mubr.msk.f32.vlgmr.msra.gmra.mrb[122].mxu1 %vm1177_vm6, %v11843_v5 }
0x492e   :  { %15188 = vmatpush3.msra.mxu1 %v12065_v50  ;;  %v12258_v1 = vpop.permute.xlu1 %12257 }
0x492f   :  { %15197 = vmatprep.subr.mxu1 %v12258_v1 }
0x4930   :  { %12643 = vrot.lane.b32.xlu1 %v19245_v58, %s17244_s3 }
0x493d   :  { %12450 = vrot.lane.b32.xlu0 %v19245_v58, %s17242_s26 }
0x493f   :  { %v12059_v17 = vpop.xlane.xlu0 %12058 }
0x4940   :  { %16287 = vrcp.f32 %v12059_v17 }
0x4943   :  { %v12252_v56 = vpop.xlane.xlu0 %12251 }
0x4947   :  { %v12445_v45 = vpop.xlane.xlu0 %12444 }
0x494a   :  { %v16288_v22 = vpop.eup %16287 }
0x494b   :  { %v12638_v4 = vpop.xlane.xlu0 %12637  ;;  %v12063_v2 = vmul.f32 %v16288_v22, %v19386_v10 }
0x49a4   :  { %v12056_v44 = vpop.xlane.xlu1 %12055 }
0x49a5   :  { %16289 = vrcp.f32 %v12056_v44 }
0x49a6   :  { %16291 = vrcp.f32 %v12252_v56 }
0x49a8   :  { %v12249_v57 = vpop.xlane.xlu1 %12248 }
0x49a9   :  { %16293 = vrcp.f32 %v12249_v57 }
0x49aa   :  { %16295 = vrcp.f32 %v12445_v45 }
0x49ac   :  { %v12442_v24 = vpop.xlane.xlu1 %12441 }
0x49ad   :  { %16297 = vrcp.f32 %v12442_v24 }
0x49ae   :  { %16299 = vrcp.f32 %v12638_v4 }
0x49af   :  { %v16290_v35 = vpop.eup %16289 }
0x49b0   :  { %v12062_v37 = vmul.f32 %v16290_v35, %v19407_v55  ;;  %v16292_v58 = vpop.eup %16291  ;;  %v12644_v13 = vpop.permute.xlu1 %12643 }
0x49b1   :  { %v12256_v3 = vmul.f32 %v16292_v58, %v19392_v34 }
0x49b2   :  { %15189 = vmatprep.mubr.msk.f32.mxu1 %vm1177_vm6, %v12062_v37 }
0x49b3   :  { %v16294_v36 = vpop.eup %16293  ;;  %15190 = vmatmul.mubr.msk.f32.vlgmr.msra.gmra.mrb[124].mxu1 %vm1177_vm6, %v12063_v2 }
0x49b4   :  { %15198 = vmatpush3.msra.mxu1 %v12258_v1  ;;  %v12635_v39 = vpop.xlane.xlu0 %12634  ;;  %v12255_v30 = vmul.f32 %v16294_v36, %v19412_v21  ;;  %v16296_v15 = vpop.eup %16295  ;;  %v10959_v21 = vld [vmem:[#allocation42 + $0x38] sm:$0xff]  ;;  %v13900_v36 = vld [vmem:[#allocation43 + $0x1] ss:$0 sm:$0xff] }
0x49b5   :  { %16301 = vrcp.f32 %v12635_v39  ;;  %v12449_v9 = vmul.f32 %v16296_v15, %v19396_v61  ;;  %v10956_v61 = vld [vmem:[#allocation42 + $0x20] sm:$0xff]  ;;  %v15620_v62 = vpack.c.bf16 %v10959_v21, %v10958_v40 }
0x49b6   :  { %15199 = vmatprep.mubr.msk.f32.mxu1 %vm1177_vm6, %v12255_v30  ;;  %v15616_v31 = vpack.c.bf16 %v10957_v29, %v10956_v61 }
0x49b7   :  { %v16298_v27 = vpop.eup %16297  ;;  %15200 = vmatmul.mubr.msk.f32.vlgmr.msra.gmra.mrb[126].mxu1 %vm1177_vm6, %v12256_v3 }
0x49b8   :  { %v12451_v10 = vpop.permute.xlu0 %12450  ;;  %v12448_v25 = vmul.f32 %v16298_v27, %v19416_v53  ;;  %v16300_v34 = vpop.eup %16299  ;;  %15617 = vmatprep.subr.bf16.mxu0 %v15616_v31 }
0x49b9   :  { %15207 = vmatprep.subr.mxu1 %v12451_v10  ;;  %v12642_v55 = vmul.f32 %v16300_v34, %v19400_v49  ;;  %15619 = vmatpush3.bf16.msra.mxu0 %v15616_v31 }
0x49ba   :  { %15208 = vmatpush3.msra.mxu1 %v12451_v10  ;;  %15209 = vmatprep.mubr.msk.f32.mxu1 %vm1177_vm6, %v12448_v25 }
0x49bb   :  { %15210 = vmatmul.mubr.msk.f32.vlgmr.msra.gmra.mrb[128].mxu1 %vm1177_vm6, %v12449_v9  ;;  %15217 = vmatprep.subr.mxu1 %v12644_v13 }
0x49bc   :  { %15218 = vmatpush3.msra.mxu1 %v12644_v13  ;;  %15621 = vmatprep.subr.bf16.mxu0 %v15620_v62 }
0x49bd   :  { %15623 = vmatpush3.bf16.msra.mxu0 %v15620_v62 }
0x49bf   :  { %v16302_v41 = vpop.eup %16301 }
0x49c0   :  { %v12641_v59 = vmul.f32 %v16302_v41, %v19426_v11 }
0x49c2   :  { %15219 = vmatprep.mubr.msk.f32.mxu1 %vm1177_vm6, %v12641_v59 }
0x49c3   :  { %15220 = vmatmul.mubr.msk.f32.vlgmr.msra.gmra.mrb[130].mxu1 %vm1177_vm6, %v12642_v55 }
0x49f4   :  { %v15151_v20 = vpop.f32.mrb[116].mxu1 }
0x49f5   :  { %v11340_v6 = vpop.f32.mrb[117].mxu1 }
0x49f8   :  { %v15161_v47 = vpop.f32.mrb[118].mxu1 }
0x49f9   :  { %11932 = vrot.lane.b32.xlu1 %v15161_v47, %s17202_s29  ;;  %v11533_v49 = vpop.f32.mrb[119].mxu1 }
0x49fa   :  { %11930 = vrot.lane.b32.xlu0 %v11533_v49, %s17202_s29 }
0x49fc   :  { %v15171_v63 = vpop.f32.mrb[120].mxu1 }
0x49fd   :  { %11940 = vrot.lane.b32.xlu1 %v15171_v63, %s17205_s22  ;;  %v11726_v23 = vpop.f32.mrb[121].mxu1 }
0x49fe   :  { %11938 = vrot.lane.b32.xlu0 %v11726_v23, %s17205_s22  ;;  %v12941_v23 = vld [vmem:[#allocation48 + $0x20] sm:$0xff] }
0x4a00   :  { %v15181_v53 = vpop.f32.mrb[122].mxu1 }
0x4a01   :  { %11948 = vrot.lane.b32.xlu1 %v15181_v53, %s17251_s30  ;;  %v11919_v60 = vpop.f32.mrb[123].mxu1  ;;  %v12942_v53 = vld [vmem:[#allocation48 + $0x28] sm:$0xff] }
0x4a02   :  { %11946 = vrot.lane.b32.xlu0 %v11919_v60, %s17251_s30  ;;  %v15624_v60 = vpack.c.bf16 %v12942_v53, %v12941_v23  ;;  %v13912_v53 = vld [vmem:[#allocation52 + $0x1] ss:$0 sm:$0xff] }
0x4a04   :  { %15625 = vmatprep.subr.bf16.mxu1 %v15624_v60 }
0x4a05   :  { %15627 = vmatpush3.bf16.msra.mxu1 %v15624_v60 }
0x4a6b   :  { %v11933_v38 = vpop.permute.xlu1 %11932 }
0x4a6c   :  { %v11931_v46 = vpop.permute.xlu0 %11930  ;;  %v11953_v54 = vsel %vm1177_vm6, %v15151_v20, %v11933_v38  ;;  %v12944_v38 = vld [vmem:[#allocation48 + $0x38] sm:$0xff] }
0x4a6d   :  { %v11952_v28 = vsel %vm1177_vm6, %v11340_v6, %v11931_v46 }
0x4a6f   :  { %v11941_v26 = vpop.permute.xlu1 %11940 }
0x4a70   :  { %v11939_v0 = vpop.permute.xlu0 %11938  ;;  %v11955_v12 = vsel %vm1847_vm7, %v11953_v54, %v11941_v26 }
0x4a71   :  { %v11954_v7 = vsel %vm1847_vm7, %v11952_v28, %v11939_v0 }
0x4a73   :  { %v11949_v51 = vpop.permute.xlu1 %11948 }
0x4a74   :  { %v11947_v48 = vpop.permute.xlu0 %11946  ;;  %v11957_v14 = vsel %vm1849_vm8, %v11955_v12, %v11949_v51 }
0x4a75   :  { %v11956_v11 = vsel %vm1849_vm8, %v11954_v7, %v11947_v48 }
0x4a76   :  { %15230 = vmatprep.mubr.msk.f32.mxu0 %vm784_vm2, %v11956_v11 }
0x4a77   :  { %15231 = vmatmul.mubr.msk.f32.vlgmr.msra.gmra.mrb[124].mxu0 %vm784_vm2, %v11957_v14 }
0x4a86   :  { %v15191_v8 = vpop.f32.mrb[124].mxu1 }
0x4a87   :  { %v12139_v18 = vpop.f32.mrb[125].mxu1 }
0x4a8a   :  { %v15201_v33 = vpop.f32.mrb[126].mxu1 }
0x4a8b   :  { %12731 = vrot.lane.b32.xlu1 %v15201_v33, %s17202_s29  ;;  %v12332_v19 = vpop.f32.mrb[127].mxu1 }
0x4a8c   :  { %12729 = vrot.lane.b32.xlu0 %v12332_v19, %s17202_s29  ;;  %s19639_s29 = sld [smem:[#allocation107_spill]] }
0x4a8e   :  { %v15211_v32 = vpop.f32.mrb[128].mxu1 }
0x4a8f   :  { %12739 = vrot.lane.b32.xlu1 %v15211_v32, %s17205_s22  ;;  %v12525_v50 = vpop.f32.mrb[129].mxu1 }
0x4a90   :  { %12737 = vrot.lane.b32.xlu0 %v12525_v50, %s17205_s22  ;;  %s19640_s22 = sld [smem:[#allocation86_spill]] }
0x4a96   :  { %v15221_v5 = vpop.f32.mrb[130].mxu1 }
0x4a97   :  { %12747 = vrot.lane.b32.xlu1 %v15221_v5, %s17251_s30  ;;  %v12718_v1 = vpop.f32.mrb[131].mxu1  ;;  %v13905_v5 = vld [vmem:[#allocation45 + $0x1] ss:$0 sm:$0xff] }
0x4a98   :  { %12745 = vrot.lane.b32.xlu0 %v12718_v1, %s17251_s30 }
0x4afd   :  { %v12732_v17 = vpop.permute.xlu1 %12731 }
0x4afe   :  { %v12730_v56 = vpop.permute.xlu0 %12729  ;;  %v12752_v22 = vsel %vm1177_vm6, %v15191_v8, %v12732_v17  ;;  %v13906_v17 = vld [vmem:[#allocation46 + $0x1] ss:$0 sm:$0xff] }
0x4aff   :  { %v12751_v45 = vsel %vm1177_vm6, %v12139_v18, %v12730_v56 }
0x4b01   :  { %v12740_v44 = vpop.permute.xlu1 %12739 }
0x4b02   :  { %v12738_v57 = vpop.permute.xlu0 %12737  ;;  %v12754_v37 = vsel %vm1847_vm7, %v12752_v22, %v12740_v44 }
0x4b03   :  { %v12753_v35 = vsel %vm1847_vm7, %v12751_v45, %v12738_v57 }
0x4b09   :  { %v12748_v24 = vpop.permute.xlu1 %12747 }
0x4b0a   :  { %v12746_v4 = vpop.permute.xlu0 %12745  ;;  %v12756_v58 = vsel %vm1849_vm8, %v12754_v37, %v12748_v24 }
0x4b0b   :  { %v12755_v2 = vsel %vm1849_vm8, %v12753_v35, %v12746_v4  ;;  %v13055_v35 = vld [vmem:[#allocation51 + $0x20] sm:$0xff]  ;;  %v13056_v4 = vld [vmem:[#allocation51 + $0x28] sm:$0xff] }
0x4b0c   :  { %15233 = vmatprep.mubr.msk.f32.mxu0 %vm784_vm2, %v12755_v2  ;;  %v15632_v37 = vpack.c.bf16 %v13056_v4, %v13055_v35  ;;  %v13057_v2 = vld [vmem:[#allocation51 + $0x30] sm:$0xff] }
0x4b0d   :  { %15234 = vmatmul.mubr.msk.f32.gmra.mrb[126].mxu0 %vm784_vm2, %v12756_v58  ;;  %v13058_v58 = vld [vmem:[#allocation51 + $0x38] sm:$0xff] }
0x4b0e   :  { %15633 = vmatprep.subr.bf16.mxu0 %v15632_v37  ;;  %v13269_v35 = vld [vmem:[%s19639_s29 + $0x18] sm:$0xff] }
0x4b0f   :  { %15635 = vmatpush3.bf16.msra.mxu0 %v15632_v37 }
0x4b4a   :  { %v15232_v39 = vpop.f32.mrb[124].mxu0 }
0x4b4b   :  { %v12847_v30 = vadd.f32 %v15232_v39, %v13900_v36  ;;  %v12841_v3 = vpop.f32.mrb[125].mxu0 }
0x4b4c   :  { %v12842_v15 = vadd.f32 %v13900_v36, %v12841_v3 }
0x4b4d   :  { %v12861_v27 = vadd.f32 %v12847_v30, %v19208_v43 }
0x4b4e   :  { %v12860_v10 = vadd.f32 %v12842_v15, %v19205_v42 }
0x4b4f   :  { %v12871_v25 = vsel %vm784_vm2, %v12861_v27, 0.0 }
0x4b50   :  { %12872 = vadd.xlane.f32.xlu1 %v12871_v25  ;;  %v12868_v9 = vsel %vm784_vm2, %v12860_v10, 0.0 }
0x4b51   :  { %12869 = vadd.xlane.f32.xlu0 %v12868_v9 }
0x4bdd   :  { %v12873_v34 = vpop.xlane.xlu1 %12872 }
0x4bde   :  { %v12870_v13 = vpop.xlane.xlu0 %12869  ;;  %v12881_v29 = vmul.f32 0.03125, %v12873_v34 }
0x4bdf   :  { %v12880_v41 = vmul.f32 0.03125, %v12870_v13 }
0x4be0   :  { %v15235_v59 = vpop.f32.mrb[126].mxu0  ;;  %v12885_v62 = vsub.f32 %v12861_v27, %v12881_v29  ;;  %v13907_v29 = vld [vmem:[#allocation49 + $0x1] ss:$0 sm:$0xff] }
0x4be1   :  { %v12884_v55 = vsub.f32 %v12860_v10, %v12880_v41  ;;  %v12851_v61 = vpop.f32.mrb[127].mxu0  ;;  %v12857_v31 = vadd.f32 %v15235_v59, %v13900_v36 }
0x4be2   :  { %v12852_v40 = vadd.f32 %v13900_v36, %v12851_v61  ;;  %v12889_v49 = vmul.f32 %v12885_v62, %v12885_v62  ;;  %v15636_v36 = vpack.c.bf16 %v13058_v58, %v13057_v2 }
0x4be3   :  { %v12888_v21 = vmul.f32 %v12884_v55, %v12884_v55  ;;  %v12863_v20 = vadd.f32 %v12857_v31, %v19220_v52 }
0x4be4   :  { %v12862_v43 = vadd.f32 %v12852_v40, %v19218_v16  ;;  %v12895_v63 = vsel %vm784_vm2, %v12889_v49, 0.0  ;;  %v12943_v16 = vld [vmem:[#allocation48 + $0x30] sm:$0xff]  ;;  %15637 = vmatprep.subr.bf16.mxu0 %v15636_v36 }
0x4be5   :  { %v12892_v42 = vsel %vm784_vm2, %v12888_v21, 0.0  ;;  %v12877_v47 = vsel %vm784_vm2, %v12863_v20, 0.0  ;;  %v15628_v46 = vpack.c.bf16 %v12944_v38, %v12943_v16  ;;  %15639 = vmatpush3.bf16.msra.mxu0 %v15636_v36 }
0x4be6   :  { %12893 = vadd.xlane.f32.xlu1 %v12892_v42  ;;  %v12874_v6 = vsel %vm784_vm2, %v12862_v43, 0.0 }
0x4be7   :  { %12875 = vadd.xlane.f32.xlu0 %v12874_v6  ;;  %15629 = vmatprep.subr.bf16.mxu1 %v15628_v46 }
0x4be8   :  { %15631 = vmatpush3.bf16.msra.mxu1 %v15628_v46 }
0x4beb   :  { %12878 = vadd.xlane.f32.xlu0 %v12877_v47 }
0x4bef   :  { %12896 = vadd.xlane.f32.xlu0 %v12895_v63 }
0x4c73   :  { %v12894_v52 = vpop.xlane.xlu1 %12893 }
0x4c74   :  { %v12904_v26 = vmul.f32 0.03125, %v12894_v52  ;;  %v12876_v0 = vpop.xlane.xlu0 %12875 }
0x4c75   :  { %v12882_v28 = vmul.f32 0.03125, %v12876_v0 }
0x4c76   :  { %v12908_v51 = vadd.f32 1e-05, %v12904_v26 }
0x4c77   :  { %v12886_v54 = vsub.f32 %v12862_v43, %v12882_v28 }
0x4c78   :  { %16303 = vrsqrt.f32 %v12908_v51  ;;  %v12879_v7 = vpop.xlane.xlu0 %12878 }
0x4c79   :  { %v12883_v48 = vmul.f32 0.03125, %v12879_v7  ;;  %v12890_v12 = vmul.f32 %v12886_v54, %v12886_v54 }
0x4c7b   :  { %v12887_v11 = vsub.f32 %v12863_v20, %v12883_v48  ;;  %v12898_v14 = vsel %vm784_vm2, %v12890_v12, 0.0 }
0x4c7c   :  { %12899 = vadd.xlane.f32.xlu1 %v12898_v14  ;;  %v12897_v8 = vpop.xlane.xlu0 %12896 }
0x4c7d   :  { %v12905_v18 = vmul.f32 0.03125, %v12897_v8  ;;  %v12891_v33 = vmul.f32 %v12887_v11, %v12887_v11 }
0x4c7f   :  { %v12909_v19 = vadd.f32 1e-05, %v12905_v18  ;;  %v12901_v32 = vsel %vm784_vm2, %v12891_v33, 0.0 }
0x4c80   :  { %12902 = vadd.xlane.f32.xlu0 %v12901_v32 }
0x4c81   :  { %16305 = vrsqrt.f32 %v12909_v19 }
0x4c82   :  { %v16304_v50 = vpop.eup %16303 }
0x4c83   :  { %v12916_v1 = vmul.f32 %v16304_v50, %v12884_v55 }
0x4c85   :  { %v12926_v56 = vmul.f32 %v13905_v5, %v12916_v1 }
0x4c87   :  { %v12936_v44 = vadd.f32 %v13906_v17, %v12926_v56 }
0x4c89   :  { %15244 = vmatprep.mubr.msk.f32.mxu1 %vm784_vm2, %v12936_v44 }
0x4c8b   :  { %v16306_v57 = vpop.eup %16305 }
0x4c8c   :  { %v12917_v45 = vmul.f32 %v16306_v57, %v12885_v62  ;;  %v13266_v57 = vld [vmem:[%s19639_s29] sm:$0xff] }
0x4c8e   :  { %v12927_v24 = vmul.f32 %v13905_v5, %v12917_v45  ;;  %v13267_v45 = vld [vmem:[%s19639_s29 + $0x8] sm:$0xff] }
0x4c90   :  { %v12937_v22 = vadd.f32 %v13906_v17, %v12927_v24  ;;  %v15640_v24 = vpack.c.bf16 %v13267_v45, %v13266_v57  ;;  %v13922_v57 = vld [vmem:[%s17490_s25] ss:$0 sm:$0xff] }
0x4c92   :  { %15245 = vmatmul.mubr.msk.f32.vlgmr.msra.gmra.mrb[132].mxu1 %vm784_vm2, %v12937_v22  ;;  %15641 = vmatprep.subr.bf16.mxu1 %v15640_v24 }
0x4c93   :  { %15643 = vmatpush3.bf16.msra.mxu1 %v15640_v24 }
0x4d09   :  { %v12900_v39 = vpop.xlane.xlu1 %12899 }
0x4d0a   :  { %v12906_v30 = vmul.f32 0.03125, %v12900_v39 }
0x4d0c   :  { %v12910_v3 = vadd.f32 1e-05, %v12906_v30 }
0x4d0d   :  { %v12903_v15 = vpop.xlane.xlu0 %12902 }
0x4d0e   :  { %16307 = vrsqrt.f32 %v12910_v3  ;;  %v12907_v27 = vmul.f32 0.03125, %v12903_v15 }
0x4d10   :  { %v12911_v10 = vadd.f32 1e-05, %v12907_v27 }
0x4d12   :  { %16309 = vrsqrt.f32 %v12911_v10 }
0x4d18   :  { %v16308_v25 = vpop.eup %16307 }
0x4d19   :  { %v12918_v9 = vmul.f32 %v16308_v25, %v12886_v54 }
0x4d1b   :  { %v12928_v13 = vmul.f32 %v13905_v5, %v12918_v9 }
0x4d1c   :  { %v16310_v34 = vpop.eup %16309 }
0x4d1d   :  { %v12938_v41 = vadd.f32 %v13906_v17, %v12928_v13  ;;  %v12919_v59 = vmul.f32 %v16310_v34, %v12887_v11 }
0x4d1f   :  { %15247 = vmatprep.mubr.msk.f32.mxu1 %vm784_vm2, %v12938_v41  ;;  %v12929_v55 = vmul.f32 %v13905_v5, %v12919_v59 }
0x4d21   :  { %v12939_v61 = vadd.f32 %v13906_v17, %v12929_v55  ;;  %v13245_v55 = vld [vmem:[%s19640_s22 + $0x8] sm:$0x1] }
0x4d23   :  { %15248 = vmatmul.mubr.msk.f32.gmra.mrb[134].mxu1 %vm784_vm2, %v12939_v61 }
0x4d65   :  { %v15246_v31 = vpop.f32.mrb[132].mxu1 }
0x4d66   :  { %v13037_v40 = vadd.f32 %v15246_v31, %v13907_v29  ;;  %v13031_v21 = vpop.f32.mrb[133].mxu1 }
0x4d67   :  { %v13032_v43 = vadd.f32 %v13907_v29, %v13031_v21  ;;  %v13244_v21 = vld [vmem:[%s19640_s22] sm:$0xff] }
0x4d68   :  { %v13051_v62 = vmax.f32 %v13037_v40, 0.0 }
0x4d69   :  { %v13050_v42 = vmax.f32 %v13032_v43, 0.0  ;;  %v13921_v43 = vld [vmem:[#allocation15] ss:$0 sm:$0xff] }
0x4d6b   :  { %15258 = vmatprep.mubr.msk.f32.mxu0 %vm784_vm2, %v13050_v42 }
0x4d6c   :  { %15259 = vmatmul.mubr.msk.f32.vlgmr.msra.gmra.mrb[128].mxu0 %vm784_vm2, %v13051_v62  ;;  %v13918_v62 = vld [vmem:[#allocation55 + $0x1] ss:$0 sm:$0xff] }
0x4df6   :  { %v15249_v20 = vpop.f32.mrb[134].mxu1 }
0x4df7   :  { %v13047_v6 = vadd.f32 %v15249_v20, %v13907_v29  ;;  %v13041_v47 = vpop.f32.mrb[135].mxu1  ;;  %v13246_v20 = vsel %vm1065_vm9, %v13245_v55, 0.0 }
0x4df8   :  { %v13042_v49 = vadd.f32 %v13907_v29, %v13041_v47  ;;  %v13917_v29 = vld [vmem:[#allocation54 + $0x1] ss:$0 sm:$0xff] }
0x4df9   :  { %v13053_v23 = vmax.f32 %v13047_v6, 0.0 }
0x4dfa   :  { %v13052_v63 = vmax.f32 %v13042_v49, 0.0  ;;  %v13258_v49 = vmul.f32 %v13921_v43, %v13244_v21 }
0x4dfc   :  { %15261 = vmatprep.mubr.msk.f32.mxu0 %vm784_vm2, %v13052_v63 }
0x4dfd   :  { %15262 = vmatmul.mubr.msk.f32.gmra.mrb[130].mxu0 %vm784_vm2, %v13053_v23  ;;  %v13259_v23 = vmul.f32 %v13921_v43, %v13246_v20 }
0x4e3f   :  { %v15260_v60 = vpop.f32.mrb[128].mxu0 }
0x4e40   :  { %v13151_v16 = vadd.f32 %v15260_v60, %v13912_v53  ;;  %v13145_v38 = vpop.f32.mrb[129].mxu0 }
0x4e41   :  { %v13146_v46 = vadd.f32 %v13912_v53, %v13145_v38  ;;  %v13378_v38 = vld [vmem:[%s17495_s20] sm:$0xff] }
0x4e42   :  { %v13165_v52 = vadd.f32 %v13151_v16, %v12937_v22  ;;  %v13268_v22 = vld [vmem:[%s19639_s29 + $0x10] sm:$0xff] }
0x4e43   :  { %v13164_v26 = vadd.f32 %v13146_v46, %v12936_v44  ;;  %v15644_v4 = vpack.c.bf16 %v13269_v35, %v13268_v22  ;;  %v13379_v46 = vld [vmem:[%s17495_s20 + $0x8] sm:$0xff] }
0x4e44   :  { %v13175_v0 = vsel %vm784_vm2, %v13165_v52, 0.0 }
0x4e45   :  { %13176 = vadd.xlane.f32.xlu0 %v13175_v0  ;;  %v13172_v28 = vsel %vm784_vm2, %v13164_v26, 0.0  ;;  %15645 = vmatprep.subr.bf16.mxu1 %v15644_v4 }
0x4e46   :  { %13173 = vadd.xlane.f32.xlu1 %v13172_v28  ;;  %15647 = vmatpush3.bf16.msra.mxu1 %v15644_v4 }
0x4ed0   :  { %v15263_v51 = vpop.f32.mrb[130].mxu0 }
0x4ed1   :  { %v13161_v54 = vadd.f32 %v15263_v51, %v13912_v53  ;;  %v13155_v7 = vpop.f32.mrb[131].mxu0 }
0x4ed2   :  { %v13156_v48 = vadd.f32 %v13912_v53, %v13155_v7  ;;  %v13177_v12 = vpop.xlane.xlu0 %13176 }
0x4ed3   :  { %v13167_v11 = vadd.f32 %v13161_v54, %v12939_v61  ;;  %v13185_v14 = vmul.f32 0.03125, %v13177_v12  ;;  %v13174_v8 = vpop.xlane.xlu1 %13173 }
0x4ed4   :  { %v13166_v18 = vadd.f32 %v13156_v48, %v12938_v41  ;;  %v13184_v33 = vmul.f32 0.03125, %v13174_v8  ;;  %v13920_v48 = vld [vmem:[%s19640_s22 + $0x18] sm:$0x1]  ;;  %v13919_v8 = vld [vmem:[%s19640_s22 + $0x10] sm:$0xff] }
0x4ed5   :  { %v13189_v19 = vsub.f32 %v13165_v52, %v13185_v14  ;;  %v13181_v32 = vsel %vm784_vm2, %v13167_v11, 0.0  ;;  %v15648_v52 = vpack.c.bf16 %v13379_v46, %v13378_v38 }
0x4ed6   :  { %v13188_v50 = vsub.f32 %v13164_v26, %v13184_v33  ;;  %13182 = vadd.xlane.f32.xlu0 %v13181_v32  ;;  %v13178_v5 = vsel %vm784_vm2, %v13166_v18, 0.0  ;;  %v13250_v33 = vsel %vm1065_vm9, %v13920_v48, 0.0 }
0x4ed7   :  { %13179 = vadd.xlane.f32.xlu1 %v13178_v5  ;;  %v13193_v1 = vmul.f32 %v13189_v19, %v13189_v19  ;;  %15649 = vmatprep.subr.bf16.mxu0 %v15648_v52 }
0x4ed8   :  { %v13192_v17 = vmul.f32 %v13188_v50, %v13188_v50  ;;  %15651 = vmatpush3.bf16.msra.mxu0 %v15648_v52 }
0x4ed9   :  { %v13199_v56 = vsel %vm784_vm2, %v13193_v1, 0.0  ;;  %v13261_v1 = vmul.f32 %v13921_v43, %v13250_v33 }
0x4eda   :  { %13200 = vadd.xlane.f32.xlu0 %v13199_v56  ;;  %v13196_v44 = vsel %vm784_vm2, %v13192_v17, 0.0 }
0x4edb   :  { %13197 = vadd.xlane.f32.xlu1 %v13196_v44 }
0x4f63   :  { %v13183_v37 = vpop.xlane.xlu0 %13182 }
0x4f64   :  { %v13187_v2 = vmul.f32 0.03125, %v13183_v37  ;;  %v13180_v58 = vpop.xlane.xlu1 %13179 }
0x4f65   :  { %v13186_v36 = vmul.f32 0.03125, %v13180_v58 }
0x4f66   :  { %v13191_v39 = vsub.f32 %v13167_v11, %v13187_v2 }
0x4f67   :  { %v13190_v30 = vsub.f32 %v13166_v18, %v13186_v36  ;;  %v13201_v3 = vpop.xlane.xlu0 %13200 }
0x4f68   :  { %v13209_v15 = vmul.f32 0.03125, %v13201_v3  ;;  %v13198_v27 = vpop.xlane.xlu1 %13197  ;;  %v13195_v10 = vmul.f32 %v13191_v39, %v13191_v39 }
0x4f69   :  { %v13208_v25 = vmul.f32 0.03125, %v13198_v27  ;;  %v13194_v9 = vmul.f32 %v13190_v30, %v13190_v30 }
0x4f6a   :  { %v13213_v13 = vadd.f32 1e-05, %v13209_v15  ;;  %v13205_v34 = vsel %vm784_vm2, %v13195_v10, 0.0  ;;  %v13927_v15 = vld [vmem:[%s17500_s13] ss:$0 sm:$0xff] }
0x4f6b   :  { %v13212_v41 = vadd.f32 1e-05, %v13208_v25  ;;  %13206 = vadd.xlane.f32.xlu0 %v13205_v34  ;;  %v13202_v59 = vsel %vm784_vm2, %v13194_v9, 0.0 }
0x4f6c   :  { %16311 = vrsqrt.f32 %v13213_v13  ;;  %13203 = vadd.xlane.f32.xlu1 %v13202_v59 }
0x4f6d   :  { %16313 = vrsqrt.f32 %v13212_v41 }
0x4f76   :  { %v16312_v61 = vpop.eup %16311 }
0x4f77   :  { %v16314_v31 = vpop.eup %16313  ;;  %v13221_v40 = vmul.f32 %v16312_v61, %v13189_v19 }
0x4f78   :  { %v13220_v42 = vmul.f32 %v16314_v31, %v13188_v50  ;;  %v13260_v50 = vmul.f32 %v13921_v43, %v13919_v8 }
0x4f79   :  { %v13231_v6 = vmul.f32 %v13917_v29, %v13221_v40 }
0x4f7a   :  { %v13230_v47 = vmul.f32 %v13917_v29, %v13220_v42 }
0x4f7b   :  { %v13241_v63 = vadd.f32 %v13918_v62, %v13231_v6 }
0x4f7c   :  { %v13240_v53 = vadd.f32 %v13918_v62, %v13230_v47 }
0x4f7d   :  { %v13263_v16 = vsub.f32 %v13241_v63, %v13259_v23 }
0x4f7e   :  { %v13262_v60 = vsub.f32 %v13240_v53, %v13258_v49 }
0x4f80   :  { %15272 = vmatprep.mubr.msk.f32.mxu1 %vm784_vm2, %v13262_v60 }
0x4f81   :  { %15273 = vmatmul.mubr.msk.f32.vlgmr.msra.gmra.mrb[136].mxu1 %vm784_vm2, %v13263_v16 }
0x4ff8   :  { %v13207_v26 = vpop.xlane.xlu0 %13206 }
0x4ff9   :  { %v13211_v0 = vmul.f32 0.03125, %v13207_v26  ;;  %v13204_v28 = vpop.xlane.xlu1 %13203 }
0x4ffa   :  { %v13210_v51 = vmul.f32 0.03125, %v13204_v28 }
0x4ffb   :  { %v13215_v54 = vadd.f32 1e-05, %v13211_v0 }
0x4ffc   :  { %v13214_v7 = vadd.f32 1e-05, %v13210_v51 }
0x4ffd   :  { %16315 = vrsqrt.f32 %v13215_v54 }
0x4ffe   :  { %16317 = vrsqrt.f32 %v13214_v7 }
0x5007   :  { %v16316_v12 = vpop.eup %16315 }
0x5008   :  { %v16318_v11 = vpop.eup %16317  ;;  %v13223_v14 = vmul.f32 %v16316_v12, %v13191_v39 }
0x5009   :  { %v13222_v18 = vmul.f32 %v16318_v11, %v13190_v30 }
0x500a   :  { %v13233_v19 = vmul.f32 %v13917_v29, %v13223_v14 }
0x500b   :  { %v13232_v32 = vmul.f32 %v13917_v29, %v13222_v18 }
0x500c   :  { %v13243_v5 = vadd.f32 %v13918_v62, %v13233_v19 }
0x500d   :  { %v13242_v17 = vadd.f32 %v13918_v62, %v13232_v32 }
0x500e   :  { %v13265_v44 = vsub.f32 %v13243_v5, %v13261_v1 }
0x500f   :  { %v13264_v56 = vsub.f32 %v13242_v17, %v13260_v50 }
0x5011   :  { %15275 = vmatprep.mubr.msk.f32.mxu1 %vm784_vm2, %v13264_v56 }
0x5012   :  { %15276 = vmatmul.mubr.msk.f32.gmra.mrb[138].mxu1 %vm784_vm2, %v13265_v44 }
0x5054   :  { %v15274_v45 = vpop.f32.mrb[136].mxu1 }
0x5055   :  { %v13361_v24 = vadd.f32 %v15274_v45, %v13922_v57  ;;  %v13355_v22 = vpop.f32.mrb[137].mxu1 }
0x5056   :  { %v13356_v35 = vadd.f32 %v13922_v57, %v13355_v22 }
0x5057   :  { %v13375_v37 = vmax.f32 %v13361_v24, 0.0 }
0x5058   :  { %v13374_v4 = vmax.f32 %v13356_v35, 0.0 }
0x505a   :  { %15282 = vmatprep.mubr.msk.f32.mxu0 %vm1847_vm7, %v13374_v4 }
0x505b   :  { %15283 = vmatmul.mubr.msk.f32.vlgmr.msra.gmra.mrb[132].mxu0 %vm1847_vm7, %v13375_v37 }
0x50e5   :  { %v15277_v2 = vpop.f32.mrb[138].mxu1 }
0x50e6   :  { %v13371_v58 = vadd.f32 %v15277_v2, %v13922_v57  ;;  %v13365_v36 = vpop.f32.mrb[139].mxu1 }
0x50e7   :  { %v13366_v39 = vadd.f32 %v13922_v57, %v13365_v36 }
0x50e8   :  { %v13377_v3 = vmax.f32 %v13371_v58, 0.0 }
0x50e9   :  { %v13376_v30 = vmax.f32 %v13366_v39, 0.0 }
0x50eb   :  { %15285 = vmatprep.mubr.msk.f32.mxu0 %vm1847_vm7, %v13376_v30 }
0x50ec   :  { %15286 = vmatmul.mubr.msk.f32.gmra.mrb[134].mxu0 %vm1847_vm7, %v13377_v3 }
0x512e   :  { %v15284_v27 = vpop.f32.mrb[132].mxu0 }
0x512f   :  { %v13471_v10 = vadd.f32 %v15284_v27, %v13927_v15  ;;  %v13465_v25 = vpop.f32.mrb[133].mxu0 }
0x5130   :  { %v13466_v9 = vadd.f32 %v13927_v15, %v13465_v25 }
0x5131   :  { %13485 = vst [vmem:[%s17505_s4 + $0x8] sm:$0x1] %v13471_v10 }
0x5132   :  { %13484 = vst [vmem:[%s17505_s4] sm:$0xff] %v13466_v9 }
0x51bf   :  { %v15287_v13 = vpop.f32.mrb[134].mxu0 }
0x51c0   :  { %v13481_v34 = vadd.f32 %v15287_v13, %v13927_v15  ;;  %v13475_v41 = vpop.f32.mrb[135].mxu0 }
0x51c1   :  { %v13476_v59 = vadd.f32 %v13927_v15, %v13475_v41 }
0x51c2   :  { %13933 = vst [vmem:[%s17505_s4 + $0x18] sm:$0x1] %v13481_v34 }
0x51c3   :  { %13932 = vst [vmem:[%s17505_s4 + $0x10] sm:$0xff] %v13476_v59 }
0x51c4   :  { %13493 = vsyncpa [#allocation3], 1 }
0x51c5   :  { %13494 = vsyncpa [#allocation5], 1 }
0x51c6   :  { %13495 = vsyncpa [#allocation8], 1 }
0x51c7   :  { %13496 = vsyncpa [#allocation11], 1 }
0x51c8   :  { %13497 = vsyncpa [#allocation14], 1 }
0x51c9   :  { %13498 = vsyncpa [#allocation17], 1 }
0x51ca   :  { %13499 = vsyncpa [#allocation20], 1 }
0x51cb   :  { %13500 = vsyncpa [#allocation23], 1 }
0x51cc   :  { %13501 = vsyncpa [#allocation26], 1 }
0x51cd   :  { %13502 = vsyncpa [#allocation29], 1 }
0x51ce   :  { %13503 = vsyncpa [#allocation32], 1 }
0x51cf   :  { %13504 = vsyncpa [#allocation35], 1 }
0x51d0   :  { %13505 = vsyncpa [#allocation38], 1 }
0x51d1   :  { %13506 = vsyncpa [#allocation41], 1 }
0x51d2   :  { %13507 = vsyncpa [#allocation44], 1 }
0x51d3   :  { %13508 = vsyncpa [#allocation47], 1 }
0x51d4   :  { %13509 = vsyncpa [#allocation50], 1 }
0x51d5   :  { %13510 = vsyncpa [#allocation53], 1 }
0x51d6   :  { %13511 = vsyncpa [#allocation56], 1 }

</bundles_post_ra>
